<compile_context>
chip_gen: v5e
topology: v5e:2x2
jax: 0.10.0
libtpu: 0.0.40
codegen_flags: <defaults>
</compile_context>

<pallas_src>
import math

import jax
import jax.numpy as jnp
from jax.experimental import pallas as pl
from jax.experimental.pallas import tpu as pltpu

# ----------------------- synthetic model configuration -----------------------
VOCAB = 128          # synthetic vocab
MAX_POS = 32
H_BERT = 64          # BERT hidden size
N_LAYERS = 2         # BERT encoder layers
N_HEADS = 4
HEAD_DIM = H_BERT // N_HEADS
INTERMEDIATE = 128   # BERT FFN intermediate size
HID = 128            # LSTM hidden_dim (module default hidden_dim=128)
LN_EPS = 1e-12

_N_LAYER_REFS = 12   # refs per encoder layer passed to the fused kernel


# ------------------------------- shared helpers -------------------------------
def _layernorm(x, gamma, beta):
    mean = jnp.mean(x, axis=-1, keepdims=True)
    var = jnp.mean(jnp.square(x - mean), axis=-1, keepdims=True)
    return (x - mean) * jax.lax.rsqrt(var + LN_EPS) * gamma + beta


def _bf16(x):
    return x.astype(jnp.bfloat16)


# --------------------------- fused forward kernel -----------------------------
def _fused_forward_kernel(*refs):
    n_fixed = 4
    n_layer = N_LAYERS * _N_LAYER_REFS
    emb_ref, mask_ref, eg_ref, eb_ref = refs[:n_fixed]
    layer_refs = refs[n_fixed:n_fixed + n_layer]
    (wih_f_ref, whh_f_ref, bf_ref, wih_b_ref, bb_ref,
     wrf_ref, wrb_ref, brg_ref, o_ref) = refs[n_fixed + n_layer:]

    B, _, S = mask_ref.shape
    BS = B * S
    scale = 1.0 / math.sqrt(HEAD_DIM)

    # Hoisted additive-mask broadcast (0 / -1e4) to the per-head score shape.
    mask_bss = jnp.broadcast_to(mask_ref[...], (B, S, S))          # [B, Sq, Sk]

    # ---- embedding LayerNorm on flattened [B*S, H] activations ---------------
    x = _layernorm(emb_ref[...], eg_ref[...], eb_ref[...])

    # ---- BERT encoder layers (Python-unrolled; weights stay VMEM resident) ---
    for l in range(N_LAYERS):
        (wqkv_ref, bqkv_ref, wo_ref, bo_ref, ln1g_ref, ln1b_ref,
         w1_ref, b1_ref, w2_ref, b2_ref, ln2g_ref, ln2b_ref) = \
            layer_refs[l * _N_LAYER_REFS:(l + 1) * _N_LAYER_REFS]

        # Fused QKV projection: one [BS,H] x [H,3H] matmul.
        xb = _bf16(x)
        qkv = (jnp.dot(xb, wqkv_ref[...], preferred_element_type=jnp.float32)
               + bqkv_ref[...])                                     # [BS, 3H]

        # Per-head scores / context (3-D einsums, proven lowering); context
        # heads are concatenated so Wo is ONE [BS,H] x [H,H] matmul.
        ctx_heads = []
        for h in range(N_HEADS):
            c0 = h * HEAD_DIM
            q = qkv[:, c0:c0 + HEAD_DIM].reshape(B, S, HEAD_DIM)
            k = qkv[:, H_BERT + c0:H_BERT + c0 + HEAD_DIM].reshape(B, S, HEAD_DIM)
            v = qkv[:, 2 * H_BERT + c0:2 * H_BERT + c0 + HEAD_DIM].reshape(
                B, S, HEAD_DIM)
            s = (jnp.einsum("bqd,bkd->bqk", _bf16(q), _bf16(k),
                            preferred_element_type=jnp.float32) * scale
                 + mask_bss)
            s = s - jnp.max(s, axis=-1, keepdims=True)
            p = jnp.exp(s)
            p = p * pl.reciprocal(jnp.sum(p, axis=-1, keepdims=True), approx=True)
            ctx = jnp.einsum("bqk,bkd->bqd", _bf16(p), _bf16(v),
                             preferred_element_type=jnp.float32)
            ctx_heads.append(ctx.reshape(BS, HEAD_DIM))
        ctx_all = jnp.concatenate(ctx_heads, axis=-1)               # [BS, H]
        attn = (jnp.dot(_bf16(ctx_all), wo_ref[...],
                        preferred_element_type=jnp.float32) + bo_ref[...])

        h1 = _layernorm(x + attn, ln1g_ref[...], ln1b_ref[...])

        inter = (jnp.dot(_bf16(h1), w1_ref[...],
                         preferred_element_type=jnp.float32) + b1_ref[...])
        # TODO(synk): BERT uses exact erf-GELU; tanh approximation used here.
        inter = jax.nn.gelu(inter, approximate=True)
        ffn = (jnp.dot(_bf16(inter), w2_ref[...],
                       preferred_element_type=jnp.float32) + b2_ref[...])
        x = _layernorm(h1 + ffn, ln2g_ref[...], ln2b_ref[...])

    # ---- BiLSTM (last position) + regressor ----------------------------------
    # Hoisted input-gate projection: one wide [BS,H] x [H,4*HID] matmul, kept
    # as a value (no VMEM scratch round trip).  Gate columns are [i|f|o|g].
    gx = (jnp.dot(_bf16(x), wih_f_ref[...],
                  preferred_element_type=jnp.float32)
          + bf_ref[...]).reshape(B, S, 4 * HID)

    hf = jnp.zeros((B, HID), jnp.float32)
    cf = jnp.zeros((B, HID), jnp.float32)
    # Serial recurrence: fully unrolled over S (compile-time), batched over B;
    # Whh read from its bf16 ref inside each step (no 64-vreg f32 hoist).
    for t in range(S):
        gates = (gx[:, t, :]
                 + jnp.dot(_bf16(hf), whh_f_ref[...],
                           preferred_element_type=jnp.float32))     # [B, 4*HID]
        ifo = jax.nn.sigmoid(gates[:, :3 * HID])
        g = jnp.tanh(gates[:, 3 * HID:])
        cf = ifo[:, HID:2 * HID] * cf + ifo[:, :HID] * g
        hf = ifo[:, 2 * HID:3 * HID] * jnp.tanh(cf)

    # lstm_out[:, -1, HID:] is the FIRST step of the reverse scan (zero initial
    # state), so only x at position S-1 matters and Whh_b contributes 0.
    x_last = x.reshape(B, S, H_BERT)[:, S - 1, :]                   # [B, H]
    gb = (jnp.dot(_bf16(x_last), wih_b_ref[...],
                  preferred_element_type=jnp.float32) + bb_ref[...])
    ifo_b = jax.nn.sigmoid(gb[:, :3 * HID])
    g_b = jnp.tanh(gb[:, 3 * HID:])
    hb = ifo_b[:, 2 * HID:3 * HID] * jnp.tanh(ifo_b[:, :HID] * g_b)

    # dropout(p=0.3) is identity at inference.
    # regressor(concat([hf, hb])) == hf @ Wf + hb @ Wb + b ; single full-block store.
    o_ref[...] = (jnp.dot(hf, wrf_ref[...], preferred_element_type=jnp.float32)
                  + jnp.dot(hb, wrb_ref[...], preferred_element_type=jnp.float32)
                  + brg_ref[...])


def _full_spec(a):
    return pl.BlockSpec(a.shape, lambda i, _nd=a.ndim: (0,) * _nd)


def fused_forward(emb_flat, add_mask, params):
    B = add_mask.shape[0]

    args = [emb_flat, add_mask, params["emb_ln_g"], params["emb_ln_b"]]
    for lp in params["layers"]:
        args += [lp["wqkv"], lp["bqkv"], lp["wo"], lp["bo"],
                 lp["ln1g"], lp["ln1b"], lp["w1"], lp["b1"],
                 lp["w2"], lp["b2"], lp["ln2g"], lp["ln2b"]]
    lstm = params["lstm"]
    args += [lstm["wih_f"], lstm["whh_f"], lstm["b_f"], lstm["wih_b"], lstm["b_b"],
             params["reg_w"][:HID, :], params["reg_w"][HID:, :], params["reg_b"]]

    return pl.pallas_call(
        _fused_forward_kernel,
        out_shape=jax.ShapeDtypeStruct((B, 1), jnp.float32),
        grid=(1,),
        in_specs=[_full_spec(a) for a in args],
        out_specs=pl.BlockSpec((B, 1), lambda i: (0, 0)),
        compiler_params=pltpu.CompilerParams(
            dimension_semantics=("arbitrary",),
        ),
    )(*args)


# ------------------------------ parameter init --------------------------------
def init_params(key):
    keys = iter(jax.random.split(key, 64))
    bf16 = jnp.bfloat16

    def nrm(shape, dtype=jnp.float32, scale=0.02):
        return (scale * jax.random.normal(next(keys), shape, dtype=jnp.float32)
                ).astype(dtype)

    params = {
        "word_emb": nrm((VOCAB, H_BERT)),
        "pos_emb": nrm((MAX_POS, H_BERT)),
        "type_emb": nrm((2, H_BERT)),
        "emb_ln_g": jnp.ones((1, H_BERT), jnp.float32),
        "emb_ln_b": jnp.zeros((1, H_BERT), jnp.float32),
        "layers": [],
    }
    for _ in range(N_LAYERS):
        lp = {
            # fused [Wq | Wk | Wv] slab (columns head-major within each block);
            # MXU operands stored directly in bf16 (synthetic weights -- keep
            # an f32 master copy and cast at call time for checkpoint parity).
            "wqkv": nrm((H_BERT, 3 * H_BERT), bf16),
            "bqkv": nrm((1, 3 * H_BERT)),
            "wo": nrm((H_BERT, H_BERT), bf16),
            "bo": nrm((1, H_BERT)),
            "ln1g": jnp.ones((1, H_BERT), jnp.float32),
            "ln1b": jnp.zeros((1, H_BERT), jnp.float32),
            "w1": nrm((H_BERT, INTERMEDIATE), bf16),
            "b1": nrm((1, INTERMEDIATE)),
            "w2": nrm((INTERMEDIATE, H_BERT), bf16),
            "b2": nrm((1, H_BERT)),
            "ln2g": jnp.ones((1, H_BERT), jnp.float32),
            "ln2b": jnp.zeros((1, H_BERT), jnp.float32),
        }
        params["layers"].append(lp)

    # BiLSTM (input H_BERT -> HID, bidirectional).  b = b_ih + b_hh combined.
    # Gate column layout is [i | f | o | g] (i,f,o contiguous -> single fused
    # sigmoid slice per step).  Whh_b is never materialized: only the first
    # reverse-scan step reaches lstm_out[:, -1, HID:] and its initial state is 0.
    params["lstm"] = {
        "wih_f": nrm((H_BERT, 4 * HID), bf16),
        "whh_f": nrm((HID, 4 * HID), bf16),      # bf16 on the serial path
        "b_f": nrm((1, 4 * HID)),
        "wih_b": nrm((H_BERT, 4 * HID), bf16),
        "b_b": nrm((1, 4 * HID)),
    }
    params["reg_w"] = nrm((2 * HID, 1))
    params["reg_b"] = nrm((1, 1))
    return params


# --------------------------------- forward ------------------------------------
def bert_bilstm_regressor(params, input_ids, attention_mask):
    B, S = input_ids.shape
    # Embedding gathers are glue (plain JAX); everything downstream runs in a
    # single fused Pallas kernel.
    word = jnp.take(params["word_emb"], input_ids, axis=0)            # [B, S, H]
    pos = params["pos_emb"][:S][None, :, :]
    tok = params["type_emb"][0][None, None, :]
    emb = (word + pos + tok).astype(jnp.float32).reshape(B * S, H_BERT)

    add_mask = ((1.0 - attention_mask.astype(jnp.float32)) * -10000.0)[:, None, :]

    out = fused_forward(emb, add_mask, params)                        # [B, 1]
    return out[:, 0]                                                  # .squeeze(1)


# ----------------------------------- main --------------------------------------
if __name__ == "__main__":
    key = jax.random.PRNGKey(0)
    pkey, ikey = jax.random.split(key)
    params = init_params(pkey)

    B, S = 2, 8
    input_ids = jax.random.randint(ikey, (B, S), 0, VOCAB, dtype=jnp.int32)
    attention_mask = jnp.array([[1] * S, [1] * 6 + [0] * 2], dtype=jnp.int32)

    out = bert_bilstm_regressor(params, input_ids, attention_mask)
    out = jax.block_until_ready(out)
    assert out.shape == (B,) and out.dtype == jnp.float32
    print("KERNEL_OK")
</pallas_src>

<mosaic_0001>
module attributes {stable_mosaic.version = 11 : i64} {
  func.func @_fused_forward_kernel(%arg0: i32, %arg1: memref<16x64xf32, #tpu.memory_space<vmem>>, %arg2: memref<2x1x8xf32, #tpu.memory_space<vmem>>, %arg3: memref<1x64xf32, #tpu.memory_space<vmem>>, %arg4: memref<1x64xf32, #tpu.memory_space<vmem>>, %arg5: memref<64x192xbf16, #tpu.memory_space<vmem>>, %arg6: memref<1x192xf32, #tpu.memory_space<vmem>>, %arg7: memref<64x64xbf16, #tpu.memory_space<vmem>>, %arg8: memref<1x64xf32, #tpu.memory_space<vmem>>, %arg9: memref<1x64xf32, #tpu.memory_space<vmem>>, %arg10: memref<1x64xf32, #tpu.memory_space<vmem>>, %arg11: memref<64x128xbf16, #tpu.memory_space<vmem>>, %arg12: memref<1x128xf32, #tpu.memory_space<vmem>>, %arg13: memref<128x64xbf16, #tpu.memory_space<vmem>>, %arg14: memref<1x64xf32, #tpu.memory_space<vmem>>, %arg15: memref<1x64xf32, #tpu.memory_space<vmem>>, %arg16: memref<1x64xf32, #tpu.memory_space<vmem>>, %arg17: memref<64x192xbf16, #tpu.memory_space<vmem>>, %arg18: memref<1x192xf32, #tpu.memory_space<vmem>>, %arg19: memref<64x64xbf16, #tpu.memory_space<vmem>>, %arg20: memref<1x64xf32, #tpu.memory_space<vmem>>, %arg21: memref<1x64xf32, #tpu.memory_space<vmem>>, %arg22: memref<1x64xf32, #tpu.memory_space<vmem>>, %arg23: memref<64x128xbf16, #tpu.memory_space<vmem>>, %arg24: memref<1x128xf32, #tpu.memory_space<vmem>>, %arg25: memref<128x64xbf16, #tpu.memory_space<vmem>>, %arg26: memref<1x64xf32, #tpu.memory_space<vmem>>, %arg27: memref<1x64xf32, #tpu.memory_space<vmem>>, %arg28: memref<1x64xf32, #tpu.memory_space<vmem>>, %arg29: memref<64x512xbf16, #tpu.memory_space<vmem>>, %arg30: memref<128x512xbf16, #tpu.memory_space<vmem>>, %arg31: memref<1x512xf32, #tpu.memory_space<vmem>>, %arg32: memref<64x512xbf16, #tpu.memory_space<vmem>>, %arg33: memref<1x512xf32, #tpu.memory_space<vmem>>, %arg34: memref<128x1xf32, #tpu.memory_space<vmem>>, %arg35: memref<128x1xf32, #tpu.memory_space<vmem>>, %arg36: memref<1x1xf32, #tpu.memory_space<vmem>>, %arg37: memref<2x1xf32, #tpu.memory_space<vmem>>) attributes {dimension_semantics = [#tpu.dimension_semantics<arbitrary>], iteration_bounds = array<i64: 1>, scalar_prefetch = 0 : i64, scratch_operands = 0 : i64, tpu.core_type = #tpu.core_type<tc>, window_params = [{pipeline_mode = #tpu.pipeline_mode<synchronous>, transform_indices = @transform_0, window_bounds = array<i64: 16, 64>}, {pipeline_mode = #tpu.pipeline_mode<synchronous>, transform_indices = @transform_1, window_bounds = array<i64: 2, 1, 8>}, {pipeline_mode = #tpu.pipeline_mode<synchronous>, transform_indices = @transform_2, window_bounds = array<i64: 1, 64>}, {pipeline_mode = #tpu.pipeline_mode<synchronous>, transform_indices = @transform_3, window_bounds = array<i64: 1, 64>}, {pipeline_mode = #tpu.pipeline_mode<synchronous>, transform_indices = @transform_4, window_bounds = array<i64: 64, 192>}, {pipeline_mode = #tpu.pipeline_mode<synchronous>, transform_indices = @transform_5, window_bounds = array<i64: 1, 192>}, {pipeline_mode = #tpu.pipeline_mode<synchronous>, transform_indices = @transform_6, window_bounds = array<i64: 64, 64>}, {pipeline_mode = #tpu.pipeline_mode<synchronous>, transform_indices = @transform_7, window_bounds = array<i64: 1, 64>}, {pipeline_mode = #tpu.pipeline_mode<synchronous>, transform_indices = @transform_8, window_bounds = array<i64: 1, 64>}, {pipeline_mode = #tpu.pipeline_mode<synchronous>, transform_indices = @transform_9, window_bounds = array<i64: 1, 64>}, {pipeline_mode = #tpu.pipeline_mode<synchronous>, transform_indices = @transform_10, window_bounds = array<i64: 64, 128>}, {pipeline_mode = #tpu.pipeline_mode<synchronous>, transform_indices = @transform_11, window_bounds = array<i64: 1, 128>}, {pipeline_mode = #tpu.pipeline_mode<synchronous>, transform_indices = @transform_12, window_bounds = array<i64: 128, 64>}, {pipeline_mode = #tpu.pipeline_mode<synchronous>, transform_indices = @transform_13, window_bounds = array<i64: 1, 64>}, {pipeline_mode = #tpu.pipeline_mode<synchronous>, transform_indices = @transform_14, window_bounds = array<i64: 1, 64>}, {pipeline_mode = #tpu.pipeline_mode<synchronous>, transform_indices = @transform_15, window_bounds = array<i64: 1, 64>}, {pipeline_mode = #tpu.pipeline_mode<synchronous>, transform_indices = @transform_16, window_bounds = array<i64: 64, 192>}, {pipeline_mode = #tpu.pipeline_mode<synchronous>, transform_indices = @transform_17, window_bounds = array<i64: 1, 192>}, {pipeline_mode = #tpu.pipeline_mode<synchronous>, transform_indices = @transform_18, window_bounds = array<i64: 64, 64>}, {pipeline_mode = #tpu.pipeline_mode<synchronous>, transform_indices = @transform_19, window_bounds = array<i64: 1, 64>}, {pipeline_mode = #tpu.pipeline_mode<synchronous>, transform_indices = @transform_20, window_bounds = array<i64: 1, 64>}, {pipeline_mode = #tpu.pipeline_mode<synchronous>, transform_indices = @transform_21, window_bounds = array<i64: 1, 64>}, {pipeline_mode = #tpu.pipeline_mode<synchronous>, transform_indices = @transform_22, window_bounds = array<i64: 64, 128>}, {pipeline_mode = #tpu.pipeline_mode<synchronous>, transform_indices = @transform_23, window_bounds = array<i64: 1, 128>}, {pipeline_mode = #tpu.pipeline_mode<synchronous>, transform_indices = @transform_24, window_bounds = array<i64: 128, 64>}, {pipeline_mode = #tpu.pipeline_mode<synchronous>, transform_indices = @transform_25, window_bounds = array<i64: 1, 64>}, {pipeline_mode = #tpu.pipeline_mode<synchronous>, transform_indices = @transform_26, window_bounds = array<i64: 1, 64>}, {pipeline_mode = #tpu.pipeline_mode<synchronous>, transform_indices = @transform_27, window_bounds = array<i64: 1, 64>}, {pipeline_mode = #tpu.pipeline_mode<synchronous>, transform_indices = @transform_28, window_bounds = array<i64: 64, 512>}, {pipeline_mode = #tpu.pipeline_mode<synchronous>, transform_indices = @transform_29, window_bounds = array<i64: 128, 512>}, {pipeline_mode = #tpu.pipeline_mode<synchronous>, transform_indices = @transform_30, window_bounds = array<i64: 1, 512>}, {pipeline_mode = #tpu.pipeline_mode<synchronous>, transform_indices = @transform_31, window_bounds = array<i64: 64, 512>}, {pipeline_mode = #tpu.pipeline_mode<synchronous>, transform_indices = @transform_32, window_bounds = array<i64: 1, 512>}, {pipeline_mode = #tpu.pipeline_mode<synchronous>, transform_indices = @transform_33, window_bounds = array<i64: 128, 1>}, {pipeline_mode = #tpu.pipeline_mode<synchronous>, transform_indices = @transform_34, window_bounds = array<i64: 128, 1>}, {pipeline_mode = #tpu.pipeline_mode<synchronous>, transform_indices = @transform_35, window_bounds = array<i64: 1, 1>}, {pipeline_mode = #tpu.pipeline_mode<synchronous>, transform_indices = @transform_36, window_bounds = array<i64: 2, 1>}]} {
    %c0 = arith.constant 0 : index
    %c0_0 = arith.constant 0 : index
    %c0_1 = arith.constant 0 : index
    %0 = vector.load %arg2[%c0, %c0_0, %c0_1] : memref<2x1x8xf32, #tpu.memory_space<vmem>>, vector<2x1x8xf32>
    %1 = vector.shape_cast %0 : vector<2x1x8xf32> to vector<2x1x8xf32>
    %2 = vector.broadcast %1 : vector<2x1x8xf32> to vector<2x8x8xf32>
    %c0_2 = arith.constant 0 : index
    %c0_3 = arith.constant 0 : index
    %3 = vector.load %arg1[%c0_2, %c0_3] : memref<16x64xf32, #tpu.memory_space<vmem>>, vector<16x64xf32>
    %c0_4 = arith.constant 0 : index
    %c0_5 = arith.constant 0 : index
    %4 = vector.load %arg3[%c0_4, %c0_5] : memref<1x64xf32, #tpu.memory_space<vmem>>, vector<1x64xf32>
    %c0_6 = arith.constant 0 : index
    %c0_7 = arith.constant 0 : index
    %5 = vector.load %arg4[%c0_6, %c0_7] : memref<1x64xf32, #tpu.memory_space<vmem>>, vector<1x64xf32>
    %cst = arith.constant dense<0.000000e+00> : vector<16xf32>
    %6 = vector.multi_reduction <add>, %3, %cst [1] : vector<16x64xf32> to vector<16xf32>
    %7 = vector.shape_cast %6 : vector<16xf32> to vector<16x1xf32>
    %cst_8 = arith.constant 6.400000e+01 : f32
    %8 = vector.broadcast %cst_8 : f32 to vector<16x1xf32>
    %9 = arith.divf %7, %8 : vector<16x1xf32>
    %10 = vector.broadcast %9 : vector<16x1xf32> to vector<16x64xf32>
    %11 = arith.subf %3, %10 : vector<16x64xf32>
    %12 = arith.mulf %11, %11 : vector<16x64xf32>
    %cst_9 = arith.constant dense<0.000000e+00> : vector<16xf32>
    %13 = vector.multi_reduction <add>, %12, %cst_9 [1] : vector<16x64xf32> to vector<16xf32>
    %14 = vector.shape_cast %13 : vector<16xf32> to vector<16x1xf32>
    %cst_10 = arith.constant 6.400000e+01 : f32
    %15 = vector.broadcast %cst_10 : f32 to vector<16x1xf32>
    %16 = arith.divf %14, %15 : vector<16x1xf32>
    %17 = vector.broadcast %9 : vector<16x1xf32> to vector<16x64xf32>
    %18 = arith.subf %3, %17 : vector<16x64xf32>
    %cst_11 = arith.constant 9.99999996E-13 : f32
    %19 = vector.broadcast %cst_11 : f32 to vector<16x1xf32>
    %20 = arith.addf %16, %19 : vector<16x1xf32>
    %21 = math.rsqrt %20 : vector<16x1xf32>
    %22 = vector.broadcast %21 : vector<16x1xf32> to vector<16x64xf32>
    %23 = arith.mulf %18, %22 : vector<16x64xf32>
    %24 = vector.broadcast %4 : vector<1x64xf32> to vector<16x64xf32>
    %25 = arith.mulf %23, %24 : vector<16x64xf32>
    %26 = vector.broadcast %5 : vector<1x64xf32> to vector<16x64xf32>
    %27 = arith.addf %25, %26 : vector<16x64xf32>
    %28 = arith.truncf %27 : vector<16x64xf32> to vector<16x64xbf16>
    %c0_12 = arith.constant 0 : index
    %c0_13 = arith.constant 0 : index
    %29 = vector.load %arg5[%c0_12, %c0_13] : memref<64x192xbf16, #tpu.memory_space<vmem>>, vector<64x192xbf16>
    %cst_14 = arith.constant dense<0.000000e+00> : vector<16x192xf32>
    %30 = tpu.matmul %28, %29, %cst_14 {dimension_numbers = #tpu.dot_dimension_numbers<[1], [0], [0], [1], [0, 0, 1, 1], [], []>} : vector<16x64xbf16>, vector<64x192xbf16>, vector<16x192xf32> -> vector<16x192xf32>
    %c0_15 = arith.constant 0 : index
    %c0_16 = arith.constant 0 : index
    %31 = vector.load %arg6[%c0_15, %c0_16] : memref<1x192xf32, #tpu.memory_space<vmem>>, vector<1x192xf32>
    %32 = vector.broadcast %31 : vector<1x192xf32> to vector<16x192xf32>
    %33 = arith.addf %30, %32 : vector<16x192xf32>
    %34 = vector.extract_strided_slice %33 {offsets = [0, 0], sizes = [16, 16], strides = [1, 1]} : vector<16x192xf32> to vector<16x16xf32>
    %35 = vector.shape_cast %34 : vector<16x16xf32> to vector<2x8x16xf32>
    %36 = vector.extract_strided_slice %33 {offsets = [0, 64], sizes = [16, 16], strides = [1, 1]} : vector<16x192xf32> to vector<16x16xf32>
    %37 = vector.shape_cast %36 : vector<16x16xf32> to vector<2x8x16xf32>
    %38 = vector.extract_strided_slice %33 {offsets = [0, 128], sizes = [16, 16], strides = [1, 1]} : vector<16x192xf32> to vector<16x16xf32>
    %39 = vector.shape_cast %38 : vector<16x16xf32> to vector<2x8x16xf32>
    %40 = arith.truncf %35 : vector<2x8x16xf32> to vector<2x8x16xbf16>
    %41 = arith.truncf %37 : vector<2x8x16xf32> to vector<2x8x16xbf16>
    "tpu.trace_start"() <{level = 10 : i32, message = "bqd,bkd->bqk"}> : () -> ()
    %cst_17 = arith.constant dense<0.000000e+00> : vector<2x8x8xf32>
    %42 = tpu.matmul %40, %41, %cst_17 {dimension_numbers = #tpu.dot_dimension_numbers<[2], [2], [1], [1], [0, 0, 0, 1, 1, 1], [0], [0]>} : vector<2x8x16xbf16>, vector<2x8x16xbf16>, vector<2x8x8xf32> -> vector<2x8x8xf32>
    "tpu.trace_stop"() : () -> ()
    %cst_18 = arith.constant 2.500000e-01 : f32
    %43 = vector.broadcast %cst_18 : f32 to vector<2x8x8xf32>
    %44 = arith.mulf %42, %43 : vector<2x8x8xf32>
    %45 = arith.addf %44, %2 : vector<2x8x8xf32>
    %cst_19 = arith.constant dense<0xFF800000> : vector<2x8xf32>
    %46 = vector.multi_reduction <maximumf>, %45, %cst_19 [2] : vector<2x8x8xf32> to vector<2x8xf32>
    %47 = vector.shape_cast %46 : vector<2x8xf32> to vector<2x8x1xf32>
    %48 = vector.broadcast %47 : vector<2x8x1xf32> to vector<2x8x8xf32>
    %49 = arith.subf %45, %48 : vector<2x8x8xf32>
    %50 = math.exp %49 : vector<2x8x8xf32>
    %cst_20 = arith.constant dense<0.000000e+00> : vector<2x8xf32>
    %51 = vector.multi_reduction <add>, %50, %cst_20 [2] : vector<2x8x8xf32> to vector<2x8xf32>
    %52 = vector.shape_cast %51 : vector<2x8xf32> to vector<2x8x1xf32>
    %53 = tpu.reciprocal %52 {approx = true} : vector<2x8x1xf32> -> vector<2x8x1xf32>
    %54 = vector.broadcast %53 : vector<2x8x1xf32> to vector<2x8x8xf32>
    %55 = arith.mulf %50, %54 : vector<2x8x8xf32>
    %56 = arith.truncf %55 : vector<2x8x8xf32> to vector<2x8x8xbf16>
    %57 = arith.truncf %39 : vector<2x8x16xf32> to vector<2x8x16xbf16>
    "tpu.trace_start"() <{level = 10 : i32, message = "bqk,bkd->bqd"}> : () -> ()
    %cst_21 = arith.constant dense<0.000000e+00> : vector<2x8x16xf32>
    %58 = tpu.matmul %56, %57, %cst_21 {dimension_numbers = #tpu.dot_dimension_numbers<[2], [1], [1], [2], [0, 0, 0, 1, 1, 2], [0], [0]>} : vector<2x8x8xbf16>, vector<2x8x16xbf16>, vector<2x8x16xf32> -> vector<2x8x16xf32>
    "tpu.trace_stop"() : () -> ()
    %59 = vector.shape_cast %58 : vector<2x8x16xf32> to vector<16x16xf32>
    %60 = vector.extract_strided_slice %33 {offsets = [0, 16], sizes = [16, 16], strides = [1, 1]} : vector<16x192xf32> to vector<16x16xf32>
    %61 = vector.shape_cast %60 : vector<16x16xf32> to vector<2x8x16xf32>
    %62 = vector.extract_strided_slice %33 {offsets = [0, 80], sizes = [16, 16], strides = [1, 1]} : vector<16x192xf32> to vector<16x16xf32>
    %63 = vector.shape_cast %62 : vector<16x16xf32> to vector<2x8x16xf32>
    %64 = vector.extract_strided_slice %33 {offsets = [0, 144], sizes = [16, 16], strides = [1, 1]} : vector<16x192xf32> to vector<16x16xf32>
    %65 = vector.shape_cast %64 : vector<16x16xf32> to vector<2x8x16xf32>
    %66 = arith.truncf %61 : vector<2x8x16xf32> to vector<2x8x16xbf16>
    %67 = arith.truncf %63 : vector<2x8x16xf32> to vector<2x8x16xbf16>
    "tpu.trace_start"() <{level = 10 : i32, message = "bqd,bkd->bqk"}> : () -> ()
    %cst_22 = arith.constant dense<0.000000e+00> : vector<2x8x8xf32>
    %68 = tpu.matmul %66, %67, %cst_22 {dimension_numbers = #tpu.dot_dimension_numbers<[2], [2], [1], [1], [0, 0, 0, 1, 1, 1], [0], [0]>} : vector<2x8x16xbf16>, vector<2x8x16xbf16>, vector<2x8x8xf32> -> vector<2x8x8xf32>
    "tpu.trace_stop"() : () -> ()
    %cst_23 = arith.constant 2.500000e-01 : f32
    %69 = vector.broadcast %cst_23 : f32 to vector<2x8x8xf32>
    %70 = arith.mulf %68, %69 : vector<2x8x8xf32>
    %71 = arith.addf %70, %2 : vector<2x8x8xf32>
    %cst_24 = arith.constant dense<0xFF800000> : vector<2x8xf32>
    %72 = vector.multi_reduction <maximumf>, %71, %cst_24 [2] : vector<2x8x8xf32> to vector<2x8xf32>
    %73 = vector.shape_cast %72 : vector<2x8xf32> to vector<2x8x1xf32>
    %74 = vector.broadcast %73 : vector<2x8x1xf32> to vector<2x8x8xf32>
    %75 = arith.subf %71, %74 : vector<2x8x8xf32>
    %76 = math.exp %75 : vector<2x8x8xf32>
    %cst_25 = arith.constant dense<0.000000e+00> : vector<2x8xf32>
    %77 = vector.multi_reduction <add>, %76, %cst_25 [2] : vector<2x8x8xf32> to vector<2x8xf32>
    %78 = vector.shape_cast %77 : vector<2x8xf32> to vector<2x8x1xf32>
    %79 = tpu.reciprocal %78 {approx = true} : vector<2x8x1xf32> -> vector<2x8x1xf32>
    %80 = vector.broadcast %79 : vector<2x8x1xf32> to vector<2x8x8xf32>
    %81 = arith.mulf %76, %80 : vector<2x8x8xf32>
    %82 = arith.truncf %81 : vector<2x8x8xf32> to vector<2x8x8xbf16>
    %83 = arith.truncf %65 : vector<2x8x16xf32> to vector<2x8x16xbf16>
    "tpu.trace_start"() <{level = 10 : i32, message = "bqk,bkd->bqd"}> : () -> ()
    %cst_26 = arith.constant dense<0.000000e+00> : vector<2x8x16xf32>
    %84 = tpu.matmul %82, %83, %cst_26 {dimension_numbers = #tpu.dot_dimension_numbers<[2], [1], [1], [2], [0, 0, 0, 1, 1, 2], [0], [0]>} : vector<2x8x8xbf16>, vector<2x8x16xbf16>, vector<2x8x16xf32> -> vector<2x8x16xf32>
    "tpu.trace_stop"() : () -> ()
    %85 = vector.shape_cast %84 : vector<2x8x16xf32> to vector<16x16xf32>
    %86 = vector.extract_strided_slice %33 {offsets = [0, 32], sizes = [16, 16], strides = [1, 1]} : vector<16x192xf32> to vector<16x16xf32>
    %87 = vector.shape_cast %86 : vector<16x16xf32> to vector<2x8x16xf32>
    %88 = vector.extract_strided_slice %33 {offsets = [0, 96], sizes = [16, 16], strides = [1, 1]} : vector<16x192xf32> to vector<16x16xf32>
    %89 = vector.shape_cast %88 : vector<16x16xf32> to vector<2x8x16xf32>
    %90 = vector.extract_strided_slice %33 {offsets = [0, 160], sizes = [16, 16], strides = [1, 1]} : vector<16x192xf32> to vector<16x16xf32>
    %91 = vector.shape_cast %90 : vector<16x16xf32> to vector<2x8x16xf32>
    %92 = arith.truncf %87 : vector<2x8x16xf32> to vector<2x8x16xbf16>
    %93 = arith.truncf %89 : vector<2x8x16xf32> to vector<2x8x16xbf16>
    "tpu.trace_start"() <{level = 10 : i32, message = "bqd,bkd->bqk"}> : () -> ()
    %cst_27 = arith.constant dense<0.000000e+00> : vector<2x8x8xf32>
    %94 = tpu.matmul %92, %93, %cst_27 {dimension_numbers = #tpu.dot_dimension_numbers<[2], [2], [1], [1], [0, 0, 0, 1, 1, 1], [0], [0]>} : vector<2x8x16xbf16>, vector<2x8x16xbf16>, vector<2x8x8xf32> -> vector<2x8x8xf32>
    "tpu.trace_stop"() : () -> ()
    %cst_28 = arith.constant 2.500000e-01 : f32
    %95 = vector.broadcast %cst_28 : f32 to vector<2x8x8xf32>
    %96 = arith.mulf %94, %95 : vector<2x8x8xf32>
    %97 = arith.addf %96, %2 : vector<2x8x8xf32>
    %cst_29 = arith.constant dense<0xFF800000> : vector<2x8xf32>
    %98 = vector.multi_reduction <maximumf>, %97, %cst_29 [2] : vector<2x8x8xf32> to vector<2x8xf32>
    %99 = vector.shape_cast %98 : vector<2x8xf32> to vector<2x8x1xf32>
    %100 = vector.broadcast %99 : vector<2x8x1xf32> to vector<2x8x8xf32>
    %101 = arith.subf %97, %100 : vector<2x8x8xf32>
    %102 = math.exp %101 : vector<2x8x8xf32>
    %cst_30 = arith.constant dense<0.000000e+00> : vector<2x8xf32>
    %103 = vector.multi_reduction <add>, %102, %cst_30 [2] : vector<2x8x8xf32> to vector<2x8xf32>
    %104 = vector.shape_cast %103 : vector<2x8xf32> to vector<2x8x1xf32>
    %105 = tpu.reciprocal %104 {approx = true} : vector<2x8x1xf32> -> vector<2x8x1xf32>
    %106 = vector.broadcast %105 : vector<2x8x1xf32> to vector<2x8x8xf32>
    %107 = arith.mulf %102, %106 : vector<2x8x8xf32>
    %108 = arith.truncf %107 : vector<2x8x8xf32> to vector<2x8x8xbf16>
    %109 = arith.truncf %91 : vector<2x8x16xf32> to vector<2x8x16xbf16>
    "tpu.trace_start"() <{level = 10 : i32, message = "bqk,bkd->bqd"}> : () -> ()
    %cst_31 = arith.constant dense<0.000000e+00> : vector<2x8x16xf32>
    %110 = tpu.matmul %108, %109, %cst_31 {dimension_numbers = #tpu.dot_dimension_numbers<[2], [1], [1], [2], [0, 0, 0, 1, 1, 2], [0], [0]>} : vector<2x8x8xbf16>, vector<2x8x16xbf16>, vector<2x8x16xf32> -> vector<2x8x16xf32>
    "tpu.trace_stop"() : () -> ()
    %111 = vector.shape_cast %110 : vector<2x8x16xf32> to vector<16x16xf32>
    %112 = vector.extract_strided_slice %33 {offsets = [0, 48], sizes = [16, 16], strides = [1, 1]} : vector<16x192xf32> to vector<16x16xf32>
    %113 = vector.shape_cast %112 : vector<16x16xf32> to vector<2x8x16xf32>
    %114 = vector.extract_strided_slice %33 {offsets = [0, 112], sizes = [16, 16], strides = [1, 1]} : vector<16x192xf32> to vector<16x16xf32>
    %115 = vector.shape_cast %114 : vector<16x16xf32> to vector<2x8x16xf32>
    %116 = vector.extract_strided_slice %33 {offsets = [0, 176], sizes = [16, 16], strides = [1, 1]} : vector<16x192xf32> to vector<16x16xf32>
    %117 = vector.shape_cast %116 : vector<16x16xf32> to vector<2x8x16xf32>
    %118 = arith.truncf %113 : vector<2x8x16xf32> to vector<2x8x16xbf16>
    %119 = arith.truncf %115 : vector<2x8x16xf32> to vector<2x8x16xbf16>
    "tpu.trace_start"() <{level = 10 : i32, message = "bqd,bkd->bqk"}> : () -> ()
    %cst_32 = arith.constant dense<0.000000e+00> : vector<2x8x8xf32>
    %120 = tpu.matmul %118, %119, %cst_32 {dimension_numbers = #tpu.dot_dimension_numbers<[2], [2], [1], [1], [0, 0, 0, 1, 1, 1], [0], [0]>} : vector<2x8x16xbf16>, vector<2x8x16xbf16>, vector<2x8x8xf32> -> vector<2x8x8xf32>
    "tpu.trace_stop"() : () -> ()
    %cst_33 = arith.constant 2.500000e-01 : f32
    %121 = vector.broadcast %cst_33 : f32 to vector<2x8x8xf32>
    %122 = arith.mulf %120, %121 : vector<2x8x8xf32>
    %123 = arith.addf %122, %2 : vector<2x8x8xf32>
    %cst_34 = arith.constant dense<0xFF800000> : vector<2x8xf32>
    %124 = vector.multi_reduction <maximumf>, %123, %cst_34 [2] : vector<2x8x8xf32> to vector<2x8xf32>
    %125 = vector.shape_cast %124 : vector<2x8xf32> to vector<2x8x1xf32>
    %126 = vector.broadcast %125 : vector<2x8x1xf32> to vector<2x8x8xf32>
    %127 = arith.subf %123, %126 : vector<2x8x8xf32>
    %128 = math.exp %127 : vector<2x8x8xf32>
    %cst_35 = arith.constant dense<0.000000e+00> : vector<2x8xf32>
    %129 = vector.multi_reduction <add>, %128, %cst_35 [2] : vector<2x8x8xf32> to vector<2x8xf32>
    %130 = vector.shape_cast %129 : vector<2x8xf32> to vector<2x8x1xf32>
    %131 = tpu.reciprocal %130 {approx = true} : vector<2x8x1xf32> -> vector<2x8x1xf32>
    %132 = vector.broadcast %131 : vector<2x8x1xf32> to vector<2x8x8xf32>
    %133 = arith.mulf %128, %132 : vector<2x8x8xf32>
    %134 = arith.truncf %133 : vector<2x8x8xf32> to vector<2x8x8xbf16>
    %135 = arith.truncf %117 : vector<2x8x16xf32> to vector<2x8x16xbf16>
    "tpu.trace_start"() <{level = 10 : i32, message = "bqk,bkd->bqd"}> : () -> ()
    %cst_36 = arith.constant dense<0.000000e+00> : vector<2x8x16xf32>
    %136 = tpu.matmul %134, %135, %cst_36 {dimension_numbers = #tpu.dot_dimension_numbers<[2], [1], [1], [2], [0, 0, 0, 1, 1, 2], [0], [0]>} : vector<2x8x8xbf16>, vector<2x8x16xbf16>, vector<2x8x16xf32> -> vector<2x8x16xf32>
    "tpu.trace_stop"() : () -> ()
    %137 = vector.shape_cast %136 : vector<2x8x16xf32> to vector<16x16xf32>
    %138 = tpu.concatenate %59, %85, %111, %137 in 1 : vector<16x16xf32>, vector<16x16xf32>, vector<16x16xf32>, vector<16x16xf32> -> vector<16x64xf32>
    %139 = arith.truncf %138 : vector<16x64xf32> to vector<16x64xbf16>
    %c0_37 = arith.constant 0 : index
    %c0_38 = arith.constant 0 : index
    %140 = vector.load %arg7[%c0_37, %c0_38] : memref<64x64xbf16, #tpu.memory_space<vmem>>, vector<64x64xbf16>
    %cst_39 = arith.constant dense<0.000000e+00> : vector<16x64xf32>
    %141 = tpu.matmul %139, %140, %cst_39 {dimension_numbers = #tpu.dot_dimension_numbers<[1], [0], [0], [1], [0, 0, 1, 1], [], []>} : vector<16x64xbf16>, vector<64x64xbf16>, vector<16x64xf32> -> vector<16x64xf32>
    %c0_40 = arith.constant 0 : index
    %c0_41 = arith.constant 0 : index
    %142 = vector.load %arg8[%c0_40, %c0_41] : memref<1x64xf32, #tpu.memory_space<vmem>>, vector<1x64xf32>
    %143 = vector.broadcast %142 : vector<1x64xf32> to vector<16x64xf32>
    %144 = arith.addf %141, %143 : vector<16x64xf32>
    %145 = arith.addf %27, %144 : vector<16x64xf32>
    %c0_42 = arith.constant 0 : index
    %c0_43 = arith.constant 0 : index
    %146 = vector.load %arg9[%c0_42, %c0_43] : memref<1x64xf32, #tpu.memory_space<vmem>>, vector<1x64xf32>
    %c0_44 = arith.constant 0 : index
    %c0_45 = arith.constant 0 : index
    %147 = vector.load %arg10[%c0_44, %c0_45] : memref<1x64xf32, #tpu.memory_space<vmem>>, vector<1x64xf32>
    %cst_46 = arith.constant dense<0.000000e+00> : vector<16xf32>
    %148 = vector.multi_reduction <add>, %145, %cst_46 [1] : vector<16x64xf32> to vector<16xf32>
    %149 = vector.shape_cast %148 : vector<16xf32> to vector<16x1xf32>
    %cst_47 = arith.constant 6.400000e+01 : f32
    %150 = vector.broadcast %cst_47 : f32 to vector<16x1xf32>
    %151 = arith.divf %149, %150 : vector<16x1xf32>
    %152 = vector.broadcast %151 : vector<16x1xf32> to vector<16x64xf32>
    %153 = arith.subf %145, %152 : vector<16x64xf32>
    %154 = arith.mulf %153, %153 : vector<16x64xf32>
    %cst_48 = arith.constant dense<0.000000e+00> : vector<16xf32>
    %155 = vector.multi_reduction <add>, %154, %cst_48 [1] : vector<16x64xf32> to vector<16xf32>
    %156 = vector.shape_cast %155 : vector<16xf32> to vector<16x1xf32>
    %cst_49 = arith.constant 6.400000e+01 : f32
    %157 = vector.broadcast %cst_49 : f32 to vector<16x1xf32>
    %158 = arith.divf %156, %157 : vector<16x1xf32>
    %159 = vector.broadcast %151 : vector<16x1xf32> to vector<16x64xf32>
    %160 = arith.subf %145, %159 : vector<16x64xf32>
    %cst_50 = arith.constant 9.99999996E-13 : f32
    %161 = vector.broadcast %cst_50 : f32 to vector<16x1xf32>
    %162 = arith.addf %158, %161 : vector<16x1xf32>
    %163 = math.rsqrt %162 : vector<16x1xf32>
    %164 = vector.broadcast %163 : vector<16x1xf32> to vector<16x64xf32>
    %165 = arith.mulf %160, %164 : vector<16x64xf32>
    %166 = vector.broadcast %146 : vector<1x64xf32> to vector<16x64xf32>
    %167 = arith.mulf %165, %166 : vector<16x64xf32>
    %168 = vector.broadcast %147 : vector<1x64xf32> to vector<16x64xf32>
    %169 = arith.addf %167, %168 : vector<16x64xf32>
    %170 = arith.truncf %169 : vector<16x64xf32> to vector<16x64xbf16>
    %c0_51 = arith.constant 0 : index
    %c0_52 = arith.constant 0 : index
    %171 = vector.load %arg11[%c0_51, %c0_52] : memref<64x128xbf16, #tpu.memory_space<vmem>>, vector<64x128xbf16>
    %cst_53 = arith.constant dense<0.000000e+00> : vector<16x128xf32>
    %172 = tpu.matmul %170, %171, %cst_53 {dimension_numbers = #tpu.dot_dimension_numbers<[1], [0], [0], [1], [0, 0, 1, 1], [], []>} : vector<16x64xbf16>, vector<64x128xbf16>, vector<16x128xf32> -> vector<16x128xf32>
    %c0_54 = arith.constant 0 : index
    %c0_55 = arith.constant 0 : index
    %173 = vector.load %arg12[%c0_54, %c0_55] : memref<1x128xf32, #tpu.memory_space<vmem>>, vector<1x128xf32>
    %174 = vector.broadcast %173 : vector<1x128xf32> to vector<16x128xf32>
    %175 = arith.addf %172, %174 : vector<16x128xf32>
    %176 = arith.mulf %175, %175 : vector<16x128xf32>
    %177 = arith.mulf %175, %176 : vector<16x128xf32>
    %cst_56 = arith.constant 4.471500e-02 : f32
    %178 = vector.broadcast %cst_56 : f32 to vector<16x128xf32>
    %179 = arith.mulf %178, %177 : vector<16x128xf32>
    %180 = arith.addf %175, %179 : vector<16x128xf32>
    %cst_57 = arith.constant 0.797884583 : f32
    %181 = vector.broadcast %cst_57 : f32 to vector<16x128xf32>
    %182 = arith.mulf %181, %180 : vector<16x128xf32>
    %183 = math.tanh %182 : vector<16x128xf32>
    %cst_58 = arith.constant 1.000000e+00 : f32
    %184 = vector.broadcast %cst_58 : f32 to vector<16x128xf32>
    %185 = arith.addf %184, %183 : vector<16x128xf32>
    %cst_59 = arith.constant 5.000000e-01 : f32
    %186 = vector.broadcast %cst_59 : f32 to vector<16x128xf32>
    %187 = arith.mulf %186, %185 : vector<16x128xf32>
    %188 = arith.mulf %175, %187 : vector<16x128xf32>
    %189 = arith.truncf %188 : vector<16x128xf32> to vector<16x128xbf16>
    %c0_60 = arith.constant 0 : index
    %c0_61 = arith.constant 0 : index
    %190 = vector.load %arg13[%c0_60, %c0_61] : memref<128x64xbf16, #tpu.memory_space<vmem>>, vector<128x64xbf16>
    %cst_62 = arith.constant dense<0.000000e+00> : vector<16x64xf32>
    %191 = tpu.matmul %189, %190, %cst_62 {dimension_numbers = #tpu.dot_dimension_numbers<[1], [0], [0], [1], [0, 0, 1, 1], [], []>} : vector<16x128xbf16>, vector<128x64xbf16>, vector<16x64xf32> -> vector<16x64xf32>
    %c0_63 = arith.constant 0 : index
    %c0_64 = arith.constant 0 : index
    %192 = vector.load %arg14[%c0_63, %c0_64] : memref<1x64xf32, #tpu.memory_space<vmem>>, vector<1x64xf32>
    %193 = vector.broadcast %192 : vector<1x64xf32> to vector<16x64xf32>
    %194 = arith.addf %191, %193 : vector<16x64xf32>
    %195 = arith.addf %169, %194 : vector<16x64xf32>
    %c0_65 = arith.constant 0 : index
    %c0_66 = arith.constant 0 : index
    %196 = vector.load %arg15[%c0_65, %c0_66] : memref<1x64xf32, #tpu.memory_space<vmem>>, vector<1x64xf32>
    %c0_67 = arith.constant 0 : index
    %c0_68 = arith.constant 0 : index
    %197 = vector.load %arg16[%c0_67, %c0_68] : memref<1x64xf32, #tpu.memory_space<vmem>>, vector<1x64xf32>
    %cst_69 = arith.constant dense<0.000000e+00> : vector<16xf32>
    %198 = vector.multi_reduction <add>, %195, %cst_69 [1] : vector<16x64xf32> to vector<16xf32>
    %199 = vector.shape_cast %198 : vector<16xf32> to vector<16x1xf32>
    %cst_70 = arith.constant 6.400000e+01 : f32
    %200 = vector.broadcast %cst_70 : f32 to vector<16x1xf32>
    %201 = arith.divf %199, %200 : vector<16x1xf32>
    %202 = vector.broadcast %201 : vector<16x1xf32> to vector<16x64xf32>
    %203 = arith.subf %195, %202 : vector<16x64xf32>
    %204 = arith.mulf %203, %203 : vector<16x64xf32>
    %cst_71 = arith.constant dense<0.000000e+00> : vector<16xf32>
    %205 = vector.multi_reduction <add>, %204, %cst_71 [1] : vector<16x64xf32> to vector<16xf32>
    %206 = vector.shape_cast %205 : vector<16xf32> to vector<16x1xf32>
    %cst_72 = arith.constant 6.400000e+01 : f32
    %207 = vector.broadcast %cst_72 : f32 to vector<16x1xf32>
    %208 = arith.divf %206, %207 : vector<16x1xf32>
    %209 = vector.broadcast %201 : vector<16x1xf32> to vector<16x64xf32>
    %210 = arith.subf %195, %209 : vector<16x64xf32>
    %cst_73 = arith.constant 9.99999996E-13 : f32
    %211 = vector.broadcast %cst_73 : f32 to vector<16x1xf32>
    %212 = arith.addf %208, %211 : vector<16x1xf32>
    %213 = math.rsqrt %212 : vector<16x1xf32>
    %214 = vector.broadcast %213 : vector<16x1xf32> to vector<16x64xf32>
    %215 = arith.mulf %210, %214 : vector<16x64xf32>
    %216 = vector.broadcast %196 : vector<1x64xf32> to vector<16x64xf32>
    %217 = arith.mulf %215, %216 : vector<16x64xf32>
    %218 = vector.broadcast %197 : vector<1x64xf32> to vector<16x64xf32>
    %219 = arith.addf %217, %218 : vector<16x64xf32>
    %220 = arith.truncf %219 : vector<16x64xf32> to vector<16x64xbf16>
    %c0_74 = arith.constant 0 : index
    %c0_75 = arith.constant 0 : index
    %221 = vector.load %arg17[%c0_74, %c0_75] : memref<64x192xbf16, #tpu.memory_space<vmem>>, vector<64x192xbf16>
    %cst_76 = arith.constant dense<0.000000e+00> : vector<16x192xf32>
    %222 = tpu.matmul %220, %221, %cst_76 {dimension_numbers = #tpu.dot_dimension_numbers<[1], [0], [0], [1], [0, 0, 1, 1], [], []>} : vector<16x64xbf16>, vector<64x192xbf16>, vector<16x192xf32> -> vector<16x192xf32>
    %c0_77 = arith.constant 0 : index
    %c0_78 = arith.constant 0 : index
    %223 = vector.load %arg18[%c0_77, %c0_78] : memref<1x192xf32, #tpu.memory_space<vmem>>, vector<1x192xf32>
    %224 = vector.broadcast %223 : vector<1x192xf32> to vector<16x192xf32>
    %225 = arith.addf %222, %224 : vector<16x192xf32>
    %226 = vector.extract_strided_slice %225 {offsets = [0, 0], sizes = [16, 16], strides = [1, 1]} : vector<16x192xf32> to vector<16x16xf32>
    %227 = vector.shape_cast %226 : vector<16x16xf32> to vector<2x8x16xf32>
    %228 = vector.extract_strided_slice %225 {offsets = [0, 64], sizes = [16, 16], strides = [1, 1]} : vector<16x192xf32> to vector<16x16xf32>
    %229 = vector.shape_cast %228 : vector<16x16xf32> to vector<2x8x16xf32>
    %230 = vector.extract_strided_slice %225 {offsets = [0, 128], sizes = [16, 16], strides = [1, 1]} : vector<16x192xf32> to vector<16x16xf32>
    %231 = vector.shape_cast %230 : vector<16x16xf32> to vector<2x8x16xf32>
    %232 = arith.truncf %227 : vector<2x8x16xf32> to vector<2x8x16xbf16>
    %233 = arith.truncf %229 : vector<2x8x16xf32> to vector<2x8x16xbf16>
    "tpu.trace_start"() <{level = 10 : i32, message = "bqd,bkd->bqk"}> : () -> ()
    %cst_79 = arith.constant dense<0.000000e+00> : vector<2x8x8xf32>
    %234 = tpu.matmul %232, %233, %cst_79 {dimension_numbers = #tpu.dot_dimension_numbers<[2], [2], [1], [1], [0, 0, 0, 1, 1, 1], [0], [0]>} : vector<2x8x16xbf16>, vector<2x8x16xbf16>, vector<2x8x8xf32> -> vector<2x8x8xf32>
    "tpu.trace_stop"() : () -> ()
    %cst_80 = arith.constant 2.500000e-01 : f32
    %235 = vector.broadcast %cst_80 : f32 to vector<2x8x8xf32>
    %236 = arith.mulf %234, %235 : vector<2x8x8xf32>
    %237 = arith.addf %236, %2 : vector<2x8x8xf32>
    %cst_81 = arith.constant dense<0xFF800000> : vector<2x8xf32>
    %238 = vector.multi_reduction <maximumf>, %237, %cst_81 [2] : vector<2x8x8xf32> to vector<2x8xf32>
    %239 = vector.shape_cast %238 : vector<2x8xf32> to vector<2x8x1xf32>
    %240 = vector.broadcast %239 : vector<2x8x1xf32> to vector<2x8x8xf32>
    %241 = arith.subf %237, %240 : vector<2x8x8xf32>
    %242 = math.exp %241 : vector<2x8x8xf32>
    %cst_82 = arith.constant dense<0.000000e+00> : vector<2x8xf32>
    %243 = vector.multi_reduction <add>, %242, %cst_82 [2] : vector<2x8x8xf32> to vector<2x8xf32>
    %244 = vector.shape_cast %243 : vector<2x8xf32> to vector<2x8x1xf32>
    %245 = tpu.reciprocal %244 {approx = true} : vector<2x8x1xf32> -> vector<2x8x1xf32>
    %246 = vector.broadcast %245 : vector<2x8x1xf32> to vector<2x8x8xf32>
    %247 = arith.mulf %242, %246 : vector<2x8x8xf32>
    %248 = arith.truncf %247 : vector<2x8x8xf32> to vector<2x8x8xbf16>
    %249 = arith.truncf %231 : vector<2x8x16xf32> to vector<2x8x16xbf16>
    "tpu.trace_start"() <{level = 10 : i32, message = "bqk,bkd->bqd"}> : () -> ()
    %cst_83 = arith.constant dense<0.000000e+00> : vector<2x8x16xf32>
    %250 = tpu.matmul %248, %249, %cst_83 {dimension_numbers = #tpu.dot_dimension_numbers<[2], [1], [1], [2], [0, 0, 0, 1, 1, 2], [0], [0]>} : vector<2x8x8xbf16>, vector<2x8x16xbf16>, vector<2x8x16xf32> -> vector<2x8x16xf32>
    "tpu.trace_stop"() : () -> ()
    %251 = vector.shape_cast %250 : vector<2x8x16xf32> to vector<16x16xf32>
    %252 = vector.extract_strided_slice %225 {offsets = [0, 16], sizes = [16, 16], strides = [1, 1]} : vector<16x192xf32> to vector<16x16xf32>
    %253 = vector.shape_cast %252 : vector<16x16xf32> to vector<2x8x16xf32>
    %254 = vector.extract_strided_slice %225 {offsets = [0, 80], sizes = [16, 16], strides = [1, 1]} : vector<16x192xf32> to vector<16x16xf32>
    %255 = vector.shape_cast %254 : vector<16x16xf32> to vector<2x8x16xf32>
    %256 = vector.extract_strided_slice %225 {offsets = [0, 144], sizes = [16, 16], strides = [1, 1]} : vector<16x192xf32> to vector<16x16xf32>
    %257 = vector.shape_cast %256 : vector<16x16xf32> to vector<2x8x16xf32>
    %258 = arith.truncf %253 : vector<2x8x16xf32> to vector<2x8x16xbf16>
    %259 = arith.truncf %255 : vector<2x8x16xf32> to vector<2x8x16xbf16>
    "tpu.trace_start"() <{level = 10 : i32, message = "bqd,bkd->bqk"}> : () -> ()
    %cst_84 = arith.constant dense<0.000000e+00> : vector<2x8x8xf32>
    %260 = tpu.matmul %258, %259, %cst_84 {dimension_numbers = #tpu.dot_dimension_numbers<[2], [2], [1], [1], [0, 0, 0, 1, 1, 1], [0], [0]>} : vector<2x8x16xbf16>, vector<2x8x16xbf16>, vector<2x8x8xf32> -> vector<2x8x8xf32>
    "tpu.trace_stop"() : () -> ()
    %cst_85 = arith.constant 2.500000e-01 : f32
    %261 = vector.broadcast %cst_85 : f32 to vector<2x8x8xf32>
    %262 = arith.mulf %260, %261 : vector<2x8x8xf32>
    %263 = arith.addf %262, %2 : vector<2x8x8xf32>
    %cst_86 = arith.constant dense<0xFF800000> : vector<2x8xf32>
    %264 = vector.multi_reduction <maximumf>, %263, %cst_86 [2] : vector<2x8x8xf32> to vector<2x8xf32>
    %265 = vector.shape_cast %264 : vector<2x8xf32> to vector<2x8x1xf32>
    %266 = vector.broadcast %265 : vector<2x8x1xf32> to vector<2x8x8xf32>
    %267 = arith.subf %263, %266 : vector<2x8x8xf32>
    %268 = math.exp %267 : vector<2x8x8xf32>
    %cst_87 = arith.constant dense<0.000000e+00> : vector<2x8xf32>
    %269 = vector.multi_reduction <add>, %268, %cst_87 [2] : vector<2x8x8xf32> to vector<2x8xf32>
    %270 = vector.shape_cast %269 : vector<2x8xf32> to vector<2x8x1xf32>
    %271 = tpu.reciprocal %270 {approx = true} : vector<2x8x1xf32> -> vector<2x8x1xf32>
    %272 = vector.broadcast %271 : vector<2x8x1xf32> to vector<2x8x8xf32>
    %273 = arith.mulf %268, %272 : vector<2x8x8xf32>
    %274 = arith.truncf %273 : vector<2x8x8xf32> to vector<2x8x8xbf16>
    %275 = arith.truncf %257 : vector<2x8x16xf32> to vector<2x8x16xbf16>
    "tpu.trace_start"() <{level = 10 : i32, message = "bqk,bkd->bqd"}> : () -> ()
    %cst_88 = arith.constant dense<0.000000e+00> : vector<2x8x16xf32>
    %276 = tpu.matmul %274, %275, %cst_88 {dimension_numbers = #tpu.dot_dimension_numbers<[2], [1], [1], [2], [0, 0, 0, 1, 1, 2], [0], [0]>} : vector<2x8x8xbf16>, vector<2x8x16xbf16>, vector<2x8x16xf32> -> vector<2x8x16xf32>
    "tpu.trace_stop"() : () -> ()
    %277 = vector.shape_cast %276 : vector<2x8x16xf32> to vector<16x16xf32>
    %278 = vector.extract_strided_slice %225 {offsets = [0, 32], sizes = [16, 16], strides = [1, 1]} : vector<16x192xf32> to vector<16x16xf32>
    %279 = vector.shape_cast %278 : vector<16x16xf32> to vector<2x8x16xf32>
    %280 = vector.extract_strided_slice %225 {offsets = [0, 96], sizes = [16, 16], strides = [1, 1]} : vector<16x192xf32> to vector<16x16xf32>
    %281 = vector.shape_cast %280 : vector<16x16xf32> to vector<2x8x16xf32>
    %282 = vector.extract_strided_slice %225 {offsets = [0, 160], sizes = [16, 16], strides = [1, 1]} : vector<16x192xf32> to vector<16x16xf32>
    %283 = vector.shape_cast %282 : vector<16x16xf32> to vector<2x8x16xf32>
    %284 = arith.truncf %279 : vector<2x8x16xf32> to vector<2x8x16xbf16>
    %285 = arith.truncf %281 : vector<2x8x16xf32> to vector<2x8x16xbf16>
    "tpu.trace_start"() <{level = 10 : i32, message = "bqd,bkd->bqk"}> : () -> ()
    %cst_89 = arith.constant dense<0.000000e+00> : vector<2x8x8xf32>
    %286 = tpu.matmul %284, %285, %cst_89 {dimension_numbers = #tpu.dot_dimension_numbers<[2], [2], [1], [1], [0, 0, 0, 1, 1, 1], [0], [0]>} : vector<2x8x16xbf16>, vector<2x8x16xbf16>, vector<2x8x8xf32> -> vector<2x8x8xf32>
    "tpu.trace_stop"() : () -> ()
    %cst_90 = arith.constant 2.500000e-01 : f32
    %287 = vector.broadcast %cst_90 : f32 to vector<2x8x8xf32>
    %288 = arith.mulf %286, %287 : vector<2x8x8xf32>
    %289 = arith.addf %288, %2 : vector<2x8x8xf32>
    %cst_91 = arith.constant dense<0xFF800000> : vector<2x8xf32>
    %290 = vector.multi_reduction <maximumf>, %289, %cst_91 [2] : vector<2x8x8xf32> to vector<2x8xf32>
    %291 = vector.shape_cast %290 : vector<2x8xf32> to vector<2x8x1xf32>
    %292 = vector.broadcast %291 : vector<2x8x1xf32> to vector<2x8x8xf32>
    %293 = arith.subf %289, %292 : vector<2x8x8xf32>
    %294 = math.exp %293 : vector<2x8x8xf32>
    %cst_92 = arith.constant dense<0.000000e+00> : vector<2x8xf32>
    %295 = vector.multi_reduction <add>, %294, %cst_92 [2] : vector<2x8x8xf32> to vector<2x8xf32>
    %296 = vector.shape_cast %295 : vector<2x8xf32> to vector<2x8x1xf32>
    %297 = tpu.reciprocal %296 {approx = true} : vector<2x8x1xf32> -> vector<2x8x1xf32>
    %298 = vector.broadcast %297 : vector<2x8x1xf32> to vector<2x8x8xf32>
    %299 = arith.mulf %294, %298 : vector<2x8x8xf32>
    %300 = arith.truncf %299 : vector<2x8x8xf32> to vector<2x8x8xbf16>
    %301 = arith.truncf %283 : vector<2x8x16xf32> to vector<2x8x16xbf16>
    "tpu.trace_start"() <{level = 10 : i32, message = "bqk,bkd->bqd"}> : () -> ()
    %cst_93 = arith.constant dense<0.000000e+00> : vector<2x8x16xf32>
    %302 = tpu.matmul %300, %301, %cst_93 {dimension_numbers = #tpu.dot_dimension_numbers<[2], [1], [1], [2], [0, 0, 0, 1, 1, 2], [0], [0]>} : vector<2x8x8xbf16>, vector<2x8x16xbf16>, vector<2x8x16xf32> -> vector<2x8x16xf32>
    "tpu.trace_stop"() : () -> ()
    %303 = vector.shape_cast %302 : vector<2x8x16xf32> to vector<16x16xf32>
    %304 = vector.extract_strided_slice %225 {offsets = [0, 48], sizes = [16, 16], strides = [1, 1]} : vector<16x192xf32> to vector<16x16xf32>
    %305 = vector.shape_cast %304 : vector<16x16xf32> to vector<2x8x16xf32>
    %306 = vector.extract_strided_slice %225 {offsets = [0, 112], sizes = [16, 16], strides = [1, 1]} : vector<16x192xf32> to vector<16x16xf32>
    %307 = vector.shape_cast %306 : vector<16x16xf32> to vector<2x8x16xf32>
    %308 = vector.extract_strided_slice %225 {offsets = [0, 176], sizes = [16, 16], strides = [1, 1]} : vector<16x192xf32> to vector<16x16xf32>
    %309 = vector.shape_cast %308 : vector<16x16xf32> to vector<2x8x16xf32>
    %310 = arith.truncf %305 : vector<2x8x16xf32> to vector<2x8x16xbf16>
    %311 = arith.truncf %307 : vector<2x8x16xf32> to vector<2x8x16xbf16>
    "tpu.trace_start"() <{level = 10 : i32, message = "bqd,bkd->bqk"}> : () -> ()
    %cst_94 = arith.constant dense<0.000000e+00> : vector<2x8x8xf32>
    %312 = tpu.matmul %310, %311, %cst_94 {dimension_numbers = #tpu.dot_dimension_numbers<[2], [2], [1], [1], [0, 0, 0, 1, 1, 1], [0], [0]>} : vector<2x8x16xbf16>, vector<2x8x16xbf16>, vector<2x8x8xf32> -> vector<2x8x8xf32>
    "tpu.trace_stop"() : () -> ()
    %cst_95 = arith.constant 2.500000e-01 : f32
    %313 = vector.broadcast %cst_95 : f32 to vector<2x8x8xf32>
    %314 = arith.mulf %312, %313 : vector<2x8x8xf32>
    %315 = arith.addf %314, %2 : vector<2x8x8xf32>
    %cst_96 = arith.constant dense<0xFF800000> : vector<2x8xf32>
    %316 = vector.multi_reduction <maximumf>, %315, %cst_96 [2] : vector<2x8x8xf32> to vector<2x8xf32>
    %317 = vector.shape_cast %316 : vector<2x8xf32> to vector<2x8x1xf32>
    %318 = vector.broadcast %317 : vector<2x8x1xf32> to vector<2x8x8xf32>
    %319 = arith.subf %315, %318 : vector<2x8x8xf32>
    %320 = math.exp %319 : vector<2x8x8xf32>
    %cst_97 = arith.constant dense<0.000000e+00> : vector<2x8xf32>
    %321 = vector.multi_reduction <add>, %320, %cst_97 [2] : vector<2x8x8xf32> to vector<2x8xf32>
    %322 = vector.shape_cast %321 : vector<2x8xf32> to vector<2x8x1xf32>
    %323 = tpu.reciprocal %322 {approx = true} : vector<2x8x1xf32> -> vector<2x8x1xf32>
    %324 = vector.broadcast %323 : vector<2x8x1xf32> to vector<2x8x8xf32>
    %325 = arith.mulf %320, %324 : vector<2x8x8xf32>
    %326 = arith.truncf %325 : vector<2x8x8xf32> to vector<2x8x8xbf16>
    %327 = arith.truncf %309 : vector<2x8x16xf32> to vector<2x8x16xbf16>
    "tpu.trace_start"() <{level = 10 : i32, message = "bqk,bkd->bqd"}> : () -> ()
    %cst_98 = arith.constant dense<0.000000e+00> : vector<2x8x16xf32>
    %328 = tpu.matmul %326, %327, %cst_98 {dimension_numbers = #tpu.dot_dimension_numbers<[2], [1], [1], [2], [0, 0, 0, 1, 1, 2], [0], [0]>} : vector<2x8x8xbf16>, vector<2x8x16xbf16>, vector<2x8x16xf32> -> vector<2x8x16xf32>
    "tpu.trace_stop"() : () -> ()
    %329 = vector.shape_cast %328 : vector<2x8x16xf32> to vector<16x16xf32>
    %330 = tpu.concatenate %251, %277, %303, %329 in 1 : vector<16x16xf32>, vector<16x16xf32>, vector<16x16xf32>, vector<16x16xf32> -> vector<16x64xf32>
    %331 = arith.truncf %330 : vector<16x64xf32> to vector<16x64xbf16>
    %c0_99 = arith.constant 0 : index
    %c0_100 = arith.constant 0 : index
    %332 = vector.load %arg19[%c0_99, %c0_100] : memref<64x64xbf16, #tpu.memory_space<vmem>>, vector<64x64xbf16>
    %cst_101 = arith.constant dense<0.000000e+00> : vector<16x64xf32>
    %333 = tpu.matmul %331, %332, %cst_101 {dimension_numbers = #tpu.dot_dimension_numbers<[1], [0], [0], [1], [0, 0, 1, 1], [], []>} : vector<16x64xbf16>, vector<64x64xbf16>, vector<16x64xf32> -> vector<16x64xf32>
    %c0_102 = arith.constant 0 : index
    %c0_103 = arith.constant 0 : index
    %334 = vector.load %arg20[%c0_102, %c0_103] : memref<1x64xf32, #tpu.memory_space<vmem>>, vector<1x64xf32>
    %335 = vector.broadcast %334 : vector<1x64xf32> to vector<16x64xf32>
    %336 = arith.addf %333, %335 : vector<16x64xf32>
    %337 = arith.addf %219, %336 : vector<16x64xf32>
    %c0_104 = arith.constant 0 : index
    %c0_105 = arith.constant 0 : index
    %338 = vector.load %arg21[%c0_104, %c0_105] : memref<1x64xf32, #tpu.memory_space<vmem>>, vector<1x64xf32>
    %c0_106 = arith.constant 0 : index
    %c0_107 = arith.constant 0 : index
    %339 = vector.load %arg22[%c0_106, %c0_107] : memref<1x64xf32, #tpu.memory_space<vmem>>, vector<1x64xf32>
    %cst_108 = arith.constant dense<0.000000e+00> : vector<16xf32>
    %340 = vector.multi_reduction <add>, %337, %cst_108 [1] : vector<16x64xf32> to vector<16xf32>
    %341 = vector.shape_cast %340 : vector<16xf32> to vector<16x1xf32>
    %cst_109 = arith.constant 6.400000e+01 : f32
    %342 = vector.broadcast %cst_109 : f32 to vector<16x1xf32>
    %343 = arith.divf %341, %342 : vector<16x1xf32>
    %344 = vector.broadcast %343 : vector<16x1xf32> to vector<16x64xf32>
    %345 = arith.subf %337, %344 : vector<16x64xf32>
    %346 = arith.mulf %345, %345 : vector<16x64xf32>
    %cst_110 = arith.constant dense<0.000000e+00> : vector<16xf32>
    %347 = vector.multi_reduction <add>, %346, %cst_110 [1] : vector<16x64xf32> to vector<16xf32>
    %348 = vector.shape_cast %347 : vector<16xf32> to vector<16x1xf32>
    %cst_111 = arith.constant 6.400000e+01 : f32
    %349 = vector.broadcast %cst_111 : f32 to vector<16x1xf32>
    %350 = arith.divf %348, %349 : vector<16x1xf32>
    %351 = vector.broadcast %343 : vector<16x1xf32> to vector<16x64xf32>
    %352 = arith.subf %337, %351 : vector<16x64xf32>
    %cst_112 = arith.constant 9.99999996E-13 : f32
    %353 = vector.broadcast %cst_112 : f32 to vector<16x1xf32>
    %354 = arith.addf %350, %353 : vector<16x1xf32>
    %355 = math.rsqrt %354 : vector<16x1xf32>
    %356 = vector.broadcast %355 : vector<16x1xf32> to vector<16x64xf32>
    %357 = arith.mulf %352, %356 : vector<16x64xf32>
    %358 = vector.broadcast %338 : vector<1x64xf32> to vector<16x64xf32>
    %359 = arith.mulf %357, %358 : vector<16x64xf32>
    %360 = vector.broadcast %339 : vector<1x64xf32> to vector<16x64xf32>
    %361 = arith.addf %359, %360 : vector<16x64xf32>
    %362 = arith.truncf %361 : vector<16x64xf32> to vector<16x64xbf16>
    %c0_113 = arith.constant 0 : index
    %c0_114 = arith.constant 0 : index
    %363 = vector.load %arg23[%c0_113, %c0_114] : memref<64x128xbf16, #tpu.memory_space<vmem>>, vector<64x128xbf16>
    %cst_115 = arith.constant dense<0.000000e+00> : vector<16x128xf32>
    %364 = tpu.matmul %362, %363, %cst_115 {dimension_numbers = #tpu.dot_dimension_numbers<[1], [0], [0], [1], [0, 0, 1, 1], [], []>} : vector<16x64xbf16>, vector<64x128xbf16>, vector<16x128xf32> -> vector<16x128xf32>
    %c0_116 = arith.constant 0 : index
    %c0_117 = arith.constant 0 : index
    %365 = vector.load %arg24[%c0_116, %c0_117] : memref<1x128xf32, #tpu.memory_space<vmem>>, vector<1x128xf32>
    %366 = vector.broadcast %365 : vector<1x128xf32> to vector<16x128xf32>
    %367 = arith.addf %364, %366 : vector<16x128xf32>
    %368 = arith.mulf %367, %367 : vector<16x128xf32>
    %369 = arith.mulf %367, %368 : vector<16x128xf32>
    %cst_118 = arith.constant 4.471500e-02 : f32
    %370 = vector.broadcast %cst_118 : f32 to vector<16x128xf32>
    %371 = arith.mulf %370, %369 : vector<16x128xf32>
    %372 = arith.addf %367, %371 : vector<16x128xf32>
    %cst_119 = arith.constant 0.797884583 : f32
    %373 = vector.broadcast %cst_119 : f32 to vector<16x128xf32>
    %374 = arith.mulf %373, %372 : vector<16x128xf32>
    %375 = math.tanh %374 : vector<16x128xf32>
    %cst_120 = arith.constant 1.000000e+00 : f32
    %376 = vector.broadcast %cst_120 : f32 to vector<16x128xf32>
    %377 = arith.addf %376, %375 : vector<16x128xf32>
    %cst_121 = arith.constant 5.000000e-01 : f32
    %378 = vector.broadcast %cst_121 : f32 to vector<16x128xf32>
    %379 = arith.mulf %378, %377 : vector<16x128xf32>
    %380 = arith.mulf %367, %379 : vector<16x128xf32>
    %381 = arith.truncf %380 : vector<16x128xf32> to vector<16x128xbf16>
    %c0_122 = arith.constant 0 : index
    %c0_123 = arith.constant 0 : index
    %382 = vector.load %arg25[%c0_122, %c0_123] : memref<128x64xbf16, #tpu.memory_space<vmem>>, vector<128x64xbf16>
    %cst_124 = arith.constant dense<0.000000e+00> : vector<16x64xf32>
    %383 = tpu.matmul %381, %382, %cst_124 {dimension_numbers = #tpu.dot_dimension_numbers<[1], [0], [0], [1], [0, 0, 1, 1], [], []>} : vector<16x128xbf16>, vector<128x64xbf16>, vector<16x64xf32> -> vector<16x64xf32>
    %c0_125 = arith.constant 0 : index
    %c0_126 = arith.constant 0 : index
    %384 = vector.load %arg26[%c0_125, %c0_126] : memref<1x64xf32, #tpu.memory_space<vmem>>, vector<1x64xf32>
    %385 = vector.broadcast %384 : vector<1x64xf32> to vector<16x64xf32>
    %386 = arith.addf %383, %385 : vector<16x64xf32>
    %387 = arith.addf %361, %386 : vector<16x64xf32>
    %c0_127 = arith.constant 0 : index
    %c0_128 = arith.constant 0 : index
    %388 = vector.load %arg27[%c0_127, %c0_128] : memref<1x64xf32, #tpu.memory_space<vmem>>, vector<1x64xf32>
    %c0_129 = arith.constant 0 : index
    %c0_130 = arith.constant 0 : index
    %389 = vector.load %arg28[%c0_129, %c0_130] : memref<1x64xf32, #tpu.memory_space<vmem>>, vector<1x64xf32>
    %cst_131 = arith.constant dense<0.000000e+00> : vector<16xf32>
    %390 = vector.multi_reduction <add>, %387, %cst_131 [1] : vector<16x64xf32> to vector<16xf32>
    %391 = vector.shape_cast %390 : vector<16xf32> to vector<16x1xf32>
    %cst_132 = arith.constant 6.400000e+01 : f32
    %392 = vector.broadcast %cst_132 : f32 to vector<16x1xf32>
    %393 = arith.divf %391, %392 : vector<16x1xf32>
    %394 = vector.broadcast %393 : vector<16x1xf32> to vector<16x64xf32>
    %395 = arith.subf %387, %394 : vector<16x64xf32>
    %396 = arith.mulf %395, %395 : vector<16x64xf32>
    %cst_133 = arith.constant dense<0.000000e+00> : vector<16xf32>
    %397 = vector.multi_reduction <add>, %396, %cst_133 [1] : vector<16x64xf32> to vector<16xf32>
    %398 = vector.shape_cast %397 : vector<16xf32> to vector<16x1xf32>
    %cst_134 = arith.constant 6.400000e+01 : f32
    %399 = vector.broadcast %cst_134 : f32 to vector<16x1xf32>
    %400 = arith.divf %398, %399 : vector<16x1xf32>
    %401 = vector.broadcast %393 : vector<16x1xf32> to vector<16x64xf32>
    %402 = arith.subf %387, %401 : vector<16x64xf32>
    %cst_135 = arith.constant 9.99999996E-13 : f32
    %403 = vector.broadcast %cst_135 : f32 to vector<16x1xf32>
    %404 = arith.addf %400, %403 : vector<16x1xf32>
    %405 = math.rsqrt %404 : vector<16x1xf32>
    %406 = vector.broadcast %405 : vector<16x1xf32> to vector<16x64xf32>
    %407 = arith.mulf %402, %406 : vector<16x64xf32>
    %408 = vector.broadcast %388 : vector<1x64xf32> to vector<16x64xf32>
    %409 = arith.mulf %407, %408 : vector<16x64xf32>
    %410 = vector.broadcast %389 : vector<1x64xf32> to vector<16x64xf32>
    %411 = arith.addf %409, %410 : vector<16x64xf32>
    %412 = arith.truncf %411 : vector<16x64xf32> to vector<16x64xbf16>
    %c0_136 = arith.constant 0 : index
    %c0_137 = arith.constant 0 : index
    %413 = vector.load %arg29[%c0_136, %c0_137] : memref<64x512xbf16, #tpu.memory_space<vmem>>, vector<64x512xbf16>
    %cst_138 = arith.constant dense<0.000000e+00> : vector<16x512xf32>
    %414 = tpu.matmul %412, %413, %cst_138 {dimension_numbers = #tpu.dot_dimension_numbers<[1], [0], [0], [1], [0, 0, 1, 1], [], []>} : vector<16x64xbf16>, vector<64x512xbf16>, vector<16x512xf32> -> vector<16x512xf32>
    %c0_139 = arith.constant 0 : index
    %c0_140 = arith.constant 0 : index
    %415 = vector.load %arg31[%c0_139, %c0_140] : memref<1x512xf32, #tpu.memory_space<vmem>>, vector<1x512xf32>
    %416 = vector.broadcast %415 : vector<1x512xf32> to vector<16x512xf32>
    %417 = arith.addf %414, %416 : vector<16x512xf32>
    %418 = vector.shape_cast %417 : vector<16x512xf32> to vector<2x8x512xf32>
    %cst_141 = arith.constant 0.000000e+00 : f32
    %419 = vector.broadcast %cst_141 : f32 to vector<2x128xf32>
    %cst_142 = arith.constant 0.000000e+00 : f32
    %420 = vector.broadcast %cst_142 : f32 to vector<2x128xf32>
    %421 = vector.extract_strided_slice %418 {offsets = [0, 0, 0], sizes = [2, 1, 512], strides = [1, 1, 1]} : vector<2x8x512xf32> to vector<2x1x512xf32>
    %422 = vector.shape_cast %421 : vector<2x1x512xf32> to vector<2x512xf32>
    %423 = arith.truncf %419 : vector<2x128xf32> to vector<2x128xbf16>
    %c0_143 = arith.constant 0 : index
    %c0_144 = arith.constant 0 : index
    %424 = vector.load %arg30[%c0_143, %c0_144] : memref<128x512xbf16, #tpu.memory_space<vmem>>, vector<128x512xbf16>
    %cst_145 = arith.constant dense<0.000000e+00> : vector<2x512xf32>
    %425 = tpu.matmul %423, %424, %cst_145 {dimension_numbers = #tpu.dot_dimension_numbers<[1], [0], [0], [1], [0, 0, 1, 1], [], []>} : vector<2x128xbf16>, vector<128x512xbf16>, vector<2x512xf32> -> vector<2x512xf32>
    %426 = arith.addf %422, %425 : vector<2x512xf32>
    %427 = vector.extract_strided_slice %426 {offsets = [0, 0], sizes = [2, 384], strides = [1, 1]} : vector<2x512xf32> to vector<2x384xf32>
    %428 = arith.negf %427 : vector<2x384xf32>
    %429 = math.exp %428 : vector<2x384xf32>
    %cst_146 = arith.constant 1.000000e+00 : f32
    %430 = vector.broadcast %cst_146 : f32 to vector<2x384xf32>
    %431 = arith.addf %430, %429 : vector<2x384xf32>
    %432 = arith.divf %430, %431 : vector<2x384xf32>
    %433 = vector.extract_strided_slice %426 {offsets = [0, 384], sizes = [2, 128], strides = [1, 1]} : vector<2x512xf32> to vector<2x128xf32>
    %434 = math.tanh %433 : vector<2x128xf32>
    %435 = vector.extract_strided_slice %432 {offsets = [0, 128], sizes = [2, 128], strides = [1, 1]} : vector<2x384xf32> to vector<2x128xf32>
    %436 = arith.mulf %435, %420 : vector<2x128xf32>
    %437 = vector.extract_strided_slice %432 {offsets = [0, 0], sizes = [2, 128], strides = [1, 1]} : vector<2x384xf32> to vector<2x128xf32>
    %438 = arith.mulf %437, %434 : vector<2x128xf32>
    %439 = arith.addf %436, %438 : vector<2x128xf32>
    %440 = vector.extract_strided_slice %432 {offsets = [0, 256], sizes = [2, 128], strides = [1, 1]} : vector<2x384xf32> to vector<2x128xf32>
    %441 = math.tanh %439 : vector<2x128xf32>
    %442 = arith.mulf %440, %441 : vector<2x128xf32>
    %443 = vector.extract_strided_slice %418 {offsets = [0, 1, 0], sizes = [2, 1, 512], strides = [1, 1, 1]} : vector<2x8x512xf32> to vector<2x1x512xf32>
    %444 = vector.shape_cast %443 : vector<2x1x512xf32> to vector<2x512xf32>
    %445 = arith.truncf %442 : vector<2x128xf32> to vector<2x128xbf16>
    %c0_147 = arith.constant 0 : index
    %c0_148 = arith.constant 0 : index
    %446 = vector.load %arg30[%c0_147, %c0_148] : memref<128x512xbf16, #tpu.memory_space<vmem>>, vector<128x512xbf16>
    %cst_149 = arith.constant dense<0.000000e+00> : vector<2x512xf32>
    %447 = tpu.matmul %445, %446, %cst_149 {dimension_numbers = #tpu.dot_dimension_numbers<[1], [0], [0], [1], [0, 0, 1, 1], [], []>} : vector<2x128xbf16>, vector<128x512xbf16>, vector<2x512xf32> -> vector<2x512xf32>
    %448 = arith.addf %444, %447 : vector<2x512xf32>
    %449 = vector.extract_strided_slice %448 {offsets = [0, 0], sizes = [2, 384], strides = [1, 1]} : vector<2x512xf32> to vector<2x384xf32>
    %450 = arith.negf %449 : vector<2x384xf32>
    %451 = math.exp %450 : vector<2x384xf32>
    %cst_150 = arith.constant 1.000000e+00 : f32
    %452 = vector.broadcast %cst_150 : f32 to vector<2x384xf32>
    %453 = arith.addf %452, %451 : vector<2x384xf32>
    %454 = arith.divf %452, %453 : vector<2x384xf32>
    %455 = vector.extract_strided_slice %448 {offsets = [0, 384], sizes = [2, 128], strides = [1, 1]} : vector<2x512xf32> to vector<2x128xf32>
    %456 = math.tanh %455 : vector<2x128xf32>
    %457 = vector.extract_strided_slice %454 {offsets = [0, 128], sizes = [2, 128], strides = [1, 1]} : vector<2x384xf32> to vector<2x128xf32>
    %458 = arith.mulf %457, %439 : vector<2x128xf32>
    %459 = vector.extract_strided_slice %454 {offsets = [0, 0], sizes = [2, 128], strides = [1, 1]} : vector<2x384xf32> to vector<2x128xf32>
    %460 = arith.mulf %459, %456 : vector<2x128xf32>
    %461 = arith.addf %458, %460 : vector<2x128xf32>
    %462 = vector.extract_strided_slice %454 {offsets = [0, 256], sizes = [2, 128], strides = [1, 1]} : vector<2x384xf32> to vector<2x128xf32>
    %463 = math.tanh %461 : vector<2x128xf32>
    %464 = arith.mulf %462, %463 : vector<2x128xf32>
    %465 = vector.extract_strided_slice %418 {offsets = [0, 2, 0], sizes = [2, 1, 512], strides = [1, 1, 1]} : vector<2x8x512xf32> to vector<2x1x512xf32>
    %466 = vector.shape_cast %465 : vector<2x1x512xf32> to vector<2x512xf32>
    %467 = arith.truncf %464 : vector<2x128xf32> to vector<2x128xbf16>
    %c0_151 = arith.constant 0 : index
    %c0_152 = arith.constant 0 : index
    %468 = vector.load %arg30[%c0_151, %c0_152] : memref<128x512xbf16, #tpu.memory_space<vmem>>, vector<128x512xbf16>
    %cst_153 = arith.constant dense<0.000000e+00> : vector<2x512xf32>
    %469 = tpu.matmul %467, %468, %cst_153 {dimension_numbers = #tpu.dot_dimension_numbers<[1], [0], [0], [1], [0, 0, 1, 1], [], []>} : vector<2x128xbf16>, vector<128x512xbf16>, vector<2x512xf32> -> vector<2x512xf32>
    %470 = arith.addf %466, %469 : vector<2x512xf32>
    %471 = vector.extract_strided_slice %470 {offsets = [0, 0], sizes = [2, 384], strides = [1, 1]} : vector<2x512xf32> to vector<2x384xf32>
    %472 = arith.negf %471 : vector<2x384xf32>
    %473 = math.exp %472 : vector<2x384xf32>
    %cst_154 = arith.constant 1.000000e+00 : f32
    %474 = vector.broadcast %cst_154 : f32 to vector<2x384xf32>
    %475 = arith.addf %474, %473 : vector<2x384xf32>
    %476 = arith.divf %474, %475 : vector<2x384xf32>
    %477 = vector.extract_strided_slice %470 {offsets = [0, 384], sizes = [2, 128], strides = [1, 1]} : vector<2x512xf32> to vector<2x128xf32>
    %478 = math.tanh %477 : vector<2x128xf32>
    %479 = vector.extract_strided_slice %476 {offsets = [0, 128], sizes = [2, 128], strides = [1, 1]} : vector<2x384xf32> to vector<2x128xf32>
    %480 = arith.mulf %479, %461 : vector<2x128xf32>
    %481 = vector.extract_strided_slice %476 {offsets = [0, 0], sizes = [2, 128], strides = [1, 1]} : vector<2x384xf32> to vector<2x128xf32>
    %482 = arith.mulf %481, %478 : vector<2x128xf32>
    %483 = arith.addf %480, %482 : vector<2x128xf32>
    %484 = vector.extract_strided_slice %476 {offsets = [0, 256], sizes = [2, 128], strides = [1, 1]} : vector<2x384xf32> to vector<2x128xf32>
    %485 = math.tanh %483 : vector<2x128xf32>
    %486 = arith.mulf %484, %485 : vector<2x128xf32>
    %487 = vector.extract_strided_slice %418 {offsets = [0, 3, 0], sizes = [2, 1, 512], strides = [1, 1, 1]} : vector<2x8x512xf32> to vector<2x1x512xf32>
    %488 = vector.shape_cast %487 : vector<2x1x512xf32> to vector<2x512xf32>
    %489 = arith.truncf %486 : vector<2x128xf32> to vector<2x128xbf16>
    %c0_155 = arith.constant 0 : index
    %c0_156 = arith.constant 0 : index
    %490 = vector.load %arg30[%c0_155, %c0_156] : memref<128x512xbf16, #tpu.memory_space<vmem>>, vector<128x512xbf16>
    %cst_157 = arith.constant dense<0.000000e+00> : vector<2x512xf32>
    %491 = tpu.matmul %489, %490, %cst_157 {dimension_numbers = #tpu.dot_dimension_numbers<[1], [0], [0], [1], [0, 0, 1, 1], [], []>} : vector<2x128xbf16>, vector<128x512xbf16>, vector<2x512xf32> -> vector<2x512xf32>
    %492 = arith.addf %488, %491 : vector<2x512xf32>
    %493 = vector.extract_strided_slice %492 {offsets = [0, 0], sizes = [2, 384], strides = [1, 1]} : vector<2x512xf32> to vector<2x384xf32>
    %494 = arith.negf %493 : vector<2x384xf32>
    %495 = math.exp %494 : vector<2x384xf32>
    %cst_158 = arith.constant 1.000000e+00 : f32
    %496 = vector.broadcast %cst_158 : f32 to vector<2x384xf32>
    %497 = arith.addf %496, %495 : vector<2x384xf32>
    %498 = arith.divf %496, %497 : vector<2x384xf32>
    %499 = vector.extract_strided_slice %492 {offsets = [0, 384], sizes = [2, 128], strides = [1, 1]} : vector<2x512xf32> to vector<2x128xf32>
    %500 = math.tanh %499 : vector<2x128xf32>
    %501 = vector.extract_strided_slice %498 {offsets = [0, 128], sizes = [2, 128], strides = [1, 1]} : vector<2x384xf32> to vector<2x128xf32>
    %502 = arith.mulf %501, %483 : vector<2x128xf32>
    %503 = vector.extract_strided_slice %498 {offsets = [0, 0], sizes = [2, 128], strides = [1, 1]} : vector<2x384xf32> to vector<2x128xf32>
    %504 = arith.mulf %503, %500 : vector<2x128xf32>
    %505 = arith.addf %502, %504 : vector<2x128xf32>
    %506 = vector.extract_strided_slice %498 {offsets = [0, 256], sizes = [2, 128], strides = [1, 1]} : vector<2x384xf32> to vector<2x128xf32>
    %507 = math.tanh %505 : vector<2x128xf32>
    %508 = arith.mulf %506, %507 : vector<2x128xf32>
    %509 = vector.extract_strided_slice %418 {offsets = [0, 4, 0], sizes = [2, 1, 512], strides = [1, 1, 1]} : vector<2x8x512xf32> to vector<2x1x512xf32>
    %510 = vector.shape_cast %509 : vector<2x1x512xf32> to vector<2x512xf32>
    %511 = arith.truncf %508 : vector<2x128xf32> to vector<2x128xbf16>
    %c0_159 = arith.constant 0 : index
    %c0_160 = arith.constant 0 : index
    %512 = vector.load %arg30[%c0_159, %c0_160] : memref<128x512xbf16, #tpu.memory_space<vmem>>, vector<128x512xbf16>
    %cst_161 = arith.constant dense<0.000000e+00> : vector<2x512xf32>
    %513 = tpu.matmul %511, %512, %cst_161 {dimension_numbers = #tpu.dot_dimension_numbers<[1], [0], [0], [1], [0, 0, 1, 1], [], []>} : vector<2x128xbf16>, vector<128x512xbf16>, vector<2x512xf32> -> vector<2x512xf32>
    %514 = arith.addf %510, %513 : vector<2x512xf32>
    %515 = vector.extract_strided_slice %514 {offsets = [0, 0], sizes = [2, 384], strides = [1, 1]} : vector<2x512xf32> to vector<2x384xf32>
    %516 = arith.negf %515 : vector<2x384xf32>
    %517 = math.exp %516 : vector<2x384xf32>
    %cst_162 = arith.constant 1.000000e+00 : f32
    %518 = vector.broadcast %cst_162 : f32 to vector<2x384xf32>
    %519 = arith.addf %518, %517 : vector<2x384xf32>
    %520 = arith.divf %518, %519 : vector<2x384xf32>
    %521 = vector.extract_strided_slice %514 {offsets = [0, 384], sizes = [2, 128], strides = [1, 1]} : vector<2x512xf32> to vector<2x128xf32>
    %522 = math.tanh %521 : vector<2x128xf32>
    %523 = vector.extract_strided_slice %520 {offsets = [0, 128], sizes = [2, 128], strides = [1, 1]} : vector<2x384xf32> to vector<2x128xf32>
    %524 = arith.mulf %523, %505 : vector<2x128xf32>
    %525 = vector.extract_strided_slice %520 {offsets = [0, 0], sizes = [2, 128], strides = [1, 1]} : vector<2x384xf32> to vector<2x128xf32>
    %526 = arith.mulf %525, %522 : vector<2x128xf32>
    %527 = arith.addf %524, %526 : vector<2x128xf32>
    %528 = vector.extract_strided_slice %520 {offsets = [0, 256], sizes = [2, 128], strides = [1, 1]} : vector<2x384xf32> to vector<2x128xf32>
    %529 = math.tanh %527 : vector<2x128xf32>
    %530 = arith.mulf %528, %529 : vector<2x128xf32>
    %531 = vector.extract_strided_slice %418 {offsets = [0, 5, 0], sizes = [2, 1, 512], strides = [1, 1, 1]} : vector<2x8x512xf32> to vector<2x1x512xf32>
    %532 = vector.shape_cast %531 : vector<2x1x512xf32> to vector<2x512xf32>
    %533 = arith.truncf %530 : vector<2x128xf32> to vector<2x128xbf16>
    %c0_163 = arith.constant 0 : index
    %c0_164 = arith.constant 0 : index
    %534 = vector.load %arg30[%c0_163, %c0_164] : memref<128x512xbf16, #tpu.memory_space<vmem>>, vector<128x512xbf16>
    %cst_165 = arith.constant dense<0.000000e+00> : vector<2x512xf32>
    %535 = tpu.matmul %533, %534, %cst_165 {dimension_numbers = #tpu.dot_dimension_numbers<[1], [0], [0], [1], [0, 0, 1, 1], [], []>} : vector<2x128xbf16>, vector<128x512xbf16>, vector<2x512xf32> -> vector<2x512xf32>
    %536 = arith.addf %532, %535 : vector<2x512xf32>
    %537 = vector.extract_strided_slice %536 {offsets = [0, 0], sizes = [2, 384], strides = [1, 1]} : vector<2x512xf32> to vector<2x384xf32>
    %538 = arith.negf %537 : vector<2x384xf32>
    %539 = math.exp %538 : vector<2x384xf32>
    %cst_166 = arith.constant 1.000000e+00 : f32
    %540 = vector.broadcast %cst_166 : f32 to vector<2x384xf32>
    %541 = arith.addf %540, %539 : vector<2x384xf32>
    %542 = arith.divf %540, %541 : vector<2x384xf32>
    %543 = vector.extract_strided_slice %536 {offsets = [0, 384], sizes = [2, 128], strides = [1, 1]} : vector<2x512xf32> to vector<2x128xf32>
    %544 = math.tanh %543 : vector<2x128xf32>
    %545 = vector.extract_strided_slice %542 {offsets = [0, 128], sizes = [2, 128], strides = [1, 1]} : vector<2x384xf32> to vector<2x128xf32>
    %546 = arith.mulf %545, %527 : vector<2x128xf32>
    %547 = vector.extract_strided_slice %542 {offsets = [0, 0], sizes = [2, 128], strides = [1, 1]} : vector<2x384xf32> to vector<2x128xf32>
    %548 = arith.mulf %547, %544 : vector<2x128xf32>
    %549 = arith.addf %546, %548 : vector<2x128xf32>
    %550 = vector.extract_strided_slice %542 {offsets = [0, 256], sizes = [2, 128], strides = [1, 1]} : vector<2x384xf32> to vector<2x128xf32>
    %551 = math.tanh %549 : vector<2x128xf32>
    %552 = arith.mulf %550, %551 : vector<2x128xf32>
    %553 = vector.extract_strided_slice %418 {offsets = [0, 6, 0], sizes = [2, 1, 512], strides = [1, 1, 1]} : vector<2x8x512xf32> to vector<2x1x512xf32>
    %554 = vector.shape_cast %553 : vector<2x1x512xf32> to vector<2x512xf32>
    %555 = arith.truncf %552 : vector<2x128xf32> to vector<2x128xbf16>
    %c0_167 = arith.constant 0 : index
    %c0_168 = arith.constant 0 : index
    %556 = vector.load %arg30[%c0_167, %c0_168] : memref<128x512xbf16, #tpu.memory_space<vmem>>, vector<128x512xbf16>
    %cst_169 = arith.constant dense<0.000000e+00> : vector<2x512xf32>
    %557 = tpu.matmul %555, %556, %cst_169 {dimension_numbers = #tpu.dot_dimension_numbers<[1], [0], [0], [1], [0, 0, 1, 1], [], []>} : vector<2x128xbf16>, vector<128x512xbf16>, vector<2x512xf32> -> vector<2x512xf32>
    %558 = arith.addf %554, %557 : vector<2x512xf32>
    %559 = vector.extract_strided_slice %558 {offsets = [0, 0], sizes = [2, 384], strides = [1, 1]} : vector<2x512xf32> to vector<2x384xf32>
    %560 = arith.negf %559 : vector<2x384xf32>
    %561 = math.exp %560 : vector<2x384xf32>
    %cst_170 = arith.constant 1.000000e+00 : f32
    %562 = vector.broadcast %cst_170 : f32 to vector<2x384xf32>
    %563 = arith.addf %562, %561 : vector<2x384xf32>
    %564 = arith.divf %562, %563 : vector<2x384xf32>
    %565 = vector.extract_strided_slice %558 {offsets = [0, 384], sizes = [2, 128], strides = [1, 1]} : vector<2x512xf32> to vector<2x128xf32>
    %566 = math.tanh %565 : vector<2x128xf32>
    %567 = vector.extract_strided_slice %564 {offsets = [0, 128], sizes = [2, 128], strides = [1, 1]} : vector<2x384xf32> to vector<2x128xf32>
    %568 = arith.mulf %567, %549 : vector<2x128xf32>
    %569 = vector.extract_strided_slice %564 {offsets = [0, 0], sizes = [2, 128], strides = [1, 1]} : vector<2x384xf32> to vector<2x128xf32>
    %570 = arith.mulf %569, %566 : vector<2x128xf32>
    %571 = arith.addf %568, %570 : vector<2x128xf32>
    %572 = vector.extract_strided_slice %564 {offsets = [0, 256], sizes = [2, 128], strides = [1, 1]} : vector<2x384xf32> to vector<2x128xf32>
    %573 = math.tanh %571 : vector<2x128xf32>
    %574 = arith.mulf %572, %573 : vector<2x128xf32>
    %575 = vector.extract_strided_slice %418 {offsets = [0, 7, 0], sizes = [2, 1, 512], strides = [1, 1, 1]} : vector<2x8x512xf32> to vector<2x1x512xf32>
    %576 = vector.shape_cast %575 : vector<2x1x512xf32> to vector<2x512xf32>
    %577 = arith.truncf %574 : vector<2x128xf32> to vector<2x128xbf16>
    %c0_171 = arith.constant 0 : index
    %c0_172 = arith.constant 0 : index
    %578 = vector.load %arg30[%c0_171, %c0_172] : memref<128x512xbf16, #tpu.memory_space<vmem>>, vector<128x512xbf16>
    %cst_173 = arith.constant dense<0.000000e+00> : vector<2x512xf32>
    %579 = tpu.matmul %577, %578, %cst_173 {dimension_numbers = #tpu.dot_dimension_numbers<[1], [0], [0], [1], [0, 0, 1, 1], [], []>} : vector<2x128xbf16>, vector<128x512xbf16>, vector<2x512xf32> -> vector<2x512xf32>
    %580 = arith.addf %576, %579 : vector<2x512xf32>
    %581 = vector.extract_strided_slice %580 {offsets = [0, 0], sizes = [2, 384], strides = [1, 1]} : vector<2x512xf32> to vector<2x384xf32>
    %582 = arith.negf %581 : vector<2x384xf32>
    %583 = math.exp %582 : vector<2x384xf32>
    %cst_174 = arith.constant 1.000000e+00 : f32
    %584 = vector.broadcast %cst_174 : f32 to vector<2x384xf32>
    %585 = arith.addf %584, %583 : vector<2x384xf32>
    %586 = arith.divf %584, %585 : vector<2x384xf32>
    %587 = vector.extract_strided_slice %580 {offsets = [0, 384], sizes = [2, 128], strides = [1, 1]} : vector<2x512xf32> to vector<2x128xf32>
    %588 = math.tanh %587 : vector<2x128xf32>
    %589 = vector.extract_strided_slice %586 {offsets = [0, 128], sizes = [2, 128], strides = [1, 1]} : vector<2x384xf32> to vector<2x128xf32>
    %590 = arith.mulf %589, %571 : vector<2x128xf32>
    %591 = vector.extract_strided_slice %586 {offsets = [0, 0], sizes = [2, 128], strides = [1, 1]} : vector<2x384xf32> to vector<2x128xf32>
    %592 = arith.mulf %591, %588 : vector<2x128xf32>
    %593 = arith.addf %590, %592 : vector<2x128xf32>
    %594 = vector.extract_strided_slice %586 {offsets = [0, 256], sizes = [2, 128], strides = [1, 1]} : vector<2x384xf32> to vector<2x128xf32>
    %595 = math.tanh %593 : vector<2x128xf32>
    %596 = arith.mulf %594, %595 : vector<2x128xf32>
    %597 = vector.shape_cast %411 : vector<16x64xf32> to vector<2x8x64xf32>
    %598 = vector.extract_strided_slice %597 {offsets = [0, 7, 0], sizes = [2, 1, 64], strides = [1, 1, 1]} : vector<2x8x64xf32> to vector<2x1x64xf32>
    %599 = vector.shape_cast %598 : vector<2x1x64xf32> to vector<2x64xf32>
    %600 = arith.truncf %599 : vector<2x64xf32> to vector<2x64xbf16>
    %c0_175 = arith.constant 0 : index
    %c0_176 = arith.constant 0 : index
    %601 = vector.load %arg32[%c0_175, %c0_176] : memref<64x512xbf16, #tpu.memory_space<vmem>>, vector<64x512xbf16>
    %cst_177 = arith.constant dense<0.000000e+00> : vector<2x512xf32>
    %602 = tpu.matmul %600, %601, %cst_177 {dimension_numbers = #tpu.dot_dimension_numbers<[1], [0], [0], [1], [0, 0, 1, 1], [], []>} : vector<2x64xbf16>, vector<64x512xbf16>, vector<2x512xf32> -> vector<2x512xf32>
    %c0_178 = arith.constant 0 : index
    %c0_179 = arith.constant 0 : index
    %603 = vector.load %arg33[%c0_178, %c0_179] : memref<1x512xf32, #tpu.memory_space<vmem>>, vector<1x512xf32>
    %604 = vector.broadcast %603 : vector<1x512xf32> to vector<2x512xf32>
    %605 = arith.addf %602, %604 : vector<2x512xf32>
    %606 = vector.extract_strided_slice %605 {offsets = [0, 0], sizes = [2, 384], strides = [1, 1]} : vector<2x512xf32> to vector<2x384xf32>
    %607 = arith.negf %606 : vector<2x384xf32>
    %608 = math.exp %607 : vector<2x384xf32>
    %cst_180 = arith.constant 1.000000e+00 : f32
    %609 = vector.broadcast %cst_180 : f32 to vector<2x384xf32>
    %610 = arith.addf %609, %608 : vector<2x384xf32>
    %611 = arith.divf %609, %610 : vector<2x384xf32>
    %612 = vector.extract_strided_slice %605 {offsets = [0, 384], sizes = [2, 128], strides = [1, 1]} : vector<2x512xf32> to vector<2x128xf32>
    %613 = math.tanh %612 : vector<2x128xf32>
    %614 = vector.extract_strided_slice %611 {offsets = [0, 256], sizes = [2, 128], strides = [1, 1]} : vector<2x384xf32> to vector<2x128xf32>
    %615 = vector.extract_strided_slice %611 {offsets = [0, 0], sizes = [2, 128], strides = [1, 1]} : vector<2x384xf32> to vector<2x128xf32>
    %616 = arith.mulf %615, %613 : vector<2x128xf32>
    %617 = math.tanh %616 : vector<2x128xf32>
    %618 = arith.mulf %614, %617 : vector<2x128xf32>
    %c0_181 = arith.constant 0 : index
    %c0_182 = arith.constant 0 : index
    %619 = vector.load %arg34[%c0_181, %c0_182] : memref<128x1xf32, #tpu.memory_space<vmem>>, vector<128x1xf32>
    %cst_183 = arith.constant dense<0.000000e+00> : vector<2x1xf32>
    %620 = tpu.matmul %596, %619, %cst_183 {dimension_numbers = #tpu.dot_dimension_numbers<[1], [0], [0], [1], [0, 0, 1, 1], [], []>} : vector<2x128xf32>, vector<128x1xf32>, vector<2x1xf32> -> vector<2x1xf32>
    %c0_184 = arith.constant 0 : index
    %c0_185 = arith.constant 0 : index
    %621 = vector.load %arg35[%c0_184, %c0_185] : memref<128x1xf32, #tpu.memory_space<vmem>>, vector<128x1xf32>
    %cst_186 = arith.constant dense<0.000000e+00> : vector<2x1xf32>
    %622 = tpu.matmul %618, %621, %cst_186 {dimension_numbers = #tpu.dot_dimension_numbers<[1], [0], [0], [1], [0, 0, 1, 1], [], []>} : vector<2x128xf32>, vector<128x1xf32>, vector<2x1xf32> -> vector<2x1xf32>
    %623 = arith.addf %620, %622 : vector<2x1xf32>
    %c0_187 = arith.constant 0 : index
    %c0_188 = arith.constant 0 : index
    %624 = vector.load %arg36[%c0_187, %c0_188] : memref<1x1xf32, #tpu.memory_space<vmem>>, vector<1x1xf32>
    %625 = vector.broadcast %624 : vector<1x1xf32> to vector<2x1xf32>
    %626 = arith.addf %623, %625 : vector<2x1xf32>
    %c0_189 = arith.constant 0 : index
    %c0_190 = arith.constant 0 : index
    %627 = vector.load %arg37[%c0_189, %c0_190] : memref<2x1xf32, #tpu.memory_space<vmem>>, vector<2x1xf32>
    tpu.vector_store %arg37[%c0_189, %c0_190], %626 {strides = array<i32>} : memref<2x1xf32, #tpu.memory_space<vmem>>, vector<2x1xf32>,
    return
  }
  func.func @transform_0(%arg0: i32) -> (i32, i32) {
    %c0_i32 = arith.constant 0 : i32
    %c0_i32_0 = arith.constant 0 : i32
    %c0_i32_1 = arith.constant 0 : i32
    return %c0_i32, %c0_i32_0 : i32, i32
  }
  func.func @transform_1(%arg0: i32) -> (i32, i32, i32) {
    %c0_i32 = arith.constant 0 : i32
    %c0_i32_0 = arith.constant 0 : i32
    %c0_i32_1 = arith.constant 0 : i32
    %c0_i32_2 = arith.constant 0 : i32
    return %c0_i32, %c0_i32_0, %c0_i32_1 : i32, i32, i32
  }
  func.func @transform_2(%arg0: i32) -> (i32, i32) {
    %c0_i32 = arith.constant 0 : i32
    %c0_i32_0 = arith.constant 0 : i32
    %c0_i32_1 = arith.constant 0 : i32
    return %c0_i32, %c0_i32_0 : i32, i32
  }
  func.func @transform_3(%arg0: i32) -> (i32, i32) {
    %c0_i32 = arith.constant 0 : i32
    %c0_i32_0 = arith.constant 0 : i32
    %c0_i32_1 = arith.constant 0 : i32
    return %c0_i32, %c0_i32_0 : i32, i32
  }
  func.func @transform_4(%arg0: i32) -> (i32, i32) {
    %c0_i32 = arith.constant 0 : i32
    %c0_i32_0 = arith.constant 0 : i32
    %c0_i32_1 = arith.constant 0 : i32
    return %c0_i32, %c0_i32_0 : i32, i32
  }
  func.func @transform_5(%arg0: i32) -> (i32, i32) {
    %c0_i32 = arith.constant 0 : i32
    %c0_i32_0 = arith.constant 0 : i32
    %c0_i32_1 = arith.constant 0 : i32
    return %c0_i32, %c0_i32_0 : i32, i32
  }
  func.func @transform_6(%arg0: i32) -> (i32, i32) {
    %c0_i32 = arith.constant 0 : i32
    %c0_i32_0 = arith.constant 0 : i32
    %c0_i32_1 = arith.constant 0 : i32
    return %c0_i32, %c0_i32_0 : i32, i32
  }
  func.func @transform_7(%arg0: i32) -> (i32, i32) {
    %c0_i32 = arith.constant 0 : i32
    %c0_i32_0 = arith.constant 0 : i32
    %c0_i32_1 = arith.constant 0 : i32
    return %c0_i32, %c0_i32_0 : i32, i32
  }
  func.func @transform_8(%arg0: i32) -> (i32, i32) {
    %c0_i32 = arith.constant 0 : i32
    %c0_i32_0 = arith.constant 0 : i32
    %c0_i32_1 = arith.constant 0 : i32
    return %c0_i32, %c0_i32_0 : i32, i32
  }
  func.func @transform_9(%arg0: i32) -> (i32, i32) {
    %c0_i32 = arith.constant 0 : i32
    %c0_i32_0 = arith.constant 0 : i32
    %c0_i32_1 = arith.constant 0 : i32
    return %c0_i32, %c0_i32_0 : i32, i32
  }
  func.func @transform_10(%arg0: i32) -> (i32, i32) {
    %c0_i32 = arith.constant 0 : i32
    %c0_i32_0 = arith.constant 0 : i32
    %c0_i32_1 = arith.constant 0 : i32
    return %c0_i32, %c0_i32_0 : i32, i32
  }
  func.func @transform_11(%arg0: i32) -> (i32, i32) {
    %c0_i32 = arith.constant 0 : i32
    %c0_i32_0 = arith.constant 0 : i32
    %c0_i32_1 = arith.constant 0 : i32
    return %c0_i32, %c0_i32_0 : i32, i32
  }
  func.func @transform_12(%arg0: i32) -> (i32, i32) {
    %c0_i32 = arith.constant 0 : i32
    %c0_i32_0 = arith.constant 0 : i32
    %c0_i32_1 = arith.constant 0 : i32
    return %c0_i32, %c0_i32_0 : i32, i32
  }
  func.func @transform_13(%arg0: i32) -> (i32, i32) {
    %c0_i32 = arith.constant 0 : i32
    %c0_i32_0 = arith.constant 0 : i32
    %c0_i32_1 = arith.constant 0 : i32
    return %c0_i32, %c0_i32_0 : i32, i32
  }
  func.func @transform_14(%arg0: i32) -> (i32, i32) {
    %c0_i32 = arith.constant 0 : i32
    %c0_i32_0 = arith.constant 0 : i32
    %c0_i32_1 = arith.constant 0 : i32
    return %c0_i32, %c0_i32_0 : i32, i32
  }
  func.func @transform_15(%arg0: i32) -> (i32, i32) {
    %c0_i32 = arith.constant 0 : i32
    %c0_i32_0 = arith.constant 0 : i32
    %c0_i32_1 = arith.constant 0 : i32
    return %c0_i32, %c0_i32_0 : i32, i32
  }
  func.func @transform_16(%arg0: i32) -> (i32, i32) {
    %c0_i32 = arith.constant 0 : i32
    %c0_i32_0 = arith.constant 0 : i32
    %c0_i32_1 = arith.constant 0 : i32
    return %c0_i32, %c0_i32_0 : i32, i32
  }
  func.func @transform_17(%arg0: i32) -> (i32, i32) {
    %c0_i32 = arith.constant 0 : i32
    %c0_i32_0 = arith.constant 0 : i32
    %c0_i32_1 = arith.constant 0 : i32
    return %c0_i32, %c0_i32_0 : i32, i32
  }
  func.func @transform_18(%arg0: i32) -> (i32, i32) {
    %c0_i32 = arith.constant 0 : i32
    %c0_i32_0 = arith.constant 0 : i32
    %c0_i32_1 = arith.constant 0 : i32
    return %c0_i32, %c0_i32_0 : i32, i32
  }
  func.func @transform_19(%arg0: i32) -> (i32, i32) {
    %c0_i32 = arith.constant 0 : i32
    %c0_i32_0 = arith.constant 0 : i32
    %c0_i32_1 = arith.constant 0 : i32
    return %c0_i32, %c0_i32_0 : i32, i32
  }
  func.func @transform_20(%arg0: i32) -> (i32, i32) {
    %c0_i32 = arith.constant 0 : i32
    %c0_i32_0 = arith.constant 0 : i32
    %c0_i32_1 = arith.constant 0 : i32
    return %c0_i32, %c0_i32_0 : i32, i32
  }
  func.func @transform_21(%arg0: i32) -> (i32, i32) {
    %c0_i32 = arith.constant 0 : i32
    %c0_i32_0 = arith.constant 0 : i32
    %c0_i32_1 = arith.constant 0 : i32
    return %c0_i32, %c0_i32_0 : i32, i32
  }
  func.func @transform_22(%arg0: i32) -> (i32, i32) {
    %c0_i32 = arith.constant 0 : i32
    %c0_i32_0 = arith.constant 0 : i32
    %c0_i32_1 = arith.constant 0 : i32
    return %c0_i32, %c0_i32_0 : i32, i32
  }
  func.func @transform_23(%arg0: i32) -> (i32, i32) {
    %c0_i32 = arith.constant 0 : i32
    %c0_i32_0 = arith.constant 0 : i32
    %c0_i32_1 = arith.constant 0 : i32
    return %c0_i32, %c0_i32_0 : i32, i32
  }
  func.func @transform_24(%arg0: i32) -> (i32, i32) {
    %c0_i32 = arith.constant 0 : i32
    %c0_i32_0 = arith.constant 0 : i32
    %c0_i32_1 = arith.constant 0 : i32
    return %c0_i32, %c0_i32_0 : i32, i32
  }
  func.func @transform_25(%arg0: i32) -> (i32, i32) {
    %c0_i32 = arith.constant 0 : i32
    %c0_i32_0 = arith.constant 0 : i32
    %c0_i32_1 = arith.constant 0 : i32
    return %c0_i32, %c0_i32_0 : i32, i32
  }
  func.func @transform_26(%arg0: i32) -> (i32, i32) {
    %c0_i32 = arith.constant 0 : i32
    %c0_i32_0 = arith.constant 0 : i32
    %c0_i32_1 = arith.constant 0 : i32
    return %c0_i32, %c0_i32_0 : i32, i32
  }
  func.func @transform_27(%arg0: i32) -> (i32, i32) {
    %c0_i32 = arith.constant 0 : i32
    %c0_i32_0 = arith.constant 0 : i32
    %c0_i32_1 = arith.constant 0 : i32
    return %c0_i32, %c0_i32_0 : i32, i32
  }
  func.func @transform_28(%arg0: i32) -> (i32, i32) {
    %c0_i32 = arith.constant 0 : i32
    %c0_i32_0 = arith.constant 0 : i32
    %c0_i32_1 = arith.constant 0 : i32
    return %c0_i32, %c0_i32_0 : i32, i32
  }
  func.func @transform_29(%arg0: i32) -> (i32, i32) {
    %c0_i32 = arith.constant 0 : i32
    %c0_i32_0 = arith.constant 0 : i32
    %c0_i32_1 = arith.constant 0 : i32
    return %c0_i32, %c0_i32_0 : i32, i32
  }
  func.func @transform_30(%arg0: i32) -> (i32, i32) {
    %c0_i32 = arith.constant 0 : i32
    %c0_i32_0 = arith.constant 0 : i32
    %c0_i32_1 = arith.constant 0 : i32
    return %c0_i32, %c0_i32_0 : i32, i32
  }
  func.func @transform_31(%arg0: i32) -> (i32, i32) {
    %c0_i32 = arith.constant 0 : i32
    %c0_i32_0 = arith.constant 0 : i32
    %c0_i32_1 = arith.constant 0 : i32
    return %c0_i32, %c0_i32_0 : i32, i32
  }
  func.func @transform_32(%arg0: i32) -> (i32, i32) {
    %c0_i32 = arith.constant 0 : i32
    %c0_i32_0 = arith.constant 0 : i32
    %c0_i32_1 = arith.constant 0 : i32
    return %c0_i32, %c0_i32_0 : i32, i32
  }
  func.func @transform_33(%arg0: i32) -> (i32, i32) {
    %c0_i32 = arith.constant 0 : i32
    %c0_i32_0 = arith.constant 0 : i32
    %c0_i32_1 = arith.constant 0 : i32
    return %c0_i32, %c0_i32_0 : i32, i32
  }
  func.func @transform_34(%arg0: i32) -> (i32, i32) {
    %c0_i32 = arith.constant 0 : i32
    %c0_i32_0 = arith.constant 0 : i32
    %c0_i32_1 = arith.constant 0 : i32
    return %c0_i32, %c0_i32_0 : i32, i32
  }
  func.func @transform_35(%arg0: i32) -> (i32, i32) {
    %c0_i32 = arith.constant 0 : i32
    %c0_i32_0 = arith.constant 0 : i32
    %c0_i32_1 = arith.constant 0 : i32
    return %c0_i32, %c0_i32_0 : i32, i32
  }
  func.func @transform_36(%arg0: i32) -> (i32, i32) {
    %c0_i32 = arith.constant 0 : i32
    %c0_i32_0 = arith.constant 0 : i32
    %c0_i32_1 = arith.constant 0 : i32
    return %c0_i32, %c0_i32_0 : i32, i32
  }
}

</mosaic_0001>

<bundles_post_ra>
// kernel: tpu_custom_call.1
= control target key start
LH: loop header
LB: loop body
LE: loop exit
PB: predicated region body
PF: predicated region fallthrough
CT: control target
= control target key end

     0   :  { %s6199_s6 = smov 1   ;;  %s6200_s10 = smov 2   ;;  %s8196_s0 = inlined_call_operand.smem [shape: u32[37], index: -1, kind: input, shape index: {}] }
   0x1   :  { %s6272_s5 = sld [smem:[%s8196_s0]]   ;;  %s6201_s14 = smov 3  }
   0x2   :  { %s6277_s9 = sld [smem:[%s8196_s0 + %s6199_s6]]   ;;  %s6202_s18 = smov 4  }
   0x3   :  { %s6282_s13 = sld [smem:[%s8196_s0 + %s6200_s10]]   ;;  %s6203_s22 = smov 5  }
   0x4   :  { %s6287_s17 = sld [smem:[%s8196_s0 + %s6201_s14]]   ;;  %s6204_s26 = smov 6  }
   0x5   :  { %s6292_s21 = sld [smem:[%s8196_s0 + %s6202_s18]]   ;;  %s6205_s30 = smov 7  }
   0x6   :  { %s6297_s25 = sld [smem:[%s8196_s0 + %s6203_s22]]   ;;  %s6206_s4 = smov 8  }
   0x7   :  { %s6302_s29 = sld [smem:[%s8196_s0 + %s6204_s26]]   ;;  %s6207_s10 = smov 9  }
   0x8   :  { %s6307_s3 = sld [smem:[%s8196_s0 + %s6205_s30]]   ;;  %s6208_s15 = smov 10  }
   0x9   :  { %s6312_s8 = sld [smem:[%s8196_s0 + %s6206_s4]]   ;;  %s6209_s20 = smov 11  }
   0xa   :  { %s6317_s14 = sld [smem:[%s8196_s0 + %s6207_s10]]   ;;  %s6210_s26 = smov 12  }
   0xb   :  { %s6322_s19 = sld [smem:[%s8196_s0 + %s6208_s15]]   ;;  %s6211_s1 = smov 13  }
   0xc   :  { %s6327_s24 = sld [smem:[%s8196_s0 + %s6209_s20]]   ;;  %s6212_s7 = smov 14  }
   0xd   :  { %8235 = sst [smem:[#allocation34_spill]] %s6302_s29  ;;  %s6213_s15 = smov 15  }
   0xe   :  { %s6332_s30 = sld [smem:[%s8196_s0 + %s6210_s26]]   ;;  %s6214_s22 = smov 16  }
   0xf   :  { %s6337_s6 = sld [smem:[%s8196_s0 + %s6211_s1]]   ;;  %s6215_s28 = smov 17  }
  0x10   :  { %s6342_s12 = sld [smem:[%s8196_s0 + %s6212_s7]]   ;;  %s6216_s7 = smov 18  }
  0x11   :  { %s6347_s20 = sld [smem:[%s8196_s0 + %s6213_s15]]   ;;  %s6217_s15 = smov 19  }
  0x12   :  { %s6352_s27 = sld [smem:[%s8196_s0 + %s6214_s22]]   ;;  %s6218_s22 = smov 20  }
  0x13   :  { %s6357_s4 = sld [smem:[%s8196_s0 + %s6215_s28]]   ;;  %s6219_s28 = smov 21  }
  0x14   :  { %8236 = sst [smem:[#allocation35_spill]] %s6332_s30  ;;  %s6234_s23 = smov 36  }
  0x15   :  { %8237 = sst [smem:[#allocation36_spill]] %s6337_s6 }
  0x16   :  { %8238 = sst [smem:[#allocation37_spill]] %s6342_s12 }
  0x17   :  { %8239 = sst [smem:[#allocation38_spill]] %s6347_s20 }
  0x18   :  { %s6362_s12 = sld [smem:[%s8196_s0 + %s6216_s7]]   ;;  %s6220_s7 = smov 22  }
  0x19   :  { %8240 = sst [smem:[#allocation39_spill]] %s6357_s4 }
  0x1a   :  { %s6367_s20 = sld [smem:[%s8196_s0 + %s6217_s15]]   ;;  %s6221_s15 = smov 23  }
  0x1b   :  { %s6372_s6 = sld [smem:[%s8196_s0 + %s6218_s22]]   ;;  %s6222_s22 = smov 24  }
  0x1c   :  { %s6377_s4 = sld [smem:[%s8196_s0 + %s6219_s28]]   ;;  %s6223_s28 = smov 25  }
  0x1d   :  { %s6382_s30 = sld [smem:[%s8196_s0 + %s6220_s7]]   ;;  %s6224_s7 = smov 26  }
  0x1e   :  { %s6402_s29 = sld [smem:[%s8196_s0 + %s6224_s7]]   ;;  %s6228_s7 = smov 30  }
  0x20   :  { %8241 = sst [smem:[#allocation40_spill]] %s6367_s20 }
  0x21   :  { %8242 = sst [smem:[#allocation41_spill]] %s6372_s6 }
  0x22   :  { %8243 = sst [smem:[#allocation42_spill]] %s6377_s4 }
  0x23   :  { %s6387_s20 = sld [smem:[%s8196_s0 + %s6221_s15]]   ;;  %s6225_s15 = smov 27  }
  0x24   :  { %s6392_s6 = sld [smem:[%s8196_s0 + %s6222_s22]]   ;;  %s6226_s22 = smov 28  }
  0x25   :  { %s6397_s4 = sld [smem:[%s8196_s0 + %s6223_s28]]   ;;  %s6227_s28 = smov 29  }
  0x26   :  { %8247 = sst [smem:[#allocation46_spill]] %s6402_s29 }
  0x27   :  { %s6422_s29 = sld [smem:[%s8196_s0 + %s6228_s7]]   ;;  %s6232_s7 = smov 34  }
  0x29   :  { %8244 = sst [smem:[#allocation43_spill]] %s6387_s20 }
  0x2a   :  { %8245 = sst [smem:[#allocation44_spill]] %s6392_s6 }
  0x2b   :  { %8246 = sst [smem:[#allocation45_spill]] %s6397_s4 }
  0x2c   :  { %s6407_s20 = sld [smem:[%s8196_s0 + %s6225_s15]]   ;;  %s6229_s15 = smov 31  }
  0x2d   :  { %s6412_s6 = sld [smem:[%s8196_s0 + %s6226_s22]]   ;;  %s6230_s22 = smov 32  }
  0x2e   :  { %s6417_s4 = sld [smem:[%s8196_s0 + %s6227_s28]]   ;;  %s6231_s28 = smov 33  }
  0x2f   :  { %8251 = sst [smem:[#allocation50_spill]] %s6422_s29 }
  0x30   :  { %s6442_s29 = sld [smem:[%s8196_s0 + %s6232_s7]]  }
  0x32   :  { %8248 = sst [smem:[#allocation47_spill]] %s6407_s20 }
  0x33   :  { %8249 = sst [smem:[#allocation48_spill]] %s6412_s6 }
  0x34   :  { %8250 = sst [smem:[#allocation49_spill]] %s6417_s4 }
  0x35   :  { %s6427_s20 = sld [smem:[%s8196_s0 + %s6229_s15]]   ;;  %s6233_s15 = smov 35  }
  0x36   :  { %s6432_s6 = sld [smem:[%s8196_s0 + %s6230_s22]]  }
  0x37   :  { %s6437_s4 = sld [smem:[%s8196_s0 + %s6231_s28]]  }
  0x3b   :  { %8252 = sst [smem:[#allocation51_spill]] %s6427_s20 }
  0x3c   :  { %8253 = sst [smem:[#allocation52_spill]] %s6432_s6 }
  0x3d   :  { %s4706_s20 = sld [smem:[%s8196_s0 + %s6233_s15]]  }
  0x3e   :  { %s6450_s6 = sld [smem:[%s8196_s0 + %s6234_s23]]  }
  0x43   :  { %v78_v0 = vstv %s4706_s20 }
  0x44   :  { %79 = vst [vmem:[#allocation2] sm:$0x1] %v78_v0 }
  0x45   :  { %80 = vsyncpa [#allocation4], 0 }
  0x46   :  { %81 = vsyncpa [#allocation6], 0 }
  0x47   :  { %82 = vsyncpa [#allocation9], 0 }
  0x48   :  { %83 = vsyncpa [#allocation12], 0 }
  0x49   :  { %84 = vsyncpa [#allocation15], 0 }
  0x4a   :  { %85 = vsyncpa [#allocation18], 0 }
  0x4b   :  { %86 = vsyncpa [#allocation21], 0  ;;  %s105_s28 = sshll.u32 %s6277_s9, 4  ;;  %s106_s28 = int_to_ptr.hbm [resolvable:$true] %s105_s28 }
  0x4c   :  { %87 = vsyncpa [#allocation24], 0  ;;  %s6235_s1 = smov [#allocation5]   ;;  %s130_s0 = sshll.u32 %s6287_s17, 4  ;;  %s131_s0 = int_to_ptr.hbm [resolvable:$true] %s130_s0 }
  0x4d   :  { %s107_s2 = sshll.u32 %s6235_s1, 4  ;;  %s5823_s20 = sshra.s32 %s106_s28, 4  ;;  %s108_s2 = int_to_ptr.vmem [resolvable:$true] %s107_s2  ;;  %s5824_s20 = int_to_ptr.hbm [resolvable:$true] %s5823_s20 }
  0x4e   :  { %s5825_s7 = scalar_lea.hbm %s5824_s20, 2  ;;  %s5827_s10 = scalar_lea.hbm %s6277_s9, 2 }
  0x4f   :  { %p5826_p0 = scmp.ne.s32.totalorder %s5824_s20, %s5825_s7  ;;  %p5828_p1 = scmp.lt.s32.totalorder %s5824_s20, %s6277_s9 }
  0x50   :  { %p5829_p2 = scmp.lt.s32.totalorder %s5827_s10, %s5825_s7 }
  0x52   :  { %p5830_p3 = por %p5829_p2, %p5828_p1 }
  0x54   :  { %p5831_p4 = pnand %p5830_p3, %p5826_p0 }
  0x56   :  { %5834 = shalt.err (!%p5831_p4)
}
  0x57   :  { %s6236_s11 = smov 16   ;;  %s6237_s15 = smov 1  }
  0x58   :  { %113 = dma.hbm_to_vmem [thread:$0]  %s106_s28, 32, %s108_s2, [#allocation6], %s6236_s11, %s6236_s11, %s6237_s15  }
  0x59   :  { %s6238_s16 = smov [#allocation8]   ;;  %s154_s23 = sshll.u32 %s6297_s25, 4  ;;  %s155_s23 = int_to_ptr.hbm [resolvable:$true] %s154_s23 }
  0x5a   :  { %s132_s18 = sshll.u32 %s6238_s16, 4  ;;  %s5847_s22 = sshra.s32 %s131_s0, 4  ;;  %s133_s18 = int_to_ptr.vmem [resolvable:$true] %s132_s18  ;;  %s5848_s22 = int_to_ptr.hbm [resolvable:$true] %s5847_s22 }
  0x5b   :  { %s5849_s9 = scalar_lea.hbm %s5848_s22, 1  ;;  %s5851_s26 = scalar_lea.hbm %s6287_s17, 1 }
  0x5c   :  { %p5850_p5 = scmp.ne.s32.totalorder %s5848_s22, %s5849_s9  ;;  %p5852_p6 = scmp.lt.s32.totalorder %s5848_s22, %s6287_s17 }
  0x5d   :  { %p5853_p7 = scmp.lt.s32.totalorder %s5851_s26, %s5849_s9 }
  0x5f   :  { %p5854_p8 = por %p5853_p7, %p5852_p6 }
  0x61   :  { %p5855_p9 = pnand %p5854_p8, %p5850_p5 }
  0x63   :  { %5858 = shalt.err (!%p5855_p9)
}
  0x64   :  { %135 = dma.hbm_to_vmem [thread:$0]  %s131_s0, 16, %s133_s18, [#allocation9]  }
  0x65   :  { %s178_s28 = sshll.u32 %s6312_s8, 4  ;;  %s6239_s1 = smov [#allocation11]   ;;  %s179_s28 = int_to_ptr.hbm [resolvable:$true] %s178_s28 }
  0x66   :  { %s156_s2 = sshll.u32 %s6239_s1, 4  ;;  %s5871_s20 = sshra.s32 %s155_s23, 4  ;;  %s157_s2 = int_to_ptr.vmem [resolvable:$true] %s156_s2  ;;  %s5872_s20 = int_to_ptr.hbm [resolvable:$true] %s5871_s20 }
  0x67   :  { %s5873_s7 = scalar_lea.hbm %s5872_s20, 2  ;;  %s5875_s10 = scalar_lea.hbm %s6297_s25, 2 }
  0x68   :  { %p5874_p10 = scmp.ne.s32.totalorder %s5872_s20, %s5873_s7  ;;  %p5876_p11 = scmp.lt.s32.totalorder %s5872_s20, %s6297_s25 }
  0x69   :  { %p5877_p12 = scmp.lt.s32.totalorder %s5875_s10, %s5873_s7 }
  0x6b   :  { %p5878_p13 = por %p5877_p12, %p5876_p11 }
  0x6d   :  { %p5879_p0 = pnand %p5878_p13, %p5874_p10 }
  0x6f   :  { %5882 = shalt.err (!%p5879_p0)
}
  0x70   :  { %159 = dma.hbm_to_vmem [thread:$0]  %s155_s23, 32, %s157_s2, [#allocation12]  }
  0x71   :  { %s6240_s17 = smov [#allocation14]   ;;  %s199_s15 = sshll.u32 %s6322_s19, 4  ;;  %s6465_s15 = int_to_ptr.hbm [resolvable:$true] %s199_s15 }
  0x72   :  { %s180_s0 = sshll.u32 %s6240_s17, 4  ;;  %s5895_s16 = sshra.s32 %s179_s28, 4  ;;  %s181_s0 = int_to_ptr.vmem [resolvable:$true] %s180_s0  ;;  %s5896_s16 = int_to_ptr.hbm [resolvable:$true] %s5895_s16 }
  0x73   :  { %s5897_s18 = scalar_lea.hbm %s5896_s16, 1  ;;  %s5899_s22 = scalar_lea.hbm %s6312_s8, 1 }
  0x74   :  { %p5898_p1 = scmp.ne.s32.totalorder %s5896_s16, %s5897_s18  ;;  %p5900_p2 = scmp.lt.s32.totalorder %s5896_s16, %s6312_s8 }
  0x75   :  { %p5901_p3 = scmp.lt.s32.totalorder %s5899_s22, %s5897_s18 }
  0x77   :  { %p5902_p4 = por %p5901_p3, %p5900_p2 }
  0x79   :  { %p5903_p5 = pnand %p5902_p4, %p5898_p1 }
  0x7b   :  { %5906 = shalt.err (!%p5903_p5)
}
  0x7c   :  { %183 = dma.hbm_to_vmem [thread:$0]  %s179_s28, 16, %s181_s0, [#allocation15]  }
  0x7d   :  { %s6241_s25 = smov [#allocation17]   ;;  %s5919_s9 = sshra.s32 %s6465_s15, 4  ;;  %s5920_s9 = int_to_ptr.hbm [resolvable:$true] %s5919_s9 }
  0x7e   :  { %s201_s23 = sshll.u32 %s6241_s25, 4  ;;  %s5921_s26 = scalar_lea.hbm %s5920_s9, 32  ;;  %s202_s23 = int_to_ptr.vmem [resolvable:$true] %s201_s23 }
  0x7f   :  { %p5922_p6 = scmp.ne.s32.totalorder %s5920_s9, %s5921_s26  ;;  %s5923_s1 = scalar_lea.hbm %s6322_s19, 32 }
  0x80   :  { %p5924_p7 = scmp.lt.s32.totalorder %s5920_s9, %s6322_s19  ;;  %p5925_p8 = scmp.lt.s32.totalorder %s5923_s1, %s5921_s26 }
  0x82   :  { %p5926_p9 = por %p5925_p8, %p5924_p7 }
  0x84   :  { %p5927_p10 = pnand %p5926_p9, %p5922_p6 }
  0x86   :  { %5930 = shalt.err (!%p5927_p10)
}
  0x87   :  { %s6242_s8 = smov 64   ;;  %s6243_s28 = smov 4  }
  0x88   :  { %207 = dma.hbm_to_vmem [thread:$0]  %s6465_s15, 512, %s202_s23, [#allocation18], %s6242_s8, %s6242_s8, %s6243_s28  }
  0x89   :  { %s231_s2 = sshll.u32 %s6352_s27, 4  ;;  %s6244_s20 = smov [#allocation20]   ;;  %s232_s2 = int_to_ptr.hbm [resolvable:$true] %s231_s2 }
  0x8a   :  { %s233_s7 = sshll.u32 %s6244_s20, 4  ;;  %s265_s19 = sshll.u32 %s6382_s30, 4  ;;  %s234_s7 = int_to_ptr.vmem [resolvable:$true] %s233_s7  ;;  %s6478_s19 = int_to_ptr.hbm [resolvable:$true] %s265_s19 }
  0x8b   :  { %s5943_s10 = sshra.s32 %s232_s2, 4  ;;  %s5947_s0 = scalar_lea.hbm %s6352_s27, 64  ;;  %s5944_s10 = int_to_ptr.hbm [resolvable:$true] %s5943_s10 }
  0x8c   :  { %s5945_s17 = scalar_lea.hbm %s5944_s10, 64  ;;  %p5948_p12 = scmp.lt.s32.totalorder %s5944_s10, %s6352_s27 }
  0x8d   :  { %p5946_p11 = scmp.ne.s32.totalorder %s5944_s10, %s5945_s17  ;;  %p5949_p13 = scmp.lt.s32.totalorder %s5947_s0, %s5945_s17 }
  0x8f   :  { %p5950_p0 = por %p5949_p13, %p5948_p12 }
  0x91   :  { %p5951_p1 = pnand %p5950_p0, %p5946_p11 }
  0x93   :  { %5954 = shalt.err (!%p5951_p1)
}
  0x94   :  { %s6245_s16 = smov 128   ;;  %s6246_s15 = smov 8  }
  0x95   :  { %239 = dma.hbm_to_vmem [thread:$0]  %s232_s2, 1024, %s234_s7, [#allocation21], %s6245_s16, %s6245_s16, %s6246_s15  }
  0x96   :  { %s92_s18 = sshll.u32 %s6272_s5, 4  ;;  %s6247_s22 = smov [#allocation23]   ;;  %s6486_s18 = int_to_ptr.hbm [resolvable:$true] %s92_s18 }
  0x97   :  { %s267_s25 = sshll.u32 %s6247_s22, 4  ;;  %s5967_s27 = sshra.s32 %s6478_s19, 4  ;;  %s268_s25 = int_to_ptr.vmem [resolvable:$true] %s267_s25  ;;  %s5968_s27 = int_to_ptr.hbm [resolvable:$true] %s5967_s27 }
  0x98   :  { %s5969_s23 = scalar_lea.hbm %s5968_s27, 32  ;;  %s5971_s9 = scalar_lea.hbm %s6382_s30, 32 }
  0x99   :  { %p5970_p2 = scmp.ne.s32.totalorder %s5968_s27, %s5969_s23  ;;  %p5972_p3 = scmp.lt.s32.totalorder %s5968_s27, %s6382_s30 }
  0x9a   :  { %p5973_p4 = scmp.lt.s32.totalorder %s5971_s9, %s5969_s23 }
  0x9c   :  { %p5974_p5 = por %p5973_p4, %p5972_p3 }
  0x9e   :  { %p5975_p6 = pnand %p5974_p5, %p5970_p2 }
  0xa0   :  { %5978 = shalt.err (!%p5975_p6)
}
  0xa1   :  { %273 = dma.hbm_to_vmem [thread:$0]  %s6478_s19, 512, %s268_s25, [#allocation24], %s6242_s8, %s6242_s8, %s6243_s28  }
  0xa2   :  { %s6248_s26 = smov [#allocation3]   ;;  %s119_s2 = sshll.u32 %s6282_s13, 4  ;;  %s120_s2 = int_to_ptr.hbm [resolvable:$true] %s119_s2 }
  0xa3   :  { %s94_s1 = sshll.u32 %s6248_s26, 4  ;;  %s5991_s20 = sshra.s32 %s6486_s18, 4  ;;  %s95_s1 = int_to_ptr.vmem [resolvable:$true] %s94_s1  ;;  %s5992_s20 = int_to_ptr.hbm [resolvable:$true] %s5991_s20 }
  0xa4   :  { %s5993_s30 = scalar_lea.hbm %s5992_s20, 16  ;;  %s5995_s7 = scalar_lea.hbm %s6272_s5, 16 }
  0xa5   :  { %p5994_p7 = scmp.ne.s32.totalorder %s5992_s20, %s5993_s30  ;;  %p5996_p8 = scmp.lt.s32.totalorder %s5992_s20, %s6272_s5 }
  0xa6   :  { %p5997_p9 = scmp.lt.s32.totalorder %s5995_s7, %s5993_s30 }
  0xa8   :  { %p5998_p10 = por %p5997_p9, %p5996_p8 }
  0xaa   :  { %p5999_p11 = pnand %p5998_p10, %p5994_p7 }
  0xac   :  { %6002 = shalt.err (!%p5999_p11)
}
  0xad   :  { %100 = dma.hbm_to_vmem [thread:$0]  %s6486_s18, 256, %s95_s1, [#allocation4], %s6245_s16, %s6245_s16, %s6246_s15  }
  0xae   :  { %s140_s19 = sshll.u32 %s6292_s21, 4  ;;  %s6249_s10 = smov [#allocation7]   ;;  %s6504_s19 = int_to_ptr.hbm [resolvable:$true] %s140_s19 }
  0xaf   :  { %s121_s17 = sshll.u32 %s6249_s10, 4  ;;  %s6015_s0 = sshra.s32 %s120_s2, 4  ;;  %s122_s17 = int_to_ptr.vmem [resolvable:$true] %s121_s17  ;;  %s6016_s0 = int_to_ptr.hbm [resolvable:$true] %s6015_s0 }
  0xb0   :  { %s6017_s5 = scalar_lea.hbm %s6016_s0, 1  ;;  %s6019_s22 = scalar_lea.hbm %s6282_s13, 1 }
  0xb1   :  { %p6018_p12 = scmp.ne.s32.totalorder %s6016_s0, %s6017_s5  ;;  %p6020_p13 = scmp.lt.s32.totalorder %s6016_s0, %s6282_s13 }
  0xb2   :  { %p6021_p0 = scmp.lt.s32.totalorder %s6019_s22, %s6017_s5 }
  0xb4   :  { %p6022_p1 = por %p6021_p0, %p6020_p13 }
  0xb6   :  { %p6023_p2 = pnand %p6022_p1, %p6018_p12 }
  0xb8   :  { %6026 = shalt.err (!%p6023_p2)
}
  0xb9   :  { %124 = dma.hbm_to_vmem [thread:$0]  %s120_s2, 16, %s122_s17, [#allocation6]  }
  0xba   :  { %s6250_s18 = smov [#allocation10]   ;;  %s167_s27 = sshll.u32 %s6307_s3, 4  ;;  %s168_s27 = int_to_ptr.hbm [resolvable:$true] %s167_s27 }
  0xbb   :  { %s142_s25 = sshll.u32 %s6250_s18, 4  ;;  %s6039_s23 = sshra.s32 %s6504_s19, 4  ;;  %s143_s25 = int_to_ptr.vmem [resolvable:$true] %s142_s25  ;;  %s6040_s23 = int_to_ptr.hbm [resolvable:$true] %s6039_s23 }
  0xbc   :  { %s6041_s9 = scalar_lea.hbm %s6040_s23, 64  ;;  %s6043_s26 = scalar_lea.hbm %s6292_s21, 64 }
  0xbd   :  { %p6042_p3 = scmp.ne.s32.totalorder %s6040_s23, %s6041_s9  ;;  %p6044_p4 = scmp.lt.s32.totalorder %s6040_s23, %s6292_s21 }
  0xbe   :  { %p6045_p5 = scmp.lt.s32.totalorder %s6043_s26, %s6041_s9 }
  0xc0   :  { %p6046_p6 = por %p6045_p5, %p6044_p4 }
  0xc2   :  { %p6047_p7 = pnand %p6046_p6, %p6042_p3 }
  0xc4   :  { %6050 = shalt.err (!%p6047_p7)
}
  0xc5   :  { %148 = dma.hbm_to_vmem [thread:$0]  %s6504_s19, 1024, %s143_s25, [#allocation9], %s6245_s16, %s6245_s16, %s6246_s15  }
  0xc6   :  { %s189_s13 = sshll.u32 %s6317_s14, 4  ;;  %s6251_s1 = smov [#allocation13]   ;;  %s190_s13 = int_to_ptr.hbm [resolvable:$true] %s189_s13 }
  0xc7   :  { %s169_s2 = sshll.u32 %s6251_s1, 4  ;;  %s6063_s20 = sshra.s32 %s168_s27, 4  ;;  %s170_s2 = int_to_ptr.vmem [resolvable:$true] %s169_s2  ;;  %s6064_s20 = int_to_ptr.hbm [resolvable:$true] %s6063_s20 }
  0xc8   :  { %s6065_s21 = scalar_lea.hbm %s6064_s20, 1  ;;  %s6067_s30 = scalar_lea.hbm %s6307_s3, 1 }
  0xc9   :  { %p6066_p8 = scmp.ne.s32.totalorder %s6064_s20, %s6065_s21  ;;  %p6068_p9 = scmp.lt.s32.totalorder %s6064_s20, %s6307_s3 }
  0xca   :  { %p6069_p10 = scmp.lt.s32.totalorder %s6067_s30, %s6065_s21 }
  0xcc   :  { %p6070_p11 = por %p6069_p10, %p6068_p9 }
  0xce   :  { %p6071_p12 = pnand %p6070_p11, %p6066_p8 }
  0xd0   :  { %6074 = shalt.err (!%p6071_p12)
}
  0xd1   :  { %172 = dma.hbm_to_vmem [thread:$0]  %s168_s27, 16, %s170_s2, [#allocation12]  }
  0xd2   :  { %s6252_s16 = smov [#allocation16]   ;;  %s213_s7 = sshll.u32 %s6327_s24, 4  ;;  %s214_s7 = int_to_ptr.hbm [resolvable:$true] %s213_s7 }
  0xd3   :  { %s191_s15 = sshll.u32 %s6252_s16, 4  ;;  %s6087_s19 = sshra.s32 %s190_s13, 4  ;;  %s192_s15 = int_to_ptr.vmem [resolvable:$true] %s191_s15  ;;  %s6088_s19 = int_to_ptr.hbm [resolvable:$true] %s6087_s19 }
  0xd4   :  { %s6089_s10 = scalar_lea.hbm %s6088_s19, 1  ;;  %s6091_s17 = scalar_lea.hbm %s6317_s14, 1 }
  0xd5   :  { %p6090_p13 = scmp.ne.s32.totalorder %s6088_s19, %s6089_s10  ;;  %p6092_p0 = scmp.lt.s32.totalorder %s6088_s19, %s6317_s14 }
  0xd6   :  { %p6093_p1 = scmp.lt.s32.totalorder %s6091_s17, %s6089_s10 }
  0xd8   :  { %p6094_p2 = por %p6093_p1, %p6092_p0 }
  0xda   :  { %p6095_p3 = pnand %p6094_p2, %p6090_p13 }
  0xdc   :  { %6098 = shalt.err (!%p6095_p3)
}
  0xdd   :  { %194 = dma.hbm_to_vmem [thread:$0]  %s190_s13, 16, %s192_s15, [#allocation15]  }
  0xde   :  { %s246_s3 = sshll.u32 %s6362_s12, 4  ;;  %s6253_s0 = smov [#allocation19]   ;;  %s6523_s3 = int_to_ptr.hbm [resolvable:$true] %s246_s3 }
  0xdf   :  { %s215_s5 = sshll.u32 %s6253_s0, 4  ;;  %s6111_s22 = sshra.s32 %s214_s7, 4  ;;  %s216_s5 = int_to_ptr.vmem [resolvable:$true] %s215_s5  ;;  %s6112_s22 = int_to_ptr.hbm [resolvable:$true] %s6111_s22 }
  0xe0   :  { %s6113_s18 = scalar_lea.hbm %s6112_s22, 1  ;;  %s6115_s25 = scalar_lea.hbm %s6327_s24, 1 }
  0xe1   :  { %p6114_p4 = scmp.ne.s32.totalorder %s6112_s22, %s6113_s18  ;;  %p6116_p5 = scmp.lt.s32.totalorder %s6112_s22, %s6327_s24 }
  0xe2   :  { %p6117_p6 = scmp.lt.s32.totalorder %s6115_s25, %s6113_s18 }
  0xe4   :  { %p6118_p7 = por %p6117_p6, %p6116_p5 }
  0xe6   :  { %p6119_p8 = pnand %p6118_p7, %p6114_p4 }
  0xe8   :  { %6122 = shalt.err (!%p6119_p8)
}
  0xe9   :  { %218 = dma.hbm_to_vmem [thread:$0]  %s214_s7, 16, %s216_s5, [#allocation18]  }
  0xea   :  { %s8254_s14 = sld [smem:[#allocation51_spill]]  ;;  %s6254_s27 = smov [#allocation22]  }
  0xeb   :  { %s248_s23 = sshll.u32 %s6254_s27, 4  ;;  %s6135_s26 = sshra.s32 %s6523_s3, 4  ;;  %s249_s23 = int_to_ptr.vmem [resolvable:$true] %s248_s23  ;;  %s6136_s26 = int_to_ptr.hbm [resolvable:$true] %s6135_s26 }
  0xec   :  { %s6137_s13 = scalar_lea.hbm %s6136_s26, 32  ;;  %s6139_s24 = scalar_lea.hbm %s6362_s12, 32 }
  0xed   :  { %p6138_p9 = scmp.ne.s32.totalorder %s6136_s26, %s6137_s13  ;;  %p6140_p10 = scmp.lt.s32.totalorder %s6136_s26, %s6362_s12 }
  0xee   :  { %p6141_p11 = scmp.lt.s32.totalorder %s6139_s24, %s6137_s13 }
  0xf0   :  { %s294_s9 = sshll.u32 %s8254_s14, 4  ;;  %p6142_p12 = por %p6141_p11, %p6140_p10  ;;  %s6528_s9 = int_to_ptr.hbm [resolvable:$true] %s294_s9 }
  0xf2   :  { %p6143_p13 = pnand %p6142_p12, %p6138_p9 }
  0xf4   :  { %6146 = shalt.err (!%p6143_p13)
}
  0xf5   :  { %254 = dma.hbm_to_vmem [thread:$0]  %s6523_s3, 512, %s249_s23, [#allocation21], %s6242_s8, %s6242_s8, %s6243_s28  }
  0xf6   :  { %s6255_s1 = smov [#allocation25]   ;;  %s6159_s20 = sshra.s32 %s6528_s9, 4  ;;  %s6160_s20 = int_to_ptr.hbm [resolvable:$true] %s6159_s20 }
  0xf7   :  { %s296_s2 = sshll.u32 %s6255_s1, 4  ;;  %s6161_s21 = scalar_lea.hbm %s6160_s20, 128  ;;  %s297_s2 = int_to_ptr.vmem [resolvable:$true] %s296_s2 }
  0xf8   :  { %p6162_p0 = scmp.ne.s32.totalorder %s6160_s20, %s6161_s21  ;;  %s6163_s12 = scalar_lea.hbm %s8254_s14, 128 }
  0xf9   :  { %p6164_p1 = scmp.lt.s32.totalorder %s6160_s20, %s8254_s14  ;;  %p6165_p2 = scmp.lt.s32.totalorder %s6163_s12, %s6161_s21 }
  0xfb   :  { %p6166_p3 = por %p6165_p2, %p6164_p1 }
  0xfd   :  { %p6167_p4 = pnand %p6166_p3, %p6162_p0 }
  0xff   :  { %6170 = shalt.err (!%p6167_p4)
}
 0x100   :  { %s6256_s30 = smov 256  }
 0x101   :  { %302 = dma.hbm_to_vmem [thread:$0]  %s6528_s9, 2048, %s297_s2, [#allocation24], %s6256_s30, %s6256_s30, %s6236_s11  }
 0x102   :  { %6183 = dma.done.wait [#allocation4], 256  }
 0x103   :  { %6184 = vsyncadd [#allocation4], 4294967040 }
 0x104   :  { %6185 = dma.done.wait [#allocation6], 48  }
 0x105   :  { %6186 = vsyncadd [#allocation6], 4294967248 }
 0x106   :  { %6187 = dma.done.wait [#allocation9], 1040  }
 0x107   :  { %6188 = vsyncadd [#allocation9], 4294966256 }
 0x108   :  { %6189 = dma.done.wait [#allocation12], 48  }
 0x109   :  { %6190 = vsyncadd [#allocation12], 4294967248 }
 0x10a   :  { %6191 = dma.done.wait [#allocation15], 32  }
 0x10b   :  { %6192 = vsyncadd [#allocation15], 4294967264 }
 0x10c   :  { %6193 = dma.done.wait [#allocation18], 528  }
 0x10d   :  { %6194 = vsyncadd [#allocation18], 4294966768 }
 0x10e   :  { %6195 = dma.done.wait [#allocation21], 1536  }
 0x10f   :  { %6196 = vsyncadd [#allocation21], 4294965760 }
 0x110   :  { %6197 = dma.done.wait [#allocation24], 2560  }
 0x111   :  { %6198 = vsyncadd [#allocation24], 4294964736  ;;  %vm384_vm0 = vcmask 523264   ;;  %v380_v1 = vld [vmem:[#allocation3] sm:$0xff]  ;;  %v381_v2 = vld [vmem:[#allocation3 + $0x8] sm:$0xff]  ;;  %v6257_v5 = vmov 64.0  }
 0x112   :  { %v385_v3 = vsel %vm384_vm0, %v380_v1, 0.0  ;;  %v388_v4 = vsel %vm384_vm0, %v381_v2, 0.0  ;;  %5459 = vrcp.f32 %v6257_v5  ;;  %v4734_v22 = vld [vmem:[#allocation10 + $0x30] sm:$0xf]  ;;  %v5244_v23 = vld [vmem:[#allocation10 + $0x34] sm:$0xf0] }
 0x113   :  { %386 = vadd.xlane.f32.xlu0 %v385_v3  ;;  %v5243_v24 = vld [vmem:[#allocation10 + $0x34] sm:$0xf]  ;;  %v4735_v25 = vor.u32 %v5244_v23, %v4734_v22  ;;  %v4736_v26 = vld [vmem:[#allocation10 + $0x38] sm:$0xf0]  ;;  %v4726_v28 = vld [vmem:[#allocation10 + $0x20] sm:$0xf] }
 0x114   :  { %v4739_v27 = vor.u32 %v5243_v24, %v4736_v26  ;;  %v5242_v29 = vld [vmem:[#allocation10 + $0x24] sm:$0xf0]  ;;  %v5241_v30 = vld [vmem:[#allocation10 + $0x24] sm:$0xf]  ;;  %v4728_v32 = vld [vmem:[#allocation10 + $0x28] sm:$0xf0] }
 0x115   :  { %508 = vmatpush.bf16.msra.mxu0 %v4735_v25  ;;  %v4727_v31 = vor.u32 %v5242_v29, %v4726_v28  ;;  %v4731_v33 = vor.u32 %v5241_v30, %v4728_v32  ;;  %v4718_v34 = vld [vmem:[#allocation10 + $0x10] sm:$0xf]  ;;  %v5240_v35 = vld [vmem:[#allocation10 + $0x14] sm:$0xf0]  ;;  %v5239_v36 = vld [vmem:[#allocation10 + $0x14] sm:$0xf] }
 0x116   :  { %522 = vmatpush.bf16.msra.mxu1 %v4739_v27  ;;  %v4719_v37 = vor.u32 %v5240_v35, %v4718_v34  ;;  %v4720_v38 = vld [vmem:[#allocation10 + $0x18] sm:$0xf0]  ;;  %v4710_v40 = vld [vmem:[#allocation10] sm:$0xf]  ;;  %v5238_v41 = vld [vmem:[#allocation10 + $0x4] sm:$0xf0] }
 0x117   :  { %v4723_v39 = vor.u32 %v5239_v36, %v4720_v38  ;;  %v5237_v42 = vld [vmem:[#allocation10 + $0x4] sm:$0xf]  ;;  %v4711_v44 = vor.u32 %v5238_v41, %v4710_v40  ;;  %v4712_v45 = vld [vmem:[#allocation10 + $0x8] sm:$0xf0]  ;;  %vm617_vm8 = vcmask 1043456   ;;  %s6258_s28 = smov 48  }
 0x118   :  { %v5460_v6 = vpop.eup %5459  ;;  %v4715_v47 = vor.u32 %v5237_v42, %v4712_v45  ;;  %s6259_s16 = smov 32   ;;  %s6260_s15 = smov 96   ;;  %vm539_vm9 = vcmask 130048   ;;  %vm587_vm10 = vcmask 64512   ;;  %vm1033_vm11 = vcmask 261120  }
 0x119   :  { %v392_v7 = vmul.f32 64.0, %v5460_v6  ;;  %vm396_vm1 = vweird.f32 %v5460_v6  ;;  %509 = vmatpush.bf16.msra.mxu0 %v4727_v31  ;;  %s6261_s7 = smov 112   ;;  %s6262_s19 = smov 80   ;;  %vm1036_vm12 = vcmask 392192  }
 0x11a   :  { %523 = vmatpush.bf16.msra.mxu1 %v4731_v33  ;;  %s8255_s10 = sld [smem:[#allocation34_spill]] }
 0x11b   :  { %389 = vadd.xlane.f32.xlu0 %v388_v4  ;;  %v393_v8 = vsub.f32 1.0, %v392_v7  ;;  %s8256_s17 = sld [smem:[#allocation35_spill]] }
 0x11c   :  { %s8257_s3 = sld [smem:[#allocation36_spill]] }
 0x11d   :  { %v394_v9 = vmul.f32 %v5460_v6, %v393_v8  ;;  %510 = vmatpush.bf16.msra.mxu0 %v4719_v37  ;;  %s8258_s0 = sld [smem:[#allocation37_spill]] }
 0x11e   :  { %524 = vmatpush.bf16.msra.mxu1 %v4723_v39  ;;  %s8259_s5 = sld [smem:[#allocation38_spill]] }
 0x11f   :  { %v395_v10 = vadd.f32 %v5460_v6, %v394_v9  ;;  %s8260_s22 = sld [smem:[#allocation39_spill]] }
 0x120   :  { %s8263_s18 = sld [smem:[#allocation42_spill]] }
 0x121   :  { %v6544_v11 = vsel %vm396_vm1, %v5460_v6, %v395_v10  ;;  %511 = vmatpush.bf16.msra.mxu0 %v4711_v44  ;;  %v5441_v6 = vld [vmem:[#allocation8] ss:$0 sm:$0xff]  ;;  %s8264_s25 = sld [smem:[#allocation44_spill]] }
 0x122   :  { %525 = vmatpush.bf16.msra.mxu1 %v4715_v47  ;;  %s8265_s14 = sld [smem:[#allocation43_spill]] }
 0x123   :  { %s8266_s27 = sld [smem:[#allocation45_spill]] }
 0x124   :  { %s8267_s23 = sld [smem:[#allocation48_spill]] }
 0x125   :  { %s8268_s9 = sld [smem:[#allocation49_spill]] }
 0x126   :  { %s8275_s26 = sld [smem:[#allocation46_spill]] }
 0x127   :  { %s8276_s13 = sld [smem:[#allocation47_spill]] }
 0x128   :  { %s8280_s24 = sld [smem:[#allocation50_spill]] }
 0x129   :  { %s8398_s1 = sld [smem:[#allocation52_spill]] }
 0x186   :  { %v387_v12 = vpop.xlane.xlu0 %386 }
 0x187   :  { %v398_v13 = vmul.f32 %v6544_v11, %v387_v12  ;;  %v455_v12 = vld [vmem:[#allocation11] sm:$0x3] }
 0x189   :  { %v6547_v14 = vsub.f32 %v380_v1, %v398_v13  ;;  %v5440_v1 = vld [vmem:[#allocation7] ss:$0 sm:$0xff]  ;;  %v457_v13 = vperm.slane %v455_v12, 0 }
 0x18b   :  { %v402_v15 = vmul.f32 %v6547_v14, %v6547_v14 }
 0x18d   :  { %v404_v16 = vsel %vm384_vm0, %v402_v15, 0.0 }
 0x18e   :  { %405 = vadd.xlane.f32.xlu1 %v404_v16  ;;  %v390_v17 = vpop.xlane.xlu0 %389 }
 0x18f   :  { %v399_v18 = vmul.f32 %v6544_v11, %v390_v17 }
 0x191   :  { %v6553_v19 = vsub.f32 %v381_v2, %v399_v18 }
 0x193   :  { %v403_v20 = vmul.f32 %v6553_v19, %v6553_v19 }
 0x195   :  { %v407_v21 = vsel %vm384_vm0, %v403_v20, 0.0 }
 0x196   :  { %408 = vadd.xlane.f32.xlu1 %v407_v21 }
 0x201   :  { %v406_v43 = vpop.xlane.xlu1 %405 }
 0x202   :  { %v410_v46 = vmul.f32 %v406_v43, %v6544_v11 }
 0x204   :  { %v412_v48 = vadd.f32 1e-12, %v410_v46 }
 0x206   :  { %5461 = vrsqrt.f32 %v412_v48  ;;  %vm420_vm3 = vweird.f32 %v412_v48 }
 0x209   :  { %v409_v49 = vpop.xlane.xlu1 %408 }
 0x20a   :  { %v411_v50 = vmul.f32 %v409_v49, %v6544_v11 }
 0x20c   :  { %v5462_v51 = vpop.eup %5461  ;;  %v413_v52 = vadd.f32 1e-12, %v411_v50 }
 0x20d   :  { %v415_v53 = vmul.f32 %v5462_v51, %v412_v48  ;;  %vm421_vm2 = vweird.f32 %v5462_v51 }
 0x20e   :  { %5463 = vrsqrt.f32 %v413_v52  ;;  %vm422_vm4 = vmor %vm420_vm3, %vm421_vm2  ;;  %vm430_vm6 = vweird.f32 %v413_v52 }
 0x20f   :  { %v416_v54 = vmul.f32 %v5462_v51, %v415_v53 }
 0x211   :  { %v417_v55 = vmul.f32 0.5, %v416_v54 }
 0x213   :  { %v418_v56 = vsub.f32 1.5, %v417_v55  ;;  %v5442_v55 = vld [vmem:[#allocation5] ss:$0 sm:$0xff] }
 0x214   :  { %v5464_v57 = vpop.eup %5463 }
 0x215   :  { %v419_v58 = vmul.f32 %v5462_v51, %v418_v56  ;;  %v425_v59 = vmul.f32 %v5464_v57, %v413_v52  ;;  %vm431_vm5 = vweird.f32 %v5464_v57 }
 0x216   :  { %vm432_vm7 = vmor %vm430_vm6, %vm431_vm5 }
 0x217   :  { %v426_v60 = vmul.f32 %v5464_v57, %v425_v59  ;;  %v423_v61 = vsel %vm422_vm4, %v5462_v51, %v419_v58 }
 0x218   :  { %v434_v0 = vmul.f32 %v423_v61, %v6547_v14  ;;  %v458_v14 = vperm.slane %v455_v12, 1  ;;  %v5443_v61 = vld [vmem:[#allocation5 + $0x1] ss:$0 sm:$0xff] }
 0x219   :  { %v427_v62 = vmul.f32 0.5, %v426_v60 }
 0x21a   :  { %v439_v5 = vmul.f32 %v5440_v1, %v434_v0 }
 0x21b   :  { %v428_v63 = vsub.f32 1.5, %v427_v62 }
 0x21c   :  { %v6562_v8 = vadd.f32 %v5441_v6, %v439_v5 }
 0x21d   :  { %v429_v2 = vmul.f32 %v5464_v57, %v428_v63 }
 0x21f   :  { %v433_v3 = vsel %vm432_vm7, %v5464_v57, %v429_v2 }
 0x220   :  { %v435_v4 = vmul.f32 %v433_v3, %v6553_v19 }
 0x222   :  { %v440_v7 = vmul.f32 %v5440_v1, %v435_v4 }
 0x224   :  { %v6564_v9 = vadd.f32 %v5441_v6, %v440_v7 }
 0x226   :  { %v446_v10 = vpack.c.bf16 %v6564_v9, %v6562_v8 }
 0x228   :  { %4740 = vmatmul.msk.bf16.vlgmr.msra.gmra.mxu0 %vm384_vm0, %v446_v10  ;;  %4741 = vmatmul.msk.bf16.vlgmr.msra.gmra.mxu1 %vm384_vm0, %v446_v10 }
 0x2a5   :  { %v513_v15 = vpop.f32.mrf.mxu0  ;;  %v527_v16 = vpop.f32.mrf.mxu1 }
 0x2a6   :  { %v514_v17 = vadd.f32 %v513_v15, %v457_v13  ;;  %v528_v18 = vadd.f32 %v527_v16, %v458_v14 }
 0x2a8   :  { %v532_v19 = vpack.c.bf16 %v514_v17, %v514_v17  ;;  %v6570_v20 = vpack.c.bf16 %v528_v18, %v528_v18 }
 0x2aa   :  { %v535_v21 = vunpack.c.l.b16 %v532_v19  ;;  %v619_v22 = vsel %vm617_vm8, %v6570_v20, 0 }
 0x2ab   :  { %628 = vmatpush.bf16.msra.mxu2 %v619_v22 }
 0x2ac   :  { %v536_v23 = vpack.c.b16 %v535_v21, %v535_v21 }
 0x2ad   :  { %v515_v24 = vpop.f32.mrf.mxu0  ;;  %v529_v29 = vpop.f32.mrf.mxu1 }
 0x2ae   :  { %v516_v25 = vadd.f32 %v515_v24, %v457_v13  ;;  %655 = vrot.lane.b32.xlu0 %v536_v23, %s6258_s28  ;;  %537 = vrot.lane.b32.xlu2 %v536_v23, %s6242_s8  ;;  %v530_v32 = vadd.f32 %v529_v29, %v458_v14 }
 0x2b0   :  { %v533_v26 = vpack.c.bf16 %v516_v25, %v516_v25  ;;  %v6589_v33 = vpack.c.bf16 %v530_v32, %v530_v32 }
 0x2b2   :  { %v560_v27 = vunpack.c.l.b16 %v533_v26  ;;  %v638_v36 = vsel %vm617_vm8, %v6589_v33, 0 }
 0x2b4   :  { %v561_v28 = vpack.c.b16 %v560_v27, %v560_v27 }
 0x2b6   :  { %678 = vrot.lane.b32.xlu1 %v561_v28, %s6258_s28  ;;  %800 = vrot.lane.b32.xlu0 %v561_v28, %s6259_s16 }
 0x2b7   :  { %562 = vrot.lane.b32.xlu2 %v561_v28, %s6242_s8 }
 0x2be   :  { %798 = vrot.lane.b32.xlu1 %v561_v28, %s6260_s15  ;;  %893 = vrot.lane.b32.xlu0 %v536_v23, %s6236_s11 }
 0x2bf   :  { %653 = vrot.lane.b32.xlu2 %v536_v23, %s6261_s7 }
 0x2c6   :  { %891 = vrot.lane.b32.xlu1 %v536_v23, %s6262_s19  ;;  %914 = vrot.lane.b32.xlu0 %v561_v28, %s6262_s19 }
 0x2c7   :  { %676 = vrot.lane.b32.xlu2 %v561_v28, %s6261_s7 }
 0x2cf   :  { %777 = vrot.lane.b32.xlu2 %v536_v23, %s6259_s16 }
 0x2d7   :  { %775 = vrot.lane.b32.xlu2 %v536_v23, %s6260_s15 }
 0x2df   :  { %916 = vrot.lane.b32.xlu2 %v561_v28, %s6236_s11 }
 0x308   :  { %v538_v30 = vpop.permute.xlu2 %537 }
 0x309   :  { %v544_v31 = vsel %vm539_vm9, %v538_v30, 0 }
 0x30a   :  { %553 = vmatpush.bf16.xpose.msra.mxu3 %v544_v31 }
 0x311   :  { %v563_v34 = vpop.permute.xlu2 %562  ;;  %4742 = vmatmul.msk.bf16.vlgmr.msra.gmra.mxu3 %vm539_vm9, %v532_v19 }
 0x312   :  { %v568_v35 = vsel %vm539_vm9, %v563_v34, 0 }
 0x313   :  { %577 = vmatpush.bf16.xpose.msrb.mxu3 %v568_v35 }
 0x319   :  { %v654_v37 = vpop.permute.xlu2 %653 }
 0x31b   :  { %647 = vmatpush.bf16.msra.mxu3 %v638_v36 }
 0x320   :  { %v656_v38 = vpop.permute.xlu0 %655 }
 0x321   :  { %v677_v39 = vpop.permute.xlu2 %676  ;;  %4743 = vmatmul.msk.bf16.vlgmr.msrb.gmra.mxu3 %vm539_vm9, %v533_v26  ;;  %v661_v40 = vsel %vm539_vm9, %v656_v38, 0  ;;  %v728_v26 = vunpack.c.l.b16 %v6570_v20 }
 0x322   :  { %670 = vmatpush.bf16.xpose.msrb.mxu0 %v661_v40 }
 0x323   :  { %v6615_v29 = vpack.c.b16 %v728_v26, %v728_v26 }
 0x328   :  { %v679_v41 = vpop.permute.xlu1 %678  ;;  %v801_v42 = vpop.permute.xlu0 %800 }
 0x329   :  { %v806_v43 = vsel %vm539_vm9, %v801_v42, 0  ;;  %v778_v44 = vpop.permute.xlu2 %777  ;;  %4746 = vmatmul.msk.bf16.vlgmr.msrb.gmra.mxu0 %vm539_vm9, %v654_v37  ;;  %v684_v45 = vsel %vm539_vm9, %v679_v41, 0 }
 0x32a   :  { %v783_v46 = vsel %vm539_vm9, %v778_v44, 0  ;;  %693 = vmatpush.bf16.xpose.msrb.mxu1 %v684_v45 }
 0x32b   :  { %792 = vmatpush.bf16.xpose.msra.mxu0 %v783_v46 }
 0x330   :  { %v894_v47 = vpop.permute.xlu0 %893  ;;  %v799_v52 = vpop.permute.xlu1 %798 }
 0x331   :  { %v899_v48 = vsel %vm539_vm9, %v894_v47, 0  ;;  %v776_v49 = vpop.permute.xlu2 %775  ;;  %4747 = vmatmul.msk.bf16.vlgmr.msrb.gmra.mxu1 %vm539_vm9, %v677_v39 }
 0x332   :  { %815 = vmatpush.bf16.xpose.msra.mxu1 %v806_v43 }
 0x333   :  { %908 = vmatpush.bf16.xpose.msrb.mxu0 %v899_v48 }
 0x338   :  { %v892_v53 = vpop.permute.xlu1 %891  ;;  %v915_v54 = vpop.permute.xlu0 %914 }
 0x339   :  { %v917_v50 = vpop.permute.xlu2 %916  ;;  %4750 = vmatmul.msk.bf16.vlgmr.msra.gmra.mxu0 %vm539_vm9, %v776_v49 }
 0x33a   :  { %v922_v51 = vsel %vm539_vm9, %v917_v50, 0 }
 0x33b   :  { %931 = vmatpush.bf16.xpose.msrb.mxu1 %v922_v51 }
 0x341   :  { %4751 = vmatmul.msk.bf16.vlgmr.msra.gmra.mxu1 %vm539_vm9, %v799_v52 }
 0x349   :  { %4754 = vmatmul.msk.bf16.vlgmr.msrb.gmra.mxu0 %vm539_vm9, %v892_v53 }
 0x351   :  { %4755 = vmatmul.msk.bf16.vlgmr.msrb.gmra.mxu1 %vm539_vm9, %v915_v54 }
 0x394   :  { %v555_v56 = vpop.f32.mrf.mxu3 }
 0x395   :  { %v583_v57 = vmul.f32 0.25, %v555_v56 }
 0x397   :  { %v585_v58 = vadd.f32 %v5442_v55, %v583_v57 }
 0x399   :  { %v588_v59 = vsel %vm587_vm10, %v585_v58, -inf }
 0x39a   :  { %589 = vmax.xlane.f32.xlu2 %v588_v59 }
 0x39c   :  { %v557_v60 = vpop.f32.mrf.mxu3 }
 0x3a4   :  { %v579_v62 = vpop.f32.mrf.mxu3 }
 0x3a5   :  { %v584_v63 = vmul.f32 0.25, %v579_v62 }
 0x3a6   :  { %v672_v0 = vpop.f32.mrf.mxu0 }
 0x3a7   :  { %v699_v1 = vmul.f32 0.25, %v672_v0  ;;  %v586_v2 = vadd.f32 %v5443_v61, %v584_v63 }
 0x3a9   :  { %v591_v3 = vsel %vm587_vm10, %v586_v2, -inf  ;;  %v701_v4 = vadd.f32 %v5442_v55, %v699_v1 }
 0x3aa   :  { %592 = vmax.xlane.f32.xlu1 %v591_v3 }
 0x3ab   :  { %v703_v5 = vsel %vm587_vm10, %v701_v4, -inf }
 0x3ac   :  { %v581_v6 = vpop.f32.mrf.mxu3  ;;  %704 = vmax.xlane.f32.xlu0 %v703_v5  ;;  %v752_v5 = vunpack.c.l.b16 %v6589_v33 }
 0x3ae   :  { %v674_v7 = vpop.f32.mrf.mxu0  ;;  %v695_v10 = vpop.f32.mrf.mxu1  ;;  %v753_v6 = vpack.c.b16 %v752_v5, %v752_v5 }
 0x3af   :  { %v700_v12 = vmul.f32 0.25, %v695_v10 }
 0x3b1   :  { %v702_v13 = vadd.f32 %v5443_v61, %v700_v12 }
 0x3b3   :  { %v706_v14 = vsel %vm587_vm10, %v702_v13, -inf }
 0x3b4   :  { %707 = vmax.xlane.f32.xlu2 %v706_v14 }
 0x3b6   :  { %v697_v15 = vpop.f32.mrf.mxu1  ;;  %v794_v16 = vpop.f32.mrf.mxu0 }
 0x3b7   :  { %v821_v17 = vmul.f32 0.25, %v794_v16 }
 0x3b9   :  { %v823_v18 = vadd.f32 %v5442_v55, %v821_v17 }
 0x3bb   :  { %v825_v19 = vsel %vm587_vm10, %v823_v18, -inf }
 0x3bc   :  { %826 = vmax.xlane.f32.xlu1 %v825_v19 }
 0x3be   :  { %v796_v21 = vpop.f32.mrf.mxu0  ;;  %v817_v22 = vpop.f32.mrf.mxu1 }
 0x3bf   :  { %v822_v23 = vmul.f32 0.25, %v817_v22 }
 0x3c1   :  { %v824_v24 = vadd.f32 %v5443_v61, %v822_v23 }
 0x3c3   :  { %v828_v25 = vsel %vm587_vm10, %v824_v24, -inf }
 0x3c4   :  { %829 = vmax.xlane.f32.xlu0 %v828_v25 }
 0x3c6   :  { %v819_v27 = vpop.f32.mrf.mxu1  ;;  %v910_v28 = vpop.f32.mrf.mxu0 }
 0x3c7   :  { %v937_v37 = vmul.f32 0.25, %v910_v28 }
 0x3c9   :  { %v939_v20 = vadd.f32 %v5442_v55, %v937_v37 }
 0x3cb   :  { %v941_v38 = vsel %vm587_vm10, %v939_v20, -inf }
 0x3cc   :  { %730 = vrot.lane.b32.xlu2 %v6615_v29, %s6261_s7 }
 0x3ce   :  { %v912_v30 = vpop.f32.mrf.mxu0  ;;  %v933_v31 = vpop.f32.mrf.mxu1 }
 0x3cf   :  { %v938_v32 = vmul.f32 0.25, %v933_v31 }
 0x3d1   :  { %v940_v34 = vadd.f32 %v5443_v61, %v938_v32 }
 0x3d3   :  { %v944_v35 = vsel %vm587_vm10, %v940_v34, -inf }
 0x3d4   :  { %945 = vmax.xlane.f32.xlu1 %v944_v35 }
 0x3d6   :  { %v935_v36 = vpop.f32.mrf.mxu1 }
 0x3d8   :  { %849 = vrot.lane.b32.xlu0 %v6615_v29, %s6260_s15 }
 0x3f5   :  { %942 = vmax.xlane.f32.xlu2 %v941_v38 }
 0x40d   :  { %v590_v39 = vpop.xlane.xlu2 %589 }
 0x40e   :  { %v594_v40 = vsub.f32 %v585_v58, %v590_v39 }
 0x410   :  { %v596_v41 = vmul.f32 1.442695, %v594_v40 }
 0x412   :  { %5465 = vpow2.f32 %v596_v41 }
 0x418   :  { %v6623_v42 = vpop.eup %5465 }
 0x419   :  { %v600_v43 = vsel %vm587_vm10, %v6623_v42, 0.0 }
 0x41a   :  { %601 = vadd.xlane.f32.xlu0 %v600_v43 }
 0x41d   :  { %v593_v44 = vpop.xlane.xlu1 %592 }
 0x41e   :  { %v595_v45 = vsub.f32 %v586_v2, %v593_v44 }
 0x41f   :  { %v705_v46 = vpop.xlane.xlu0 %704 }
 0x420   :  { %v598_v47 = vmul.f32 1.442695, %v595_v45  ;;  %v709_v48 = vsub.f32 %v701_v4, %v705_v46 }
 0x422   :  { %5467 = vpow2.f32 %v598_v47  ;;  %v711_v49 = vmul.f32 1.442695, %v709_v48 }
 0x424   :  { %5469 = vpow2.f32 %v711_v49 }
 0x427   :  { %v708_v50 = vpop.xlane.xlu2 %707 }
 0x428   :  { %v6627_v51 = vpop.eup %5467  ;;  %v710_v52 = vsub.f32 %v702_v13, %v708_v50 }
 0x429   :  { %v603_v53 = vsel %vm587_vm10, %v6627_v51, 0.0 }
 0x42a   :  { %v6631_v54 = vpop.eup %5469  ;;  %v713_v55 = vmul.f32 1.442695, %v710_v52  ;;  %604 = vadd.xlane.f32.xlu2 %v603_v53 }
 0x42b   :  { %v715_v56 = vsel %vm587_vm10, %v6631_v54, 0.0 }
 0x42c   :  { %5471 = vpow2.f32 %v713_v55  ;;  %716 = vadd.xlane.f32.xlu1 %v715_v56 }
 0x42f   :  { %v827_v57 = vpop.xlane.xlu1 %826  ;;  %v731_v58 = vpop.permute.xlu2 %730 }
 0x430   :  { %v831_v59 = vsub.f32 %v823_v18, %v827_v57  ;;  %v736_v60 = vsel %vm617_vm8, %v731_v58, 0 }
 0x431   :  { %745 = vmatpush.bf16.msrb.mxu2 %v736_v60 }
 0x432   :  { %v6636_v61 = vpop.eup %5471  ;;  %v833_v62 = vmul.f32 1.442695, %v831_v59 }
 0x433   :  { %v718_v63 = vsel %vm587_vm10, %v6636_v61, 0.0 }
 0x434   :  { %5473 = vpow2.f32 %v833_v62  ;;  %719 = vadd.xlane.f32.xlu0 %v718_v63 }
 0x437   :  { %v830_v0 = vpop.xlane.xlu0 %829 }
 0x438   :  { %v832_v1 = vsub.f32 %v824_v24, %v830_v0 }
 0x43a   :  { %v5474_v2 = vpop.eup %5473  ;;  %v835_v3 = vmul.f32 1.442695, %v832_v1 }
 0x43b   :  { %v837_v4 = vsel %vm587_vm10, %v5474_v2, 0.0 }
 0x43c   :  { %5475 = vpow2.f32 %v835_v3  ;;  %838 = vadd.xlane.f32.xlu0 %v837_v4 }
 0x442   :  { %v6642_v7 = vpop.eup %5475  ;;  %870 = vrot.lane.b32.xlu2 %v753_v6, %s6260_s15 }
 0x443   :  { %v840_v10 = vsel %vm587_vm10, %v6642_v7, 0.0 }
 0x444   :  { %841 = vadd.xlane.f32.xlu0 %v840_v10 }
 0x445   :  { %754 = vrot.lane.b32.xlu1 %v753_v6, %s6261_s7 }
 0x447   :  { %v946_v12 = vpop.xlane.xlu1 %945 }
 0x448   :  { %v948_v13 = vsub.f32 %v940_v34, %v946_v12 }
 0x44a   :  { %v951_v14 = vmul.f32 1.442695, %v948_v13  ;;  %v850_v22 = vpop.permute.xlu0 %849 }
 0x44b   :  { %v855_v27 = vsel %vm617_vm8, %v850_v22, 0  ;;  %v5248_v22 = vld [vmem:[%s8255_s10 + $0x18] sm:$0xff] }
 0x44c   :  { %5477 = vpow2.f32 %v951_v14  ;;  %1083 = vmatpush.bf16.msra.mxu0 %v5248_v22 }
 0x452   :  { %v6651_v33 = vpop.eup %5477 }
 0x453   :  { %v956_v17 = vsel %vm587_vm10, %v6651_v33, 0.0 }
 0x458   :  { %965 = vrot.lane.b32.xlu0 %v6615_v29, %s6262_s19 }
 0x460   :  { %986 = vrot.lane.b32.xlu0 %v753_v6, %s6262_s19 }
 0x468   :  { %v943_v15 = vpop.xlane.xlu2 %942 }
 0x469   :  { %v947_v16 = vsub.f32 %v939_v20, %v943_v15 }
 0x46b   :  { %v949_v18 = vmul.f32 1.442695, %v947_v16  ;;  %957 = vadd.xlane.f32.xlu2 %v956_v17 }
 0x46d   :  { %5479 = vpow2.f32 %v949_v18 }
 0x473   :  { %v6655_v19 = vpop.eup %5479 }
 0x474   :  { %v953_v21 = vsel %vm587_vm10, %v6655_v19, 0.0 }
 0x475   :  { %954 = vadd.xlane.f32.xlu1 %v953_v21 }
 0x48d   :  { %v602_v23 = vpop.xlane.xlu0 %601 }
 0x48e   :  { %5481 = vrcp.f32 %v602_v23  ;;  %v5247_v23 = vld [vmem:[%s8255_s10 + $0x10] sm:$0xff] }
 0x48f   :  { %1084 = vmatpush.bf16.msra.mxu0 %v5247_v23 }
 0x494   :  { %v5482_v24 = vpop.eup %5481 }
 0x495   :  { %v608_v25 = vmul.f32 %v5482_v24, %v6623_v42  ;;  %v5246_v24 = vld [vmem:[%s8255_s10 + $0x8] sm:$0xff] }
 0x496   :  { %1085 = vmatpush.bf16.msra.mxu0 %v5246_v24  ;;  %v5446_v24 = vld [vmem:[#allocation16] ss:$0 sm:$0xff] }
 0x497   :  { %v610_v26 = vpack.c.bf16 %v608_v25, %v608_v25  ;;  %v5245_v25 = vld [vmem:[%s8255_s10] sm:$0xff] }
 0x499   :  { %4744 = vmatmul.msk.bf16.vlgmr.msra.gmra.mxu2 %vm587_vm10, %v610_v26 }
 0x49a   :  { %864 = vmatpush.bf16.msra.mxu2 %v855_v27  ;;  %1086 = vmatpush.bf16.msra.mxu0 %v5245_v25 }
 0x49d   :  { %v605_v28 = vpop.xlane.xlu2 %604 }
 0x49e   :  { %5483 = vrcp.f32 %v605_v28 }
 0x49f   :  { %v717_v29 = vpop.xlane.xlu1 %716 }
 0x4a0   :  { %5485 = vrcp.f32 %v717_v29 }
 0x4a4   :  { %v5484_v30 = vpop.eup %5483 }
 0x4a5   :  { %v609_v31 = vmul.f32 %v5484_v30, %v6627_v51  ;;  %v871_v40 = vpop.permute.xlu2 %870 }
 0x4a6   :  { %v5486_v32 = vpop.eup %5485  ;;  %v876_v45 = vsel %vm617_vm8, %v871_v40, 0 }
 0x4a7   :  { %v611_v34 = vpack.c.bf16 %v609_v31, %v609_v31  ;;  %v723_v35 = vmul.f32 %v5486_v32, %v6631_v54  ;;  %v720_v36 = vpop.xlane.xlu0 %719 }
 0x4a8   :  { %5487 = vrcp.f32 %v720_v36 }
 0x4a9   :  { %4745 = vmatmul.msk.bf16.vlgmr.msra.gmra.mxu3 %vm587_vm10, %v611_v34  ;;  %v725_v37 = vpack.c.bf16 %v723_v35, %v723_v35 }
 0x4ab   :  { %4748 = vmatmul.msk.bf16.vlgmr.msrb.gmra.mxu2 %vm587_vm10, %v725_v37 }
 0x4ae   :  { %v5488_v38 = vpop.eup %5487 }
 0x4af   :  { %v839_v20 = vpop.xlane.xlu0 %838  ;;  %v724_v41 = vmul.f32 %v5488_v38, %v6636_v61 }
 0x4b0   :  { %5489 = vrcp.f32 %v839_v20 }
 0x4b1   :  { %v726_v47 = vpack.c.bf16 %v724_v41, %v724_v41 }
 0x4b6   :  { %v5490_v39 = vpop.eup %5489 }
 0x4b7   :  { %v845_v42 = vmul.f32 %v5490_v39, %v5474_v2  ;;  %v755_v43 = vpop.permute.xlu1 %754  ;;  %v842_v48 = vpop.xlane.xlu0 %841 }
 0x4b8   :  { %v760_v44 = vsel %vm617_vm8, %v755_v43, 0  ;;  %5491 = vrcp.f32 %v842_v48 }
 0x4b9   :  { %v847_v46 = vpack.c.bf16 %v845_v42, %v845_v42  ;;  %769 = vmatpush.bf16.msrb.mxu3 %v760_v44  ;;  %v5444_v42 = vld [vmem:[#allocation13] ss:$0 sm:$0xff] }
 0x4bb   :  { %4752 = vmatmul.msk.bf16.vlgmr.msra.gmra.mxu2 %vm587_vm10, %v847_v46 }
 0x4bc   :  { %4749 = vmatmul.msk.bf16.vlgmr.msrb.gmra.mxu3 %vm587_vm10, %v726_v47 }
 0x4bd   :  { %885 = vmatpush.bf16.msra.mxu3 %v876_v45 }
 0x4be   :  { %v5492_v49 = vpop.eup %5491 }
 0x4bf   :  { %v846_v50 = vmul.f32 %v5492_v49, %v6642_v7 }
 0x4c1   :  { %v848_v51 = vpack.c.bf16 %v846_v50, %v846_v50 }
 0x4ca   :  { %v966_v52 = vpop.permute.xlu0 %965 }
 0x4cb   :  { %v971_v53 = vsel %vm617_vm8, %v966_v52, 0 }
 0x4cc   :  { %4753 = vmatmul.msk.bf16.vlgmr.msra.gmra.mxu3 %vm587_vm10, %v848_v51  ;;  %980 = vmatpush.bf16.msrb.mxu2 %v971_v53 }
 0x4d2   :  { %v987_v54 = vpop.permute.xlu0 %986 }
 0x4d3   :  { %v992_v55 = vsel %vm617_vm8, %v987_v54, 0 }
 0x4d4   :  { %1001 = vmatpush.bf16.msrb.mxu3 %v992_v55 }
 0x4de   :  { %v958_v56 = vpop.xlane.xlu2 %957 }
 0x4df   :  { %5493 = vrcp.f32 %v958_v56 }
 0x4e5   :  { %v5494_v57 = vpop.eup %5493 }
 0x4e6   :  { %v962_v58 = vmul.f32 %v5494_v57, %v6651_v33 }
 0x4e8   :  { %v964_v59 = vpack.c.bf16 %v962_v58, %v962_v58  ;;  %v955_v60 = vpop.xlane.xlu1 %954 }
 0x4e9   :  { %5495 = vrcp.f32 %v955_v60  ;;  %v5251_v60 = vld [vmem:[#allocation17 + $0x10] sm:$0xff] }
 0x4ea   :  { %4757 = vmatmul.msk.bf16.vlgmr.msrb.gmra.mxu3 %vm587_vm10, %v964_v59 }
 0x4ef   :  { %v5496_v61 = vpop.eup %5495 }
 0x4f0   :  { %v961_v62 = vmul.f32 %v5496_v61, %v6655_v19  ;;  %v5250_v61 = vld [vmem:[#allocation17 + $0x8] sm:$0xff] }
 0x4f2   :  { %v963_v63 = vpack.c.bf16 %v961_v62, %v961_v62 }
 0x4f4   :  { %4756 = vmatmul.msk.bf16.vlgmr.msrb.gmra.mxu2 %vm587_vm10, %v963_v63 }
 0x51c   :  { %v630_v0 = vpop.f32.mrf.mxu2 }
 0x524   :  { %v632_v1 = vpop.f32.mrf.mxu2 }
 0x525   :  { %v5249_v1 = vld [vmem:[#allocation17] sm:$0xff] }
 0x52c   :  { %v649_v2 = vpop.f32.mrf.mxu3 }
 0x52e   :  { %v747_v3 = vpop.f32.mrf.mxu2 }
 0x534   :  { %v651_v4 = vpop.f32.mrf.mxu3 }
 0x536   :  { %v749_v5 = vpop.f32.mrf.mxu2 }
 0x53e   :  { %v866_v6 = vpop.f32.mrf.mxu2 }
 0x53f   :  { %v771_v7 = vpop.f32.mrf.mxu3 }
 0x540   :  { %v5410_v10 = vpack.i.bf16 %v771_v7, %v747_v3 }
 0x542   :  { %5411 = vrot.lane.b32.xlu0 %v5410_v10, %s6236_s11 }
 0x546   :  { %v868_v12 = vpop.f32.mrf.mxu2 }
 0x547   :  { %v773_v13 = vpop.f32.mrf.mxu3 }
 0x54f   :  { %v887_v14 = vpop.f32.mrf.mxu3 }
 0x550   :  { %v5415_v33 = vpack.i.bf16 %v887_v14, %v866_v6 }
 0x552   :  { %5416 = vrot.lane.b32.xlu0 %v5415_v33, %s6259_s16 }
 0x557   :  { %v889_v15 = vpop.f32.mrf.mxu3 }
 0x56d   :  { %v1003_v16 = vpop.f32.mrf.mxu3 }
 0x575   :  { %v1005_v17 = vpop.f32.mrf.mxu3 }
 0x577   :  { %v982_v18 = vpop.f32.mrf.mxu2 }
 0x578   :  { %v5420_v19 = vpack.i.bf16 %v1003_v16, %v982_v18 }
 0x57a   :  { %5421 = vrot.lane.b32.xlu1 %v5420_v19, %s6258_s28  ;;  %v5445_v19 = vld [vmem:[#allocation14] ss:$0 sm:$0xff] }
 0x57f   :  { %v984_v21 = vpop.f32.mrf.mxu2 }
 0x5b4   :  { %v5412_v26 = vpop.permute.xlu0 %5411 }
 0x5b5   :  { %v5414_v28 = vunpack.i.h.bf16 %v5412_v26  ;;  %v5413_v29 = vunpack.i.l.bf16 %v5412_v26 }
 0x5b7   :  { %v1032_v34 = vsel %vm539_vm9, %v649_v2, %v5414_v28  ;;  %v1031_v35 = vsel %vm539_vm9, %v630_v0, %v5413_v29 }
 0x5c4   :  { %v5417_v27 = vpop.permute.xlu0 %5416 }
 0x5c5   :  { %v5419_v30 = vunpack.i.h.bf16 %v5417_v27  ;;  %v5418_v31 = vunpack.i.l.bf16 %v5417_v27 }
 0x5c7   :  { %v1035_v20 = vsel %vm1033_vm11, %v1032_v34, %v5419_v30  ;;  %v1034_v38 = vsel %vm1033_vm11, %v1031_v35, %v5418_v31  ;;  %v5260_v31 = vld [vmem:[%s8256_s17 + $0x38] sm:$0xff]  ;;  %v5258_v34 = vld [vmem:[%s8256_s17 + $0x28] sm:$0xff]  ;;  %v5257_v35 = vld [vmem:[%s8256_s17 + $0x20] sm:$0xff] }
 0x5c8   :  { %1292 = vmatpush.bf16.msra.mxu2 %v5260_v31  ;;  %v4834_v31 = vld [vmem:[#allocation20 + $0x10] sm:$0xf] }
 0x5ec   :  { %v5422_v32 = vpop.permute.xlu1 %5421 }
 0x5ed   :  { %v5424_v36 = vunpack.i.h.bf16 %v5422_v32  ;;  %v5423_v37 = vunpack.i.l.bf16 %v5422_v32  ;;  %v5259_v32 = vld [vmem:[%s8256_s17 + $0x30] sm:$0xff] }
 0x5ee   :  { %1293 = vmatpush.bf16.msra.mxu2 %v5259_v32  ;;  %v5264_v32 = vld [vmem:[#allocation20 + $0x14] sm:$0xf0] }
 0x5ef   :  { %v1038_v39 = vsel %vm1036_vm12, %v1035_v20, %v5424_v36  ;;  %v1037_v40 = vsel %vm1036_vm12, %v1034_v38, %v5423_v37  ;;  %v5256_v36 = vld [vmem:[%s8256_s17 + $0x18] sm:$0xff]  ;;  %v5255_v37 = vld [vmem:[%s8256_s17 + $0x10] sm:$0xff]  ;;  %v5254_v20 = vld [vmem:[%s8256_s17 + $0x8] sm:$0xff] }
 0x5f0   :  { %v1039_v41 = vpack.c.bf16 %v1038_v39, %v1037_v40  ;;  %v5447_v38 = vld [vmem:[#allocation19] ss:$0 sm:$0xff]  ;;  %v5253_v39 = vld [vmem:[%s8256_s17] sm:$0xff] }
 0x5f2   :  { %4774 = vmatmul.msk.bf16.vlgmr.msra.gmra.mxu0 %vm384_vm0, %v1039_v41  ;;  %1294 = vmatpush.bf16.msra.mxu2 %v5258_v34  ;;  %v5263_v34 = vld [vmem:[#allocation20 + $0x14] sm:$0xf] }
 0x5f6   :  { %1295 = vmatpush.bf16.msra.mxu2 %v5257_v35  ;;  %v4835_v35 = vor.u32 %v5264_v32, %v4834_v31 }
 0x5fa   :  { %1296 = vmatpush.bf16.msra.mxu2 %v5256_v36  ;;  %v4836_v36 = vld [vmem:[#allocation20 + $0x18] sm:$0xf0] }
 0x5fe   :  { %1297 = vmatpush.bf16.msra.mxu2 %v5255_v37 }
 0x602   :  { %1298 = vmatpush.bf16.msra.mxu2 %v5254_v20  ;;  %v4839_v20 = vor.u32 %v5263_v34, %v4836_v36 }
 0x606   :  { %1299 = vmatpush.bf16.msra.mxu2 %v5253_v39  ;;  %v4826_v39 = vld [vmem:[#allocation20] sm:$0xf] }
 0x66f   :  { %v1088_v43 = vpop.f32.mrf.mxu0 }
 0x670   :  { %v1089_v44 = vadd.f32 %v5444_v42, %v1088_v43 }
 0x672   :  { %v1093_v45 = vadd.f32 %v1089_v44, %v6562_v8 }
 0x674   :  { %v1097_v46 = vsel %vm384_vm0, %v1093_v45, 0.0 }
 0x675   :  { %1098 = vadd.xlane.f32.xlu0 %v1097_v46 }
 0x677   :  { %v1090_v47 = vpop.f32.mrf.mxu0 }
 0x678   :  { %v1091_v48 = vadd.f32 %v5444_v42, %v1090_v47 }
 0x67a   :  { %v1094_v49 = vadd.f32 %v1091_v48, %v6564_v9  ;;  %v5252_v9 = vld [vmem:[#allocation17 + $0x18] sm:$0xff] }
 0x67b   :  { %1195 = vmatpush.bf16.msra.mxu1 %v5252_v9 }
 0x67c   :  { %v1100_v50 = vsel %vm384_vm0, %v1094_v49, 0.0 }
 0x67d   :  { %1101 = vadd.xlane.f32.xlu2 %v1100_v50 }
 0x67f   :  { %1196 = vmatpush.bf16.msra.mxu1 %v5251_v60 }
 0x683   :  { %1197 = vmatpush.bf16.msra.mxu1 %v5250_v61  ;;  %v5448_v61 = vld [vmem:[%s8257_s3] ss:$0 sm:$0xff] }
 0x687   :  { %1198 = vmatpush.bf16.msra.mxu1 %v5249_v1 }
 0x6e8   :  { %v1099_v51 = vpop.xlane.xlu0 %1098 }
 0x6e9   :  { %v1103_v52 = vmul.f32 %v1099_v51, %v6544_v11 }
 0x6eb   :  { %v1105_v53 = vsub.f32 %v1093_v45, %v1103_v52 }
 0x6ed   :  { %v1107_v54 = vmul.f32 %v1105_v53, %v1105_v53 }
 0x6ef   :  { %v1109_v55 = vsel %vm384_vm0, %v1107_v54, 0.0 }
 0x6f0   :  { %v1102_v56 = vpop.xlane.xlu2 %1101  ;;  %1110 = vadd.xlane.f32.xlu2 %v1109_v55 }
 0x6f1   :  { %v1104_v8 = vmul.f32 %v1102_v56, %v6544_v11 }
 0x6f3   :  { %v1106_v57 = vsub.f32 %v1094_v49, %v1104_v8 }
 0x6f5   :  { %v1108_v58 = vmul.f32 %v1106_v57, %v1106_v57 }
 0x6f7   :  { %v1112_v59 = vsel %vm384_vm0, %v1108_v58, 0.0 }
 0x6f8   :  { %1113 = vadd.xlane.f32.xlu2 %v1112_v59 }
 0x763   :  { %v1111_v62 = vpop.xlane.xlu2 %1110 }
 0x764   :  { %v1115_v63 = vmul.f32 %v1111_v62, %v6544_v11 }
 0x766   :  { %v1117_v0 = vadd.f32 1e-12, %v1115_v63 }
 0x768   :  { %5497 = vrsqrt.f32 %v1117_v0  ;;  %vm1125_vm14 = vweird.f32 %v1117_v0 }
 0x76b   :  { %v1114_v2 = vpop.xlane.xlu2 %1113 }
 0x76c   :  { %v1116_v3 = vmul.f32 %v1114_v2, %v6544_v11 }
 0x76e   :  { %v5498_v4 = vpop.eup %5497  ;;  %v1118_v5 = vadd.f32 1e-12, %v1116_v3 }
 0x76f   :  { %v1120_v6 = vmul.f32 %v5498_v4, %v1117_v0  ;;  %vm1126_vm13 = vweird.f32 %v5498_v4 }
 0x770   :  { %5499 = vrsqrt.f32 %v1118_v5  ;;  %vm1127_vm15 = vmor %vm1125_vm14, %vm1126_vm13  ;;  %vm1135_vm2 = vweird.f32 %v1118_v5 }
 0x771   :  { %v1121_v7 = vmul.f32 %v5498_v4, %v1120_v6 }
 0x773   :  { %v1122_v10 = vmul.f32 0.5, %v1121_v7 }
 0x775   :  { %v1123_v12 = vsub.f32 1.5, %v1122_v10 }
 0x776   :  { %v5500_v13 = vpop.eup %5499 }
 0x777   :  { %v1124_v14 = vmul.f32 %v5498_v4, %v1123_v12  ;;  %v1130_v33 = vmul.f32 %v5500_v13, %v1118_v5  ;;  %vm1136_vm1 = vweird.f32 %v5500_v13 }
 0x778   :  { %vm1137_vm3 = vmor %vm1135_vm2, %vm1136_vm1 }
 0x779   :  { %v1131_v15 = vmul.f32 %v5500_v13, %v1130_v33  ;;  %v1128_v16 = vsel %vm1127_vm15, %v5498_v4, %v1124_v14 }
 0x77a   :  { %v1139_v21 = vmul.f32 %v1128_v16, %v1105_v53 }
 0x77b   :  { %v1132_v17 = vmul.f32 0.5, %v1131_v15 }
 0x77c   :  { %v1144_v25 = vmul.f32 %v5445_v19, %v1139_v21  ;;  %v5267_v21 = vld [vmem:[#allocation20 + $0x34] sm:$0xf] }
 0x77d   :  { %v1133_v18 = vsub.f32 1.5, %v1132_v17 }
 0x77e   :  { %v1149_v28 = vadd.f32 %v5446_v24, %v1144_v25  ;;  %v4842_v25 = vld [vmem:[#allocation20 + $0x20] sm:$0xf] }
 0x77f   :  { %v1134_v22 = vmul.f32 %v5500_v13, %v1133_v18  ;;  %v4850_v18 = vld [vmem:[#allocation20 + $0x30] sm:$0xf] }
 0x781   :  { %v1138_v23 = vsel %vm1137_vm3, %v5500_v13, %v1134_v22 }
 0x782   :  { %v1140_v26 = vmul.f32 %v1138_v23, %v1106_v57  ;;  %v4852_v23 = vld [vmem:[#allocation20 + $0x38] sm:$0xf0] }
 0x784   :  { %v1145_v27 = vmul.f32 %v5445_v19, %v1140_v26  ;;  %v5268_v19 = vld [vmem:[#allocation20 + $0x34] sm:$0xf0]  ;;  %v5266_v26 = vld [vmem:[#allocation20 + $0x24] sm:$0xf0] }
 0x785   :  { %v4851_v22 = vor.u32 %v5268_v19, %v4850_v18 }
 0x786   :  { %v1150_v29 = vadd.f32 %v5446_v24, %v1145_v27  ;;  %v4855_v24 = vor.u32 %v5267_v21, %v4852_v23  ;;  %v5265_v27 = vld [vmem:[#allocation20 + $0x24] sm:$0xf] }
 0x787   :  { %1426 = vmatpush.bf16.msra.mxu3 %v4851_v22 }
 0x788   :  { %v1151_v30 = vpack.c.bf16 %v1150_v29, %v1149_v28  ;;  %1440 = vmatpush.bf16.msrb.mxu0 %v4855_v24 }
 0x78a   :  { %4791 = vmatmul.msk.bf16.vlgmr.msra.gmra.mxu1 %vm384_vm0, %v1151_v30 }
 0x807   :  { %v1200_v40 = vpop.f32.mrf.mxu1 }
 0x808   :  { %v1201_v41 = vadd.f32 %v5447_v38, %v1200_v40  ;;  %v5262_v40 = vld [vmem:[#allocation20 + $0x4] sm:$0xf0] }
 0x80a   :  { %v1205_v42 = vmul.f32 %v1201_v41, %v1201_v41 }
 0x80c   :  { %v1207_v43 = vmul.f32 %v1205_v42, %v1201_v41 }
 0x80e   :  { %v1209_v44 = vmul.f32 0.044715, %v1207_v43  ;;  %v4827_v43 = vor.u32 %v5262_v40, %v4826_v39 }
 0x80f   :  { %v1202_v45 = vpop.f32.mrf.mxu1 }
 0x810   :  { %v1211_v46 = vadd.f32 %v1209_v44, %v1201_v41  ;;  %v1203_v47 = vadd.f32 %v5447_v38, %v1202_v45  ;;  %v4828_v44 = vld [vmem:[#allocation20 + $0x8] sm:$0xf0] }
 0x812   :  { %v1213_v48 = vmul.f32 0.7978846, %v1211_v46  ;;  %v1206_v49 = vmul.f32 %v1203_v47, %v1203_v47 }
 0x814   :  { %v1208_v50 = vmul.f32 %v1206_v49, %v1203_v47  ;;  %5501 = vtanh.f32 %v1213_v48 }
 0x816   :  { %v1210_v51 = vmul.f32 0.044715, %v1208_v50 }
 0x818   :  { %v1212_v52 = vadd.f32 %v1210_v51, %v1203_v47 }
 0x81a   :  { %v1214_v53 = vmul.f32 0.7978846, %v1212_v52  ;;  %v5502_v54 = vpop.eup %5501 }
 0x81b   :  { %v1217_v55 = vadd.f32 1.0, %v5502_v54 }
 0x81c   :  { %5503 = vtanh.f32 %v1214_v53 }
 0x81d   :  { %v1219_v8 = vmul.f32 0.5, %v1217_v55 }
 0x81f   :  { %v1221_v59 = vmul.f32 %v1219_v8, %v1201_v41  ;;  %v5261_v41 = vld [vmem:[#allocation20 + $0x4] sm:$0xf] }
 0x820   :  { %v4831_v45 = vor.u32 %v5261_v41, %v4828_v44 }
 0x822   :  { %v5504_v56 = vpop.eup %5503 }
 0x823   :  { %v1218_v57 = vadd.f32 1.0, %v5504_v56 }
 0x825   :  { %v1220_v58 = vmul.f32 0.5, %v1218_v57 }
 0x827   :  { %v1222_v9 = vmul.f32 %v1220_v58, %v1203_v47 }
 0x829   :  { %v1223_v60 = vpack.c.bf16 %v1222_v9, %v1221_v59  ;;  %v5449_v9 = vld [vmem:[%s8258_s0] ss:$0 sm:$0xff] }
 0x82b   :  { %1300 = vmatmul.bf16.vlgmr.msra.gmra.mxu2 %v1223_v60 }
 0x8ae   :  { %v1301_v62 = vpop.f32.mrf.mxu2 }
 0x8af   :  { %v1302_v63 = vadd.f32 %v5448_v61, %v1301_v62 }
 0x8b1   :  { %v1306_v0 = vadd.f32 %v1302_v63, %v1149_v28  ;;  %v4843_v28 = vor.u32 %v5266_v26, %v4842_v25  ;;  %v5450_v63 = vld [vmem:[%s8259_s5] ss:$0 sm:$0xff] }
 0x8b3   :  { %v1310_v1 = vsel %vm384_vm0, %v1306_v0, 0.0  ;;  %1427 = vmatpush.bf16.msra.mxu3 %v4843_v28 }
 0x8b4   :  { %1311 = vadd.xlane.f32.xlu1 %v1310_v1 }
 0x8b6   :  { %v1303_v2 = vpop.f32.mrf.mxu2 }
 0x8b7   :  { %v1304_v3 = vadd.f32 %v5448_v61, %v1303_v2  ;;  %1428 = vmatpush.bf16.msra.mxu3 %v4835_v35 }
 0x8b9   :  { %v1307_v4 = vadd.f32 %v1304_v3, %v1150_v29  ;;  %v4844_v29 = vld [vmem:[#allocation20 + $0x28] sm:$0xf0] }
 0x8ba   :  { %v4847_v30 = vor.u32 %v5265_v27, %v4844_v29 }
 0x8bb   :  { %v1313_v5 = vsel %vm384_vm0, %v1307_v4, 0.0  ;;  %1429 = vmatpush.bf16.msra.mxu3 %v4827_v43 }
 0x8bc   :  { %1314 = vadd.xlane.f32.xlu2 %v1313_v5  ;;  %1441 = vmatpush.bf16.msrb.mxu0 %v4847_v30 }
 0x8c0   :  { %1442 = vmatpush.bf16.msrb.mxu0 %v4839_v20 }
 0x8c4   :  { %1443 = vmatpush.bf16.msrb.mxu0 %v4831_v45 }
 0x927   :  { %v1312_v6 = vpop.xlane.xlu1 %1311 }
 0x928   :  { %v1316_v7 = vmul.f32 %v1312_v6, %v6544_v11  ;;  %v1373_v6 = vld [vmem:[%s8260_s22] sm:$0x3] }
 0x92a   :  { %v6716_v10 = vsub.f32 %v1306_v0, %v1316_v7  ;;  %v1376_v7 = vperm.slane %v1373_v6, 1 }
 0x92c   :  { %v1320_v12 = vmul.f32 %v6716_v10, %v6716_v10 }
 0x92e   :  { %v1322_v13 = vsel %vm384_vm0, %v1320_v12, 0.0 }
 0x92f   :  { %v1315_v14 = vpop.xlane.xlu2 %1314  ;;  %1323 = vadd.xlane.f32.xlu2 %v1322_v13 }
 0x930   :  { %v1317_v33 = vmul.f32 %v1315_v14, %v6544_v11  ;;  %v1375_v14 = vperm.slane %v1373_v6, 0 }
 0x932   :  { %v6722_v15 = vsub.f32 %v1307_v4, %v1317_v33 }
 0x934   :  { %v1321_v16 = vmul.f32 %v6722_v15, %v6722_v15 }
 0x936   :  { %v1325_v17 = vsel %vm384_vm0, %v1321_v16, 0.0 }
 0x937   :  { %1326 = vadd.xlane.f32.xlu2 %v1325_v17 }
 0x9a2   :  { %v1324_v37 = vpop.xlane.xlu2 %1323 }
 0x9a3   :  { %v1328_v38 = vmul.f32 %v1324_v37, %v6544_v11 }
 0x9a5   :  { %v1330_v42 = vadd.f32 1e-12, %v1328_v38 }
 0x9a7   :  { %5505 = vrsqrt.f32 %v1330_v42  ;;  %vm1338_vm5 = vweird.f32 %v1330_v42 }
 0x9aa   :  { %v1327_v46 = vpop.xlane.xlu2 %1326 }
 0x9ab   :  { %v1329_v47 = vmul.f32 %v1327_v46, %v6544_v11 }
 0x9ad   :  { %v5506_v48 = vpop.eup %5505  ;;  %v1331_v49 = vadd.f32 1e-12, %v1329_v47 }
 0x9ae   :  { %v1333_v50 = vmul.f32 %v5506_v48, %v1330_v42  ;;  %vm1339_vm4 = vweird.f32 %v5506_v48 }
 0x9af   :  { %5507 = vrsqrt.f32 %v1331_v49  ;;  %vm1340_vm6 = vmor %vm1338_vm5, %vm1339_vm4  ;;  %vm1348_vm13 = vweird.f32 %v1331_v49 }
 0x9b0   :  { %v1334_v51 = vmul.f32 %v5506_v48, %v1333_v50 }
 0x9b2   :  { %v1335_v52 = vmul.f32 0.5, %v1334_v51 }
 0x9b4   :  { %v1336_v53 = vsub.f32 1.5, %v1335_v52 }
 0x9b5   :  { %v5508_v54 = vpop.eup %5507 }
 0x9b6   :  { %v1337_v55 = vmul.f32 %v5506_v48, %v1336_v53  ;;  %v1343_v56 = vmul.f32 %v5508_v54, %v1331_v49  ;;  %vm1349_vm7 = vweird.f32 %v5508_v54 }
 0x9b7   :  { %vm1350_vm14 = vmor %vm1348_vm13, %vm1349_vm7  ;;  %vm2844_vm7 = vcmask 1041409  }
 0x9b8   :  { %v1344_v8 = vmul.f32 %v5508_v54, %v1343_v56  ;;  %v1341_v57 = vsel %vm1340_vm6, %v5506_v48, %v1337_v55 }
 0x9b9   :  { %v1352_v60 = vmul.f32 %v1341_v57, %v6716_v10 }
 0x9ba   :  { %v1345_v58 = vmul.f32 0.5, %v1344_v8 }
 0x9bb   :  { %v1357_v0 = vmul.f32 %v5449_v9, %v1352_v60 }
 0x9bc   :  { %v1346_v59 = vsub.f32 1.5, %v1345_v58 }
 0x9bd   :  { %v6733_v3 = vadd.f32 %v5450_v63, %v1357_v0 }
 0x9be   :  { %v1347_v61 = vmul.f32 %v5508_v54, %v1346_v59  ;;  %v5822_v59 = vld [vmem:[#allocation5 + $0x1] ss:$0 sm:$0xff] }
 0x9c0   :  { %v1351_v62 = vsel %vm1350_vm14, %v5508_v54, %v1347_v61  ;;  %v5821_v54 = vld [vmem:[#allocation5] ss:$0 sm:$0xff] }
 0x9c1   :  { %v1353_v1 = vmul.f32 %v1351_v62, %v6722_v15 }
 0x9c3   :  { %v1358_v2 = vmul.f32 %v5449_v9, %v1353_v1 }
 0x9c5   :  { %v6735_v4 = vadd.f32 %v5450_v63, %v1358_v2 }
 0x9c7   :  { %v1364_v5 = vpack.c.bf16 %v6735_v4, %v6733_v3 }
 0x9c9   :  { %4856 = vmatmul.msk.bf16.vlgmr.msra.gmra.mxu3 %vm384_vm0, %v1364_v5  ;;  %4857 = vmatmul.msk.bf16.vlgmr.msrb.gmra.mxu0 %vm384_vm0, %v1364_v5 }
 0xa46   :  { %v1445_v10 = vpop.f32.mrf.mxu0 }
 0xa47   :  { %v1446_v12 = vadd.f32 %v1445_v10, %v1376_v7 }
 0xa49   :  { %v6742_v13 = vpack.c.bf16 %v1446_v12, %v1446_v12 }
 0xa4b   :  { %v1534_v33 = vsel %vm617_vm8, %v6742_v13, 0 }
 0xa4c   :  { %v1431_v15 = vpop.f32.mrf.mxu3  ;;  %1543 = vmatpush.bf16.msra.mxu0 %v1534_v33 }
 0xa4d   :  { %v1432_v16 = vadd.f32 %v1431_v15, %v1375_v14 }
 0xa4e   :  { %v1447_v26 = vpop.f32.mrf.mxu0 }
 0xa4f   :  { %v1450_v17 = vpack.c.bf16 %v1432_v16, %v1432_v16  ;;  %v1448_v27 = vadd.f32 %v1447_v26, %v1376_v7 }
 0xa51   :  { %v1453_v18 = vunpack.c.l.b16 %v1450_v17  ;;  %v6760_v28 = vpack.c.bf16 %v1448_v27, %v1448_v27 }
 0xa53   :  { %v1454_v19 = vpack.c.b16 %v1453_v18, %v1453_v18  ;;  %v1553_v31 = vsel %vm617_vm8, %v6760_v28, 0 }
 0xa54   :  { %v1433_v21 = vpop.f32.mrf.mxu3 }
 0xa55   :  { %v1434_v22 = vadd.f32 %v1433_v21, %v1375_v14  ;;  %1455 = vrot.lane.b32.xlu2 %v1454_v19, %s6242_s8 }
 0xa57   :  { %v1451_v23 = vpack.c.bf16 %v1434_v22, %v1434_v22  ;;  %v1643_v22 = vunpack.c.l.b16 %v6742_v13 }
 0xa59   :  { %v1477_v24 = vunpack.c.l.b16 %v1451_v23 }
 0xa5b   :  { %v1478_v25 = vpack.c.b16 %v1477_v24, %v1477_v24  ;;  %v6790_v24 = vpack.c.b16 %v1643_v22, %v1643_v22 }
 0xa5d   :  { %1593 = vrot.lane.b32.xlu1 %v1478_v25, %s6258_s28  ;;  %1479 = vrot.lane.b32.xlu0 %v1478_v25, %s6242_s8  ;;  %s8262_s8 = sld [smem:[#allocation41_spill]] }
 0xa5e   :  { %1591 = vrot.lane.b32.xlu2 %v1478_v25, %s6261_s7 }
 0xa65   :  { %1713 = vrot.lane.b32.xlu1 %v1478_v25, %s6260_s15  ;;  %1570 = vrot.lane.b32.xlu0 %v1454_v19, %s6258_s28 }
 0xa66   :  { %1715 = vrot.lane.b32.xlu2 %v1478_v25, %s6259_s16 }
 0xa6d   :  { %1806 = vrot.lane.b32.xlu1 %v1454_v19, %s6262_s19  ;;  %1568 = vrot.lane.b32.xlu0 %v1454_v19, %s6261_s7 }
 0xa6e   :  { %1808 = vrot.lane.b32.xlu2 %v1454_v19, %s6236_s11 }
 0xa75   :  { %1692 = vrot.lane.b32.xlu0 %v1454_v19, %s6259_s16 }
 0xa76   :  { %1829 = vrot.lane.b32.xlu2 %v1478_v25, %s6262_s19 }
 0xa7d   :  { %1690 = vrot.lane.b32.xlu0 %v1454_v19, %s6260_s15 }
 0xa85   :  { %1831 = vrot.lane.b32.xlu0 %v1478_v25, %s6236_s11 }
 0xaaf   :  { %v1456_v29 = vpop.permute.xlu2 %1455 }
 0xab0   :  { %v1461_v30 = vsel %vm539_vm9, %v1456_v29, 0 }
 0xab1   :  { %1470 = vmatpush.bf16.xpose.msrb.mxu1 %v1461_v30 }
 0xab8   :  { %4858 = vmatmul.msk.bf16.vlgmr.msrb.gmra.mxu1 %vm539_vm9, %v1450_v17  ;;  %v1592_v32 = vpop.permute.xlu2 %1591 }
 0xab9   :  { %1562 = vmatpush.bf16.msra.mxu1 %v1553_v31 }
 0xac0   :  { %v1716_v20 = vpop.permute.xlu2 %1715 }
 0xac1   :  { %v1721_v39 = vsel %vm539_vm9, %v1716_v20, 0 }
 0xac8   :  { %v1809_v42 = vpop.permute.xlu2 %1808 }
 0xac9   :  { %v1814_v45 = vsel %vm539_vm9, %v1809_v42, 0 }
 0xacf   :  { %v1594_v34 = vpop.permute.xlu1 %1593  ;;  %v1480_v35 = vpop.permute.xlu0 %1479 }
 0xad0   :  { %v1599_v36 = vsel %vm539_vm9, %v1594_v34, 0  ;;  %v1485_v37 = vsel %vm539_vm9, %v1480_v35, 0  ;;  %v1830_v51 = vpop.permute.xlu2 %1829 }
 0xad1   :  { %1494 = vmatpush.bf16.xpose.msrb.mxu3 %v1485_v37 }
 0xad7   :  { %v1571_v38 = vpop.permute.xlu0 %1570  ;;  %v1714_v47 = vpop.permute.xlu1 %1713 }
 0xad8   :  { %v1576_v40 = vsel %vm539_vm9, %v1571_v38, 0  ;;  %4859 = vmatmul.msk.bf16.vlgmr.msrb.gmra.mxu3 %vm539_vm9, %v1451_v23 }
 0xad9   :  { %1608 = vmatpush.bf16.xpose.msra.mxu3 %v1599_v36  ;;  %1585 = vmatpush.bf16.xpose.msrb.mxu2 %v1576_v40 }
 0xadf   :  { %v1569_v41 = vpop.permute.xlu0 %1568  ;;  %v1807_v50 = vpop.permute.xlu1 %1806 }
 0xae0   :  { %4862 = vmatmul.msk.bf16.vlgmr.msrb.gmra.mxu2 %vm539_vm9, %v1569_v41 }
 0xae1   :  { %1730 = vmatpush.bf16.xpose.msrb.mxu3 %v1721_v39 }
 0xae7   :  { %v1693_v43 = vpop.permute.xlu0 %1692 }
 0xae8   :  { %v1698_v44 = vsel %vm539_vm9, %v1693_v43, 0  ;;  %4863 = vmatmul.msk.bf16.vlgmr.msra.gmra.mxu3 %vm539_vm9, %v1592_v32 }
 0xae9   :  { %1707 = vmatpush.bf16.xpose.msra.mxu2 %v1698_v44 }
 0xaef   :  { %v1691_v46 = vpop.permute.xlu0 %1690 }
 0xaf0   :  { %4866 = vmatmul.msk.bf16.vlgmr.msra.gmra.mxu2 %vm539_vm9, %v1691_v46 }
 0xaf1   :  { %1823 = vmatpush.bf16.xpose.msrb.mxu2 %v1814_v45 }
 0xaf7   :  { %v1832_v48 = vpop.permute.xlu0 %1831 }
 0xaf8   :  { %v1837_v49 = vsel %vm539_vm9, %v1832_v48, 0  ;;  %4867 = vmatmul.msk.bf16.vlgmr.msrb.gmra.mxu3 %vm539_vm9, %v1714_v47 }
 0xaf9   :  { %1846 = vmatpush.bf16.xpose.msra.mxu3 %v1837_v49 }
 0xb00   :  { %4870 = vmatmul.msk.bf16.vlgmr.msrb.gmra.mxu2 %vm539_vm9, %v1807_v50 }
 0xb08   :  { %4871 = vmatmul.msk.bf16.vlgmr.msra.gmra.mxu3 %vm539_vm9, %v1830_v51 }
 0xb35   :  { %v1472_v52 = vpop.f32.mrf.mxu1 }
 0xb36   :  { %v1500_v53 = vmul.f32 0.25, %v1472_v52 }
 0xb38   :  { %v1502_v55 = vadd.f32 %v5821_v54, %v1500_v53  ;;  %v1667_v53 = vunpack.c.l.b16 %v6760_v28 }
 0xb3a   :  { %v1504_v56 = vsel %vm587_vm10, %v1502_v55, -inf }
 0xb3b   :  { %1505 = vmax.xlane.f32.xlu0 %v1504_v56  ;;  %v1668_v56 = vpack.c.b16 %v1667_v53, %v1667_v53 }
 0xb3d   :  { %v1474_v8 = vpop.f32.mrf.mxu1 }
 0xb5b   :  { %v1496_v57 = vpop.f32.mrf.mxu3 }
 0xb5c   :  { %v1501_v58 = vmul.f32 0.25, %v1496_v57 }
 0xb5e   :  { %v1503_v9 = vadd.f32 %v5822_v59, %v1501_v58 }
 0xb60   :  { %v1507_v60 = vsel %vm587_vm10, %v1503_v9, -inf }
 0xb61   :  { %1508 = vmax.xlane.f32.xlu1 %v1507_v60 }
 0xb63   :  { %v1498_v61 = vpop.f32.mrf.mxu3  ;;  %v1587_v62 = vpop.f32.mrf.mxu2 }
 0xb64   :  { %v1614_v63 = vmul.f32 0.25, %v1587_v62 }
 0xb66   :  { %v1616_v0 = vadd.f32 %v5821_v54, %v1614_v63 }
 0xb68   :  { %v1618_v1 = vsel %vm587_vm10, %v1616_v0, -inf }
 0xb69   :  { %1619 = vmax.xlane.f32.xlu2 %v1618_v1 }
 0xb6b   :  { %v1589_v2 = vpop.f32.mrf.mxu2  ;;  %v1610_v5 = vpop.f32.mrf.mxu3 }
 0xb6c   :  { %v1615_v6 = vmul.f32 0.25, %v1610_v5 }
 0xb6e   :  { %v6783_v7 = vadd.f32 %v5822_v59, %v1615_v6 }
 0xb70   :  { %v1621_v10 = vsel %vm587_vm10, %v6783_v7, -inf }
 0xb71   :  { %1622 = vmax.xlane.f32.xlu0 %v1621_v10 }
 0xb73   :  { %v1612_v12 = vpop.f32.mrf.mxu3  ;;  %v1709_v14 = vpop.f32.mrf.mxu2 }
 0xb74   :  { %v1736_v33 = vmul.f32 0.25, %v1709_v14 }
 0xb76   :  { %v1738_v15 = vadd.f32 %v5821_v54, %v1736_v33 }
 0xb78   :  { %v1740_v16 = vsel %vm587_vm10, %v1738_v15, -inf }
 0xb79   :  { %1741 = vmax.xlane.f32.xlu2 %v1740_v16 }
 0xb7b   :  { %v1711_v17 = vpop.f32.mrf.mxu2  ;;  %v1732_v18 = vpop.f32.mrf.mxu3 }
 0xb7c   :  { %v1737_v19 = vmul.f32 0.25, %v1732_v18 }
 0xb7e   :  { %v1739_v21 = vadd.f32 %v5822_v59, %v1737_v19 }
 0xb80   :  { %v1743_v23 = vsel %vm587_vm10, %v1739_v21, -inf }
 0xb81   :  { %1744 = vmax.xlane.f32.xlu1 %v1743_v23 }
 0xb83   :  { %v1734_v25 = vpop.f32.mrf.mxu3  ;;  %v1825_v26 = vpop.f32.mrf.mxu2 }
 0xb84   :  { %v1852_v35 = vmul.f32 0.25, %v1825_v26 }
 0xb85   :  { %1645 = vrot.lane.b32.xlu0 %v6790_v24, %s6261_s7 }
 0xb86   :  { %v1854_v13 = vadd.f32 %v5821_v54, %v1852_v35 }
 0xb88   :  { %v1856_v37 = vsel %vm587_vm10, %v1854_v13, -inf }
 0xb8b   :  { %v1827_v27 = vpop.f32.mrf.mxu2  ;;  %v1848_v29 = vpop.f32.mrf.mxu3 }
 0xb8c   :  { %v1853_v30 = vmul.f32 0.25, %v1848_v29 }
 0xb8e   :  { %v1855_v31 = vadd.f32 %v5822_v59, %v1853_v30 }
 0xb90   :  { %v1859_v32 = vsel %vm587_vm10, %v1855_v31, -inf }
 0xb91   :  { %1860 = vmax.xlane.f32.xlu2 %v1859_v32 }
 0xb93   :  { %v1850_v34 = vpop.f32.mrf.mxu3 }
 0xbae   :  { %v1506_v36 = vpop.xlane.xlu0 %1505 }
 0xbaf   :  { %v1510_v20 = vsub.f32 %v1502_v55, %v1506_v36  ;;  %1857 = vmax.xlane.f32.xlu0 %v1856_v37 }
 0xbb1   :  { %v1512_v38 = vmul.f32 1.442695, %v1510_v20 }
 0xbb3   :  { %5509 = vpow2.f32 %v1512_v38 }
 0xbb9   :  { %v6796_v39 = vpop.eup %5509 }
 0xbba   :  { %v1516_v40 = vsel %vm587_vm10, %v6796_v39, 0.0 }
 0xbbb   :  { %1517 = vadd.xlane.f32.xlu1 %v1516_v40 }
 0xbd4   :  { %v1509_v41 = vpop.xlane.xlu1 %1508  ;;  %1764 = vrot.lane.b32.xlu1 %v6790_v24, %s6260_s15 }
 0xbd5   :  { %v1511_v42 = vsub.f32 %v1503_v9, %v1509_v41 }
 0xbd7   :  { %v1514_v43 = vmul.f32 1.442695, %v1511_v42 }
 0xbd9   :  { %5511 = vpow2.f32 %v1514_v43 }
 0xbdc   :  { %v1620_v44 = vpop.xlane.xlu2 %1619 }
 0xbdd   :  { %v1624_v45 = vsub.f32 %v1616_v0, %v1620_v44 }
 0xbdf   :  { %v6802_v46 = vpop.eup %5511  ;;  %v1626_v47 = vmul.f32 1.442695, %v1624_v45 }
 0xbe0   :  { %v1519_v48 = vsel %vm587_vm10, %v6802_v46, 0.0 }
 0xbe1   :  { %5513 = vpow2.f32 %v1626_v47  ;;  %1520 = vadd.xlane.f32.xlu0 %v1519_v48 }
 0xbe4   :  { %v1623_v54 = vpop.xlane.xlu0 %1622 }
 0xbe5   :  { %v1625_v8 = vsub.f32 %v6783_v7, %v1623_v54 }
 0xbe7   :  { %v6806_v49 = vpop.eup %5513  ;;  %v1628_v58 = vmul.f32 1.442695, %v1625_v8 }
 0xbe8   :  { %v1630_v50 = vsel %vm587_vm10, %v6806_v49, 0.0 }
 0xbe9   :  { %1631 = vadd.xlane.f32.xlu2 %v1630_v50 }
 0xbec   :  { %v1742_v51 = vpop.xlane.xlu2 %1741 }
 0xbed   :  { %v1746_v52 = vsub.f32 %v1738_v15, %v1742_v51 }
 0xbef   :  { %v1748_v55 = vmul.f32 1.442695, %v1746_v52 }
 0xbf1   :  { %5515 = vpow2.f32 %v1748_v55 }
 0xbf2   :  { %5517 = vpow2.f32 %v1628_v58 }
 0xbf4   :  { %v1745_v9 = vpop.xlane.xlu1 %1744 }
 0xbf5   :  { %1785 = vrot.lane.b32.xlu0 %v1668_v56, %s6260_s15  ;;  %v1747_v61 = vsub.f32 %v1739_v21, %v1745_v9 }
 0xbf7   :  { %v1646_v57 = vpop.permute.xlu0 %1645  ;;  %v5516_v60 = vpop.eup %5515  ;;  %v1750_v28 = vmul.f32 1.442695, %v1747_v61 }
 0xbf8   :  { %v1651_v59 = vsel %vm617_vm8, %v1646_v57, 0  ;;  %v1752_v62 = vsel %vm587_vm10, %v5516_v60, 0.0  ;;  %v5518_v63 = vpop.eup %5517 }
 0xbf9   :  { %1660 = vmatpush.bf16.msrb.mxu0 %v1651_v59  ;;  %5519 = vpow2.f32 %v1750_v28  ;;  %v1633_v0 = vsel %vm587_vm10, %v5518_v63, 0.0 }
 0xbfe   :  { %1753 = vadd.xlane.f32.xlu1 %v1752_v62 }
 0xbff   :  { %v5520_v1 = vpop.eup %5519 }
 0xc00   :  { %v1755_v6 = vsel %vm587_vm10, %v5520_v1, 0.0 }
 0xc01   :  { %1669 = vrot.lane.b32.xlu2 %v1668_v56, %s6261_s7 }
 0xc04   :  { %v1861_v2 = vpop.xlane.xlu2 %1860 }
 0xc05   :  { %v1863_v5 = vsub.f32 %v1855_v31, %v1861_v2 }
 0xc06   :  { %1634 = vadd.xlane.f32.xlu1 %v1633_v0 }
 0xc07   :  { %v1866_v7 = vmul.f32 1.442695, %v1863_v5 }
 0xc09   :  { %5521 = vpow2.f32 %v1866_v7 }
 0xc0e   :  { %1756 = vadd.xlane.f32.xlu1 %v1755_v6 }
 0xc0f   :  { %v6818_v10 = vpop.eup %5521 }
 0xc10   :  { %v1871_v12 = vsel %vm587_vm10, %v6818_v10, 0.0 }
 0xc1f   :  { %1872 = vadd.xlane.f32.xlu0 %v1871_v12 }
 0xc22   :  { %v1858_v14 = vpop.xlane.xlu0 %1857 }
 0xc23   :  { %v1862_v33 = vsub.f32 %v1854_v13, %v1858_v14 }
 0xc25   :  { %v1864_v15 = vmul.f32 1.442695, %v1862_v33 }
 0xc27   :  { %5523 = vpow2.f32 %v1864_v15  ;;  %1880 = vrot.lane.b32.xlu1 %v6790_v24, %s6262_s19 }
 0xc2d   :  { %v6824_v16 = vpop.eup %5523 }
 0xc2e   :  { %v1518_v17 = vpop.xlane.xlu1 %1517  ;;  %v1868_v18 = vsel %vm587_vm10, %v6824_v16, 0.0 }
 0xc2f   :  { %5525 = vrcp.f32 %v1518_v17  ;;  %1869 = vadd.xlane.f32.xlu2 %v1868_v18  ;;  %1901 = vrot.lane.b32.xlu1 %v1668_v56, %s6262_s19  ;;  %v5272_v18 = vld [vmem:[#allocation22 + $0x18] sm:$0xff] }
 0xc30   :  { %1996 = vmatpush.bf16.msra.mxu2 %v5272_v18 }
 0xc35   :  { %v5526_v19 = vpop.eup %5525 }
 0xc36   :  { %v1524_v21 = vmul.f32 %v5526_v19, %v6796_v39  ;;  %v5271_v19 = vld [vmem:[#allocation22 + $0x10] sm:$0xff] }
 0xc37   :  { %1997 = vmatpush.bf16.msra.mxu2 %v5271_v19 }
 0xc38   :  { %v1526_v22 = vpack.c.bf16 %v1524_v21, %v1524_v21  ;;  %v5270_v21 = vld [vmem:[#allocation22 + $0x8] sm:$0xff] }
 0xc3a   :  { %4860 = vmatmul.msk.bf16.vlgmr.msra.gmra.mxu0 %vm587_vm10, %v1526_v22  ;;  %v5269_v22 = vld [vmem:[#allocation22] sm:$0xff] }
 0xc3b   :  { %1998 = vmatpush.bf16.msra.mxu2 %v5270_v21  ;;  %v5453_v21 = vld [vmem:[%s8263_s18] ss:$0 sm:$0xff] }
 0xc3f   :  { %1999 = vmatpush.bf16.msra.mxu2 %v5269_v22 }
 0xc46   :  { %v1765_v23 = vpop.permute.xlu1 %1764 }
 0xc47   :  { %v1770_v25 = vsel %vm617_vm8, %v1765_v23, 0 }
 0xc48   :  { %1779 = vmatpush.bf16.msra.mxu0 %v1770_v25 }
 0xc54   :  { %v1521_v24 = vpop.xlane.xlu0 %1520 }
 0xc55   :  { %5527 = vrcp.f32 %v1521_v24 }
 0xc5b   :  { %v5528_v26 = vpop.eup %5527 }
 0xc5c   :  { %v1525_v27 = vmul.f32 %v5528_v26, %v6802_v46  ;;  %v1632_v29 = vpop.xlane.xlu2 %1631 }
 0xc5d   :  { %5529 = vrcp.f32 %v1632_v29 }
 0xc5e   :  { %v1527_v30 = vpack.c.bf16 %v1525_v27, %v1525_v27 }
 0xc60   :  { %4861 = vmatmul.msk.bf16.vlgmr.msra.gmra.mxu1 %vm587_vm10, %v1527_v30 }
 0xc63   :  { %v5530_v31 = vpop.eup %5529 }
 0xc64   :  { %v1638_v32 = vmul.f32 %v5530_v31, %v6806_v49  ;;  %v1670_v34 = vpop.permute.xlu2 %1669 }
 0xc65   :  { %v1675_v35 = vsel %vm617_vm8, %v1670_v34, 0 }
 0xc66   :  { %v1640_v13 = vpack.c.bf16 %v1638_v32, %v1638_v32  ;;  %1684 = vmatpush.bf16.msrb.mxu1 %v1675_v35 }
 0xc67   :  { %v1786_v36 = vpop.permute.xlu0 %1785 }
 0xc68   :  { %v1791_v37 = vsel %vm617_vm8, %v1786_v36, 0  ;;  %4864 = vmatmul.msk.bf16.vlgmr.msrb.gmra.mxu0 %vm587_vm10, %v1640_v13 }
 0xc6a   :  { %1800 = vmatpush.bf16.msra.mxu1 %v1791_v37 }
 0xc71   :  { %v1754_v20 = vpop.xlane.xlu1 %1753 }
 0xc72   :  { %5531 = vrcp.f32 %v1754_v20 }
 0xc78   :  { %v5532_v38 = vpop.eup %5531 }
 0xc79   :  { %v1760_v39 = vmul.f32 %v5532_v38, %v5516_v60  ;;  %v1635_v40 = vpop.xlane.xlu1 %1634 }
 0xc7a   :  { %5533 = vrcp.f32 %v1635_v40 }
 0xc7b   :  { %v1762_v41 = vpack.c.bf16 %v1760_v39, %v1760_v39 }
 0xc7d   :  { %4868 = vmatmul.msk.bf16.vlgmr.msra.gmra.mxu0 %vm587_vm10, %v1762_v41 }
 0xc80   :  { %v5534_v42 = vpop.eup %5533 }
 0xc81   :  { %v1639_v43 = vmul.f32 %v5534_v42, %v5518_v63  ;;  %v1757_v45 = vpop.xlane.xlu1 %1756 }
 0xc82   :  { %5535 = vrcp.f32 %v1757_v45 }
 0xc83   :  { %v1641_v44 = vpack.c.bf16 %v1639_v43, %v1639_v43 }
 0xc85   :  { %4865 = vmatmul.msk.bf16.vlgmr.msrb.gmra.mxu1 %vm587_vm10, %v1641_v44 }
 0xc88   :  { %v5536_v46 = vpop.eup %5535 }
 0xc89   :  { %v1761_v47 = vmul.f32 %v5536_v46, %v5520_v1 }
 0xc8b   :  { %v1763_v48 = vpack.c.bf16 %v1761_v47, %v1761_v47 }
 0xc92   :  { %v1873_v49 = vpop.xlane.xlu0 %1872 }
 0xc93   :  { %5537 = vrcp.f32 %v1873_v49 }
 0xc95   :  { %4869 = vmatmul.msk.bf16.vlgmr.msra.gmra.mxu1 %vm587_vm10, %v1763_v48 }
 0xc99   :  { %v1881_v50 = vpop.permute.xlu1 %1880  ;;  %v5538_v52 = vpop.eup %5537 }
 0xc9a   :  { %v1886_v51 = vsel %vm617_vm8, %v1881_v50, 0  ;;  %v1877_v53 = vmul.f32 %v5538_v52, %v6818_v10 }
 0xc9b   :  { %1895 = vmatpush.bf16.msrb.mxu0 %v1886_v51 }
 0xc9c   :  { %v1879_v8 = vpack.c.bf16 %v1877_v53, %v1877_v53 }
 0xca1   :  { %v1902_v54 = vpop.permute.xlu1 %1901 }
 0xca2   :  { %v1907_v55 = vsel %vm617_vm8, %v1902_v54, 0  ;;  %v1870_v56 = vpop.xlane.xlu2 %1869 }
 0xca3   :  { %5539 = vrcp.f32 %v1870_v56  ;;  %1916 = vmatpush.bf16.msrb.mxu1 %v1907_v55 }
 0xca6   :  { %4873 = vmatmul.msk.bf16.vlgmr.msrb.gmra.mxu1 %vm587_vm10, %v1879_v8  ;;  %v5275_v8 = vld [vmem:[#allocation23 + $0x10] sm:$0xff] }
 0xca9   :  { %v5540_v57 = vpop.eup %5539 }
 0xcaa   :  { %v1876_v58 = vmul.f32 %v5540_v57, %v6824_v16  ;;  %v5274_v57 = vld [vmem:[#allocation23 + $0x8] sm:$0xff] }
 0xcac   :  { %v1878_v59 = vpack.c.bf16 %v1876_v58, %v1876_v58 }
 0xcae   :  { %4872 = vmatmul.msk.bf16.vlgmr.msrb.gmra.mxu0 %vm587_vm10, %v1878_v59 }
 0xcb7   :  { %v1545_v9 = vpop.f32.mrf.mxu0 }
 0xcbf   :  { %v1547_v60 = vpop.f32.mrf.mxu0 }
 0xcc0   :  { %v5273_v60 = vld [vmem:[#allocation23] sm:$0xff] }
 0xcdd   :  { %v1564_v61 = vpop.f32.mrf.mxu1 }
 0xce5   :  { %v1566_v62 = vpop.f32.mrf.mxu1  ;;  %v1662_v28 = vpop.f32.mrf.mxu0 }
 0xced   :  { %v1664_v63 = vpop.f32.mrf.mxu0 }
 0xcfa   :  { %v1781_v0 = vpop.f32.mrf.mxu0 }
 0xd02   :  { %v1686_v1 = vpop.f32.mrf.mxu1  ;;  %v1783_v2 = vpop.f32.mrf.mxu0 }
 0xd03   :  { %v5425_v5 = vpack.i.bf16 %v1686_v1, %v1662_v28 }
 0xd05   :  { %5426 = vrot.lane.b32.xlu1 %v5425_v5, %s6236_s11  ;;  %s8261_s11 = sld [smem:[#allocation40_spill]] }
 0xd0a   :  { %v1688_v6 = vpop.f32.mrf.mxu1 }
 0xd0b   :  { %v5451_v39 = vld [vmem:[%s8261_s11] ss:$0 sm:$0xff] }
 0xd12   :  { %v1802_v7 = vpop.f32.mrf.mxu1 }
 0xd13   :  { %v5430_v10 = vpack.i.bf16 %v1802_v7, %v1781_v0 }
 0xd15   :  { %5431 = vrot.lane.b32.xlu2 %v5430_v10, %s6259_s16 }
 0xd1a   :  { %v1804_v12 = vpop.f32.mrf.mxu1 }
 0xd23   :  { %v1918_v14 = vpop.f32.mrf.mxu1 }
 0xd2b   :  { %v1897_v33 = vpop.f32.mrf.mxu0  ;;  %v1920_v15 = vpop.f32.mrf.mxu1 }
 0xd2c   :  { %v5435_v16 = vpack.i.bf16 %v1918_v14, %v1897_v33 }
 0xd2e   :  { %5436 = vrot.lane.b32.xlu1 %v5435_v16, %s6258_s28  ;;  %v5452_v16 = vld [vmem:[%s8262_s8] ss:$0 sm:$0xff] }
 0xd33   :  { %v1899_v17 = vpop.f32.mrf.mxu0 }
 0xd6f   :  { %v5432_v26 = vpop.permute.xlu2 %5431 }
 0xd70   :  { %v5434_v30 = vunpack.i.h.bf16 %v5432_v26  ;;  %v5433_v31 = vunpack.i.l.bf16 %v5432_v26 }
 0xd77   :  { %v5427_v23 = vpop.permute.xlu1 %5426 }
 0xd78   :  { %v5429_v25 = vunpack.i.h.bf16 %v5427_v23  ;;  %v5428_v24 = vunpack.i.l.bf16 %v5427_v23 }
 0xd7a   :  { %v1947_v27 = vsel %vm539_vm9, %v1564_v61, %v5429_v25  ;;  %v1946_v29 = vsel %vm539_vm9, %v1545_v9, %v5428_v24 }
 0xd7b   :  { %v1948_v13 = vsel %vm1033_vm11, %v1946_v29, %v5433_v31  ;;  %v1949_v36 = vsel %vm1033_vm11, %v1947_v27, %v5434_v30  ;;  %v5284_v29 = vld [vmem:[%s8264_s25 + $0x38] sm:$0xff]  ;;  %v5283_v30 = vld [vmem:[%s8264_s25 + $0x30] sm:$0xff]  ;;  %v5282_v31 = vld [vmem:[%s8264_s25 + $0x28] sm:$0xff] }
 0xd7c   :  { %2205 = vmatpush.bf16.msra.mxu0 %v5284_v29 }
 0xd80   :  { %2206 = vmatpush.bf16.msra.mxu0 %v5283_v30  ;;  %v5296_v30 = vld [vmem:[%s8267_s23 + $0x54] sm:$0xf0] }
 0xd84   :  { %2207 = vmatpush.bf16.msra.mxu0 %v5282_v31  ;;  %v5130_v31 = vld [vmem:[%s8268_s9 + $0xe8] sm:$0xf] }
 0xda0   :  { %v5437_v32 = vpop.permute.xlu1 %5436 }
 0xda1   :  { %v5439_v34 = vunpack.i.h.bf16 %v5437_v32  ;;  %v5438_v35 = vunpack.i.l.bf16 %v5437_v32  ;;  %v5281_v32 = vld [vmem:[%s8264_s25 + $0x20] sm:$0xff] }
 0xda2   :  { %2208 = vmatpush.bf16.msra.mxu0 %v5281_v32  ;;  %v5332_v32 = vld [vmem:[%s8268_s9 + $0xf4] sm:$0xf0] }
 0xda3   :  { %v1950_v37 = vsel %vm1036_vm12, %v1948_v13, %v5438_v35  ;;  %v1951_v20 = vsel %vm1036_vm12, %v1949_v36, %v5439_v34  ;;  %v5280_v34 = vld [vmem:[%s8264_s25 + $0x18] sm:$0xff]  ;;  %v5279_v35 = vld [vmem:[%s8264_s25 + $0x10] sm:$0xff]  ;;  %v5278_v13 = vld [vmem:[%s8264_s25 + $0x8] sm:$0xff] }
 0xda4   :  { %v1952_v38 = vpack.c.bf16 %v1951_v20, %v1950_v37  ;;  %v5454_v36 = vld [vmem:[%s8265_s14] ss:$0 sm:$0xff] }
 0xda5   :  { %v5277_v20 = vld [vmem:[%s8264_s25] sm:$0xff] }
 0xda6   :  { %4890 = vmatmul.msk.bf16.vlgmr.msra.gmra.mxu2 %vm384_vm0, %v1952_v38  ;;  %2209 = vmatpush.bf16.msra.mxu0 %v5280_v34 }
 0xdaa   :  { %2210 = vmatpush.bf16.msra.mxu0 %v5279_v35  ;;  %v6907_v35 = vor.u32 %v5332_v32, %v5130_v31 }
 0xdae   :  { %2211 = vmatpush.bf16.msra.mxu0 %v5278_v13  ;;  %v4974_v13 = vld [vmem:[%s8267_s23 + $0x40] sm:$0xf] }
 0xdb2   :  { %2212 = vmatpush.bf16.msra.mxu0 %v5277_v20  ;;  %v5289_v20 = vld [vmem:[%s8267_s23 + $0x24] sm:$0xf] }
 0xdb6   :  { %2661 = vmatpush.bf16.msrb.mxu0 %v6907_v35 }
 0xe29   :  { %v2001_v40 = vpop.f32.mrf.mxu2 }
 0xe2a   :  { %v2002_v41 = vadd.f32 %v5451_v39, %v2001_v40 }
 0xe2c   :  { %v2006_v42 = vadd.f32 %v2002_v41, %v6733_v3 }
 0xe2e   :  { %v2010_v43 = vsel %vm384_vm0, %v2006_v42, 0.0 }
 0xe2f   :  { %2011 = vadd.xlane.f32.xlu0 %v2010_v43 }
 0xe31   :  { %v2003_v44 = vpop.f32.mrf.mxu2 }
 0xe32   :  { %v2004_v45 = vadd.f32 %v5451_v39, %v2003_v44 }
 0xe34   :  { %v2007_v46 = vadd.f32 %v2004_v45, %v6735_v4  ;;  %v5276_v4 = vld [vmem:[#allocation23 + $0x18] sm:$0xff] }
 0xe35   :  { %2108 = vmatpush.bf16.msrb.mxu3 %v5276_v4 }
 0xe36   :  { %v2013_v47 = vsel %vm384_vm0, %v2007_v46, 0.0 }
 0xe37   :  { %2014 = vadd.xlane.f32.xlu1 %v2013_v47 }
 0xe39   :  { %2109 = vmatpush.bf16.msrb.mxu3 %v5275_v8 }
 0xe3d   :  { %2110 = vmatpush.bf16.msrb.mxu3 %v5274_v57  ;;  %v5455_v57 = vld [vmem:[%s8266_s27] ss:$0 sm:$0xff] }
 0xe41   :  { %2111 = vmatpush.bf16.msrb.mxu3 %v5273_v60 }
 0xea2   :  { %v2012_v48 = vpop.xlane.xlu0 %2011 }
 0xea3   :  { %v2016_v49 = vmul.f32 %v2012_v48, %v6544_v11 }
 0xea5   :  { %v2018_v50 = vsub.f32 %v2006_v42, %v2016_v49 }
 0xea7   :  { %v2020_v51 = vmul.f32 %v2018_v50, %v2018_v50 }
 0xea9   :  { %v2022_v52 = vsel %vm384_vm0, %v2020_v51, 0.0 }
 0xeaa   :  { %v2015_v53 = vpop.xlane.xlu1 %2014  ;;  %2023 = vadd.xlane.f32.xlu0 %v2022_v52 }
 0xeab   :  { %v2017_v3 = vmul.f32 %v2015_v53, %v6544_v11 }
 0xead   :  { %v2019_v54 = vsub.f32 %v2007_v46, %v2017_v3 }
 0xeaf   :  { %v2021_v55 = vmul.f32 %v2019_v54, %v2019_v54 }
 0xeb1   :  { %v2025_v56 = vsel %vm384_vm0, %v2021_v55, 0.0 }
 0xeb2   :  { %2026 = vadd.xlane.f32.xlu0 %v2025_v56 }
 0xf1d   :  { %v2024_v58 = vpop.xlane.xlu0 %2023 }
 0xf1e   :  { %v2028_v59 = vmul.f32 %v2024_v58, %v6544_v11 }
 0xf20   :  { %v2030_v9 = vadd.f32 1e-12, %v2028_v59 }
 0xf22   :  { %5541 = vrsqrt.f32 %v2030_v9  ;;  %vm2038_vm9 = vweird.f32 %v2030_v9 }
 0xf25   :  { %v2027_v61 = vpop.xlane.xlu0 %2026 }
 0xf26   :  { %v2029_v62 = vmul.f32 %v2027_v61, %v6544_v11 }
 0xf28   :  { %v5542_v28 = vpop.eup %5541  ;;  %v2031_v63 = vadd.f32 1e-12, %v2029_v62 }
 0xf29   :  { %v2033_v0 = vmul.f32 %v5542_v28, %v2030_v9  ;;  %vm2039_vm8 = vweird.f32 %v5542_v28 }
 0xf2a   :  { %5543 = vrsqrt.f32 %v2031_v63  ;;  %vm2040_vm10 = vmor %vm2038_vm9, %vm2039_vm8  ;;  %vm2048_vm12 = vweird.f32 %v2031_v63 }
 0xf2b   :  { %v2034_v1 = vmul.f32 %v5542_v28, %v2033_v0 }
 0xf2d   :  { %v2035_v2 = vmul.f32 0.5, %v2034_v1 }
 0xf2f   :  { %v2036_v5 = vsub.f32 1.5, %v2035_v2 }
 0xf30   :  { %v5544_v6 = vpop.eup %5543 }
 0xf31   :  { %v2037_v7 = vmul.f32 %v5542_v28, %v2036_v5  ;;  %v2043_v10 = vmul.f32 %v5544_v6, %v2031_v63  ;;  %vm2049_vm11 = vweird.f32 %v5544_v6 }
 0xf32   :  { %vm2050_vm15 = vmor %vm2048_vm12, %vm2049_vm11 }
 0xf33   :  { %v2044_v12 = vmul.f32 %v5544_v6, %v2043_v10  ;;  %v2041_v14 = vsel %vm2040_vm10, %v5542_v28, %v2037_v7 }
 0xf34   :  { %v2052_v17 = vmul.f32 %v2041_v14, %v2018_v50 }
 0xf35   :  { %v2045_v33 = vmul.f32 0.5, %v2044_v12 }
 0xf36   :  { %v2057_v22 = vmul.f32 %v5452_v16, %v2052_v17  ;;  %v4998_v17 = vld [vmem:[%s8267_s23 + $0x68] sm:$0xf] }
 0xf37   :  { %v2046_v15 = vsub.f32 1.5, %v2045_v33 }
 0xf38   :  { %v2062_v24 = vadd.f32 %v5453_v21, %v2057_v22  ;;  %v4990_v22 = vld [vmem:[%s8267_s23 + $0x60] sm:$0xf] }
 0xf39   :  { %v2047_v18 = vmul.f32 %v5544_v6, %v2046_v15  ;;  %v5297_v15 = vld [vmem:[%s8267_s23 + $0x64] sm:$0xf] }
 0xf3b   :  { %v2051_v19 = vsel %vm2050_vm15, %v5544_v6, %v2047_v18 }
 0xf3c   :  { %v2053_v23 = vmul.f32 %v2051_v19, %v2019_v54  ;;  %v5300_v19 = vld [vmem:[%s8267_s23 + $0x74] sm:$0xf0] }
 0xf3e   :  { %v2058_v25 = vmul.f32 %v5452_v16, %v2053_v23  ;;  %v4992_v16 = vld [vmem:[%s8267_s23 + $0x70] sm:$0xf0]  ;;  %v5299_v23 = vld [vmem:[%s8267_s23 + $0x6c] sm:$0xf0] }
 0xf3f   :  { %v4995_v18 = vor.u32 %v5297_v15, %v4992_v16 }
 0xf40   :  { %v2063_v26 = vadd.f32 %v5453_v21, %v2058_v25  ;;  %v4999_v21 = vor.u32 %v5300_v19, %v4998_v17  ;;  %v4991_v25 = vor.u32 %v5299_v23, %v4990_v22  ;;  %v5294_v17 = vld [vmem:[%s8267_s23 + $0x4c] sm:$0xf]  ;;  %v5323_v22 = vld [vmem:[%s8268_s9 + $0xac] sm:$0xf0]  ;;  %v5321_v23 = vld [vmem:[%s8268_s9 + $0xa4] sm:$0xf] }
 0xf41   :  { %2405 = vmatpush.bf16.msrb.mxu2 %v4995_v18  ;;  %v4984_v18 = vld [vmem:[%s8267_s23 + $0x58] sm:$0xf0] }
 0xf42   :  { %v2064_v27 = vpack.c.bf16 %v2063_v26, %v2062_v24  ;;  %2419 = vmatpush.bf16.msra.mxu3 %v4999_v21  ;;  %2391 = vmatpush.bf16.msra.mxu1 %v4991_v25  ;;  %v4987_v19 = vor.u32 %v5294_v17, %v4984_v18  ;;  %v5090_v21 = vld [vmem:[%s8268_s9 + $0xa0] sm:$0xf]  ;;  %v5307_v17 = vld [vmem:[%s8268_s9 + $0x2c] sm:$0xf0] }
 0xf43   :  { %v6966_v25 = vor.u32 %v5323_v22, %v5090_v21  ;;  %v5028_v21 = vld [vmem:[%s8268_s9 + $0x30] sm:$0xf0] }
 0xf44   :  { %4907 = vmatmul.msk.bf16.vlgmr.msrb.gmra.mxu3 %vm384_vm0, %v2064_v27  ;;  %v4982_v27 = vld [vmem:[%s8267_s23 + $0x48] sm:$0xf] }
 0xf45   :  { %v4983_v34 = vor.u32 %v5296_v30, %v4982_v27  ;;  %v5316_v27 = vld [vmem:[%s8268_s9 + $0x74] sm:$0xf0] }
 0xf47   :  { %2420 = vmatpush.bf16.msra.mxu3 %v4983_v34  ;;  %v5290_v34 = vld [vmem:[%s8267_s23 + $0x2c] sm:$0xf] }
 0xfc7   :  { %v2113_v37 = vpop.f32.mrf.mxu3 }
 0xfc8   :  { %v2114_v38 = vadd.f32 %v5454_v36, %v2113_v37 }
 0xfca   :  { %v2118_v39 = vmul.f32 %v2114_v38, %v2114_v38 }
 0xfcc   :  { %v2120_v40 = vmul.f32 %v2118_v39, %v2114_v38  ;;  %v4966_v39 = vld [vmem:[%s8267_s23 + $0x28] sm:$0xf] }
 0xfce   :  { %v2122_v41 = vmul.f32 0.044715, %v2120_v40 }
 0xfcf   :  { %v2115_v42 = vpop.f32.mrf.mxu3 }
 0xfd0   :  { %v2124_v43 = vadd.f32 %v2122_v41, %v2114_v38  ;;  %v2116_v44 = vadd.f32 %v5454_v36, %v2115_v42  ;;  %v5295_v36 = vld [vmem:[%s8267_s23 + $0x4c] sm:$0xf0]  ;;  %v5292_v41 = vld [vmem:[%s8267_s23 + $0x34] sm:$0xf0]  ;;  %v5114_v42 = vld [vmem:[%s8268_s9 + $0xc8] sm:$0xf] }
 0xfd1   :  { %v4975_v37 = vor.u32 %v5295_v36, %v4974_v13  ;;  %v4968_v13 = vld [vmem:[%s8267_s23 + $0x38] sm:$0xf0] }
 0xfd2   :  { %v2126_v45 = vmul.f32 0.7978846, %v2124_v43  ;;  %v2119_v46 = vmul.f32 %v2116_v44, %v2116_v44  ;;  %v5328_v43 = vld [vmem:[%s8268_s9 + $0xd4] sm:$0xf0]  ;;  %v4971_v36 = vor.u32 %v5290_v34, %v4968_v13  ;;  %v5012_v34 = vld [vmem:[%s8268_s9 + $0x10] sm:$0xf0] }
 0xfd3   :  { %2392 = vmatpush.bf16.msra.mxu1 %v4975_v37  ;;  %v5074_v37 = vld [vmem:[%s8268_s9 + $0x80] sm:$0xf] }
 0xfd4   :  { %v2121_v47 = vmul.f32 %v2119_v46, %v2116_v44  ;;  %5545 = vtanh.f32 %v2126_v45  ;;  %v6918_v45 = vor.u32 %v5328_v43, %v5114_v42  ;;  %v4958_v46 = vld [vmem:[%s8267_s23 + $0x20] sm:$0xf]  ;;  %v5050_v42 = vld [vmem:[%s8268_s9 + $0x48] sm:$0xf] }
 0xfd6   :  { %v2123_v48 = vmul.f32 0.044715, %v2121_v47  ;;  %v5291_v47 = vld [vmem:[%s8267_s23 + $0x2c] sm:$0xf0]  ;;  %2662 = vmatpush.bf16.msrb.mxu0 %v6918_v45 }
 0xfd8   :  { %v2125_v49 = vadd.f32 %v2123_v48, %v2116_v44  ;;  %v4959_v48 = vor.u32 %v5291_v47, %v4958_v46  ;;  %v5286_v47 = vld [vmem:[%s8267_s23 + $0xc] sm:$0xf] }
 0xfda   :  { %v2127_v50 = vmul.f32 0.7978846, %v2125_v49  ;;  %v5546_v51 = vpop.eup %5545  ;;  %v5285_v49 = vld [vmem:[%s8267_s23 + $0x4] sm:$0xf]  ;;  %2393 = vmatpush.bf16.msra.mxu1 %v4959_v48  ;;  %v4952_v48 = vld [vmem:[%s8267_s23 + $0x18] sm:$0xf0] }
 0xfdb   :  { %v2130_v52 = vadd.f32 1.0, %v5546_v51  ;;  %v4950_v51 = vld [vmem:[%s8267_s23 + $0x8] sm:$0xf] }
 0xfdc   :  { %5547 = vtanh.f32 %v2127_v50  ;;  %v4944_v50 = vld [vmem:[%s8267_s23 + $0x10] sm:$0xf0] }
 0xfdd   :  { %v2132_v3 = vmul.f32 0.5, %v2130_v52  ;;  %v4947_v52 = vor.u32 %v5285_v49, %v4944_v50  ;;  %v4955_v49 = vor.u32 %v5286_v47, %v4952_v48  ;;  %v5058_v50 = vld [vmem:[%s8268_s9 + $0x60] sm:$0xf] }
 0xfdf   :  { %v2134_v56 = vmul.f32 %v2132_v3, %v2114_v38  ;;  %v4960_v38 = vld [vmem:[%s8267_s23 + $0x30] sm:$0xf0]  ;;  %v5122_v3 = vld [vmem:[%s8268_s9 + $0xe0] sm:$0xf] }
 0xfe0   :  { %v4963_v40 = vor.u32 %v5289_v20, %v4960_v38  ;;  %v5319_v20 = vld [vmem:[%s8268_s9 + $0x8c] sm:$0xf0]  ;;  %v5317_v38 = vld [vmem:[%s8268_s9 + $0x84] sm:$0xf] }
 0xfe2   :  { %v5548_v53 = vpop.eup %5547 }
 0xfe3   :  { %v2131_v54 = vadd.f32 1.0, %v5548_v53  ;;  %v5288_v53 = vld [vmem:[%s8267_s23 + $0x14] sm:$0xf0] }
 0xfe5   :  { %v2133_v55 = vmul.f32 0.5, %v2131_v54  ;;  %v5331_v54 = vld [vmem:[%s8268_s9 + $0xec] sm:$0xf0] }
 0xfe7   :  { %v2135_v4 = vmul.f32 %v2133_v55, %v2116_v44  ;;  %v4967_v44 = vor.u32 %v5292_v41, %v4966_v39  ;;  %v4951_v55 = vor.u32 %v5288_v53, %v4950_v51  ;;  %v5076_v41 = vld [vmem:[%s8268_s9 + $0x90] sm:$0xf0]  ;;  %v5315_v51 = vld [vmem:[%s8268_s9 + $0x6c] sm:$0xf0] }
 0xfe8   :  { %v6990_v43 = vor.u32 %v5317_v38, %v5076_v41  ;;  %v7004_v53 = vor.u32 %v5315_v51, %v5058_v50 }
 0xfe9   :  { %v2136_v8 = vpack.c.bf16 %v2135_v4, %v2134_v56  ;;  %2421 = vmatpush.bf16.msra.mxu3 %v4967_v44  ;;  %v6929_v56 = vor.u32 %v5331_v54, %v5122_v3  ;;  %v5329_v4 = vld [vmem:[%s8268_s9 + $0xe4] sm:$0xf]  ;;  %v5312_v44 = vld [vmem:[%s8268_s9 + $0x54] sm:$0xf0]  ;;  %v5060_v3 = vld [vmem:[%s8268_s9 + $0x70] sm:$0xf0] }
 0xfea   :  { %v6995_v46 = vor.u32 %v5312_v44, %v5050_v42  ;;  %v5034_v54 = vld [vmem:[%s8268_s9 + $0x28] sm:$0xf] }
 0xfeb   :  { %2213 = vmatmul.bf16.vlgmr.msra.gmra.mxu0 %v2136_v8  ;;  %v5124_v8 = vld [vmem:[%s8268_s9 + $0xf0] sm:$0xf0] }
 0xfed   :  { %2422 = vmatpush.bf16.msra.mxu3 %v4951_v55  ;;  %v5308_v55 = vld [vmem:[%s8268_s9 + $0x34] sm:$0xf0] }
0x1068   :  { %v2214_v58 = vpop.f32.mrf.mxu0 }
0x1069   :  { %v2215_v59 = vadd.f32 %v5455_v57, %v2214_v58  ;;  %v6934_v58 = vor.u32 %v5329_v4, %v5124_v8 }
0x106b   :  { %v2219_v9 = vadd.f32 %v2215_v59, %v2062_v24  ;;  %v5293_v24 = vld [vmem:[%s8267_s23 + $0x44] sm:$0xf]  ;;  %v5324_v59 = vld [vmem:[%s8268_s9 + $0xb4] sm:$0xf0]  ;;  %2648 = vmatpush.bf16.msrb.mxu3 %v6934_v58 }
0x106d   :  { %v2223_v60 = vsel %vm384_vm0, %v2219_v9, 0.0 }
0x106e   :  { %2224 = vadd.xlane.f32.xlu2 %v2223_v60  ;;  %v5287_v60 = vld [vmem:[%s8267_s23 + $0xc] sm:$0xf0] }
0x1070   :  { %v2216_v61 = vpop.f32.mrf.mxu0 }
0x1071   :  { %v2217_v62 = vadd.f32 %v5455_v57, %v2216_v61  ;;  %v5098_v57 = vld [vmem:[%s8268_s9 + $0xa8] sm:$0xf] }
0x1072   :  { %v6940_v61 = vor.u32 %v5324_v59, %v5098_v57  ;;  %v7011_v57 = vor.u32 %v5308_v55, %v5034_v54 }
0x1073   :  { %v2220_v28 = vadd.f32 %v2217_v62, %v2063_v26  ;;  %v4976_v26 = vld [vmem:[%s8267_s23 + $0x50] sm:$0xf0] }
0x1074   :  { %v4979_v29 = vor.u32 %v5293_v24, %v4976_v26  ;;  %2663 = vmatpush.bf16.msrb.mxu0 %v6940_v61  ;;  %v5092_v24 = vld [vmem:[%s8268_s9 + $0xb0] sm:$0xf0]  ;;  %v5066_v26 = vld [vmem:[%s8268_s9 + $0x68] sm:$0xf]  ;;  %8269 = vst [vmem:[#allocation53_spill] sm:$0xff] %v7011_v57 }
0x1075   :  { %v2226_v63 = vsel %vm384_vm0, %v2220_v28, 0.0  ;;  %v6971_v30 = vor.u32 %v5321_v23, %v5092_v24  ;;  %v6973_v31 = vor.u32 %v5316_v27, %v5066_v26  ;;  %v5010_v26 = vld [vmem:[%s8268_s9] sm:$0xf]  ;;  %v5303_v27 = vld [vmem:[%s8268_s9 + $0xc] sm:$0xf0] }
0x1076   :  { %2227 = vadd.xlane.f32.xlu0 %v2226_v63  ;;  %2406 = vmatpush.bf16.msrb.mxu2 %v4979_v29  ;;  %v5000_v63 = vld [vmem:[%s8267_s23 + $0x78] sm:$0xf0] }
0x107a   :  { %2407 = vmatpush.bf16.msrb.mxu2 %v4963_v40  ;;  %v6986_v40 = vor.u32 %v5319_v20, %v5074_v37 }
0x107e   :  { %2408 = vmatpush.bf16.msrb.mxu2 %v4947_v52  ;;  %v5313_v52 = vld [vmem:[%s8268_s9 + $0x64] sm:$0xf] }
0x107f   :  { %v7009_v8 = vor.u32 %v5313_v52, %v5060_v3  ;;  %v5457_v52 = vld [vmem:[%s8276_s13] ss:$0 sm:$0xff] }
0x1082   :  { %2635 = vmatpush.bf16.msra.mxu2 %v6929_v56 }
0x10e1   :  { %v2225_v0 = vpop.xlane.xlu2 %2224 }
0x10e2   :  { %v2229_v1 = vmul.f32 %v2225_v0, %v6544_v11 }
0x10e4   :  { %v6884_v2 = vsub.f32 %v2219_v9, %v2229_v1  ;;  %v4942_v9 = vld [vmem:[%s8267_s23] sm:$0xf] }
0x10e5   :  { %v4943_v62 = vor.u32 %v5287_v60, %v4942_v9  ;;  %v5106_v1 = vld [vmem:[%s8268_s9 + $0xc0] sm:$0xf]  ;;  %v5311_v60 = vld [vmem:[%s8268_s9 + $0x4c] sm:$0xf0] }
0x10e6   :  { %v2233_v5 = vmul.f32 %v6884_v2, %v6884_v2  ;;  %v5042_v9 = vld [vmem:[%s8268_s9 + $0x40] sm:$0xf] }
0x10e7   :  { %2394 = vmatpush.bf16.msra.mxu1 %v4943_v62  ;;  %v5309_v62 = vld [vmem:[%s8268_s9 + $0x44] sm:$0xf] }
0x10e8   :  { %v2235_v6 = vsel %vm384_vm0, %v2233_v5, 0.0  ;;  %v5327_v5 = vld [vmem:[%s8268_s9 + $0xcc] sm:$0xf0] }
0x10e9   :  { %v2228_v7 = vpop.xlane.xlu0 %2227  ;;  %2236 = vadd.xlane.f32.xlu0 %v2235_v6  ;;  %v5325_v6 = vld [vmem:[%s8268_s9 + $0xc4] sm:$0xf] }
0x10ea   :  { %v2230_v10 = vmul.f32 %v2228_v7, %v6544_v11  ;;  %v6949_v7 = vor.u32 %v5327_v5, %v5106_v1  ;;  %v5304_v1 = vld [vmem:[%s8268_s9 + $0x14] sm:$0xf0] }
0x10ec   :  { %v6890_v12 = vsub.f32 %v2220_v28, %v2230_v10  ;;  %v5298_v28 = vld [vmem:[%s8267_s23 + $0x6c] sm:$0xf]  ;;  %v5108_v10 = vld [vmem:[%s8268_s9 + $0xd0] sm:$0xf0]  ;;  %2636 = vmatpush.bf16.msra.mxu2 %v6949_v7 }
0x10ed   :  { %v5003_v0 = vor.u32 %v5298_v28, %v5000_v63  ;;  %v6954_v15 = vor.u32 %v5325_v6, %v5108_v10  ;;  %v7019_v28 = vor.u32 %v5311_v60, %v5042_v9  ;;  %v5044_v63 = vld [vmem:[%s8268_s9 + $0x50] sm:$0xf0] }
0x10ee   :  { %v2234_v14 = vmul.f32 %v6890_v12, %v6890_v12 }
0x10ef   :  { %2433 = vmatpush.bf16.msrb.mxu1 %v5003_v0  ;;  %2649 = vmatpush.bf16.msrb.mxu3 %v6954_v15  ;;  %v5018_v0 = vld [vmem:[%s8268_s9 + $0x8] sm:$0xf] }
0x10f0   :  { %v2238_v33 = vsel %vm384_vm0, %v2234_v14, 0.0  ;;  %v5082_v14 = vld [vmem:[%s8268_s9 + $0x88] sm:$0xf]  ;;  %2637 = vmatpush.bf16.msra.mxu2 %v6966_v25  ;;  %v7027_v10 = vor.u32 %v5304_v1, %v5018_v0  ;;  %v5116_v0 = vld [vmem:[%s8268_s9 + $0xd8] sm:$0xf0] }
0x10f1   :  { %2239 = vadd.xlane.f32.xlu0 %v2238_v33  ;;  %v5320_v33 = vld [vmem:[%s8268_s9 + $0x94] sm:$0xf0]  ;;  %v5322_v1 = vld [vmem:[%s8268_s9 + $0xac] sm:$0xf] }
0x10f2   :  { %v6956_v16 = vor.u32 %v5320_v33, %v5082_v14  ;;  %8270 = vst [vmem:[#allocation54_spill] sm:$0xff] %v7027_v10  ;;  %v5026_v33 = vld [vmem:[%s8268_s9 + $0x20] sm:$0xf] }
0x10f3   :  { %2434 = vmatpush.bf16.msrb.mxu1 %v4987_v19  ;;  %2650 = vmatpush.bf16.msrb.mxu3 %v6971_v30  ;;  %v7033_v18 = vor.u32 %v5307_v17, %v5026_v33  ;;  %v5305_v19 = vld [vmem:[%s8268_s9 + $0x24] sm:$0xf]  ;;  %v5084_v33 = vld [vmem:[%s8268_s9 + $0x98] sm:$0xf0] }
0x10f4   :  { %2664 = vmatpush.bf16.msrb.mxu0 %v6956_v16  ;;  %2638 = vmatpush.bf16.msra.mxu2 %v6986_v40  ;;  %v7038_v23 = vor.u32 %v5305_v19, %v5028_v21  ;;  %v5314_v21 = vld [vmem:[%s8268_s9 + $0x6c] sm:$0xf] }
0x10f5   :  { %8271 = vst [vmem:[#allocation55_spill] sm:$0xff] %v7033_v18 }
0x10f6   :  { %8272 = vst [vmem:[#allocation56_spill] sm:$0xff] %v7038_v23 }
0x10f7   :  { %2435 = vmatpush.bf16.msrb.mxu1 %v4971_v36  ;;  %2651 = vmatpush.bf16.msrb.mxu3 %v6990_v43  ;;  %v6263_v36 = vmov 0  }
0x10f8   :  { %2665 = vmatpush.bf16.msrb.mxu0 %v6973_v31  ;;  %2639 = vmatpush.bf16.msra.mxu2 %v7004_v53 }
0x10fb   :  { %2436 = vmatpush.bf16.msrb.mxu1 %v4955_v49  ;;  %2652 = vmatpush.bf16.msrb.mxu3 %v7009_v8  ;;  %v5456_v49 = vld [vmem:[%s8275_s26] ss:$0 sm:$0xff] }
0x10fc   :  { %2666 = vmatpush.bf16.msrb.mxu0 %v6995_v46  ;;  %2640 = vmatpush.bf16.msra.mxu2 %v7019_v28 }
0x1100   :  { %2667 = vmatpush.bf16.msrb.mxu0 %v7011_v57  ;;  %2641 = vmatpush.bf16.msra.mxu2 %v7033_v18 }
0x1104   :  { %2668 = vmatpush.bf16.msrb.mxu0 %v7027_v10 }
0x1107   :  { %2669 = vmatmul.bf16.vlgmr.msrb.gmra.mxu0 %v6263_v36 }
0x1108   :  { %2874 = vmatpush.bf16.msra.mxu0 %v6907_v35 }
0x110c   :  { %2875 = vmatpush.bf16.msra.mxu0 %v6918_v45 }
0x1110   :  { %2876 = vmatpush.bf16.msra.mxu0 %v6940_v61 }
0x1114   :  { %2877 = vmatpush.bf16.msra.mxu0 %v6956_v16 }
0x1118   :  { %2878 = vmatpush.bf16.msra.mxu0 %v6973_v31 }
0x111c   :  { %2879 = vmatpush.bf16.msra.mxu0 %v6995_v46 }
0x1120   :  { %2880 = vmatpush.bf16.msra.mxu0 %v7011_v57 }
0x1124   :  { %2881 = vmatpush.bf16.msra.mxu0 %v7027_v10 }
0x1128   :  { %3092 = vmatpush.bf16.msrb.mxu0 %v6907_v35 }
0x112c   :  { %3093 = vmatpush.bf16.msrb.mxu0 %v6918_v45 }
0x1130   :  { %3094 = vmatpush.bf16.msrb.mxu0 %v6940_v61 }
0x1134   :  { %3095 = vmatpush.bf16.msrb.mxu0 %v6956_v16 }
0x1138   :  { %3096 = vmatpush.bf16.msrb.mxu0 %v6973_v31 }
0x113c   :  { %3097 = vmatpush.bf16.msrb.mxu0 %v6995_v46 }
0x1140   :  { %3098 = vmatpush.bf16.msrb.mxu0 %v7011_v57 }
0x1144   :  { %3099 = vmatpush.bf16.msrb.mxu0 %v7027_v10 }
0x115c   :  { %v2237_v29 = vpop.xlane.xlu0 %2236 }
0x115d   :  { %v2241_v32 = vmul.f32 %v2237_v29, %v6544_v11  ;;  %v7045_v29 = vor.u32 %v5303_v27, %v5010_v26 }
0x115f   :  { %v6983_v39 = vadd.f32 1e-12, %v2241_v32  ;;  %8273 = vst [vmem:[#allocation57_spill] sm:$0xff] %v7045_v29  ;;  %v5301_v32 = vld [vmem:[%s8268_s9 + $0x4] sm:$0xf]  ;;  %2642 = vmatpush.bf16.msra.mxu2 %v7045_v29 }
0x1160   :  { %v7051_v37 = vor.u32 %v5301_v32, %v5012_v34  ;;  %v5310_v32 = vld [vmem:[%s8268_s9 + $0x4c] sm:$0xf]  ;;  %v5052_v34 = vld [vmem:[%s8268_s9 + $0x58] sm:$0xf0] }
0x1161   :  { %5549 = vrsqrt.f32 %v6983_v39  ;;  %vm2251_vm2 = vweird.f32 %v6983_v39 }
0x1162   :  { %8274 = vst [vmem:[#allocation58_spill] sm:$0xff] %v7051_v37 }
0x1164   :  { %v2240_v4 = vpop.xlane.xlu0 %2239 }
0x1165   :  { %v2242_v59 = vmul.f32 %v2240_v4, %v6544_v11  ;;  %v7025_v11 = vor.u32 %v5309_v62, %v5044_v63  ;;  %v5330_v4 = vld [vmem:[%s8268_s9 + $0xec] sm:$0xf] }
0x1166   :  { %v5326_v63 = vld [vmem:[%s8268_s9 + $0xcc] sm:$0xf] }
0x1167   :  { %v5550_v5 = vpop.eup %5549  ;;  %v2244_v6 = vadd.f32 1e-12, %v2242_v59  ;;  %2653 = vmatpush.bf16.msrb.mxu3 %v7025_v11  ;;  %v5132_v59 = vld [vmem:[%s8268_s9 + $0xf8] sm:$0xf0] }
0x1168   :  { %v2246_v14 = vmul.f32 %v5550_v5, %v6983_v39  ;;  %vm2252_vm1 = vweird.f32 %v5550_v5  ;;  %v7066_v60 = vor.u32 %v5330_v4, %v5132_v59 }
0x1169   :  { %5551 = vrsqrt.f32 %v2244_v6  ;;  %vm2253_vm3 = vmor %vm2251_vm2, %vm2252_vm1  ;;  %vm2261_vm5 = vweird.f32 %v2244_v6 }
0x116a   :  { %v2247_v22 = vmul.f32 %v5550_v5, %v2246_v14  ;;  %v5318_v14 = vld [vmem:[%s8268_s9 + $0x8c] sm:$0xf] }
0x116b   :  { %2654 = vmatpush.bf16.msrb.mxu3 %v7038_v23  ;;  %v7092_v17 = vor.u32 %v5318_v14, %v5084_v33 }
0x116c   :  { %v2248_v24 = vmul.f32 0.5, %v2247_v22  ;;  %v5068_v22 = vld [vmem:[%s8268_s9 + $0x78] sm:$0xf0] }
0x116d   :  { %v7100_v26 = vor.u32 %v5314_v21, %v5068_v22 }
0x116e   :  { %v2249_v13 = vsub.f32 1.5, %v2248_v24 }
0x116f   :  { %v5552_v20 = vpop.eup %5551  ;;  %2655 = vmatpush.bf16.msrb.mxu3 %v7051_v37 }
0x1170   :  { %v2250_v38 = vmul.f32 %v5550_v5, %v2249_v13  ;;  %v2256_v41 = vmul.f32 %v5552_v20, %v2244_v6  ;;  %vm2262_vm4 = vweird.f32 %v5552_v20 }
0x1171   :  { %vm2263_vm6 = vmor %vm2261_vm5, %vm2262_vm4 }
0x1172   :  { %v2257_v42 = vmul.f32 %v5552_v20, %v2256_v41  ;;  %v2254_v44 = vsel %vm2253_vm3, %v5550_v5, %v2250_v38  ;;  %v5100_v5 = vld [vmem:[%s8268_s9 + $0xb8] sm:$0xf0]  ;;  %v5306_v41 = vld [vmem:[%s8268_s9 + $0x2c] sm:$0xf] }
0x1173   :  { %v2265_v50 = vmul.f32 %v2254_v44, %v6884_v2  ;;  %v7083_v6 = vor.u32 %v5322_v1, %v5100_v5 }
0x1174   :  { %v2258_v47 = vmul.f32 0.5, %v2257_v42  ;;  %v5036_v42 = vld [vmem:[%s8268_s9 + $0x38] sm:$0xf0] }
0x1175   :  { %v2270_v3 = vmul.f32 %v5456_v49, %v2265_v50 }
0x1176   :  { %v2259_v48 = vsub.f32 1.5, %v2258_v47  ;;  %v7118_v47 = vor.u32 %v5306_v41, %v5036_v42 }
0x1177   :  { %v2275_v2 = vadd.f32 %v5457_v52, %v2270_v3  ;;  %v7174_v3 = vld [vmem:[%s8280_s24] sm:$0xf] }
0x1178   :  { %v2260_v51 = vmul.f32 %v5552_v20, %v2259_v48  ;;  %8277 = vst [vmem:[#allocation59_spill] sm:$0xff] %v7118_v47  ;;  %v5302_v48 = vld [vmem:[%s8268_s9 + $0xc] sm:$0xf]  ;;  %v2296_v33 = vperm.slane %v7174_v3, 0 }
0x1179   :  { %v4393_v24 = vpack.c.bf16 %v2275_v2, %v2275_v2 }
0x117a   :  { %v2264_v39 = vsel %vm2263_vm6, %v5552_v20, %v2260_v51  ;;  %v7110_v20 = vor.u32 %v5310_v32, %v5052_v34 }
0x117b   :  { %v2266_v54 = vmul.f32 %v2264_v39, %v6890_v12  ;;  %v7075_v12 = vor.u32 %v5326_v63, %v5116_v0  ;;  %v4421_v13 = vunpack.c.l.b16 %v4393_v24 }
0x117d   :  { %v2271_v55 = vmul.f32 %v5456_v49, %v2266_v54  ;;  %v4423_v44 = vrot.slane %v4421_v13, 7  ;;  %v5020_v49 = vld [vmem:[%s8268_s9 + $0x18] sm:$0xf0]  ;;  %v2298_v54 = vperm.slane %v7174_v3, 2 }
0x117e   :  { %v7129_v51 = vor.u32 %v5302_v48, %v5020_v49 }
0x117f   :  { %v2276_v9 = vadd.f32 %v5457_v52, %v2271_v55 }
0x1180   :  { %8279 = vst [vmem:[#allocation61_spill] sm:$0xff] %v7129_v51 }
0x1181   :  { %v2277_v62 = vpack.c.bf16 %v2276_v9, %v2275_v2  ;;  %v4394_v19 = vpack.c.bf16 %v2276_v9, %v2276_v9 }
0x1183   :  { %5004 = vmatmul.msk.bf16.vlgmr.msra.gmra.mxu1 %vm384_vm0, %v2277_v62  ;;  %5005 = vmatmul.msk.bf16.vlgmr.msrb.gmra.mxu2 %vm384_vm0, %v2277_v62  ;;  %v4422_v27 = vunpack.c.l.b16 %v4394_v19  ;;  %v2297_v19 = vperm.slane %v7174_v3, 1 }
0x1184   :  { %5006 = vmatmul.msk.bf16.vlgmr.msra.gmra.mxu3 %vm384_vm0, %v2277_v62  ;;  %2674 = vmatpush.bf16.msra.mxu1 %v7066_v60 }
0x1185   :  { %2848 = vmatpush.bf16.msrb.mxu2 %v6929_v56  ;;  %2861 = vmatpush.bf16.msra.mxu3 %v6934_v58  ;;  %v4424_v38 = vrot.slane %v4422_v27, 6 }
0x1187   :  { %v7125_v50 = vsel %vm2844_vm7, %v4424_v38, %v4423_v44 }
0x1188   :  { %2675 = vmatpush.bf16.msra.mxu1 %v7075_v12  ;;  %8278 = vst [vmem:[#allocation60_spill] sm:$0xff] %v7125_v50 }
0x1189   :  { %2849 = vmatpush.bf16.msrb.mxu2 %v6949_v7  ;;  %2862 = vmatpush.bf16.msra.mxu3 %v6954_v15 }
0x118c   :  { %2676 = vmatpush.bf16.msra.mxu1 %v7083_v6 }
0x118d   :  { %2850 = vmatpush.bf16.msrb.mxu2 %v6966_v25  ;;  %2863 = vmatpush.bf16.msra.mxu3 %v6971_v30 }
0x1190   :  { %2677 = vmatpush.bf16.msra.mxu1 %v7092_v17 }
0x1191   :  { %2851 = vmatpush.bf16.msrb.mxu2 %v6986_v40  ;;  %2864 = vmatpush.bf16.msra.mxu3 %v6990_v43 }
0x1193   :  { %5007 = vmatmul.msk.bf16.vlgmr.msrb.gmra.mxu1 %vm384_vm0, %v2277_v62  ;;  %2643 = vmatmul.bf16.vlgmr.msra.gmra.mxu2 %v6263_v36 }
0x1194   :  { %2656 = vmatmul.bf16.vlgmr.msrb.gmra.mxu3 %v6263_v36  ;;  %2678 = vmatpush.bf16.msra.mxu1 %v7100_v26 }
0x1195   :  { %2852 = vmatpush.bf16.msrb.mxu2 %v7004_v53  ;;  %2865 = vmatpush.bf16.msra.mxu3 %v7009_v8 }
0x1198   :  { %2679 = vmatpush.bf16.msra.mxu1 %v7110_v20 }
0x1199   :  { %2853 = vmatpush.bf16.msrb.mxu2 %v7019_v28  ;;  %2866 = vmatpush.bf16.msra.mxu3 %v7025_v11 }
0x119c   :  { %2680 = vmatpush.bf16.msra.mxu1 %v7118_v47 }
0x119d   :  { %2854 = vmatpush.bf16.msrb.mxu2 %v7033_v18  ;;  %2867 = vmatpush.bf16.msra.mxu3 %v7038_v23 }
0x11a0   :  { %2681 = vmatpush.bf16.msra.mxu1 %v7129_v51 }
0x11a1   :  { %2855 = vmatpush.bf16.msrb.mxu2 %v7045_v29  ;;  %2868 = vmatpush.bf16.msra.mxu3 %v7051_v37 }
0x11a3   :  { %2682 = vmatmul.bf16.vlgmr.msra.gmra.mxu1 %v6263_v36  ;;  %v2670_v36 = vpop.f32.mrf.mxu0 }
0x11a4   :  { %2887 = vmatpush.bf16.msrb.mxu1 %v7066_v60  ;;  %v2693_v63 = vrot.slane %v2670_v36, 1 }
0x11a5   :  { %3066 = vmatpush.bf16.msra.mxu2 %v6929_v56  ;;  %3079 = vmatpush.bf16.msrb.mxu3 %v6934_v58 }
0x11a8   :  { %2888 = vmatpush.bf16.msrb.mxu1 %v7075_v12 }
0x11a9   :  { %3067 = vmatpush.bf16.msra.mxu2 %v6949_v7  ;;  %3080 = vmatpush.bf16.msrb.mxu3 %v6954_v15 }
0x11ab   :  { %v2672_v39 = vpop.f32.mrf.mxu0 }
0x11ac   :  { %2889 = vmatpush.bf16.msrb.mxu1 %v7083_v6 }
0x11ad   :  { %3068 = vmatpush.bf16.msra.mxu2 %v6966_v25  ;;  %3081 = vmatpush.bf16.msrb.mxu3 %v6971_v30 }
0x11b0   :  { %2890 = vmatpush.bf16.msrb.mxu1 %v7092_v17 }
0x11b1   :  { %3069 = vmatpush.bf16.msra.mxu2 %v6986_v40  ;;  %3082 = vmatpush.bf16.msrb.mxu3 %v6990_v43 }
0x11b4   :  { %2891 = vmatpush.bf16.msrb.mxu1 %v7100_v26 }
0x11b5   :  { %3070 = vmatpush.bf16.msra.mxu2 %v7004_v53  ;;  %3083 = vmatpush.bf16.msrb.mxu3 %v7009_v8 }
0x11b8   :  { %2892 = vmatpush.bf16.msrb.mxu1 %v7110_v20 }
0x11b9   :  { %3071 = vmatpush.bf16.msra.mxu2 %v7019_v28  ;;  %3084 = vmatpush.bf16.msrb.mxu3 %v7025_v11 }
0x11bc   :  { %2893 = vmatpush.bf16.msrb.mxu1 %v7118_v47 }
0x11bd   :  { %3072 = vmatpush.bf16.msra.mxu2 %v7033_v18  ;;  %3085 = vmatpush.bf16.msrb.mxu3 %v7038_v23 }
0x11c0   :  { %2894 = vmatpush.bf16.msrb.mxu1 %v7129_v51 }
0x11c1   :  { %3073 = vmatpush.bf16.msra.mxu2 %v7045_v29  ;;  %3086 = vmatpush.bf16.msrb.mxu3 %v7051_v37 }
0x11c4   :  { %3105 = vmatpush.bf16.msra.mxu1 %v7066_v60 }
0x11c8   :  { %3106 = vmatpush.bf16.msra.mxu1 %v7075_v12 }
0x11cc   :  { %3107 = vmatpush.bf16.msra.mxu1 %v7083_v6 }
0x11d0   :  { %3108 = vmatpush.bf16.msra.mxu1 %v7092_v17 }
0x11d4   :  { %3109 = vmatpush.bf16.msra.mxu1 %v7100_v26 }
0x11d8   :  { %3110 = vmatpush.bf16.msra.mxu1 %v7110_v20 }
0x11dc   :  { %3111 = vmatpush.bf16.msra.mxu1 %v7118_v47 }
0x11e0   :  { %3112 = vmatpush.bf16.msra.mxu1 %v7129_v51 }
0x1200   :  { %v2396_v52 = vpop.f32.mrf.mxu1 }
0x1201   :  { %v7185_v27 = vadd.f32 %v2396_v52, %v2296_v33 }
0x1203   :  { %8283 = vst [vmem:[#allocation64_spill] sm:$0xff] %v7185_v27 }
0x1206   :  { %v2410_v55 = vpop.f32.mrf.mxu2 }
0x1207   :  { %v2424_v4 = vpop.f32.mrf.mxu3  ;;  %v7187_v32 = vadd.f32 %v2410_v55, %v2297_v19 }
0x1208   :  { %v7177_v59 = vadd.f32 %v2424_v4, %v2298_v54  ;;  %v2398_v2 = vpop.f32.mrf.mxu1 }
0x1209   :  { %8284 = vst [vmem:[#allocation65_spill] sm:$0xff] %v7187_v32  ;;  %v7191_v38 = vadd.f32 %v2398_v2, %v2296_v33 }
0x120a   :  { %8281 = vst [vmem:[#allocation62_spill] sm:$0xff] %v7177_v59  ;;  %v2705_v9 = vadd.f32 %v2670_v36, %v7177_v59 }
0x120b   :  { %8285 = vst [vmem:[#allocation66_spill] sm:$0xff] %v7191_v38 }
0x120c   :  { %v5138_v62 = vmul.f32 -1.442695, %v2705_v9 }
0x120e   :  { %5553 = vpow2.f32 %v5138_v62  ;;  %v2412_v0 = vpop.f32.mrf.mxu2 }
0x120f   :  { %v2426_v1 = vpop.f32.mrf.mxu3  ;;  %v7193_v44 = vadd.f32 %v2412_v0, %v2297_v19 }
0x1210   :  { %v7180_v5 = vadd.f32 %v2426_v1, %v2298_v54  ;;  %v2438_v14 = vpop.f32.mrf.mxu1 }
0x1211   :  { %8286 = vst [vmem:[#allocation67_spill] sm:$0xff] %v7193_v44 }
0x1212   :  { %8282 = vst [vmem:[#allocation63_spill] sm:$0xff] %v7180_v5  ;;  %v2709_v21 = vadd.f32 %v2693_v63, %v7180_v5 }
0x1214   :  { %v5554_v22 = vpop.eup %5553  ;;  %v5141_v24 = vmul.f32 -1.442695, %v2709_v21  ;;  %v2299_v21 = vperm.slane %v7174_v3, 3 }
0x1215   :  { %v7189_v34 = vadd.f32 1.0, %v5554_v22 }
0x1216   :  { %v2644_v13 = vpop.f32.mrf.mxu2  ;;  %5555 = vpow2.f32 %v5141_v24 }
0x1217   :  { %v2691_v41 = vrot.slane %v2644_v13, 1  ;;  %v2657_v42 = vpop.f32.mrf.mxu3  ;;  %v2703_v48 = vadd.f32 %v2644_v13, %v7185_v27  ;;  %5557 = vrcp.f32 %v7189_v34 }
0x1218   :  { %v2692_v49 = vrot.slane %v2657_v42, 1  ;;  %v2704_v36 = vadd.f32 %v2657_v42, %v7187_v32  ;;  %v2440_v39 = vpop.f32.mrf.mxu1 }
0x1219   :  { %v2707_v52 = vadd.f32 %v2691_v41, %v7191_v38  ;;  %v5136_v54 = vmul.f32 -1.442695, %v2703_v48 }
0x121a   :  { %v2708_v55 = vadd.f32 %v2692_v49, %v7193_v44  ;;  %v5137_v4 = vmul.f32 -1.442695, %v2704_v36  ;;  %v7210_v36 = vadd.f32 %v2438_v14, %v2299_v21 }
0x121b   :  { %v5139_v2 = vmul.f32 -1.442695, %v2707_v52  ;;  %5559 = vpow2.f32 %v5136_v54 }
0x121c   :  { %v5140_v9 = vmul.f32 -1.442695, %v2708_v55  ;;  %v5556_v62 = vpop.eup %5555  ;;  %8287 = vst [vmem:[#allocation68_spill] sm:$0xff] %v7210_v36 }
0x121d   :  { %5561 = vpow2.f32 %v5139_v2  ;;  %v7200_v1 = vpop.eup %5557  ;;  %v7202_v19 = vadd.f32 1.0, %v5556_v62  ;;  %v7220_v62 = vadd.f32 %v2440_v39, %v2299_v21 }
0x121e   :  { %5563 = vpow2.f32 %v5137_v4  ;;  %v2646_v63 = vpop.f32.mrf.mxu2  ;;  %v2766_v13 = vmul.f32 %v7200_v1, %v7189_v34 }
0x121f   :  { %5565 = vpow2.f32 %v5140_v9  ;;  %v2659_v0 = vpop.f32.mrf.mxu3  ;;  %8288 = vst [vmem:[#allocation69_spill] sm:$0xff] %v7220_v62 }
0x1220   :  { %v2683_v33 = vpop.f32.mrf.mxu1  ;;  %5567 = vrcp.f32 %v7202_v19  ;;  %v2767_v54 = vsub.f32 1.0, %v2766_v13 }
0x1221   :  { %v5560_v22 = vpop.eup %5559  ;;  %v2694_v55 = vrot.slane %v2683_v33, 1  ;;  %v2706_v4 = vadd.f32 %v2683_v33, %v7210_v36 }
0x1222   :  { %v2729_v41 = vadd.f32 1.0, %v5560_v22 }
0x1223   :  { %v5562_v24 = vpop.eup %5561  ;;  %v2710_v13 = vadd.f32 %v2694_v55, %v7220_v62 }
0x1224   :  { %v5564_v42 = vpop.eup %5563  ;;  %v7207_v48 = vadd.f32 1.0, %v5562_v24  ;;  %5569 = vrcp.f32 %v2729_v41  ;;  %v2744_v2 = vand.u32 2147483647, %v2729_v41  ;;  %v2746_v14 = vand.u32 2147483648, %v2729_v41 }
0x1225   :  { %v5566_v49 = vpop.eup %5565  ;;  %v7212_v52 = vadd.f32 1.0, %v5564_v42  ;;  %v7226_v24 = vmul.f32 %v7200_v1, %v2767_v54  ;;  %vm2740_vm13 = vweird.f32 %v2729_v41 }
0x1226   :  { %5571 = vrcp.f32 %v7207_v48  ;;  %v7215_v3 = vadd.f32 1.0, %v5566_v49  ;;  %v7222_v63 = vpop.eup %5567  ;;  %vm7230_vm8 = vcmp.eq.f32.partialorder %v2744_v2, 8.507059e+37  ;;  %vm2785_vm9 = vweird.f32 %v7207_v48 }
0x1227   :  { %5573 = vrcp.f32 %v7212_v52  ;;  %v2761_v0 = vand.u32 2147483648, %v7212_v52  ;;  %vm2755_vm14 = vweird.f32 %v7212_v52  ;;  %v2747_v55 = vor.u32 1.1754944e-38, %v2746_v14 }
0x1228   :  { %5575 = vrcp.f32 %v7215_v3  ;;  %v2685_v9 = vpop.f32.mrf.mxu1  ;;  %vm2800_vm10 = vweird.f32 %v7215_v3  ;;  %v2806_v54 = vand.u32 2147483648, %v7215_v3  ;;  %v2759_v2 = vand.u32 2147483647, %v7212_v52 }
0x1229   :  { %5577 = vtanh.f32 %v2706_v4  ;;  %v2762_v36 = vor.u32 1.1754944e-38, %v2761_v0  ;;  %v2791_v27 = vand.u32 2147483648, %v7207_v48  ;;  %v2811_v59 = vmul.f32 %v7222_v63, %v7202_v19 }
0x122a   :  { %v5570_v22 = vpop.eup %5569  ;;  %5579 = vtanh.f32 %v2710_v13  ;;  %v2789_v0 = vand.u32 2147483647, %v7207_v48  ;;  %v2807_v10 = vor.u32 1.1754944e-38, %v2806_v54  ;;  %vm2760_vm6 = vcmp.eq.f32.partialorder %v2759_v2, 8.507059e+37 }
0x122b   :  { %v2736_v42 = vmul.f32 %v5570_v22, %v2729_v41  ;;  %vm2741_vm11 = vweird.f32 %v5570_v22 }
0x122c   :  { %v5572_v33 = vpop.eup %5571  ;;  %vm2742_vm1 = vmor %vm2740_vm13, %vm2741_vm11  ;;  %vm2790_vm5 = vcmp.eq.f32.partialorder %v2789_v0, 8.507059e+37 }
0x122d   :  { %v5574_v21 = vpop.eup %5573  ;;  %v2781_v49 = vmul.f32 %v5572_v33, %v7207_v48  ;;  %v2737_v4 = vsub.f32 1.0, %v2736_v42  ;;  %vm2786_vm12 = vweird.f32 %v5572_v33 }
0x122e   :  { %v5576_v9 = vpop.eup %5575  ;;  %v2751_v50 = vmul.f32 %v5574_v21, %v7212_v52  ;;  %vm2756_vm15 = vweird.f32 %v5574_v21  ;;  %vm2787_vm3 = vmor %vm2785_vm9, %vm2786_vm12  ;;  %vm2815_vm12 = vweird.f32 %v7202_v19 }
0x122f   :  { %v2782_v62 = vsub.f32 1.0, %v2781_v49  ;;  %v2796_v32 = vmul.f32 %v5576_v9, %v7215_v3  ;;  %v2738_v38 = vmul.f32 %v5570_v22, %v2737_v4  ;;  %v5578_v14 = vpop.eup %5577  ;;  %vm2801_vm2 = vweird.f32 %v5576_v9  ;;  %vm2757_vm4 = vmor %vm2755_vm14, %vm2756_vm15 }
0x1230   :  { %v2752_v44 = vsub.f32 1.0, %v2751_v50  ;;  %v2804_v50 = vand.u32 2147483647, %v7215_v3  ;;  %v5580_v47 = vpop.eup %5579  ;;  %vm2802_vm13 = vmor %vm2800_vm10, %vm2801_vm2  ;;  %vm2771_vm14 = vweird.f32 %v7200_v1  ;;  %v2776_v3 = vand.u32 2147483648, %v7189_v34 }
0x1231   :  { %v2797_v5 = vsub.f32 1.0, %v2796_v32  ;;  %v2783_v42 = vmul.f32 %v5572_v33, %v2782_v62  ;;  %v2739_v49 = vadd.f32 %v5570_v22, %v2738_v38  ;;  %v2792_v32 = vor.u32 1.1754944e-38, %v2791_v27 }
0x1232   :  { %v2753_v51 = vmul.f32 %v5574_v21, %v2752_v44  ;;  %v2812_v62 = vsub.f32 1.0, %v2811_v59  ;;  %vm2805_vm9 = vcmp.eq.f32.partialorder %v2804_v50, 8.507059e+37  ;;  %vm2770_vm10 = vweird.f32 %v7189_v34 }
0x1233   :  { %v2798_v37 = vmul.f32 %v5576_v9, %v2797_v5  ;;  %v2784_v13 = vadd.f32 %v5572_v33, %v2783_v42  ;;  %v2743_v4 = vsel %vm2742_vm1, %v5570_v22, %v2739_v49  ;;  %vm2772_vm11 = vmor %vm2770_vm10, %vm2771_vm14 }
0x1234   :  { %v2754_v29 = vadd.f32 %v5574_v21, %v2753_v51  ;;  %v2748_v44 = vsel %vm7230_vm8, %v2747_v55, %v2743_v4  ;;  %v2813_v52 = vmul.f32 %v7222_v63, %v2812_v62  ;;  %vm2816_vm8 = vweird.f32 %v7222_v63 }
0x1235   :  { %v2788_v5 = vsel %vm2787_vm3, %v5572_v33, %v2784_v13  ;;  %v2799_v38 = vadd.f32 %v5576_v9, %v2798_v37  ;;  %v2829_v51 = vmul.f32 %v5578_v14, %v2748_v44  ;;  %v2769_v37 = vadd.f32 %v7200_v1, %v7226_v24  ;;  %vm2817_vm15 = vmor %vm2815_vm12, %vm2816_vm8 }
0x1236   :  { %v2758_v41 = vsel %vm2757_vm4, %v5574_v21, %v2754_v29  ;;  %v2793_v54 = vsel %vm2790_vm5, %v2792_v32, %v2788_v5  ;;  %v2819_v24 = vand.u32 2147483647, %v7202_v19 }
0x1237   :  { %v2763_v27 = vsel %vm2760_vm6, %v2762_v36, %v2758_v41  ;;  %v2803_v59 = vsel %vm2802_vm13, %v5576_v9, %v2799_v38  ;;  %v2830_v48 = vmul.f32 %v5580_v47, %v2793_v54  ;;  %v2814_v47 = vadd.f32 %v7222_v63, %v2813_v52  ;;  %v8292_v38 = vld [vmem:[#allocation57_spill] sm:$0xff]  ;;  %v8293_v41 = vld [vmem:[#allocation58_spill] sm:$0xff] }
0x1238   :  { %v2808_v22 = vsel %vm2805_vm9, %v2807_v10, %v2803_v59  ;;  %v2827_v39 = vmul.f32 0.0, %v2763_v27  ;;  %v2774_v10 = vand.u32 2147483647, %v7189_v34  ;;  %v2821_v36 = vand.u32 2147483648, %v7202_v19  ;;  %v8294_v54 = vld [vmem:[#allocation54_spill] sm:$0xff] }
0x1239   :  { %v2828_v55 = vmul.f32 0.0, %v2808_v22  ;;  %v2773_v21 = vsel %vm2772_vm11, %v7200_v1, %v2769_v37  ;;  %v2777_v9 = vor.u32 1.1754944e-38, %v2776_v3  ;;  %v2818_v2 = vsel %vm2817_vm15, %v7222_v63, %v2814_v47  ;;  %v8291_v63 = vld [vmem:[#allocation59_spill] sm:$0xff]  ;;  %v8297_v52 = vld [vmem:[#allocation62_spill] sm:$0xff] }
0x123a   :  { %v7257_v33 = vadd.f32 %v2829_v51, %v2827_v39  ;;  %vm2775_vm1 = vcmp.eq.f32.partialorder %v2774_v10, 8.507059e+37  ;;  %v2822_v14 = vor.u32 1.1754944e-38, %v2821_v36  ;;  %vm2820_vm2 = vcmp.eq.f32.partialorder %v2819_v24, 8.507059e+37  ;;  %v8295_v51 = vld [vmem:[#allocation61_spill] sm:$0xff]  ;;  %v8296_v22 = vld [vmem:[#allocation63_spill] sm:$0xff]  ;;  %v8298_v24 = vld [vmem:[#allocation66_spill] sm:$0xff] }
0x123b   :  { %v7260_v29 = vadd.f32 %v2830_v48, %v2828_v55  ;;  %v2778_v0 = vsel %vm2775_vm1, %v2777_v9, %v2773_v21 }
0x123c   :  { %5581 = vtanh.f32 %v7257_v33  ;;  %v2823_v34 = vsel %vm2820_vm2, %v2822_v14, %v2818_v2  ;;  %v8299_v2 = vld [vmem:[#allocation67_spill] sm:$0xff] }
0x123d   :  { %5583 = vtanh.f32 %v7260_v29 }
0x1242   :  { %v5582_v42 = vpop.eup %5581 }
0x1243   :  { %v5584_v49 = vpop.eup %5583  ;;  %v2835_v13 = vmul.f32 %v5582_v42, %v2778_v0  ;;  %v8300_v42 = vld [vmem:[#allocation64_spill] sm:$0xff] }
0x1244   :  { %v2836_v50 = vmul.f32 %v5584_v49, %v2823_v34  ;;  %v8301_v34 = vld [vmem:[#allocation65_spill] sm:$0xff] }
0x1245   :  { %v2837_v4 = vpack.c.bf16 %v2835_v13, %v2835_v13 }
0x1246   :  { %v2838_v32 = vpack.c.bf16 %v2836_v50, %v2836_v50 }
0x1247   :  { %v2841_v44 = vunpack.c.l.b16 %v2837_v4 }
0x1248   :  { %v2842_v62 = vunpack.c.l.b16 %v2838_v32 }
0x124a   :  { %v2843_v19 = vrot.slane %v2842_v62, 7 }
0x124c   :  { %v2845_v1 = vsel %vm2844_vm7, %v2843_v19, %v2841_v44 }
0x124d   :  { %v2846_v5 = vpack.c.b16 %v2845_v1, %v2845_v1 }
0x124f   :  { %2856 = vmatmul.bf16.vlgmr.msrb.gmra.mxu2 %v2846_v5  ;;  %2869 = vmatmul.bf16.vlgmr.msra.gmra.mxu3 %v2846_v5 }
0x1250   :  { %2882 = vmatmul.bf16.vlgmr.msra.gmra.mxu0 %v2846_v5  ;;  %2895 = vmatmul.bf16.vlgmr.msrb.gmra.mxu1 %v2846_v5 }
0x1251   :  { %3289 = vmatpush.bf16.msrb.mxu2 %v6929_v56  ;;  %3302 = vmatpush.bf16.msra.mxu3 %v6934_v58 }
0x1252   :  { %3315 = vmatpush.bf16.msra.mxu0 %v6907_v35  ;;  %3328 = vmatpush.bf16.msrb.mxu1 %v7066_v60 }
0x1255   :  { %3290 = vmatpush.bf16.msrb.mxu2 %v6949_v7  ;;  %3303 = vmatpush.bf16.msra.mxu3 %v6954_v15 }
0x1256   :  { %3316 = vmatpush.bf16.msra.mxu0 %v6918_v45  ;;  %3329 = vmatpush.bf16.msrb.mxu1 %v7075_v12 }
0x1259   :  { %3291 = vmatpush.bf16.msrb.mxu2 %v6966_v25  ;;  %3304 = vmatpush.bf16.msra.mxu3 %v6971_v30 }
0x125a   :  { %3317 = vmatpush.bf16.msra.mxu0 %v6940_v61  ;;  %3330 = vmatpush.bf16.msrb.mxu1 %v7083_v6 }
0x125d   :  { %3292 = vmatpush.bf16.msrb.mxu2 %v6986_v40  ;;  %3305 = vmatpush.bf16.msra.mxu3 %v6990_v43 }
0x125e   :  { %3318 = vmatpush.bf16.msra.mxu0 %v6956_v16  ;;  %3331 = vmatpush.bf16.msrb.mxu1 %v7092_v17 }
0x1261   :  { %3293 = vmatpush.bf16.msrb.mxu2 %v7004_v53  ;;  %3306 = vmatpush.bf16.msra.mxu3 %v7009_v8 }
0x1262   :  { %3319 = vmatpush.bf16.msra.mxu0 %v6973_v31  ;;  %3332 = vmatpush.bf16.msrb.mxu1 %v7100_v26 }
0x1265   :  { %3294 = vmatpush.bf16.msrb.mxu2 %v7019_v28  ;;  %3307 = vmatpush.bf16.msra.mxu3 %v7025_v11 }
0x1266   :  { %3320 = vmatpush.bf16.msra.mxu0 %v6995_v46  ;;  %3333 = vmatpush.bf16.msrb.mxu1 %v7110_v20 }
0x1269   :  { %3295 = vmatpush.bf16.msrb.mxu2 %v7033_v18  ;;  %3308 = vmatpush.bf16.msra.mxu3 %v7038_v23 }
0x126a   :  { %3321 = vmatpush.bf16.msra.mxu0 %v7011_v57  ;;  %3334 = vmatpush.bf16.msrb.mxu1 %v8291_v63 }
0x126d   :  { %3296 = vmatpush.bf16.msrb.mxu2 %v8292_v38  ;;  %3309 = vmatpush.bf16.msra.mxu3 %v8293_v41 }
0x126e   :  { %3322 = vmatpush.bf16.msra.mxu0 %v8294_v54  ;;  %3335 = vmatpush.bf16.msrb.mxu1 %v8295_v51 }
0x12cd   :  { %v2883_v27 = vpop.f32.mrf.mxu0  ;;  %v2896_v59 = vpop.f32.mrf.mxu1 }
0x12ce   :  { %v2906_v48 = vrot.slane %v2883_v27, 7  ;;  %v2922_v39 = vadd.f32 %v2883_v27, %v8296_v22 }
0x12d0   :  { %v2918_v55 = vadd.f32 %v2906_v48, %v8297_v52  ;;  %v5147_v37 = vmul.f32 -1.442695, %v2922_v39 }
0x12d2   :  { %v5144_v3 = vmul.f32 -1.442695, %v2918_v55  ;;  %5585 = vpow2.f32 %v5147_v37  ;;  %v2857_v47 = vpop.f32.mrf.mxu2  ;;  %v2870_v10 = vpop.f32.mrf.mxu3 }
0x12d3   :  { %v2904_v36 = vrot.slane %v2857_v47, 7  ;;  %v2920_v21 = vadd.f32 %v2857_v47, %v8298_v24  ;;  %v2905_v9 = vrot.slane %v2870_v10, 7  ;;  %v2921_v14 = vadd.f32 %v2870_v10, %v8299_v2 }
0x12d4   :  { %5587 = vpow2.f32 %v5144_v3  ;;  %v2907_v10 = vrot.slane %v2896_v59, 7 }
0x12d5   :  { %v2916_v0 = vadd.f32 %v2904_v36, %v8300_v42  ;;  %v5145_v49 = vmul.f32 -1.442695, %v2920_v21  ;;  %v2917_v13 = vadd.f32 %v2905_v9, %v8301_v34  ;;  %v2885_v50 = vpop.f32.mrf.mxu0  ;;  %v2898_v4 = vpop.f32.mrf.mxu1  ;;  %v5146_v32 = vmul.f32 -1.442695, %v2921_v14 }
0x12d6   :  { %v8303_v50 = vld [vmem:[#allocation68_spill] sm:$0xff] }
0x12d7   :  { %v5142_v62 = vmul.f32 -1.442695, %v2916_v0  ;;  %5589 = vpow2.f32 %v5145_v49  ;;  %v5143_v44 = vmul.f32 -1.442695, %v2917_v13  ;;  %v8302_v49 = vld [vmem:[#allocation69_spill] sm:$0xff]  ;;  %v2919_v4 = vadd.f32 %v2907_v10, %v8303_v50 }
0x12d8   :  { %v5586_v19 = vpop.eup %5585  ;;  %5591 = vpow2.f32 %v5146_v32  ;;  %v2923_v13 = vadd.f32 %v2896_v59, %v8302_v49 }
0x12d9   :  { %v7315_v1 = vadd.f32 1.0, %v5586_v19  ;;  %5593 = vpow2.f32 %v5142_v62 }
0x12da   :  { %v5588_v5 = vpop.eup %5587  ;;  %5595 = vpow2.f32 %v5143_v44  ;;  %v2859_v27 = vpop.f32.mrf.mxu2 }
0x12db   :  { %v2872_v48 = vpop.f32.mrf.mxu3  ;;  %v7317_v39 = vadd.f32 1.0, %v5588_v5  ;;  %5597 = vrcp.f32 %v7315_v1  ;;  %v3043_v27 = vrot.slane %v7260_v29, 7 }
0x12dd   :  { %v5590_v55 = vpop.eup %5589  ;;  %5599 = vrcp.f32 %v7317_v39 }
0x12de   :  { %v5592_v37 = vpop.eup %5591  ;;  %v2945_v3 = vadd.f32 1.0, %v5590_v55 }
0x12df   :  { %v5594_v47 = vpop.eup %5593  ;;  %v7321_v36 = vadd.f32 1.0, %v5592_v37 }
0x12e0   :  { %v5596_v21 = vpop.eup %5595  ;;  %v2942_v9 = vadd.f32 1.0, %v5594_v47  ;;  %5601 = vrcp.f32 %v2945_v3  ;;  %v3002_v32 = vand.u32 2147483647, %v2945_v3  ;;  %v3004_v62 = vand.u32 2147483648, %v2945_v3 }
0x12e1   :  { %v7323_v14 = vadd.f32 1.0, %v5596_v21  ;;  %5603 = vrcp.f32 %v7321_v36  ;;  %v7326_v0 = vpop.eup %5597  ;;  %vm2998_vm3 = vweird.f32 %v2945_v3  ;;  %vm3013_vm4 = vweird.f32 %v7321_v36 }
0x12e2   :  { %5605 = vrcp.f32 %v2942_v9  ;;  %v3024_v19 = vmul.f32 %v7326_v0, %v7315_v1  ;;  %v2957_v48 = vand.u32 2147483647, %v2942_v9  ;;  %v2959_v55 = vand.u32 2147483648, %v2942_v9 }
0x12e3   :  { %5607 = vrcp.f32 %v7323_v14  ;;  %v7331_v44 = vpop.eup %5599  ;;  %vm2953_vm5 = vweird.f32 %v2942_v9  ;;  %vm7337_vm6 = vcmp.eq.f32.partialorder %v3002_v32, 8.507059e+37  ;;  %v3005_v21 = vor.u32 1.1754944e-38, %v3004_v62 }
0x12e4   :  { %5609 = vtanh.f32 %v2923_v13  ;;  %v2979_v29 = vmul.f32 %v7331_v44, %v7317_v39  ;;  %v3025_v13 = vsub.f32 1.0, %v3024_v19  ;;  %vm7344_vm13 = vcmp.eq.f32.partialorder %v2957_v48, 8.507059e+37 }
0x12e5   :  { %5611 = vtanh.f32 %v2919_v4  ;;  %v2960_v24 = vor.u32 1.1754944e-38, %v2959_v55  ;;  %v3019_v52 = vand.u32 2147483648, %v7321_v36  ;;  %vm2968_vm14 = vweird.f32 %v7323_v14 }
0x12e6   :  { %v5602_v5 = vpop.eup %5601  ;;  %v2980_v57 = vsub.f32 1.0, %v2979_v29 }
0x12e7   :  { %v5604_v37 = vpop.eup %5603  ;;  %v2994_v59 = vmul.f32 %v5602_v5, %v2945_v3  ;;  %vm2999_vm9 = vweird.f32 %v5602_v5 }
0x12e8   :  { %v5606_v47 = vpop.eup %5605  ;;  %v3009_v49 = vmul.f32 %v5604_v37, %v7321_v36  ;;  %vm3014_vm8 = vweird.f32 %v5604_v37  ;;  %vm3000_vm11 = vmor %vm2998_vm3, %vm2999_vm9 }
0x12e9   :  { %v2949_v50 = vmul.f32 %v5606_v47, %v2942_v9  ;;  %v2995_v2 = vsub.f32 1.0, %v2994_v59  ;;  %v5608_v4 = vpop.eup %5607  ;;  %v3017_v59 = vand.u32 2147483647, %v7321_v36  ;;  %vm2954_vm10 = vweird.f32 %v5606_v47  ;;  %vm3015_vm15 = vmor %vm3013_vm4, %vm3014_vm8 }
0x12ea   :  { %v3010_v32 = vsub.f32 1.0, %v3009_v49  ;;  %v2964_v62 = vmul.f32 %v5608_v4, %v7323_v14  ;;  %v5610_v51 = vpop.eup %5609  ;;  %vm2969_vm12 = vweird.f32 %v5608_v4  ;;  %v2974_v49 = vand.u32 2147483648, %v7323_v14  ;;  %vm2955_vm1 = vmor %vm2953_vm5, %vm2954_vm10 }
0x12eb   :  { %v2950_v42 = vsub.f32 1.0, %v2949_v50  ;;  %v2996_v22 = vmul.f32 %v5602_v5, %v2995_v2  ;;  %v5612_v48 = vpop.eup %5611  ;;  %v2972_v2 = vand.u32 2147483647, %v7323_v14  ;;  %vm3018_vm2 = vcmp.eq.f32.partialorder %v3017_v59, 8.507059e+37  ;;  %vm2970_vm3 = vmor %vm2968_vm14, %vm2969_vm12 }
0x12ec   :  { %v3011_v19 = vmul.f32 %v5604_v37, %v3010_v32  ;;  %v2965_v55 = vsub.f32 1.0, %v2964_v62  ;;  %v3042_v9 = vrot.slane %v7257_v33, 7  ;;  %vm3029_vm5 = vweird.f32 %v7326_v0 }
0x12ed   :  { %v2951_v54 = vmul.f32 %v5606_v47, %v2950_v42  ;;  %v2997_v41 = vadd.f32 %v5602_v5, %v2996_v22  ;;  %v3020_v42 = vor.u32 1.1754944e-38, %v3019_v52  ;;  %v2975_v52 = vor.u32 1.1754944e-38, %v2974_v49 }
0x12ee   :  { %v3012_v50 = vadd.f32 %v5604_v37, %v3011_v19  ;;  %v2966_v32 = vmul.f32 %v5608_v4, %v2965_v55  ;;  %vm2973_vm4 = vcmp.eq.f32.partialorder %v2972_v2, 8.507059e+37  ;;  %vm2983_vm14 = vweird.f32 %v7317_v39 }
0x12ef   :  { %v2952_v38 = vadd.f32 %v5606_v47, %v2951_v54  ;;  %v3001_v63 = vsel %vm3000_vm11, %v5602_v5, %v2997_v41  ;;  %v3026_v41 = vmul.f32 %v7326_v0, %v3025_v13 }
0x12f0   :  { %v3006_v22 = vsel %vm7337_vm6, %v3005_v21, %v3001_v63  ;;  %v3016_v3 = vsel %vm3015_vm15, %v5604_v37, %v3012_v50  ;;  %v2967_v18 = vadd.f32 %v5608_v4, %v2966_v32  ;;  %vm2984_vm6 = vweird.f32 %v7331_v44 }
0x12f1   :  { %v2956_v62 = vsel %vm2955_vm1, %v5606_v47, %v2952_v38  ;;  %v3049_v23 = vmul.f32 %v5610_v51, %v3006_v22  ;;  %v3021_v19 = vsel %vm3018_vm2, %v3020_v42, %v3016_v3  ;;  %v2981_v38 = vmul.f32 %v7331_v44, %v2980_v57  ;;  %vm2985_vm8 = vmor %vm2983_vm14, %vm2984_vm6  ;;  %v8309_v22 = vld [vmem:[#allocation56_spill] sm:$0xff]  ;;  %v8310_v3 = vld [vmem:[#allocation53_spill] sm:$0xff] }
0x12f2   :  { %v2961_v54 = vsel %vm7344_vm13, %v2960_v24, %v2956_v62  ;;  %v3047_v36 = vmul.f32 %v3043_v27, %v3021_v19  ;;  %v2971_v5 = vsel %vm2970_vm3, %v5608_v4, %v2967_v18  ;;  %v3027_v34 = vadd.f32 %v7326_v0, %v3026_v41  ;;  %v8311_v62 = vld [vmem:[#allocation59_spill] sm:$0xff]  ;;  %v8312_v19 = vld [vmem:[#allocation57_spill] sm:$0xff]  ;;  %v8313_v41 = vld [vmem:[#allocation58_spill] sm:$0xff] }
0x12f3   :  { %v3048_v63 = vmul.f32 %v5612_v48, %v2961_v54  ;;  %v2976_v51 = vsel %vm2973_vm4, %v2975_v52, %v2971_v5  ;;  %v3034_v24 = vand.u32 2147483648, %v7315_v1  ;;  %v2982_v33 = vadd.f32 %v7331_v44, %v2981_v38  ;;  %v8314_v54 = vld [vmem:[#allocation54_spill] sm:$0xff]  ;;  %v8315_v52 = vld [vmem:[#allocation61_spill] sm:$0xff] }
0x12f4   :  { %v7370_v37 = vadd.f32 %v3049_v23, %v3047_v36  ;;  %v3046_v47 = vmul.f32 %v3042_v9, %v2976_v51  ;;  %vm3028_vm13 = vweird.f32 %v7315_v1  ;;  %v3032_v57 = vand.u32 2147483647, %v7315_v1  ;;  %v8316_v38 = vld [vmem:[#allocation62_spill] sm:$0xff] }
0x12f5   :  { %v2989_v18 = vand.u32 2147483648, %v7317_v39  ;;  %vm3030_vm9 = vmor %vm3028_vm13, %vm3029_vm5  ;;  %v2987_v23 = vand.u32 2147483647, %v7317_v39  ;;  %v3035_v10 = vor.u32 1.1754944e-38, %v3034_v24  ;;  %v2986_v29 = vsel %vm2985_vm8, %v7331_v44, %v2982_v33  ;;  %v8308_v44 = vld [vmem:[#allocation55_spill] sm:$0xff] }
0x12f6   :  { %5613 = vtanh.f32 %v7370_v37  ;;  %v7376_v14 = vadd.f32 %v3048_v63, %v3046_v47  ;;  %v3031_v27 = vsel %vm3030_vm9, %v7326_v0, %v3027_v34  ;;  %vm3033_vm10 = vcmp.eq.f32.partialorder %v3032_v57, 8.507059e+37  ;;  %v8317_v47 = vld [vmem:[#allocation63_spill] sm:$0xff] }
0x12f7   :  { %v2990_v13 = vor.u32 1.1754944e-38, %v2989_v18  ;;  %v3036_v4 = vsel %vm3033_vm10, %v3035_v10, %v3031_v27  ;;  %vm2988_vm11 = vcmp.eq.f32.partialorder %v2987_v23, 8.507059e+37 }
0x12f8   :  { %5615 = vtanh.f32 %v7376_v14 }
0x12f9   :  { %v2991_v48 = vsel %vm2988_vm11, %v2990_v13, %v2986_v29  ;;  %v8318_v29 = vld [vmem:[#allocation64_spill] sm:$0xff] }
0x12fc   :  { %v5614_v21 = vpop.eup %5613 }
0x12fd   :  { %v3055_v1 = vmul.f32 %v5614_v21, %v3036_v4  ;;  %v8319_v4 = vld [vmem:[#allocation66_spill] sm:$0xff] }
0x12fe   :  { %v5616_v59 = vpop.eup %5615 }
0x12ff   :  { %v3054_v55 = vmul.f32 %v5616_v59, %v2991_v48  ;;  %v3057_v49 = vpack.c.bf16 %v3055_v1, %v3055_v1  ;;  %v8320_v59 = vld [vmem:[#allocation65_spill] sm:$0xff] }
0x1301   :  { %v3056_v2 = vpack.c.bf16 %v3054_v55, %v3054_v55  ;;  %v3061_v32 = vunpack.c.l.b16 %v3057_v49  ;;  %v8321_v49 = vld [vmem:[#allocation67_spill] sm:$0xff] }
0x1303   :  { %v3060_v50 = vunpack.c.l.b16 %v3056_v2 }
0x1305   :  { %v3062_v39 = vrot.slane %v3060_v50, 1 }
0x1307   :  { %v3063_v0 = vsel %vm2844_vm7, %v3061_v32, %v3062_v39 }
0x1308   :  { %v3064_v42 = vpack.c.b16 %v3063_v0, %v3063_v0 }
0x130a   :  { %3074 = vmatmul.bf16.vlgmr.msra.gmra.mxu2 %v3064_v42  ;;  %3087 = vmatmul.bf16.vlgmr.msrb.gmra.mxu3 %v3064_v42 }
0x130b   :  { %3100 = vmatmul.bf16.vlgmr.msrb.gmra.mxu0 %v3064_v42  ;;  %3113 = vmatmul.bf16.vlgmr.msra.gmra.mxu1 %v3064_v42 }
0x130c   :  { %3512 = vmatpush.bf16.msra.mxu2 %v6929_v56  ;;  %3525 = vmatpush.bf16.msrb.mxu3 %v6934_v58 }
0x130d   :  { %3538 = vmatpush.bf16.msrb.mxu0 %v6907_v35  ;;  %3551 = vmatpush.bf16.msra.mxu1 %v7066_v60 }
0x1310   :  { %3513 = vmatpush.bf16.msra.mxu2 %v6949_v7  ;;  %3526 = vmatpush.bf16.msrb.mxu3 %v6954_v15 }
0x1311   :  { %3539 = vmatpush.bf16.msrb.mxu0 %v6918_v45  ;;  %3552 = vmatpush.bf16.msra.mxu1 %v7075_v12 }
0x1314   :  { %3514 = vmatpush.bf16.msra.mxu2 %v6966_v25  ;;  %3527 = vmatpush.bf16.msrb.mxu3 %v6971_v30 }
0x1315   :  { %3540 = vmatpush.bf16.msrb.mxu0 %v6940_v61  ;;  %3553 = vmatpush.bf16.msra.mxu1 %v7083_v6 }
0x1318   :  { %3515 = vmatpush.bf16.msra.mxu2 %v6986_v40  ;;  %3528 = vmatpush.bf16.msrb.mxu3 %v6990_v43 }
0x1319   :  { %3541 = vmatpush.bf16.msrb.mxu0 %v6956_v16  ;;  %3554 = vmatpush.bf16.msra.mxu1 %v7092_v17 }
0x131c   :  { %3516 = vmatpush.bf16.msra.mxu2 %v7004_v53  ;;  %3529 = vmatpush.bf16.msrb.mxu3 %v7009_v8 }
0x131d   :  { %3542 = vmatpush.bf16.msrb.mxu0 %v6973_v31  ;;  %3555 = vmatpush.bf16.msra.mxu1 %v7100_v26 }
0x1320   :  { %3517 = vmatpush.bf16.msra.mxu2 %v7019_v28  ;;  %3530 = vmatpush.bf16.msrb.mxu3 %v7025_v11 }
0x1321   :  { %3543 = vmatpush.bf16.msrb.mxu0 %v6995_v46  ;;  %3556 = vmatpush.bf16.msra.mxu1 %v7110_v20 }
0x1324   :  { %3518 = vmatpush.bf16.msra.mxu2 %v8308_v44  ;;  %3531 = vmatpush.bf16.msrb.mxu3 %v8309_v22 }
0x1325   :  { %3544 = vmatpush.bf16.msrb.mxu0 %v8310_v3  ;;  %3557 = vmatpush.bf16.msra.mxu1 %v8311_v62 }
0x1328   :  { %3519 = vmatpush.bf16.msra.mxu2 %v8312_v19  ;;  %3532 = vmatpush.bf16.msrb.mxu3 %v8313_v41 }
0x1329   :  { %3545 = vmatpush.bf16.msrb.mxu0 %v8314_v54  ;;  %3558 = vmatpush.bf16.msra.mxu1 %v8315_v52 }
0x1388   :  { %v3101_v36 = vpop.f32.mrf.mxu0  ;;  %v3114_v9 = vpop.f32.mrf.mxu1 }
0x1389   :  { %v3124_v63 = vrot.slane %v3101_v36, 6  ;;  %v3128_v5 = vrot.slane %v3101_v36, 7 }
0x138b   :  { %v3140_v51 = vadd.f32 %v3124_v63, %v8316_v38  ;;  %v3144_v34 = vadd.f32 %v3128_v5, %v8317_v47 }
0x138d   :  { %v3075_v24 = vpop.f32.mrf.mxu2  ;;  %v3088_v33 = vpop.f32.mrf.mxu3  ;;  %v5150_v57 = vmul.f32 -1.442695, %v3140_v51  ;;  %v5153_v10 = vmul.f32 -1.442695, %v3144_v34 }
0x138e   :  { %v3122_v18 = vrot.slane %v3075_v24, 6  ;;  %v3126_v23 = vrot.slane %v3075_v24, 7  ;;  %v3123_v27 = vrot.slane %v3088_v33, 6  ;;  %v3127_v21 = vrot.slane %v3088_v33, 7 }
0x138f   :  { %5617 = vpow2.f32 %v5150_v57 }
0x1390   :  { %v3138_v13 = vadd.f32 %v3122_v18, %v8318_v29  ;;  %v3142_v1 = vadd.f32 %v3126_v23, %v8319_v4  ;;  %v3139_v48 = vadd.f32 %v3123_v27, %v8320_v59  ;;  %v3103_v55 = vpop.f32.mrf.mxu0  ;;  %v3116_v2 = vpop.f32.mrf.mxu1  ;;  %v3143_v50 = vadd.f32 %v3127_v21, %v8321_v49 }
0x1391   :  { %5619 = vpow2.f32 %v5153_v10  ;;  %v3125_v21 = vrot.slane %v3114_v9, 6 }
0x1392   :  { %v5148_v32 = vmul.f32 -1.442695, %v3138_v13  ;;  %v5151_v39 = vmul.f32 -1.442695, %v3142_v1  ;;  %v5149_v0 = vmul.f32 -1.442695, %v3139_v48 }
0x1393   :  { %v5152_v42 = vmul.f32 -1.442695, %v3143_v50  ;;  %v3129_v13 = vrot.slane %v3114_v9, 7  ;;  %v8322_v50 = vld [vmem:[#allocation68_spill] sm:$0xff] }
0x1394   :  { %5621 = vpow2.f32 %v5148_v32  ;;  %v3141_v32 = vadd.f32 %v3125_v21, %v8322_v50 }
0x1395   :  { %5623 = vpow2.f32 %v5151_v39  ;;  %v3077_v36 = vpop.f32.mrf.mxu2  ;;  %v3090_v63 = vpop.f32.mrf.mxu3 }
0x1396   :  { %v5618_v5 = vpop.eup %5617  ;;  %5625 = vpow2.f32 %v5149_v0  ;;  %v8323_v0 = vld [vmem:[#allocation69_spill] sm:$0xff] }
0x1397   :  { %v5620_v51 = vpop.eup %5619  ;;  %5627 = vpow2.f32 %v5152_v42  ;;  %v7427_v23 = vadd.f32 1.0, %v5618_v5  ;;  %v3145_v42 = vadd.f32 %v3129_v13, %v8323_v0 }
0x1398   :  { %v7429_v27 = vadd.f32 1.0, %v5620_v51  ;;  %v3264_v51 = vrot.slane %v7376_v14, 7 }
0x139a   :  { %v5622_v34 = vpop.eup %5621 }
0x139b   :  { %v5624_v24 = vpop.eup %5623  ;;  %v3164_v33 = vadd.f32 1.0, %v5622_v34 }
0x139c   :  { %v3167_v18 = vadd.f32 1.0, %v5624_v24  ;;  %v5626_v57 = vpop.eup %5625 }
0x139d   :  { %5629 = vrcp.f32 %v3164_v33  ;;  %v5628_v10 = vpop.eup %5627  ;;  %v7432_v1 = vadd.f32 1.0, %v5626_v57  ;;  %v3179_v57 = vand.u32 2147483647, %v3164_v33  ;;  %v3181_v21 = vand.u32 2147483648, %v3164_v33 }
0x139e   :  { %5631 = vrcp.f32 %v3167_v18  ;;  %v7435_v48 = vadd.f32 1.0, %v5628_v10  ;;  %v3224_v13 = vand.u32 2147483647, %v3167_v18  ;;  %vm3175_vm15 = vweird.f32 %v3164_v33 }
0x139f   :  { %5633 = vrcp.f32 %v7427_v23  ;;  %vm3220_vm2 = vweird.f32 %v3167_v18  ;;  %vm3180_vm4 = vcmp.eq.f32.partialorder %v3179_v57, 8.507059e+37  ;;  %v3196_v4 = vand.u32 2147483648, %v7432_v1 }
0x13a0   :  { %5635 = vrcp.f32 %v7429_v27  ;;  %vm7457_vm5 = vcmp.eq.f32.partialorder %v3224_v13, 8.507059e+37  ;;  %vm3190_vm9 = vweird.f32 %v7432_v1  ;;  %v3241_v54 = vand.u32 2147483648, %v7435_v48 }
0x13a1   :  { %5637 = vrcp.f32 %v7432_v1  ;;  %v3197_v41 = vor.u32 1.1754944e-38, %v3196_v4  ;;  %vm3235_vm11 = vweird.f32 %v7435_v48 }
0x13a2   :  { %5639 = vrcp.f32 %v7435_v48 }
0x13a3   :  { %v5630_v55 = vpop.eup %5629  ;;  %5641 = vtanh.f32 %v3141_v32 }
0x13a4   :  { %v5632_v2 = vpop.eup %5631  ;;  %v3171_v39 = vmul.f32 %v5630_v55, %v3164_v33  ;;  %vm3176_vm12 = vweird.f32 %v5630_v55  ;;  %5643 = vtanh.f32 %v3145_v42 }
0x13a5   :  { %v3216_v36 = vmul.f32 %v5632_v2, %v3167_v18  ;;  %v7441_v9 = vpop.eup %5633  ;;  %vm7449_vm1 = vmor %vm3175_vm15, %vm3176_vm12  ;;  %vm3221_vm3 = vweird.f32 %v5632_v2 }
0x13a6   :  { %v3172_v63 = vsub.f32 1.0, %v3171_v39  ;;  %v7444_v34 = vpop.eup %5635  ;;  %v3226_v39 = vand.u32 2147483648, %v3167_v18  ;;  %vm7463_vm6 = vmor %vm3220_vm2, %vm3221_vm3  ;;  %vm3205_vm2 = vweird.f32 %v7427_v23 }
0x13a7   :  { %v3217_v5 = vsub.f32 1.0, %v3216_v36  ;;  %v5638_v10 = vpop.eup %5637  ;;  %v3201_v36 = vmul.f32 %v7441_v9, %v7427_v23  ;;  %v3246_v42 = vmul.f32 %v7444_v34, %v7429_v27 }
0x13a8   :  { %v3173_v24 = vmul.f32 %v5630_v55, %v3172_v63  ;;  %v3186_v49 = vmul.f32 %v5638_v10, %v7432_v1  ;;  %v5640_v63 = vpop.eup %5639  ;;  %v3227_v47 = vor.u32 1.1754944e-38, %v3226_v39  ;;  %vm3191_vm13 = vweird.f32 %v5638_v10 }
0x13a9   :  { %v3218_v50 = vmul.f32 %v5632_v2, %v3217_v5  ;;  %v5642_v18 = vpop.eup %5641  ;;  %v3247_v14 = vsub.f32 1.0, %v3246_v42  ;;  %vm3192_vm14 = vmor %vm3190_vm9, %vm3191_vm13  ;;  %vm3236_vm8 = vweird.f32 %v5640_v63 }
0x13aa   :  { %v3174_v0 = vadd.f32 %v5630_v55, %v3173_v24  ;;  %v3187_v5 = vsub.f32 1.0, %v3186_v49  ;;  %v3182_v24 = vor.u32 1.1754944e-38, %v3181_v21  ;;  %v5644_v49 = vpop.eup %5643  ;;  %vm3237_vm12 = vmor %vm3235_vm11, %vm3236_vm8 }
0x13ab   :  { %v3219_v32 = vadd.f32 %v5632_v2, %v3218_v50  ;;  %v3231_v50 = vmul.f32 %v5640_v63, %v7435_v48  ;;  %v3248_v59 = vmul.f32 %v7444_v34, %v3247_v14 }
0x13ac   :  { %v3178_v33 = vsel %vm7449_vm1, %v5630_v55, %v3174_v0  ;;  %v3188_v38 = vmul.f32 %v5638_v10, %v3187_v5  ;;  %v3194_v55 = vand.u32 2147483647, %v7432_v1  ;;  %v3202_v0 = vsub.f32 1.0, %v3201_v36 }
0x13ad   :  { %v3183_v57 = vsel %vm3180_vm4, %v3182_v24, %v3178_v33  ;;  %v3223_v21 = vsel %vm7463_vm6, %v5632_v2, %v3219_v32  ;;  %v3232_v13 = vsub.f32 1.0, %v3231_v50  ;;  %v3239_v5 = vand.u32 2147483647, %v7435_v48 }
0x13ae   :  { %v3189_v52 = vadd.f32 %v5638_v10, %v3188_v38  ;;  %v3228_v36 = vsel %vm7457_vm5, %v3227_v47, %v3223_v21  ;;  %v3270_v33 = vmul.f32 %v5642_v18, %v3183_v57  ;;  %vm3195_vm10 = vcmp.eq.f32.partialorder %v3194_v55, 8.507059e+37 }
0x13af   :  { %v3233_v39 = vmul.f32 %v5640_v63, %v3232_v13  ;;  %v3203_v29 = vmul.f32 %v7441_v9, %v3202_v0  ;;  %v3242_v1 = vor.u32 1.1754944e-38, %v3241_v54  ;;  %v3271_v4 = vmul.f32 %v5644_v49, %v3228_v36 }
0x13b0   :  { %v3193_v24 = vsel %vm3192_vm14, %v5638_v10, %v3189_v52  ;;  %vm3240_vm15 = vcmp.eq.f32.partialorder %v3239_v5, 8.507059e+37  ;;  %v3265_v50 = vrot.slane %v7370_v37, 7  ;;  %vm3206_vm1 = vweird.f32 %v7441_v9 }
0x13b1   :  { %v3198_v2 = vsel %vm3195_vm10, %v3197_v41, %v3193_v24  ;;  %v3234_v38 = vadd.f32 %v5640_v63, %v3233_v39  ;;  %v3204_v52 = vadd.f32 %v7441_v9, %v3203_v29  ;;  %v3211_v48 = vand.u32 2147483648, %v7427_v23  ;;  %vm3207_vm3 = vmor %vm3205_vm2, %vm3206_vm1 }
0x13b2   :  { %v3268_v32 = vmul.f32 %v3264_v51, %v3198_v2  ;;  %v3209_v54 = vand.u32 2147483647, %v7427_v23  ;;  %v3249_v37 = vadd.f32 %v7444_v34, %v3248_v59  ;;  %vm3251_vm4 = vweird.f32 %v7444_v34 }
0x13b3   :  { %v3238_v42 = vsel %vm3237_vm12, %v5640_v63, %v3234_v38  ;;  %v3256_v10 = vand.u32 2147483648, %v7429_v27  ;;  %v3208_v63 = vsel %vm3207_vm3, %v7441_v9, %v3204_v52  ;;  %v3212_v55 = vor.u32 1.1754944e-38, %v3211_v48 }
0x13b4   :  { %v3243_v47 = vsel %vm3240_vm15, %v3242_v1, %v3238_v42  ;;  %v7479_v18 = vadd.f32 %v3270_v33, %v3268_v32  ;;  %vm3250_vm5 = vweird.f32 %v7429_v27  ;;  %v3254_v49 = vand.u32 2147483647, %v7429_v27  ;;  %v8331_v1 = vld [vmem:[#allocation54_spill] sm:$0xff]  ;;  %v8332_v32 = vld [vmem:[#allocation61_spill] sm:$0xff] }
0x13b5   :  { %v3269_v41 = vmul.f32 %v3265_v50, %v3243_v47  ;;  %vm3210_vm6 = vcmp.eq.f32.partialorder %v3209_v54, 8.507059e+37  ;;  %vm3252_vm13 = vmor %vm3250_vm5, %vm3251_vm4  ;;  %v3257_v21 = vor.u32 1.1754944e-38, %v3256_v10  ;;  %v8333_v47 = vld [vmem:[#allocation62_spill] sm:$0xff] }
0x13b6   :  { %5645 = vtanh.f32 %v7479_v18  ;;  %v3213_v0 = vsel %vm3210_vm6, %v3212_v55, %v3208_v63  ;;  %v3253_v57 = vsel %vm3252_vm13, %v7444_v34, %v3249_v37  ;;  %vm3255_vm9 = vcmp.eq.f32.partialorder %v3254_v49, 8.507059e+37  ;;  %v8330_v34 = vld [vmem:[#allocation58_spill] sm:$0xff] }
0x13b7   :  { %v7487_v51 = vadd.f32 %v3271_v4, %v3269_v41  ;;  %v3258_v39 = vsel %vm3255_vm9, %v3257_v21, %v3253_v57  ;;  %v8334_v41 = vld [vmem:[#allocation63_spill] sm:$0xff]  ;;  %v8335_v57 = vld [vmem:[#allocation64_spill] sm:$0xff] }
0x13b9   :  { %5647 = vtanh.f32 %v7487_v51 }
0x13bc   :  { %v5646_v23 = vpop.eup %5645 }
0x13bd   :  { %v3276_v13 = vmul.f32 %v5646_v23, %v3213_v0 }
0x13bf   :  { %v5648_v14 = vpop.eup %5647  ;;  %v3278_v5 = vpack.c.bf16 %v3276_v13, %v3276_v13  ;;  %v8336_v13 = vld [vmem:[#allocation66_spill] sm:$0xff] }
0x13c0   :  { %v3277_v9 = vmul.f32 %v5648_v14, %v3258_v39  ;;  %v8337_v39 = vld [vmem:[#allocation65_spill] sm:$0xff] }
0x13c1   :  { %v3282_v36 = vunpack.c.l.b16 %v3278_v5 }
0x13c2   :  { %v3279_v33 = vpack.c.bf16 %v3277_v9, %v3277_v9 }
0x13c3   :  { %v3284_v29 = vrot.slane %v3282_v36, 2 }
0x13c4   :  { %v3283_v24 = vunpack.c.l.b16 %v3279_v33  ;;  %v8338_v33 = vld [vmem:[#allocation67_spill] sm:$0xff] }
0x13c6   :  { %v3285_v2 = vrot.slane %v3283_v24, 1 }
0x13c8   :  { %v3286_v27 = vsel %vm2844_vm7, %v3285_v2, %v3284_v29 }
0x13c9   :  { %v3287_v38 = vpack.c.b16 %v3286_v27, %v3286_v27 }
0x13cb   :  { %3297 = vmatmul.bf16.vlgmr.msrb.gmra.mxu2 %v3287_v38  ;;  %3310 = vmatmul.bf16.vlgmr.msra.gmra.mxu3 %v3287_v38 }
0x13cc   :  { %3323 = vmatmul.bf16.vlgmr.msra.gmra.mxu0 %v3287_v38  ;;  %3336 = vmatmul.bf16.vlgmr.msrb.gmra.mxu1 %v3287_v38 }
0x13cd   :  { %3735 = vmatpush.bf16.msrb.mxu2 %v6929_v56  ;;  %3748 = vmatpush.bf16.msra.mxu3 %v6934_v58 }
0x13ce   :  { %3761 = vmatpush.bf16.msra.mxu0 %v6907_v35  ;;  %3774 = vmatpush.bf16.msrb.mxu1 %v7066_v60 }
0x13d1   :  { %3736 = vmatpush.bf16.msrb.mxu2 %v6949_v7  ;;  %3749 = vmatpush.bf16.msra.mxu3 %v6954_v15 }
0x13d2   :  { %3762 = vmatpush.bf16.msra.mxu0 %v6918_v45  ;;  %3775 = vmatpush.bf16.msrb.mxu1 %v7075_v12 }
0x13d5   :  { %3737 = vmatpush.bf16.msrb.mxu2 %v6966_v25  ;;  %3750 = vmatpush.bf16.msra.mxu3 %v6971_v30 }
0x13d6   :  { %3763 = vmatpush.bf16.msra.mxu0 %v6940_v61  ;;  %3776 = vmatpush.bf16.msrb.mxu1 %v7083_v6 }
0x13d9   :  { %3738 = vmatpush.bf16.msrb.mxu2 %v6986_v40  ;;  %3751 = vmatpush.bf16.msra.mxu3 %v6990_v43 }
0x13da   :  { %3764 = vmatpush.bf16.msra.mxu0 %v6956_v16  ;;  %3777 = vmatpush.bf16.msrb.mxu1 %v7092_v17 }
0x13dd   :  { %3739 = vmatpush.bf16.msrb.mxu2 %v7004_v53  ;;  %3752 = vmatpush.bf16.msra.mxu3 %v7009_v8 }
0x13de   :  { %3765 = vmatpush.bf16.msra.mxu0 %v6973_v31  ;;  %3778 = vmatpush.bf16.msrb.mxu1 %v7100_v26 }
0x13e1   :  { %3740 = vmatpush.bf16.msrb.mxu2 %v7019_v28  ;;  %3753 = vmatpush.bf16.msra.mxu3 %v7025_v11 }
0x13e2   :  { %3766 = vmatpush.bf16.msra.mxu0 %v6995_v46  ;;  %3779 = vmatpush.bf16.msrb.mxu1 %v7110_v20 }
0x13e5   :  { %3741 = vmatpush.bf16.msrb.mxu2 %v8308_v44  ;;  %3754 = vmatpush.bf16.msra.mxu3 %v8309_v22 }
0x13e6   :  { %3767 = vmatpush.bf16.msra.mxu0 %v8310_v3  ;;  %3780 = vmatpush.bf16.msrb.mxu1 %v8311_v62 }
0x13e9   :  { %3742 = vmatpush.bf16.msrb.mxu2 %v8312_v19  ;;  %3755 = vmatpush.bf16.msra.mxu3 %v8330_v34 }
0x13ea   :  { %3768 = vmatpush.bf16.msra.mxu0 %v8331_v1  ;;  %3781 = vmatpush.bf16.msrb.mxu1 %v8332_v32 }
0x1449   :  { %v3324_v4 = vpop.f32.mrf.mxu0  ;;  %v3337_v42 = vpop.f32.mrf.mxu1 }
0x144a   :  { %v3347_v50 = vrot.slane %v3324_v4, 5  ;;  %v3351_v59 = vrot.slane %v3324_v4, 6 }
0x144c   :  { %v3363_v52 = vadd.f32 %v3347_v50, %v8333_v47  ;;  %v3367_v48 = vadd.f32 %v3351_v59, %v8334_v41 }
0x144e   :  { %v3298_v54 = vpop.f32.mrf.mxu2  ;;  %v3311_v37 = vpop.f32.mrf.mxu3  ;;  %v5156_v10 = vmul.f32 -1.442695, %v3363_v52  ;;  %v5159_v23 = vmul.f32 -1.442695, %v3367_v48 }
0x144f   :  { %v3345_v63 = vrot.slane %v3298_v54, 5  ;;  %v3349_v55 = vrot.slane %v3298_v54, 6  ;;  %v3346_v49 = vrot.slane %v3311_v37, 5  ;;  %v3350_v0 = vrot.slane %v3311_v37, 6 }
0x1450   :  { %5649 = vpow2.f32 %v5156_v10 }
0x1451   :  { %v3361_v21 = vadd.f32 %v3345_v63, %v8335_v57  ;;  %v3365_v14 = vadd.f32 %v3349_v55, %v8336_v13  ;;  %v3362_v5 = vadd.f32 %v3346_v49, %v8337_v39  ;;  %v3326_v9 = vpop.f32.mrf.mxu0  ;;  %v3339_v36 = vpop.f32.mrf.mxu1  ;;  %v3366_v24 = vadd.f32 %v3350_v0, %v8338_v33 }
0x1452   :  { %5651 = vpow2.f32 %v5159_v23  ;;  %v3348_v0 = vrot.slane %v3337_v42, 5 }
0x1453   :  { %v5154_v29 = vmul.f32 -1.442695, %v3361_v21  ;;  %v5157_v2 = vmul.f32 -1.442695, %v3365_v14  ;;  %v5155_v27 = vmul.f32 -1.442695, %v3362_v5 }
0x1454   :  { %v5158_v38 = vmul.f32 -1.442695, %v3366_v24  ;;  %v3352_v21 = vrot.slane %v3337_v42, 6  ;;  %v8339_v24 = vld [vmem:[#allocation68_spill] sm:$0xff] }
0x1455   :  { %5653 = vpow2.f32 %v5154_v29  ;;  %v3364_v29 = vadd.f32 %v3348_v0, %v8339_v24 }
0x1456   :  { %5655 = vpow2.f32 %v5157_v2  ;;  %v3300_v4 = vpop.f32.mrf.mxu2  ;;  %v3313_v50 = vpop.f32.mrf.mxu3 }
0x1457   :  { %v5650_v59 = vpop.eup %5649  ;;  %5657 = vpow2.f32 %v5155_v27  ;;  %v8340_v27 = vld [vmem:[#allocation69_spill] sm:$0xff] }
0x1458   :  { %v5652_v52 = vpop.eup %5651  ;;  %5659 = vpow2.f32 %v5158_v38  ;;  %v7536_v55 = vadd.f32 1.0, %v5650_v59  ;;  %v3368_v38 = vadd.f32 %v3352_v21, %v8340_v27 }
0x1459   :  { %v7538_v49 = vadd.f32 1.0, %v5652_v52  ;;  %v3487_v52 = vrot.slane %v7479_v18, 7 }
0x145b   :  { %v5654_v48 = vpop.eup %5653 }
0x145c   :  { %v5656_v54 = vpop.eup %5655  ;;  %v3387_v37 = vadd.f32 1.0, %v5654_v48 }
0x145d   :  { %v3390_v63 = vadd.f32 1.0, %v5656_v54  ;;  %v5658_v10 = vpop.eup %5657 }
0x145e   :  { %5661 = vrcp.f32 %v3387_v37  ;;  %v5660_v23 = vpop.eup %5659  ;;  %v7541_v14 = vadd.f32 1.0, %v5658_v10  ;;  %v3402_v10 = vand.u32 2147483647, %v3387_v37  ;;  %v3404_v0 = vand.u32 2147483648, %v3387_v37 }
0x145f   :  { %5663 = vrcp.f32 %v3390_v63  ;;  %v7544_v5 = vadd.f32 1.0, %v5660_v23  ;;  %v3447_v21 = vand.u32 2147483647, %v3390_v63  ;;  %vm3398_vm8 = vweird.f32 %v3387_v37 }
0x1460   :  { %5665 = vrcp.f32 %v7536_v55  ;;  %vm3443_vm11 = vweird.f32 %v3390_v63  ;;  %vm3403_vm15 = vcmp.eq.f32.partialorder %v3402_v10, 8.507059e+37  ;;  %v3419_v13 = vand.u32 2147483648, %v7541_v14 }
0x1461   :  { %5667 = vrcp.f32 %v7538_v49  ;;  %vm7566_vm1 = vcmp.eq.f32.partialorder %v3447_v21, 8.507059e+37  ;;  %vm3413_vm4 = vweird.f32 %v7541_v14  ;;  %v3464_v1 = vand.u32 2147483648, %v7544_v5 }
0x1462   :  { %5669 = vrcp.f32 %v7541_v14  ;;  %v3420_v34 = vor.u32 1.1754944e-38, %v3419_v13  ;;  %vm3458_vm9 = vweird.f32 %v7544_v5 }
0x1463   :  { %5671 = vrcp.f32 %v7544_v5 }
0x1464   :  { %v5662_v9 = vpop.eup %5661  ;;  %5673 = vtanh.f32 %v3364_v29 }
0x1465   :  { %v5664_v36 = vpop.eup %5663  ;;  %v3394_v2 = vmul.f32 %v5662_v9, %v3387_v37  ;;  %vm3399_vm14 = vweird.f32 %v5662_v9  ;;  %5675 = vtanh.f32 %v3368_v38 }
0x1466   :  { %v3439_v4 = vmul.f32 %v5664_v36, %v3390_v63  ;;  %v7550_v42 = vpop.eup %5665  ;;  %vm7558_vm10 = vmor %vm3398_vm8, %vm3399_vm14  ;;  %vm3444_vm12 = vweird.f32 %v5664_v36 }
0x1467   :  { %v3395_v50 = vsub.f32 1.0, %v3394_v2  ;;  %v7553_v48 = vpop.eup %5667  ;;  %v3449_v2 = vand.u32 2147483648, %v3390_v63  ;;  %vm7572_vm2 = vmor %vm3443_vm11, %vm3444_vm12  ;;  %vm3428_vm11 = vweird.f32 %v7536_v55 }
0x1468   :  { %v3440_v59 = vsub.f32 1.0, %v3439_v4  ;;  %v5670_v23 = vpop.eup %5669  ;;  %v3424_v4 = vmul.f32 %v7550_v42, %v7536_v55  ;;  %v3469_v38 = vmul.f32 %v7553_v48, %v7538_v49 }
0x1469   :  { %v3396_v54 = vmul.f32 %v5662_v9, %v3395_v50  ;;  %v3409_v33 = vmul.f32 %v5670_v23, %v7541_v14  ;;  %v5672_v50 = vpop.eup %5671  ;;  %v3450_v41 = vor.u32 1.1754944e-38, %v3449_v2  ;;  %vm3414_vm3 = vweird.f32 %v5670_v23 }
0x146a   :  { %v3441_v24 = vmul.f32 %v5664_v36, %v3440_v59  ;;  %v5674_v63 = vpop.eup %5673  ;;  %v3470_v18 = vsub.f32 1.0, %v3469_v38  ;;  %vm3415_vm5 = vmor %vm3413_vm4, %vm3414_vm3  ;;  %vm3459_vm6 = vweird.f32 %v5672_v50 }
0x146b   :  { %v3397_v27 = vadd.f32 %v5662_v9, %v3396_v54  ;;  %v3410_v59 = vsub.f32 1.0, %v3409_v33  ;;  %v3405_v54 = vor.u32 1.1754944e-38, %v3404_v0  ;;  %v5676_v33 = vpop.eup %5675  ;;  %vm3460_vm14 = vmor %vm3458_vm9, %vm3459_vm6 }
0x146c   :  { %v3442_v29 = vadd.f32 %v5664_v36, %v3441_v24  ;;  %v3454_v24 = vmul.f32 %v5672_v50, %v7544_v5  ;;  %v3471_v39 = vmul.f32 %v7553_v48, %v3470_v18 }
0x146d   :  { %v3401_v37 = vsel %vm7558_vm10, %v5662_v9, %v3397_v27  ;;  %v3411_v47 = vmul.f32 %v5670_v23, %v3410_v59  ;;  %v3417_v9 = vand.u32 2147483647, %v7541_v14  ;;  %v3425_v27 = vsub.f32 1.0, %v3424_v4 }
0x146e   :  { %v3406_v10 = vsel %vm3403_vm15, %v3405_v54, %v3401_v37  ;;  %v3446_v0 = vsel %vm7572_vm2, %v5664_v36, %v3442_v29  ;;  %v3455_v21 = vsub.f32 1.0, %v3454_v24  ;;  %v3462_v59 = vand.u32 2147483647, %v7544_v5 }
0x146f   :  { %v3412_v32 = vadd.f32 %v5670_v23, %v3411_v47  ;;  %v3451_v4 = vsel %vm7566_vm1, %v3450_v41, %v3446_v0  ;;  %v3493_v37 = vmul.f32 %v5674_v63, %v3406_v10  ;;  %vm3418_vm13 = vcmp.eq.f32.partialorder %v3417_v9, 8.507059e+37 }
0x1470   :  { %v3456_v2 = vmul.f32 %v5672_v50, %v3455_v21  ;;  %v3426_v57 = vmul.f32 %v7550_v42, %v3425_v27  ;;  %v3465_v14 = vor.u32 1.1754944e-38, %v3464_v1  ;;  %v3494_v13 = vmul.f32 %v5676_v33, %v3451_v4 }
0x1471   :  { %v3416_v54 = vsel %vm3415_vm5, %v5670_v23, %v3412_v32  ;;  %vm3463_vm8 = vcmp.eq.f32.partialorder %v3462_v59, 8.507059e+37  ;;  %v3488_v24 = vrot.slane %v7487_v51, 7  ;;  %vm3429_vm10 = vweird.f32 %v7550_v42 }
0x1472   :  { %v3421_v36 = vsel %vm3418_vm13, %v3420_v34, %v3416_v54  ;;  %v3457_v47 = vadd.f32 %v5672_v50, %v3456_v2  ;;  %v3427_v32 = vadd.f32 %v7550_v42, %v3426_v57  ;;  %v3434_v5 = vand.u32 2147483648, %v7536_v55  ;;  %vm3430_vm12 = vmor %vm3428_vm11, %vm3429_vm10 }
0x1473   :  { %v3491_v29 = vmul.f32 %v3487_v52, %v3421_v36  ;;  %v3432_v1 = vand.u32 2147483647, %v7536_v55  ;;  %v3472_v51 = vadd.f32 %v7553_v48, %v3471_v39  ;;  %vm3474_vm15 = vweird.f32 %v7553_v48 }
0x1474   :  { %v3461_v38 = vsel %vm3460_vm14, %v5672_v50, %v3457_v47  ;;  %v3479_v23 = vand.u32 2147483648, %v7538_v49  ;;  %v3431_v50 = vsel %vm3430_vm12, %v7550_v42, %v3427_v32  ;;  %v3435_v9 = vor.u32 1.1754944e-38, %v3434_v5 }
0x1475   :  { %v3466_v41 = vsel %vm3463_vm8, %v3465_v14, %v3461_v38  ;;  %v7588_v63 = vadd.f32 %v3493_v37, %v3491_v29  ;;  %vm3473_vm1 = vweird.f32 %v7538_v49  ;;  %v3477_v33 = vand.u32 2147483647, %v7538_v49  ;;  %v8348_v14 = vld [vmem:[#allocation54_spill] sm:$0xff]  ;;  %v8349_v29 = vld [vmem:[#allocation61_spill] sm:$0xff] }
0x1476   :  { %v3492_v34 = vmul.f32 %v3488_v24, %v3466_v41  ;;  %vm3433_vm2 = vcmp.eq.f32.partialorder %v3432_v1, 8.507059e+37  ;;  %vm3475_vm3 = vmor %vm3473_vm1, %vm3474_vm15  ;;  %v3480_v0 = vor.u32 1.1754944e-38, %v3479_v23  ;;  %v8350_v41 = vld [vmem:[#allocation62_spill] sm:$0xff] }
0x1477   :  { %5677 = vtanh.f32 %v7588_v63  ;;  %v3436_v27 = vsel %vm3433_vm2, %v3435_v9, %v3431_v50  ;;  %v3476_v10 = vsel %vm3475_vm3, %v7553_v48, %v3472_v51  ;;  %vm3478_vm4 = vcmp.eq.f32.partialorder %v3477_v33, 8.507059e+37  ;;  %v8347_v48 = vld [vmem:[#allocation58_spill] sm:$0xff] }
0x1478   :  { %v7596_v52 = vadd.f32 %v3494_v13, %v3492_v34  ;;  %v3481_v2 = vsel %vm3478_vm4, %v3480_v0, %v3476_v10  ;;  %v8351_v34 = vld [vmem:[#allocation63_spill] sm:$0xff]  ;;  %v8352_v10 = vld [vmem:[#allocation64_spill] sm:$0xff] }
0x147a   :  { %5679 = vtanh.f32 %v7596_v52 }
0x147d   :  { %v5678_v55 = vpop.eup %5677 }
0x147e   :  { %v3499_v21 = vmul.f32 %v5678_v55, %v3436_v27 }
0x1480   :  { %v5680_v18 = vpop.eup %5679  ;;  %v3501_v59 = vpack.c.bf16 %v3499_v21, %v3499_v21  ;;  %v8353_v21 = vld [vmem:[#allocation66_spill] sm:$0xff] }
0x1481   :  { %v3500_v42 = vmul.f32 %v5680_v18, %v3481_v2  ;;  %v8354_v2 = vld [vmem:[#allocation65_spill] sm:$0xff] }
0x1482   :  { %v3505_v4 = vunpack.c.l.b16 %v3501_v59 }
0x1483   :  { %v3502_v37 = vpack.c.bf16 %v3500_v42, %v3500_v42 }
0x1484   :  { %v3507_v57 = vrot.slane %v3505_v4, 3 }
0x1485   :  { %v3506_v54 = vunpack.c.l.b16 %v3502_v37  ;;  %v8355_v37 = vld [vmem:[#allocation67_spill] sm:$0xff] }
0x1487   :  { %v3508_v36 = vrot.slane %v3506_v54, 2 }
0x1489   :  { %v3509_v49 = vsel %vm2844_vm7, %v3508_v36, %v3507_v57 }
0x148a   :  { %v3510_v47 = vpack.c.b16 %v3509_v49, %v3509_v49 }
0x148c   :  { %3520 = vmatmul.bf16.vlgmr.msra.gmra.mxu2 %v3510_v47  ;;  %3533 = vmatmul.bf16.vlgmr.msrb.gmra.mxu3 %v3510_v47 }
0x148d   :  { %3546 = vmatmul.bf16.vlgmr.msrb.gmra.mxu0 %v3510_v47  ;;  %3559 = vmatmul.bf16.vlgmr.msra.gmra.mxu1 %v3510_v47 }
0x148e   :  { %3958 = vmatpush.bf16.msra.mxu2 %v6929_v56  ;;  %3971 = vmatpush.bf16.msrb.mxu3 %v6934_v58 }
0x148f   :  { %3984 = vmatpush.bf16.msrb.mxu0 %v6907_v35  ;;  %3997 = vmatpush.bf16.msra.mxu1 %v7066_v60 }
0x1492   :  { %3959 = vmatpush.bf16.msra.mxu2 %v6949_v7  ;;  %3972 = vmatpush.bf16.msrb.mxu3 %v6954_v15 }
0x1493   :  { %3985 = vmatpush.bf16.msrb.mxu0 %v6918_v45  ;;  %3998 = vmatpush.bf16.msra.mxu1 %v7075_v12 }
0x1496   :  { %3960 = vmatpush.bf16.msra.mxu2 %v6966_v25  ;;  %3973 = vmatpush.bf16.msrb.mxu3 %v6971_v30 }
0x1497   :  { %3986 = vmatpush.bf16.msrb.mxu0 %v6940_v61  ;;  %3999 = vmatpush.bf16.msra.mxu1 %v7083_v6 }
0x149a   :  { %3961 = vmatpush.bf16.msra.mxu2 %v6986_v40  ;;  %3974 = vmatpush.bf16.msrb.mxu3 %v6990_v43 }
0x149b   :  { %3987 = vmatpush.bf16.msrb.mxu0 %v6956_v16  ;;  %4000 = vmatpush.bf16.msra.mxu1 %v7092_v17 }
0x149e   :  { %3962 = vmatpush.bf16.msra.mxu2 %v7004_v53  ;;  %3975 = vmatpush.bf16.msrb.mxu3 %v7009_v8 }
0x149f   :  { %3988 = vmatpush.bf16.msrb.mxu0 %v6973_v31  ;;  %4001 = vmatpush.bf16.msra.mxu1 %v7100_v26 }
0x14a2   :  { %3963 = vmatpush.bf16.msra.mxu2 %v7019_v28  ;;  %3976 = vmatpush.bf16.msrb.mxu3 %v7025_v11 }
0x14a3   :  { %3989 = vmatpush.bf16.msrb.mxu0 %v6995_v46  ;;  %4002 = vmatpush.bf16.msra.mxu1 %v7110_v20 }
0x14a6   :  { %3964 = vmatpush.bf16.msra.mxu2 %v8308_v44  ;;  %3977 = vmatpush.bf16.msrb.mxu3 %v8309_v22 }
0x14a7   :  { %3990 = vmatpush.bf16.msrb.mxu0 %v8310_v3  ;;  %4003 = vmatpush.bf16.msra.mxu1 %v8311_v62 }
0x14aa   :  { %3965 = vmatpush.bf16.msra.mxu2 %v8312_v19  ;;  %3978 = vmatpush.bf16.msrb.mxu3 %v8347_v48 }
0x14ab   :  { %3991 = vmatpush.bf16.msrb.mxu0 %v8348_v14  ;;  %4004 = vmatpush.bf16.msra.mxu1 %v8349_v29 }
0x150a   :  { %v3547_v13 = vpop.f32.mrf.mxu0  ;;  %v3560_v38 = vpop.f32.mrf.mxu1 }
0x150b   :  { %v3570_v24 = vrot.slane %v3547_v13, 4  ;;  %v3574_v39 = vrot.slane %v3547_v13, 5 }
0x150d   :  { %v3586_v32 = vadd.f32 %v3570_v24, %v8350_v41  ;;  %v3590_v5 = vadd.f32 %v3574_v39, %v8351_v34 }
0x150f   :  { %v3521_v1 = vpop.f32.mrf.mxu2  ;;  %v3534_v51 = vpop.f32.mrf.mxu3  ;;  %v5162_v23 = vmul.f32 -1.442695, %v3586_v32  ;;  %v5165_v55 = vmul.f32 -1.442695, %v3590_v5 }
0x1510   :  { %v3568_v50 = vrot.slane %v3521_v1, 4  ;;  %v3572_v9 = vrot.slane %v3521_v1, 5  ;;  %v3569_v33 = vrot.slane %v3534_v51, 4  ;;  %v3573_v27 = vrot.slane %v3534_v51, 5 }
0x1511   :  { %5681 = vpow2.f32 %v5162_v23 }
0x1512   :  { %v3584_v0 = vadd.f32 %v3568_v50, %v8352_v10  ;;  %v3588_v18 = vadd.f32 %v3572_v9, %v8353_v21  ;;  %v3585_v59 = vadd.f32 %v3569_v33, %v8354_v2  ;;  %v3549_v42 = vpop.f32.mrf.mxu0  ;;  %v3562_v4 = vpop.f32.mrf.mxu1  ;;  %v3589_v54 = vadd.f32 %v3573_v27, %v8355_v37 }
0x1513   :  { %5683 = vpow2.f32 %v5165_v55  ;;  %v3571_v27 = vrot.slane %v3560_v38, 4 }
0x1514   :  { %v5160_v57 = vmul.f32 -1.442695, %v3584_v0  ;;  %v5163_v36 = vmul.f32 -1.442695, %v3588_v18  ;;  %v5161_v49 = vmul.f32 -1.442695, %v3585_v59 }
0x1515   :  { %v5164_v47 = vmul.f32 -1.442695, %v3589_v54  ;;  %v3575_v0 = vrot.slane %v3560_v38, 5  ;;  %v8356_v54 = vld [vmem:[#allocation68_spill] sm:$0xff] }
0x1516   :  { %5685 = vpow2.f32 %v5160_v57  ;;  %v3587_v57 = vadd.f32 %v3571_v27, %v8356_v54 }
0x1517   :  { %5687 = vpow2.f32 %v5163_v36  ;;  %v3523_v13 = vpop.f32.mrf.mxu2  ;;  %v3536_v24 = vpop.f32.mrf.mxu3 }
0x1518   :  { %v5682_v39 = vpop.eup %5681  ;;  %5689 = vpow2.f32 %v5161_v49  ;;  %v8357_v49 = vld [vmem:[#allocation69_spill] sm:$0xff] }
0x1519   :  { %v5684_v32 = vpop.eup %5683  ;;  %5691 = vpow2.f32 %v5164_v47  ;;  %v7645_v9 = vadd.f32 1.0, %v5682_v39  ;;  %v3591_v47 = vadd.f32 %v3575_v0, %v8357_v49 }
0x151a   :  { %v7647_v33 = vadd.f32 1.0, %v5684_v32  ;;  %v3710_v32 = vrot.slane %v7588_v63, 7 }
0x151c   :  { %v5686_v5 = vpop.eup %5685 }
0x151d   :  { %v5688_v1 = vpop.eup %5687  ;;  %v3610_v51 = vadd.f32 1.0, %v5686_v5 }
0x151e   :  { %v3613_v50 = vadd.f32 1.0, %v5688_v1  ;;  %v5690_v23 = vpop.eup %5689 }
0x151f   :  { %5693 = vrcp.f32 %v3610_v51  ;;  %v5692_v55 = vpop.eup %5691  ;;  %v7650_v18 = vadd.f32 1.0, %v5690_v23  ;;  %v3625_v23 = vand.u32 2147483647, %v3610_v51  ;;  %v3627_v27 = vand.u32 2147483648, %v3610_v51 }
0x1520   :  { %5695 = vrcp.f32 %v3613_v50  ;;  %v7653_v59 = vadd.f32 1.0, %v5692_v55  ;;  %v3670_v0 = vand.u32 2147483647, %v3613_v50  ;;  %vm3621_vm6 = vweird.f32 %v3610_v51 }
0x1521   :  { %5697 = vrcp.f32 %v7645_v9  ;;  %vm3666_vm9 = vweird.f32 %v3613_v50  ;;  %vm3626_vm8 = vcmp.eq.f32.partialorder %v3625_v23, 8.507059e+37  ;;  %v3642_v21 = vand.u32 2147483648, %v7650_v18 }
0x1522   :  { %5699 = vrcp.f32 %v7647_v33  ;;  %vm7675_vm10 = vcmp.eq.f32.partialorder %v3670_v0, 8.507059e+37  ;;  %vm3636_vm15 = vweird.f32 %v7650_v18  ;;  %v3687_v14 = vand.u32 2147483648, %v7653_v59 }
0x1523   :  { %5701 = vrcp.f32 %v7650_v18  ;;  %v3643_v48 = vor.u32 1.1754944e-38, %v3642_v21  ;;  %vm3681_vm4 = vweird.f32 %v7653_v59 }
0x1524   :  { %5703 = vrcp.f32 %v7653_v59 }
0x1525   :  { %v5694_v42 = vpop.eup %5693  ;;  %5705 = vtanh.f32 %v3587_v57 }
0x1526   :  { %v5696_v4 = vpop.eup %5695  ;;  %v3617_v36 = vmul.f32 %v5694_v42, %v3610_v51  ;;  %vm3622_vm5 = vweird.f32 %v5694_v42  ;;  %5707 = vtanh.f32 %v3591_v47 }
0x1527   :  { %v3662_v13 = vmul.f32 %v5696_v4, %v3613_v50  ;;  %v7659_v38 = vpop.eup %5697  ;;  %vm7667_vm13 = vmor %vm3621_vm6, %vm3622_vm5  ;;  %vm3667_vm14 = vweird.f32 %v5696_v4 }
0x1528   :  { %v3618_v24 = vsub.f32 1.0, %v3617_v36  ;;  %v7662_v5 = vpop.eup %5699  ;;  %v3672_v36 = vand.u32 2147483648, %v3613_v50  ;;  %vm7681_vm11 = vmor %vm3666_vm9, %vm3667_vm14  ;;  %vm3651_vm9 = vweird.f32 %v7645_v9 }
0x1529   :  { %v3663_v39 = vsub.f32 1.0, %v3662_v13  ;;  %v5702_v55 = vpop.eup %5701  ;;  %v3647_v13 = vmul.f32 %v7659_v38, %v7645_v9  ;;  %v3692_v47 = vmul.f32 %v7662_v5, %v7647_v33 }
0x152a   :  { %v3619_v1 = vmul.f32 %v5694_v42, %v3618_v24  ;;  %v3632_v37 = vmul.f32 %v5702_v55, %v7650_v18  ;;  %v5704_v24 = vpop.eup %5703  ;;  %v3673_v34 = vor.u32 1.1754944e-38, %v3672_v36  ;;  %vm3637_vm12 = vweird.f32 %v5702_v55 }
0x152b   :  { %v3664_v54 = vmul.f32 %v5696_v4, %v3663_v39  ;;  %v5706_v50 = vpop.eup %5705  ;;  %v3693_v63 = vsub.f32 1.0, %v3692_v47  ;;  %vm3638_vm1 = vmor %vm3636_vm15, %vm3637_vm12  ;;  %vm3682_vm2 = vweird.f32 %v5704_v24 }
0x152c   :  { %v3620_v49 = vadd.f32 %v5694_v42, %v3619_v1  ;;  %v3633_v39 = vsub.f32 1.0, %v3632_v37  ;;  %v3628_v1 = vor.u32 1.1754944e-38, %v3627_v27  ;;  %v5708_v37 = vpop.eup %5707  ;;  %vm3683_vm5 = vmor %vm3681_vm4, %vm3682_vm2 }
0x152d   :  { %v3665_v57 = vadd.f32 %v5696_v4, %v3664_v54  ;;  %v3677_v54 = vmul.f32 %v5704_v24, %v7653_v59  ;;  %v3694_v2 = vmul.f32 %v7662_v5, %v3693_v63 }
0x152e   :  { %v3624_v51 = vsel %vm7667_vm13, %v5694_v42, %v3620_v49  ;;  %v3634_v41 = vmul.f32 %v5702_v55, %v3633_v39  ;;  %v3640_v42 = vand.u32 2147483647, %v7650_v18  ;;  %v3648_v49 = vsub.f32 1.0, %v3647_v13 }
0x152f   :  { %v3629_v23 = vsel %vm3626_vm8, %v3628_v1, %v3624_v51  ;;  %v3669_v27 = vsel %vm7681_vm11, %v5696_v4, %v3665_v57  ;;  %v3678_v0 = vsub.f32 1.0, %v3677_v54  ;;  %v3685_v39 = vand.u32 2147483647, %v7653_v59 }
0x1530   :  { %v3635_v29 = vadd.f32 %v5702_v55, %v3634_v41  ;;  %v3674_v13 = vsel %vm7675_vm10, %v3673_v34, %v3669_v27  ;;  %v3716_v51 = vmul.f32 %v5706_v50, %v3629_v23  ;;  %vm3641_vm3 = vcmp.eq.f32.partialorder %v3640_v42, 8.507059e+37 }
0x1531   :  { %v3679_v36 = vmul.f32 %v5704_v24, %v3678_v0  ;;  %v3649_v10 = vmul.f32 %v7659_v38, %v3648_v49  ;;  %v3688_v18 = vor.u32 1.1754944e-38, %v3687_v14  ;;  %v3717_v21 = vmul.f32 %v5708_v37, %v3674_v13 }
0x1532   :  { %v3639_v1 = vsel %vm3638_vm1, %v5702_v55, %v3635_v29  ;;  %vm3686_vm6 = vcmp.eq.f32.partialorder %v3685_v39, 8.507059e+37  ;;  %v3711_v54 = vrot.slane %v7596_v52, 7  ;;  %vm3652_vm13 = vweird.f32 %v7659_v38 }
0x1533   :  { %v3644_v4 = vsel %vm3641_vm3, %v3643_v48, %v3639_v1  ;;  %v3680_v41 = vadd.f32 %v5704_v24, %v3679_v36  ;;  %v3650_v29 = vadd.f32 %v7659_v38, %v3649_v10  ;;  %v3657_v59 = vand.u32 2147483648, %v7645_v9  ;;  %vm3653_vm14 = vmor %vm3651_vm9, %vm3652_vm13 }
0x1534   :  { %v3714_v57 = vmul.f32 %v3710_v32, %v3644_v4  ;;  %v3655_v14 = vand.u32 2147483647, %v7645_v9  ;;  %v3695_v52 = vadd.f32 %v7662_v5, %v3694_v2  ;;  %vm3697_vm8 = vweird.f32 %v7662_v5 }
0x1535   :  { %v3684_v47 = vsel %vm3683_vm5, %v5704_v24, %v3680_v41  ;;  %v3702_v55 = vand.u32 2147483648, %v7647_v33  ;;  %v3654_v24 = vsel %vm3653_vm14, %v7659_v38, %v3650_v29  ;;  %v3658_v42 = vor.u32 1.1754944e-38, %v3657_v59 }
0x1536   :  { %v3689_v34 = vsel %vm3686_vm6, %v3688_v18, %v3684_v47  ;;  %v7697_v50 = vadd.f32 %v3716_v51, %v3714_v57  ;;  %vm3696_vm10 = vweird.f32 %v7647_v33  ;;  %v3700_v37 = vand.u32 2147483647, %v7647_v33 }
0x1537   :  { %v3715_v48 = vmul.f32 %v3711_v54, %v3689_v34  ;;  %vm3656_vm11 = vcmp.eq.f32.partialorder %v3655_v14, 8.507059e+37  ;;  %vm3698_vm12 = vmor %vm3696_vm10, %vm3697_vm8  ;;  %v3703_v27 = vor.u32 1.1754944e-38, %v3702_v55 }
0x1538   :  { %5709 = vtanh.f32 %v7697_v50  ;;  %v3659_v49 = vsel %vm3656_vm11, %v3658_v42, %v3654_v24  ;;  %v3699_v23 = vsel %vm3698_vm12, %v7662_v5, %v3695_v52  ;;  %vm3701_vm15 = vcmp.eq.f32.partialorder %v3700_v37, 8.507059e+37 }
0x1539   :  { %v7705_v32 = vadd.f32 %v3717_v21, %v3715_v48  ;;  %v3704_v36 = vsel %vm3701_vm15, %v3703_v27, %v3699_v23 }
0x153b   :  { %5711 = vtanh.f32 %v7705_v32 }
0x153e   :  { %v5710_v9 = vpop.eup %5709 }
0x153f   :  { %v3722_v0 = vmul.f32 %v5710_v9, %v3659_v49 }
0x1541   :  { %v5712_v63 = vpop.eup %5711  ;;  %v3724_v39 = vpack.c.bf16 %v3722_v0, %v3722_v0 }
0x1542   :  { %v3723_v38 = vmul.f32 %v5712_v63, %v3704_v36  ;;  %v8373_v63 = vld [vmem:[#allocation68_spill] sm:$0xff] }
0x1543   :  { %v3728_v13 = vunpack.c.l.b16 %v3724_v39 }
0x1544   :  { %v3725_v51 = vpack.c.bf16 %v3723_v38, %v3723_v38  ;;  %v8374_v38 = vld [vmem:[#allocation69_spill] sm:$0xff] }
0x1545   :  { %v3730_v10 = vrot.slane %v3728_v13, 4 }
0x1546   :  { %v3729_v1 = vunpack.c.l.b16 %v3725_v51 }
0x1548   :  { %v3731_v4 = vrot.slane %v3729_v1, 3 }
0x154a   :  { %v3732_v33 = vsel %vm2844_vm7, %v3731_v4, %v3730_v10 }
0x154b   :  { %v3733_v41 = vpack.c.b16 %v3732_v33, %v3732_v33  ;;  %v3933_v33 = vrot.slane %v7697_v50, 7 }
0x154d   :  { %3743 = vmatmul.bf16.vlgmr.msrb.gmra.mxu2 %v3733_v41  ;;  %3756 = vmatmul.bf16.vlgmr.msra.gmra.mxu3 %v3733_v41 }
0x154e   :  { %3769 = vmatmul.bf16.vlgmr.msra.gmra.mxu0 %v3733_v41  ;;  %3782 = vmatmul.bf16.vlgmr.msrb.gmra.mxu1 %v3733_v41 }
0x154f   :  { %4181 = vmatpush.bf16.msrb.mxu2 %v6929_v56  ;;  %4194 = vmatpush.bf16.msra.mxu3 %v6934_v58  ;;  %v8366_v56 = vld [vmem:[#allocation61_spill] sm:$0xff] }
0x1550   :  { %4207 = vmatpush.bf16.msra.mxu0 %v6907_v35  ;;  %4220 = vmatpush.bf16.msrb.mxu1 %v7066_v60  ;;  %v8364_v35 = vld [vmem:[#allocation58_spill] sm:$0xff] }
0x1553   :  { %4182 = vmatpush.bf16.msrb.mxu2 %v6949_v7  ;;  %4195 = vmatpush.bf16.msra.mxu3 %v6954_v15 }
0x1554   :  { %4208 = vmatpush.bf16.msra.mxu0 %v6918_v45  ;;  %4221 = vmatpush.bf16.msrb.mxu1 %v7075_v12  ;;  %v8365_v45 = vld [vmem:[#allocation54_spill] sm:$0xff]  ;;  %v8369_v12 = vld [vmem:[#allocation64_spill] sm:$0xff] }
0x1557   :  { %4183 = vmatpush.bf16.msrb.mxu2 %v6966_v25  ;;  %4196 = vmatpush.bf16.msra.mxu3 %v6971_v30  ;;  %v8368_v30 = vld [vmem:[#allocation63_spill] sm:$0xff] }
0x1558   :  { %4209 = vmatpush.bf16.msra.mxu0 %v6940_v61  ;;  %4222 = vmatpush.bf16.msrb.mxu1 %v7083_v6 }
0x155b   :  { %4184 = vmatpush.bf16.msrb.mxu2 %v6986_v40  ;;  %4197 = vmatpush.bf16.msra.mxu3 %v6990_v43 }
0x155c   :  { %4210 = vmatpush.bf16.msra.mxu0 %v6956_v16  ;;  %4223 = vmatpush.bf16.msrb.mxu1 %v7092_v17  ;;  %v8367_v16 = vld [vmem:[#allocation62_spill] sm:$0xff] }
0x155d   :  { %v8370_v17 = vld [vmem:[#allocation66_spill] sm:$0xff] }
0x155f   :  { %4185 = vmatpush.bf16.msrb.mxu2 %v7004_v53  ;;  %4198 = vmatpush.bf16.msra.mxu3 %v7009_v8 }
0x1560   :  { %4211 = vmatpush.bf16.msra.mxu0 %v6973_v31  ;;  %4224 = vmatpush.bf16.msrb.mxu1 %v7100_v26 }
0x1563   :  { %4186 = vmatpush.bf16.msrb.mxu2 %v7019_v28  ;;  %4199 = vmatpush.bf16.msra.mxu3 %v7025_v11 }
0x1564   :  { %4212 = vmatpush.bf16.msra.mxu0 %v6995_v46  ;;  %4225 = vmatpush.bf16.msrb.mxu1 %v7110_v20  ;;  %v8371_v20 = vld [vmem:[#allocation65_spill] sm:$0xff] }
0x1567   :  { %4187 = vmatpush.bf16.msrb.mxu2 %v8308_v44  ;;  %4200 = vmatpush.bf16.msra.mxu3 %v8309_v22 }
0x1568   :  { %4213 = vmatpush.bf16.msra.mxu0 %v8310_v3  ;;  %4226 = vmatpush.bf16.msrb.mxu1 %v8311_v62  ;;  %v8372_v62 = vld [vmem:[#allocation67_spill] sm:$0xff] }
0x156b   :  { %4188 = vmatpush.bf16.msrb.mxu2 %v8312_v19  ;;  %4201 = vmatpush.bf16.msra.mxu3 %v8364_v35 }
0x156c   :  { %4214 = vmatpush.bf16.msra.mxu0 %v8365_v45  ;;  %4227 = vmatpush.bf16.msrb.mxu1 %v8366_v56 }
0x15cb   :  { %v3770_v58 = vpop.f32.mrf.mxu0  ;;  %v3783_v61 = vpop.f32.mrf.mxu1 }
0x15cc   :  { %v3793_v7 = vrot.slane %v3770_v58, 3  ;;  %v3797_v15 = vrot.slane %v3770_v58, 4  ;;  %v3794_v37 = vrot.slane %v3783_v61, 3  ;;  %v3798_v9 = vrot.slane %v3783_v61, 4 }
0x15ce   :  { %v3809_v25 = vadd.f32 %v3793_v7, %v8367_v16  ;;  %v3813_v31 = vadd.f32 %v3797_v15, %v8368_v30  ;;  %v3810_v36 = vadd.f32 %v3794_v37, %v8373_v63  ;;  %v3814_v13 = vadd.f32 %v3798_v9, %v8374_v38 }
0x15d0   :  { %v3744_v40 = vpop.f32.mrf.mxu2  ;;  %v3757_v43 = vpop.f32.mrf.mxu3  ;;  %v5168_v46 = vmul.f32 -1.442695, %v3809_v25  ;;  %v5171_v11 = vmul.f32 -1.442695, %v3813_v31 }
0x15d1   :  { %v3791_v53 = vrot.slane %v3744_v40, 3  ;;  %v3795_v8 = vrot.slane %v3744_v40, 4  ;;  %v3792_v28 = vrot.slane %v3757_v43, 3  ;;  %v3796_v60 = vrot.slane %v3757_v43, 4 }
0x15d2   :  { %5713 = vpow2.f32 %v5168_v46 }
0x15d3   :  { %v3807_v6 = vadd.f32 %v3791_v53, %v8369_v12  ;;  %v3811_v26 = vadd.f32 %v3795_v8, %v8370_v17  ;;  %v3808_v44 = vadd.f32 %v3792_v28, %v8371_v20  ;;  %v3772_v22 = vpop.f32.mrf.mxu0  ;;  %v3785_v3 = vpop.f32.mrf.mxu1  ;;  %v3812_v19 = vadd.f32 %v3796_v60, %v8372_v62 }
0x15d4   :  { %5715 = vpow2.f32 %v5171_v11 }
0x15d5   :  { %v5166_v5 = vmul.f32 -1.442695, %v3807_v6  ;;  %v5169_v18 = vmul.f32 -1.442695, %v3811_v26  ;;  %v5167_v57 = vmul.f32 -1.442695, %v3808_v44 }
0x15d6   :  { %v5170_v21 = vmul.f32 -1.442695, %v3812_v19 }
0x15d7   :  { %5717 = vpow2.f32 %v5166_v5 }
0x15d8   :  { %5719 = vpow2.f32 %v5169_v18  ;;  %v3746_v47 = vpop.f32.mrf.mxu2  ;;  %v3759_v54 = vpop.f32.mrf.mxu3 }
0x15d9   :  { %v5714_v2 = vpop.eup %5713  ;;  %5721 = vpow2.f32 %v5167_v57 }
0x15da   :  { %v5716_v34 = vpop.eup %5715  ;;  %5723 = vpow2.f32 %v5170_v21  ;;  %v7754_v52 = vadd.f32 1.0, %v5714_v2 }
0x15db   :  { %v7756_v24 = vadd.f32 1.0, %v5716_v34 }
0x15dd   :  { %v5718_v29 = vpop.eup %5717 }
0x15de   :  { %v5720_v48 = vpop.eup %5719  ;;  %v3833_v59 = vadd.f32 1.0, %v5718_v29 }
0x15df   :  { %v3836_v14 = vadd.f32 1.0, %v5720_v48  ;;  %v5722_v55 = vpop.eup %5721 }
0x15e0   :  { %5725 = vrcp.f32 %v3833_v59  ;;  %v5724_v42 = vpop.eup %5723  ;;  %v7759_v49 = vadd.f32 1.0, %v5722_v55  ;;  %v3848_v45 = vand.u32 2147483647, %v3833_v59  ;;  %v3850_v58 = vand.u32 2147483648, %v3833_v59 }
0x15e1   :  { %5727 = vrcp.f32 %v3836_v14  ;;  %v7762_v23 = vadd.f32 1.0, %v5724_v42  ;;  %v3893_v7 = vand.u32 2147483647, %v3836_v14  ;;  %vm3844_vm2 = vweird.f32 %v3833_v59 }
0x15e2   :  { %5729 = vrcp.f32 %v7754_v52  ;;  %v3895_v25 = vand.u32 2147483648, %v3836_v14  ;;  %vm3889_vm4 = vweird.f32 %v3836_v14  ;;  %vm3849_vm6 = vcmp.eq.f32.partialorder %v3848_v45, 8.507059e+37 }
0x15e3   :  { %5731 = vrcp.f32 %v7756_v24  ;;  %v3851_v11 = vor.u32 1.1754944e-38, %v3850_v58  ;;  %vm7784_vm13 = vcmp.eq.f32.partialorder %v3893_v7, 8.507059e+37  ;;  %v3865_v6 = vand.u32 2147483648, %v7759_v49 }
0x15e4   :  { %5733 = vrcp.f32 %v7759_v49  ;;  %v3896_v3 = vor.u32 1.1754944e-38, %v3895_v25  ;;  %v3863_v5 = vand.u32 2147483647, %v7759_v49  ;;  %vm3859_vm8 = vweird.f32 %v7759_v49 }
0x15e5   :  { %5735 = vrcp.f32 %v7762_v23  ;;  %v3910_v29 = vand.u32 2147483648, %v7762_v23  ;;  %v3866_v48 = vor.u32 1.1754944e-38, %v3865_v6  ;;  %vm3904_vm15 = vweird.f32 %v7762_v23 }
0x15e6   :  { %v5726_v27 = vpop.eup %5725  ;;  %5737 = vtanh.f32 %v3810_v36  ;;  %vm3864_vm12 = vcmp.eq.f32.partialorder %v3863_v5, 8.507059e+37  ;;  %v3923_v25 = vand.u32 2147483647, %v7756_v24 }
0x15e7   :  { %v5728_v0 = vpop.eup %5727  ;;  %v3840_v39 = vmul.f32 %v5726_v27, %v3833_v59  ;;  %vm3845_vm1 = vweird.f32 %v5726_v27  ;;  %5739 = vtanh.f32 %v3814_v13 }
0x15e8   :  { %v3885_v51 = vmul.f32 %v5728_v0, %v3836_v14  ;;  %v7768_v10 = vpop.eup %5729  ;;  %vm7776_vm3 = vmor %vm3844_vm2, %vm3845_vm1  ;;  %vm3890_vm5 = vweird.f32 %v5728_v0  ;;  %v3908_v14 = vand.u32 2147483647, %v7762_v23 }
0x15e9   :  { %v3841_v1 = vsub.f32 1.0, %v3840_v39  ;;  %v7771_v41 = vpop.eup %5731  ;;  %v3870_v40 = vmul.f32 %v7768_v10, %v7754_v52  ;;  %vm7790_vm9 = vmor %vm3889_vm4, %vm3890_vm5  ;;  %vm3874_vm4 = vweird.f32 %v7754_v52 }
0x15ea   :  { %v3886_v4 = vsub.f32 1.0, %v3885_v51  ;;  %v5734_v56 = vpop.eup %5733  ;;  %v3915_v53 = vmul.f32 %v7771_v41, %v7756_v24  ;;  %vm3909_vm2 = vcmp.eq.f32.partialorder %v3908_v14, 8.507059e+37  ;;  %v3934_v51 = vrot.slane %v7705_v32, 7 }
0x15eb   :  { %v3842_v35 = vmul.f32 %v5726_v27, %v3841_v1  ;;  %v3855_v31 = vmul.f32 %v5734_v56, %v7759_v49  ;;  %v5736_v46 = vpop.eup %5735  ;;  %vm3860_vm14 = vweird.f32 %v5734_v56  ;;  %v3871_v57 = vsub.f32 1.0, %v3870_v40 }
0x15ec   :  { %v3887_v61 = vmul.f32 %v5728_v0, %v3886_v4  ;;  %v3900_v26 = vmul.f32 %v5736_v46, %v7762_v23  ;;  %v5738_v44 = vpop.eup %5737  ;;  %v3916_v2 = vsub.f32 1.0, %v3915_v53  ;;  %vm3861_vm10 = vmor %vm3859_vm8, %vm3860_vm14  ;;  %vm3905_vm11 = vweird.f32 %v5736_v46 }
0x15ed   :  { %v3843_v15 = vadd.f32 %v5726_v27, %v3842_v35  ;;  %v3856_v28 = vsub.f32 1.0, %v3855_v31  ;;  %v5740_v18 = vpop.eup %5739  ;;  %v3872_v9 = vmul.f32 %v7768_v10, %v3871_v57  ;;  %vm3906_vm1 = vmor %vm3904_vm15, %vm3905_vm11  ;;  %v3911_v49 = vor.u32 1.1754944e-38, %v3910_v29 }
0x15ee   :  { %v3888_v43 = vadd.f32 %v5728_v0, %v3887_v61  ;;  %v3901_v54 = vsub.f32 1.0, %v3900_v26  ;;  %v3917_v1 = vmul.f32 %v7771_v41, %v3916_v2  ;;  %v3880_v23 = vand.u32 2147483648, %v7754_v52 }
0x15ef   :  { %v3847_v8 = vsel %vm7776_vm3, %v5726_v27, %v3843_v15  ;;  %v3857_v19 = vmul.f32 %v5734_v56, %v3856_v28  ;;  %v3873_v45 = vadd.f32 %v7768_v10, %v3872_v9  ;;  %vm3875_vm3 = vweird.f32 %v7768_v10 }
0x15f0   :  { %v3852_v21 = vsel %vm3849_vm6, %v3851_v11, %v3847_v8  ;;  %v3892_v47 = vsel %vm7790_vm9, %v5728_v0, %v3888_v43  ;;  %v3902_v59 = vmul.f32 %v5736_v46, %v3901_v54  ;;  %vm3876_vm5 = vmor %vm3874_vm4, %vm3875_vm3  ;;  %v3918_v32 = vadd.f32 %v7771_v41, %v3917_v1 }
0x15f1   :  { %v3858_v34 = vadd.f32 %v5734_v56, %v3857_v19  ;;  %v3897_v55 = vsel %vm7784_vm13, %v3896_v3, %v3892_v47  ;;  %v3939_v42 = vmul.f32 %v5738_v44, %v3852_v21  ;;  %vm3920_vm6 = vweird.f32 %v7771_v41 }
0x15f2   :  { %v3903_v0 = vadd.f32 %v5736_v46, %v3902_v59  ;;  %v3940_v39 = vmul.f32 %v5740_v18, %v3897_v55  ;;  %v3925_v61 = vand.u32 2147483648, %v7756_v24  ;;  %v3877_v7 = vsel %vm3876_vm5, %v7768_v10, %v3873_v45 }
0x15f3   :  { %v3862_v37 = vsel %vm3861_vm10, %v5734_v56, %v3858_v34  ;;  %v3881_v15 = vor.u32 1.1754944e-38, %v3880_v23  ;;  %vm3919_vm13 = vweird.f32 %v7756_v24  ;;  %vm3924_vm8 = vcmp.eq.f32.partialorder %v3923_v25, 8.507059e+37 }
0x15f4   :  { %v3867_v27 = vsel %vm3864_vm12, %v3866_v48, %v3862_v37  ;;  %v3907_v13 = vsel %vm3906_vm1, %v5736_v46, %v3903_v0  ;;  %vm3921_vm14 = vmor %vm3919_vm13, %vm3920_vm6  ;;  %v3926_v50 = vor.u32 1.1754944e-38, %v3925_v61 }
0x15f5   :  { %v3937_v36 = vmul.f32 %v3933_v33, %v3867_v27  ;;  %v3912_v4 = vsel %vm3909_vm2, %v3911_v49, %v3907_v13  ;;  %v3878_v33 = vand.u32 2147483647, %v7754_v52  ;;  %v3922_v40 = vsel %vm3921_vm14, %v7771_v41, %v3918_v32 }
0x15f6   :  { %v3938_v56 = vmul.f32 %v3934_v51, %v3912_v4  ;;  %v3927_v53 = vsel %vm3924_vm8, %v3926_v50, %v3922_v40 }
0x15f7   :  { %v7806_v35 = vadd.f32 %v3939_v42, %v3937_v36  ;;  %vm3879_vm9 = vcmp.eq.f32.partialorder %v3878_v33, 8.507059e+37 }
0x15f8   :  { %v7814_v58 = vadd.f32 %v3940_v39, %v3938_v56  ;;  %v3882_v31 = vsel %vm3879_vm9, %v3881_v15, %v3877_v7 }
0x15f9   :  { %5741 = vtanh.f32 %v7806_v35 }
0x15fa   :  { %5743 = vtanh.f32 %v7814_v58 }
0x15ff   :  { %v5742_v52 = vpop.eup %5741 }
0x1600   :  { %v3945_v43 = vmul.f32 %v5742_v52, %v3882_v31  ;;  %v5744_v46 = vpop.eup %5743 }
0x1601   :  { %v3946_v10 = vmul.f32 %v5744_v46, %v3927_v53  ;;  %v4156_v53 = vrot.slane %v7806_v35, 7 }
0x1602   :  { %v3947_v8 = vpack.c.bf16 %v3945_v43, %v3945_v43 }
0x1603   :  { %v3948_v11 = vpack.c.bf16 %v3946_v10, %v3946_v10 }
0x1604   :  { %v3951_v28 = vunpack.c.l.b16 %v3947_v8 }
0x1605   :  { %v3952_v60 = vunpack.c.l.b16 %v3948_v11 }
0x1606   :  { %v3953_v6 = vrot.slane %v3951_v28, 5 }
0x1607   :  { %v3954_v26 = vrot.slane %v3952_v60, 4  ;;  %v4157_v60 = vrot.slane %v7814_v58, 7 }
0x1609   :  { %v3955_v24 = vsel %vm2844_vm7, %v3954_v26, %v3953_v6 }
0x160a   :  { %v3956_v44 = vpack.c.b16 %v3955_v24, %v3955_v24 }
0x160c   :  { %3966 = vmatmul.bf16.vlgmr.msra.gmra.mxu2 %v3956_v44  ;;  %3979 = vmatmul.bf16.vlgmr.msrb.gmra.mxu3 %v3956_v44 }
0x160d   :  { %3992 = vmatmul.bf16.vlgmr.msrb.gmra.mxu0 %v3956_v44  ;;  %4005 = vmatmul.bf16.vlgmr.msra.gmra.mxu1 %v3956_v44 }
0x168a   :  { %v3993_v41 = vpop.f32.mrf.mxu0  ;;  %v4006_v22 = vpop.f32.mrf.mxu1 }
0x168b   :  { %v4016_v3 = vrot.slane %v3993_v41, 2  ;;  %v4020_v19 = vrot.slane %v3993_v41, 3  ;;  %v4017_v61 = vrot.slane %v4006_v22, 2  ;;  %v4021_v25 = vrot.slane %v4006_v22, 3 }
0x168d   :  { %v4032_v5 = vadd.f32 %v4016_v3, %v8367_v16  ;;  %v4036_v18 = vadd.f32 %v4020_v19, %v8368_v30  ;;  %v4033_v31 = vadd.f32 %v4017_v61, %v8373_v63  ;;  %v4037_v10 = vadd.f32 %v4021_v25, %v8374_v38  ;;  %v5342_v61 = vld [vmem:[#allocation25 + $0x6c] sm:$0xf] }
0x168f   :  { %v5174_v57 = vmul.f32 -1.442695, %v4032_v5  ;;  %v5177_v21 = vmul.f32 -1.442695, %v4036_v18  ;;  %v3967_v47 = vpop.f32.mrf.mxu2  ;;  %v3980_v54 = vpop.f32.mrf.mxu3  ;;  %v5216_v18 = vld [vmem:[#allocation25 + $0x58] sm:$0xf0] }
0x1690   :  { %v4014_v2 = vrot.slane %v3967_v47, 2  ;;  %v4018_v34 = vrot.slane %v3967_v47, 3  ;;  %v4015_v29 = vrot.slane %v3980_v54, 2  ;;  %v4019_v48 = vrot.slane %v3980_v54, 3 }
0x1691   :  { %5745 = vpow2.f32 %v5174_v57 }
0x1692   :  { %5747 = vpow2.f32 %v5177_v21  ;;  %v4030_v59 = vadd.f32 %v4014_v2, %v8369_v12  ;;  %v4034_v14 = vadd.f32 %v4018_v34, %v8370_v17  ;;  %v4031_v55 = vadd.f32 %v4015_v29, %v8371_v20  ;;  %v3995_v42 = vpop.f32.mrf.mxu0  ;;  %v4008_v37 = vpop.f32.mrf.mxu1 }
0x1693   :  { %v4035_v9 = vadd.f32 %v4019_v48, %v8372_v62 }
0x1694   :  { %v5172_v27 = vmul.f32 -1.442695, %v4030_v59  ;;  %v5175_v0 = vmul.f32 -1.442695, %v4034_v14  ;;  %v5173_v49 = vmul.f32 -1.442695, %v4031_v55 }
0x1695   :  { %v5176_v39 = vmul.f32 -1.442695, %v4035_v9 }
0x1696   :  { %5749 = vpow2.f32 %v5172_v27 }
0x1697   :  { %v5746_v36 = vpop.eup %5745  ;;  %5751 = vpow2.f32 %v5175_v0  ;;  %v3969_v13 = vpop.f32.mrf.mxu2 }
0x1698   :  { %v3982_v51 = vpop.f32.mrf.mxu3  ;;  %v5748_v1 = vpop.eup %5747  ;;  %v7831_v4 = vadd.f32 1.0, %v5746_v36  ;;  %5753 = vpow2.f32 %v5173_v49  ;;  %v5204_v36 = vld [vmem:[#allocation25 + $0x38] sm:$0xf0] }
0x1699   :  { %v7833_v45 = vadd.f32 1.0, %v5748_v1  ;;  %5755 = vpow2.f32 %v5176_v39  ;;  %v5222_v51 = vld [vmem:[#allocation25 + $0x60] sm:$0xf]  ;;  %v5343_v1 = vld [vmem:[#allocation25 + $0x6c] sm:$0xf0] }
0x169a   :  { %5757 = vrcp.f32 %v7831_v4 }
0x169b   :  { %5759 = vrcp.f32 %v7833_v45 }
0x169c   :  { %v5750_v56 = vpop.eup %5749 }
0x169d   :  { %v5752_v23 = vpop.eup %5751  ;;  %v4056_v33 = vadd.f32 1.0, %v5750_v56 }
0x169e   :  { %v4059_v32 = vadd.f32 1.0, %v5752_v23  ;;  %v5754_v7 = vpop.eup %5753 }
0x169f   :  { %5761 = vrcp.f32 %v4056_v33  ;;  %v5756_v15 = vpop.eup %5755  ;;  %v7840_v40 = vadd.f32 1.0, %v5754_v7  ;;  %v4071_v11 = vand.u32 2147483647, %v4056_v33  ;;  %v4073_v6 = vand.u32 2147483648, %v4056_v33 }
0x16a0   :  { %5763 = vrcp.f32 %v4059_v32  ;;  %v7837_v52 = vpop.eup %5757  ;;  %v7844_v43 = vadd.f32 1.0, %v5756_v15  ;;  %v4116_v24 = vand.u32 2147483647, %v4059_v32  ;;  %vm4067_vm10 = vweird.f32 %v4056_v33 }
0x16a1   :  { %v7842_v50 = vpop.eup %5759  ;;  %5765 = vrcp.f32 %v7840_v40  ;;  %v4118_v41 = vand.u32 2147483648, %v4059_v32  ;;  %v7856_v22 = vmul.f32 %v7837_v52, %v7831_v4  ;;  %vm4112_vm11 = vweird.f32 %v4059_v32 }
0x16a2   :  { %5767 = vtanh.f32 %v4033_v31  ;;  %v7860_v3 = vmul.f32 %v7842_v50, %v7833_v45  ;;  %vm7862_vm15 = vcmp.eq.f32.partialorder %v4071_v11, 8.507059e+37  ;;  %v4086_v57 = vand.u32 2147483647, %v7840_v40 }
0x16a3   :  { %5769 = vrcp.f32 %v7844_v43  ;;  %v4074_v47 = vor.u32 1.1754944e-38, %v4073_v6  ;;  %vm7871_vm2 = vcmp.eq.f32.partialorder %v4116_v24, 8.507059e+37  ;;  %v4119_v29 = vor.u32 1.1754944e-38, %v4118_v41  ;;  %v5214_v24 = vld [vmem:[#allocation25 + $0x48] sm:$0xf] }
0x16a4   :  { %v4088_v59 = vand.u32 2147483648, %v7840_v40  ;;  %v4094_v55 = vsub.f32 1.0, %v7856_v22  ;;  %v4139_v42 = vsub.f32 1.0, %v7860_v3  ;;  %v4131_v27 = vand.u32 2147483647, %v7844_v43 }
0x16a5   :  { %v5762_v46 = vpop.eup %5761  ;;  %vm7898_vm6 = vcmp.eq.f32.partialorder %v4086_v57, 8.507059e+37  ;;  %5771 = vtanh.f32 %v4037_v10  ;;  %vm4082_vm13 = vweird.f32 %v7840_v40  ;;  %v4133_v25 = vand.u32 2147483648, %v7844_v43  ;;  %v5210_v10 = vld [vmem:[#allocation25 + $0x40] sm:$0xf] }
0x16a6   :  { %v7848_v8 = vpop.eup %5763  ;;  %v4063_v28 = vmul.f32 %v5762_v46, %v4056_v33  ;;  %vm4068_vm12 = vweird.f32 %v5762_v46  ;;  %v5226_v33 = vld [vmem:[#allocation25 + $0x68] sm:$0xf]  ;;  %v4089_v15 = vor.u32 1.1754944e-38, %v4088_v59  ;;  %v5223_v31 = vor.u32 %v5343_v1, %v5222_v51 }
0x16a7   :  { %v4108_v26 = vmul.f32 %v7848_v8, %v4059_v32  ;;  %v7867_v21 = vpop.eup %5765  ;;  %vm4113_vm1 = vweird.f32 %v7848_v8  ;;  %vm7882_vm3 = vmor %vm4067_vm10, %vm4068_vm12  ;;  %v5344_v32 = vld [vmem:[#allocation25 + $0x74] sm:$0xf0]  ;;  %v5202_v59 = vld [vmem:[#allocation25 + $0x28] sm:$0xf]  ;;  %v4095_v2 = vmul.f32 %v7837_v52, %v4094_v55  ;;  %vm4127_vm8 = vweird.f32 %v7844_v43 }
0x16a8   :  { %v4064_v44 = vsub.f32 1.0, %v4063_v28  ;;  %v4078_v48 = vmul.f32 %v7867_v21, %v7840_v40  ;;  %v5768_v14 = vpop.eup %5767  ;;  %vm7893_vm4 = vmor %vm4112_vm11, %vm4113_vm1  ;;  %vm4083_vm5 = vweird.f32 %v7867_v21  ;;  %v5227_v11 = vor.u32 %v5344_v32, %v5226_v33  ;;  %4498 = vmatpush.bf16.msra.mxu2 %v5223_v31  ;;  %v5334_v32 = vld [vmem:[#allocation25 + $0xc] sm:$0xf0]  ;;  %v5192_v31 = vld [vmem:[#allocation25 + $0x18] sm:$0xf0] }
0x16a9   :  { %v4109_v19 = vsub.f32 1.0, %v4108_v26  ;;  %v7888_v0 = vpop.eup %5769  ;;  %vm7914_vm9 = vmor %vm4082_vm13, %vm4083_vm5  ;;  %v5340_v26 = vld [vmem:[#allocation25 + $0x4c] sm:$0xf0]  ;;  %vm7931_vm10 = vcmp.eq.f32.partialorder %v4131_v27, 8.507059e+37  ;;  %v5186_v27 = vld [vmem:[#allocation25] sm:$0xf]  ;;  %vm4098_vm12 = vweird.f32 %v7837_v52 }
0x16aa   :  { %v4065_v5 = vmul.f32 %v5762_v46, %v4064_v44  ;;  %v4079_v39 = vsub.f32 1.0, %v4078_v48  ;;  %v4123_v23 = vmul.f32 %v7888_v0, %v7844_v43  ;;  %v5211_v22 = vor.u32 %v5340_v26, %v5210_v10  ;;  %4511 = vmatpush.bf16.msrb.mxu3 %v5227_v11  ;;  %v5337_v48 = vld [vmem:[#allocation25 + $0x2c] sm:$0xf0]  ;;  %v4604_v11 = vld [vmem:[%s6442_s29 + $0x68] sm:$0xff] }
0x16ab   :  { %v4110_v54 = vmul.f32 %v7848_v8, %v4109_v19  ;;  %v5341_v19 = vld [vmem:[#allocation25 + $0x54] sm:$0xf0]  ;;  %vm4128_vm14 = vweird.f32 %v7888_v0  ;;  %v4103_v3 = vand.u32 2147483648, %v7831_v4  ;;  %v4101_v10 = vand.u32 2147483647, %v7831_v4 }
0x16ac   :  { %v4066_v34 = vadd.f32 %v5762_v46, %v4065_v5  ;;  %v4080_v7 = vmul.f32 %v7867_v21, %v4079_v39  ;;  %v5339_v5 = vld [vmem:[#allocation25 + $0x4c] sm:$0xf]  ;;  %v5772_v39 = vpop.eup %5771  ;;  %vm4129_vm11 = vmor %vm4127_vm8, %vm4128_vm14  ;;  %4499 = vmatpush.bf16.msra.mxu2 %v5211_v22  ;;  %v4146_v26 = vand.u32 2147483647, %v7833_v45 }
0x16ad   :  { %v4111_v9 = vadd.f32 %v7848_v8, %v4110_v54  ;;  %v5219_v54 = vor.u32 %v5339_v5, %v5216_v18 }
0x16ae   :  { %v4070_v49 = vsel %vm7882_vm3, %v5762_v46, %v4066_v34  ;;  %v5228_v46 = vld [vmem:[#allocation25 + $0x78] sm:$0xf0]  ;;  %v4081_v41 = vadd.f32 %v7867_v21, %v4080_v7  ;;  %v5198_v34 = vld [vmem:[#allocation25 + $0x20] sm:$0xf]  ;;  %v4140_v7 = vmul.f32 %v7842_v50, %v4139_v42  ;;  %v5187_v42 = vor.u32 %v5334_v32, %v5186_v27 }
0x16af   :  { %v4115_v56 = vsel %vm7893_vm4, %v7848_v8, %v4111_v9  ;;  %v4075_v28 = vsel %vm7862_vm15, %v4074_v47, %v4070_v49  ;;  %v4124_v8 = vsub.f32 1.0, %v4123_v23  ;;  %v5231_v6 = vor.u32 %v5342_v61, %v5228_v46  ;;  %v5338_v9 = vld [vmem:[#allocation25 + $0x34] sm:$0xf0]  ;;  %v5336_v49 = vld [vmem:[#allocation25 + $0x2c] sm:$0xf] }
0x16b0   :  { %v4120_v44 = vsel %vm7871_vm2, %v4119_v29, %v4115_v56  ;;  %v5215_v47 = vor.u32 %v5341_v19, %v5214_v24  ;;  %v4162_v29 = vmul.f32 %v5768_v14, %v4075_v28  ;;  %v4085_v37 = vsel %vm7914_vm9, %v7867_v21, %v4081_v41  ;;  %v5190_v61 = vld [vmem:[#allocation25 + $0x8] sm:$0xf] }
0x16b1   :  { %v4125_v57 = vmul.f32 %v7888_v0, %v4124_v8  ;;  %4524 = vmatpush.bf16.msrb.mxu0 %v5231_v6  ;;  %v4090_v51 = vsel %vm7898_vm6, %v4089_v15, %v4085_v37  ;;  %v4163_v14 = vmul.f32 %v5772_v39, %v4120_v44  ;;  %v4134_v21 = vor.u32 1.1754944e-38, %v4133_v25  ;;  %v5333_v25 = vld [vmem:[#allocation25 + $0xc] sm:$0xf]  ;;  %v4590_v37 = vld [vmem:[%s6437_s4 + $0x78] sm:$0xff] }
0x16b2   :  { %v4160_v55 = vmul.f32 %v4156_v53, %v4090_v51  ;;  %v5199_v23 = vor.u32 %v5337_v48, %v5198_v34  ;;  %4512 = vmatpush.bf16.msrb.mxu3 %v5215_v47  ;;  %v5203_v33 = vor.u32 %v5338_v9, %v5202_v59  ;;  %v5207_v43 = vor.u32 %v5336_v49, %v5204_v36  ;;  %v5335_v53 = vld [vmem:[#allocation25 + $0x14] sm:$0xf0]  ;;  %v4589_v9 = vld [vmem:[%s6437_s4 + $0x70] sm:$0xff] }
0x16b3   :  { %v4126_v1 = vadd.f32 %v7888_v0, %v4125_v57  ;;  %vm4097_vm15 = vweird.f32 %v7831_v4  ;;  %v5191_v40 = vor.u32 %v5335_v53, %v5190_v61  ;;  %v5195_v8 = vor.u32 %v5333_v25, %v5192_v31 }
0x16b4   :  { %v7945_v35 = vadd.f32 %v4162_v29, %v4160_v55  ;;  %4500 = vmatpush.bf16.msra.mxu2 %v5199_v23  ;;  %vm7957_vm1 = vmor %vm4097_vm15, %vm4098_vm12  ;;  %v4141_v58 = vadd.f32 %v7842_v50, %v4140_v7  ;;  %vm4143_vm2 = vweird.f32 %v7842_v50  ;;  %v4104_v6 = vor.u32 1.1754944e-38, %v4103_v3  ;;  %v4606_v7 = vld [vmem:[%s6442_s29 + $0x78] sm:$0xff] }
0x16b5   :  { %v4130_v13 = vsel %vm4129_vm11, %v7888_v0, %v4126_v1  ;;  %4525 = vmatpush.bf16.msrb.mxu0 %v5219_v54  ;;  %v4096_v0 = vadd.f32 %v7837_v52, %v4095_v2  ;;  %vm4142_vm3 = vweird.f32 %v7833_v45  ;;  %vm4102_vm4 = vcmp.eq.f32.partialorder %v4101_v10, 8.507059e+37  ;;  %v4588_v1 = vld [vmem:[%s6437_s4 + $0x68] sm:$0xff]  ;;  %4607 = vmatpush.msra.mxu1 %v4606_v7 }
0x16b6   :  { %v4135_v15 = vsel %vm7931_vm10, %v4134_v21, %v4130_v13  ;;  %5773 = vtanh.f32 %v7945_v35  ;;  %4513 = vmatpush.bf16.msrb.mxu3 %v5203_v33  ;;  %vm4144_vm5 = vmor %vm4142_vm3, %vm4143_vm2  ;;  %vm4147_vm6 = vcmp.eq.f32.partialorder %v4146_v26, 8.507059e+37  ;;  %v4587_v21 = vld [vmem:[%s6437_s4 + $0x60] sm:$0xff]  ;;  %v4602_v26 = vld [vmem:[%s6442_s29 + $0x58] sm:$0xff] }
0x16b7   :  { %v4161_v46 = vmul.f32 %v4157_v60, %v4135_v15  ;;  %v4148_v60 = vand.u32 2147483648, %v7833_v45  ;;  %v4100_v4 = vsel %vm7957_vm1, %v7837_v52, %v4096_v0  ;;  %v4145_v41 = vsel %vm4144_vm5, %v7842_v50, %v4141_v58  ;;  %v8397_v50 = vld [vmem:[#allocation60_spill] sm:$0xff] }
0x16b8   :  { %4501 = vmatpush.bf16.msra.mxu2 %v5187_v42  ;;  %v4105_v44 = vsel %vm4102_vm4, %v4104_v6, %v4100_v4  ;;  %v4426_v29 = vpack.c.b16 %v8397_v50, %v8397_v50  ;;  %v4584_v42 = vld [vmem:[%s6437_s4 + $0x48] sm:$0xff]  ;;  %v4582_v4 = vld [vmem:[%s6437_s4 + $0x38] sm:$0xff] }
0x16b9   :  { %v7955_v28 = vadd.f32 %v4163_v14, %v4161_v46  ;;  %4526 = vmatpush.bf16.msrb.mxu0 %v5207_v43  ;;  %v4149_v22 = vor.u32 1.1754944e-38, %v4148_v60  ;;  %v4586_v43 = vld [vmem:[%s6437_s4 + $0x58] sm:$0xff]  ;;  %v4605_v46 = vld [vmem:[%s6442_s29 + $0x70] sm:$0xff] }
0x16ba   :  { %4514 = vmatpush.bf16.msrb.mxu3 %v5191_v40  ;;  %4608 = vmatpush.msra.mxu1 %v4605_v46 }
0x16bb   :  { %5775 = vtanh.f32 %v7955_v28  ;;  %v4150_v5 = vsel %vm4147_vm6, %v4149_v22, %v4145_v41 }
0x16bc   :  { %v5774_v24 = vpop.eup %5773  ;;  %4609 = vmatpush.msra.mxu1 %v4604_v11 }
0x16bd   :  { %4527 = vmatpush.bf16.msrb.mxu0 %v5195_v8  ;;  %v4168_v19 = vmul.f32 %v5774_v24, %v4105_v44  ;;  %v4581_v44 = vld [vmem:[%s6437_s4 + $0x30] sm:$0xff] }
0x16bf   :  { %v4170_v18 = vpack.c.bf16 %v4168_v19, %v4168_v19  ;;  %v4601_v19 = vld [vmem:[%s6442_s29 + $0x50] sm:$0xff] }
0x16c1   :  { %v5776_v52 = vpop.eup %5775  ;;  %v4174_v47 = vunpack.c.l.b16 %v4170_v18  ;;  %v4600_v18 = vld [vmem:[%s6442_s29 + $0x48] sm:$0xff] }
0x16c2   :  { %v4169_v57 = vmul.f32 %v5776_v52, %v4150_v5  ;;  %v4580_v52 = vld [vmem:[%s6437_s4 + $0x28] sm:$0xff] }
0x16c3   :  { %v4176_v34 = vrot.slane %v4174_v47, 6 }
0x16c4   :  { %v4171_v54 = vpack.c.bf16 %v4169_v57, %v4169_v57 }
0x16c6   :  { %v4175_v45 = vunpack.c.l.b16 %v4171_v54 }
0x16c8   :  { %v4177_v48 = vrot.slane %v4175_v45, 5  ;;  %v4579_v45 = vld [vmem:[%s6437_s4 + $0x20] sm:$0xff] }
0x16ca   :  { %v4178_v59 = vsel %vm2844_vm7, %v4177_v48, %v4176_v34 }
0x16cb   :  { %v4179_v2 = vpack.c.b16 %v4178_v59, %v4178_v59 }
0x16cd   :  { %4189 = vmatmul.bf16.vlgmr.msrb.gmra.mxu2 %v4179_v2  ;;  %4202 = vmatmul.bf16.vlgmr.msra.gmra.mxu3 %v4179_v2 }
0x16ce   :  { %4215 = vmatmul.bf16.vlgmr.msra.gmra.mxu0 %v4179_v2  ;;  %4228 = vmatmul.bf16.vlgmr.msrb.gmra.mxu1 %v4179_v2  ;;  %v4599_v2 = vld [vmem:[%s6442_s29 + $0x40] sm:$0xff] }
0x16cf   :  { %4633 = vmatpush.msrb.mxu2 %v4590_v37 }
0x16d1   :  { %4634 = vmatpush.msrb.mxu2 %v4589_v9  ;;  %v4578_v9 = vld [vmem:[%s6437_s4 + $0x18] sm:$0xff] }
0x16d3   :  { %4635 = vmatpush.msrb.mxu2 %v4588_v1 }
0x16d5   :  { %4636 = vmatpush.msrb.mxu2 %v4587_v21 }
0x16d7   :  { %4637 = vmatpush.msrb.mxu2 %v4586_v43  ;;  %v4596_v43 = vld [vmem:[%s6442_s29 + $0x28] sm:$0xff] }
0x16dd   :  { %5232 = vmatmul.msk.bf16.vlgmr.msra.gmra.mxu2 %vm384_vm0, %v4426_v29  ;;  %5233 = vmatmul.msk.bf16.vlgmr.msrb.gmra.mxu3 %vm384_vm0, %v4426_v29 }
0x16de   :  { %5234 = vmatmul.msk.bf16.vlgmr.msrb.gmra.mxu0 %vm384_vm0, %v4426_v29 }
0x174b   :  { %v4216_v49 = vpop.f32.mrf.mxu0  ;;  %v7979_v36 = vpop.f32.mrf.mxu1 }
0x174c   :  { %v4239_v39 = vrot.slane %v4216_v49, 1  ;;  %v4243_v51 = vrot.slane %v4216_v49, 2  ;;  %v4240_v47 = vrot.slane %v7979_v36, 1  ;;  %v4244_v48 = vrot.slane %v7979_v36, 2  ;;  %v8023_v49 = vld [vmem:[%s8398_s1] sm:$0xf] }
0x174d   :  { %v4598_v36 = vld [vmem:[%s6442_s29 + $0x38] sm:$0xff]  ;;  %v4413_v1 = vperm.slane %v8023_v49, 0 }
0x174e   :  { %v4255_v56 = vadd.f32 %v4239_v39, %v8367_v16  ;;  %v4259_v14 = vadd.f32 %v4243_v51, %v8368_v30  ;;  %v4585_v16 = vld [vmem:[%s6437_s4 + $0x50] sm:$0xff]  ;;  %v4256_v39 = vadd.f32 %v4240_v47, %v8373_v63  ;;  %v4576_v63 = vld [vmem:[%s6437_s4 + $0x8] sm:$0xff] }
0x174f   :  { %4638 = vmatpush.msrb.mxu2 %v4585_v16  ;;  %v4592_v47 = vld [vmem:[%s6442_s29 + $0x8] sm:$0xff] }
0x1750   :  { %v5180_v55 = vmul.f32 -1.442695, %v4255_v56  ;;  %v5183_v23 = vmul.f32 -1.442695, %v4259_v14  ;;  %v4190_v13 = vpop.f32.mrf.mxu2  ;;  %v4203_v33 = vpop.f32.mrf.mxu3  ;;  %v4577_v56 = vld [vmem:[%s6437_s4 + $0x10] sm:$0xff]  ;;  %v4260_v14 = vadd.f32 %v4244_v48, %v8374_v38  ;;  %v4379_v38 = vrot.slane %v7945_v35, 7 }
0x1751   :  { %v4237_v27 = vrot.slane %v4190_v13, 1  ;;  %v4241_v32 = vrot.slane %v4190_v13, 2  ;;  %v4238_v61 = vrot.slane %v4203_v33, 1  ;;  %v4242_v15 = vrot.slane %v4203_v33, 2  ;;  %4639 = vmatpush.msrb.mxu2 %v4584_v42  ;;  %v4597_v13 = vld [vmem:[%s6442_s29 + $0x30] sm:$0xff] }
0x1752   :  { %5777 = vpow2.f32 %v5180_v55  ;;  %v4414_v55 = vperm.slane %v8023_v49, 2 }
0x1753   :  { %5779 = vpow2.f32 %v5183_v23  ;;  %v4253_v30 = vadd.f32 %v4237_v27, %v8369_v12  ;;  %v4257_v53 = vadd.f32 %v4241_v32, %v8370_v17  ;;  %v4254_v25 = vadd.f32 %v4238_v61, %v8371_v20  ;;  %v4218_v31 = vpop.f32.mrf.mxu0  ;;  %v4231_v0 = vpop.f32.mrf.mxu1  ;;  %v4583_v17 = vld [vmem:[%s6437_s4 + $0x40] sm:$0xff] }
0x1754   :  { %v4258_v3 = vadd.f32 %v4242_v15, %v8372_v62  ;;  %4640 = vmatpush.msrb.mxu2 %v4583_v17  ;;  %v4603_v20 = vld [vmem:[%s6442_s29 + $0x60] sm:$0xff]  ;;  %v4380_v61 = vrot.slane %v7955_v28, 7 }
0x1755   :  { %v5178_v10 = vmul.f32 -1.442695, %v4253_v30  ;;  %v5181_v40 = vmul.f32 -1.442695, %v4257_v53  ;;  %v5179_v8 = vmul.f32 -1.442695, %v4254_v25  ;;  %4610 = vmatpush.msra.mxu1 %v4603_v20 }
0x1756   :  { %v5182_v12 = vmul.f32 -1.442695, %v4258_v3  ;;  %4641 = vmatpush.msrb.mxu2 %v4582_v4  ;;  %v4575_v27 = vld [vmem:[%s6437_s4] sm:$0xff] }
0x1757   :  { %5781 = vpow2.f32 %v5178_v10  ;;  %4611 = vmatpush.msra.mxu1 %v4602_v26  ;;  %v4595_v53 = vld [vmem:[%s6442_s29 + $0x20] sm:$0xff]  ;;  %v4593_v26 = vld [vmem:[%s6442_s29 + $0x10] sm:$0xff] }
0x1758   :  { %v5778_v58 = vpop.eup %5777  ;;  %5783 = vpow2.f32 %v5181_v40  ;;  %v4192_v62 = vpop.f32.mrf.mxu2  ;;  %4642 = vmatpush.msrb.mxu2 %v4581_v44 }
0x1759   :  { %v4205_v60 = vpop.f32.mrf.mxu3  ;;  %v5780_v6 = vpop.eup %5779  ;;  %5785 = vpow2.f32 %v5179_v8  ;;  %v7999_v24 = vadd.f32 1.0, %v5778_v58  ;;  %4612 = vmatpush.msra.mxu1 %v4601_v19  ;;  %v4594_v8 = vld [vmem:[%s6442_s29 + $0x18] sm:$0xff] }
0x175a   :  { %5787 = vpow2.f32 %v5182_v12  ;;  %v8002_v41 = vadd.f32 1.0, %v5780_v6  ;;  %4643 = vmatpush.msrb.mxu2 %v4580_v52 }
0x175b   :  { %v8004_v22 = vpop.f32.mrf.mxu0  ;;  %5789 = vrcp.f32 %v7999_v24  ;;  %4613 = vmatpush.msra.mxu1 %v4600_v18 }
0x175c   :  { %5791 = vrcp.f32 %v8002_v41  ;;  %4644 = vmatpush.msrb.mxu2 %v4579_v45 }
0x175d   :  { %v5782_v5 = vpop.eup %5781  ;;  %4614 = vmatpush.msra.mxu1 %v4599_v2 }
0x175e   :  { %v5784_v57 = vpop.eup %5783  ;;  %v8011_v54 = vadd.f32 1.0, %v5782_v5  ;;  %4645 = vmatpush.msrb.mxu2 %v4578_v9 }
0x175f   :  { %v5786_v34 = vpop.eup %5785  ;;  %v8016_v59 = vadd.f32 1.0, %v5784_v57  ;;  %4615 = vmatpush.msra.mxu1 %v4598_v36 }
0x1760   :  { %v5788_v50 = vpop.eup %5787  ;;  %5793 = vrcp.f32 %v8011_v54  ;;  %v4503_v29 = vpop.f32.mrf.mxu2  ;;  %v8027_v51 = vadd.f32 1.0, %v5786_v34  ;;  %4646 = vmatpush.msrb.mxu2 %v4577_v56  ;;  %v4294_v15 = vand.u32 2147483647, %v8011_v54  ;;  %v4296_v16 = vand.u32 2147483648, %v8011_v54 }
0x1761   :  { %v4516_v37 = vpop.f32.mrf.mxu3  ;;  %5795 = vrcp.f32 %v8016_v59  ;;  %v8032_v21 = vadd.f32 1.0, %v5788_v50  ;;  %v8036_v33 = vpop.eup %5789  ;;  %4616 = vmatpush.msra.mxu1 %v4597_v13  ;;  %v4504_v30 = vadd.f32 %v4503_v29, %v4413_v1  ;;  %vm4290_vm0 = vweird.f32 %v8011_v54  ;;  %v4591_v1 = vld [vmem:[%s6442_s29] sm:$0xff] }
0x1762   :  { %5797 = vrcp.f32 %v8027_v51  ;;  %v8042_v32 = vpop.eup %5791  ;;  %4647 = vmatpush.msrb.mxu2 %v4576_v63  ;;  %v4517_v0 = vadd.f32 %v4516_v37, %v4414_v55  ;;  %vm4335_vm13 = vweird.f32 %v8016_v59  ;;  %v4339_v3 = vand.u32 2147483647, %v8016_v59 }
0x1763   :  { %v4531_v23 = vpop.f32.mrf.mxu0  ;;  %5799 = vrcp.f32 %v8032_v21  ;;  %4617 = vmatpush.msra.mxu1 %v4596_v43  ;;  %v4341_v42 = vand.u32 2147483648, %v8016_v59  ;;  %v8065_v12 = vmul.f32 %v8036_v33, %v7999_v24  ;;  %v5235_v17 = vmul.f32 -1.442695, %v4504_v30 }
0x1764   :  { %5801 = vtanh.f32 %v4256_v39  ;;  %4648 = vmatpush.msrb.mxu2 %v4575_v27  ;;  %v5236_v20 = vmul.f32 -1.442695, %v4517_v0  ;;  %v8071_v62 = vmul.f32 %v8042_v32, %v8002_v41  ;;  %vm8073_vm9 = vcmp.eq.f32.partialorder %v4294_v15, 8.507059e+37 }
0x1765   :  { %5803 = vtanh.f32 %v4260_v14  ;;  %4618 = vmatpush.msra.mxu1 %v4595_v53  ;;  %v4297_v4 = vor.u32 1.1754944e-38, %v4296_v16  ;;  %vm8090_vm10 = vcmp.eq.f32.partialorder %v4339_v3, 8.507059e+37  ;;  %v4342_v2 = vor.u32 1.1754944e-38, %v4341_v42 }
0x1766   :  { %v8047_v7 = vpop.eup %5793  ;;  %5805 = vpow2.f32 %v5235_v17  ;;  %v4317_v29 = vsub.f32 1.0, %v8065_v12  ;;  %v4309_v36 = vand.u32 2147483647, %v8027_v51  ;;  %v4311_v55 = vand.u32 2147483648, %v8027_v51 }
0x1767   :  { %v8052_v25 = vpop.eup %5795  ;;  %v4286_v31 = vmul.f32 %v8047_v7, %v8011_v54  ;;  %vm4291_vm14 = vweird.f32 %v8047_v7  ;;  %4619 = vmatpush.msra.mxu1 %v4594_v8  ;;  %5807 = vpow2.f32 %v5236_v20  ;;  %vm4305_vm2 = vweird.f32 %v8027_v51 }
0x1768   :  { %v4331_v46 = vmul.f32 %v8052_v25, %v8016_v59  ;;  %v4505_v10 = vpop.f32.mrf.mxu2  ;;  %v8067_v58 = vpop.eup %5797  ;;  %vm4336_vm8 = vweird.f32 %v8052_v25  ;;  %vm8099_vm11 = vmor %vm4290_vm0, %vm4291_vm14  ;;  %v4356_v59 = vand.u32 2147483648, %v8032_v21  ;;  %vm4350_vm3 = vweird.f32 %v8032_v21 }
0x1769   :  { %v4518_v40 = vpop.f32.mrf.mxu3  ;;  %v4287_v11 = vsub.f32 1.0, %v4286_v31  ;;  %v8078_v44 = vpop.eup %5799  ;;  %v4301_v52 = vmul.f32 %v8067_v58, %v8027_v51  ;;  %4620 = vmatpush.msra.mxu1 %v4593_v26  ;;  %vm8113_vm12 = vmor %vm4335_vm13, %vm4336_vm8  ;;  %vm4306_vm15 = vweird.f32 %v8067_v58  ;;  %v4354_v27 = vand.u32 2147483647, %v8032_v21 }
0x176a   :  { %v4332_v6 = vsub.f32 1.0, %v4331_v46  ;;  %v5802_v5 = vpop.eup %5801  ;;  %v4346_v57 = vmul.f32 %v8078_v44, %v8032_v21  ;;  %vm4351_vm1 = vweird.f32 %v8078_v44  ;;  %vm8130_vm4 = vmor %vm4305_vm2, %vm4306_vm15  ;;  %vm4310_vm5 = vcmp.eq.f32.partialorder %v4309_v36, 8.507059e+37 }
0x176b   :  { %v4288_v19 = vmul.f32 %v8047_v7, %v4287_v11  ;;  %v5804_v45 = vpop.eup %5803  ;;  %v4302_v50 = vsub.f32 1.0, %v4301_v52  ;;  %4621 = vmatpush.msra.mxu1 %v4592_v47  ;;  %vm4352_vm6 = vmor %vm4350_vm3, %vm4351_vm1  ;;  %v4312_v0 = vor.u32 1.1754944e-38, %v4311_v55  ;;  %v4357_v3 = vor.u32 1.1754944e-38, %v4356_v59 }
0x176c   :  { %v4333_v18 = vmul.f32 %v8052_v25, %v4332_v6  ;;  %v4347_v39 = vsub.f32 1.0, %v4346_v57  ;;  %v5806_v63 = vpop.eup %5805  ;;  %vm4355_vm0 = vcmp.eq.f32.partialorder %v4354_v27, 8.507059e+37  ;;  %v4415_v40 = vperm.slane %v8023_v49, 3 }
0x176d   :  { %v4289_v34 = vadd.f32 %v8047_v7, %v4288_v19  ;;  %v4303_v14 = vmul.f32 %v8067_v58, %v4302_v50  ;;  %4622 = vmatpush.msra.mxu1 %v4591_v1  ;;  %v8135_v30 = vadd.f32 1.0, %v5806_v63  ;;  %v4318_v12 = vmul.f32 %v8036_v33, %v4317_v29 }
0x176e   :  { %v4334_v9 = vadd.f32 %v8052_v25, %v4333_v18  ;;  %v4348_v13 = vmul.f32 %v8078_v44, %v4347_v39  ;;  %v4530_v26 = vadd.f32 %v8004_v22, %v4415_v40  ;;  %vm4320_vm13 = vweird.f32 %v7999_v24 }
0x176f   :  { %v4293_v56 = vsel %vm8099_vm11, %v8047_v7, %v4289_v34  ;;  %v4304_v43 = vadd.f32 %v8067_v58, %v4303_v14  ;;  %v5808_v7 = vpop.eup %5807  ;;  %5809 = vrcp.f32 %v8135_v30  ;;  %v4319_v49 = vadd.f32 %v8036_v33, %v4318_v12 }
0x1770   :  { %v4338_v23 = vsel %vm8113_vm12, %v8052_v25, %v4334_v9  ;;  %v4349_v16 = vadd.f32 %v8078_v44, %v4348_v13  ;;  %v4298_v53 = vsel %vm8073_vm9, %v4297_v4, %v4293_v56  ;;  %v4362_v25 = vsub.f32 1.0, %v8071_v62 }
0x1771   :  { %v4343_v51 = vsel %vm8090_vm10, %v4342_v2, %v4338_v23  ;;  %v4308_v21 = vsel %vm8130_vm4, %v8067_v58, %v4304_v43  ;;  %v8147_v31 = vadd.f32 1.0, %v5808_v7  ;;  %v4385_v42 = vmul.f32 %v5802_v5, %v4298_v53 }
0x1772   :  { %v4353_v46 = vsel %vm4352_vm6, %v8078_v44, %v4349_v16  ;;  %v4386_v10 = vmul.f32 %v5804_v45, %v4343_v51  ;;  %v4313_v8 = vsel %vm4310_vm5, %v4312_v0, %v4308_v21  ;;  %v4363_v17 = vmul.f32 %v8042_v32, %v4362_v25  ;;  %v5458_v51 = vld [vmem:[#allocation2] ss:$0 sm:$0xff] }
0x1773   :  { %5811 = vrcp.f32 %v8147_v31  ;;  %v4358_v11 = vsel %vm4355_vm0, %v4357_v3, %v4353_v46  ;;  %v4383_v20 = vmul.f32 %v4379_v38, %v4313_v8  ;;  %v4326_v62 = vand.u32 2147483648, %v7999_v24 }
0x1774   :  { %v4384_v58 = vmul.f32 %v4380_v61, %v4358_v11  ;;  %vm4321_vm9 = vweird.f32 %v8036_v33  ;;  %v4364_v38 = vadd.f32 %v8042_v32, %v4363_v17  ;;  %vm4366_vm14 = vweird.f32 %v8042_v32 }
0x1775   :  { %v4387_v60 = vadd.f32 %v4385_v42, %v4383_v20  ;;  %v5810_v6 = vpop.eup %5809  ;;  %v4324_v61 = vand.u32 2147483647, %v7999_v24  ;;  %v4371_v22 = vand.u32 2147483648, %v8002_v41  ;;  %vm8170_vm8 = vmor %vm4320_vm13, %vm4321_vm9  ;;  %v4327_v5 = vor.u32 1.1754944e-38, %v4326_v62 }
0x1776   :  { %v4388_v4 = vadd.f32 %v4386_v10, %v4384_v58  ;;  %v4542_v35 = vmul.f32 %v5810_v6, %v8135_v30  ;;  %vm4365_vm10 = vweird.f32 %v8002_v41  ;;  %v4369_v18 = vand.u32 2147483647, %v8002_v41 }
0x1777   :  { %5813 = vtanh.f32 %v4387_v60  ;;  %v4552_v57 = vand.u32 2147483648, %v8135_v30  ;;  %v4323_v24 = vsel %vm8170_vm8, %v8036_v33, %v4319_v49  ;;  %vm8182_vm11 = vmor %vm4365_vm10, %vm4366_vm14  ;;  %vm4547_vm12 = vweird.f32 %v5810_v6 }
0x1778   :  { %5815 = vtanh.f32 %v4388_v4  ;;  %v4543_v19 = vsub.f32 1.0, %v4542_v35  ;;  %v4550_v48 = vand.u32 2147483647, %v8135_v30  ;;  %v4368_v41 = vsel %vm8182_vm11, %v8042_v32, %v4364_v38 }
0x1779   :  { %v5812_v44 = vpop.eup %5811  ;;  %5817 = vtanh.f32 %v4530_v26  ;;  %vm4325_vm15 = vcmp.eq.f32.partialorder %v4324_v61, 8.507059e+37  ;;  %v4372_v2 = vor.u32 1.1754944e-38, %v4371_v22  ;;  %vm4546_vm1 = vweird.f32 %v8135_v30 }
0x177a   :  { %v4557_v28 = vmul.f32 %v5812_v44, %v8147_v31  ;;  %v4544_v34 = vmul.f32 %v5810_v6, %v4543_v19  ;;  %v4328_v33 = vsel %vm4325_vm15, %v4327_v5, %v4323_v24  ;;  %vm4370_vm2 = vcmp.eq.f32.partialorder %v4369_v18, 8.507059e+37  ;;  %vm4548_vm3 = vmor %vm4546_vm1, %vm4547_vm12 }
0x177b   :  { %v4553_v9 = vor.u32 1.1754944e-38, %v4552_v57  ;;  %v4373_v39 = vsel %vm4370_vm2, %v4372_v2, %v4368_v41  ;;  %vm4551_vm4 = vcmp.eq.f32.partialorder %v4550_v48, 8.507059e+37  ;;  %vm4562_vm5 = vweird.f32 %v5812_v44 }
0x177c   :  { %v4558_v47 = vsub.f32 1.0, %v4557_v28  ;;  %v4545_v29 = vadd.f32 %v5810_v6, %v4544_v34  ;;  %v4567_v63 = vand.u32 2147483648, %v8147_v31  ;;  %vm4561_vm6 = vweird.f32 %v8147_v31 }
0x177d   :  { %v5814_v50 = vpop.eup %5813  ;;  %v4565_v27 = vand.u32 2147483647, %v8147_v31  ;;  %vm4563_vm0 = vmor %vm4561_vm6, %vm4562_vm5 }
0x177e   :  { %v5816_v37 = vpop.eup %5815  ;;  %v4559_v36 = vmul.f32 %v5812_v44, %v4558_v47  ;;  %v4391_v1 = vmul.f32 %v5814_v50, %v4328_v33  ;;  %v4549_v56 = vsel %vm4548_vm3, %v5810_v6, %v4545_v29  ;;  %v4568_v15 = vor.u32 1.1754944e-38, %v4567_v63 }
0x177f   :  { %v4392_v54 = vmul.f32 %v5816_v37, %v4373_v39  ;;  %v5818_v14 = vpop.eup %5817  ;;  %v4554_v55 = vsel %vm4551_vm4, %v4553_v9, %v4549_v56  ;;  %vm4566_vm13 = vcmp.eq.f32.partialorder %v4565_v27, 8.507059e+37 }
0x1780   :  { %v4629_v32 = vrot.slane %v4391_v1, 7  ;;  %v4572_v13 = vmul.f32 %v5818_v14, %v4554_v55  ;;  %v4560_v59 = vadd.f32 %v5812_v44, %v4559_v36 }
0x1781   :  { %v4630_v23 = vrot.slane %v4392_v54, 6 }
0x1782   :  { %5819 = vtanh.f32 %v4572_v13  ;;  %v4564_v7 = vsel %vm4563_vm0, %v5812_v44, %v4560_v59 }
0x1783   :  { %v4631_v43 = vsel %vm2844_vm7, %v4630_v23, %v4629_v32  ;;  %v4569_v30 = vsel %vm4566_vm13, %v4568_v15, %v4564_v7  ;;  %vm4658_vm7 = vcmask 1024  }
0x1784   :  { %4649 = vmatmul.f32.vlgmr.msrb.gmra.mxu2 %v4631_v43 }
0x1788   :  { %v5820_v16 = vpop.eup %5819 }
0x1789   :  { %v4574_v53 = vmul.f32 %v5820_v16, %v4569_v30 }
0x178b   :  { %4623 = vmatmul.f32.vlgmr.msra.gmra.mxu1 %v4574_v53 }
0x1807   :  { %v4650_v25 = vpop.f32.mrf.mxu2 }
0x1808   :  { %v4624_v21 = vpop.f32.mrf.mxu1 }
0x1809   :  { %v4651_v0 = vadd.f32 %v4650_v25, %v4624_v21 }
0x180b   :  { %v4657_v46 = vadd.f32 %v5458_v51, %v4651_v0 }
0x180d   :  { %4659 = vst.msk [vmem:[%s6450_s6] sm:$0x3] %vm4658_vm7, %v4657_v46 }
0x180e   :  { %4664 = vsyncpa [#allocation4], 1 }
0x180f   :  { %4665 = vsyncpa [#allocation6], 1 }
0x1810   :  { %4666 = vsyncpa [#allocation9], 1 }
0x1811   :  { %4667 = vsyncpa [#allocation12], 1 }
0x1812   :  { %4668 = vsyncpa [#allocation15], 1 }
0x1813   :  { %4669 = vsyncpa [#allocation18], 1 }
0x1814   :  { %4670 = vsyncpa [#allocation21], 1 }
0x1815   :  { %4671 = vsyncpa [#allocation24], 1 }

</bundles_post_ra>
